<compile_context>
chip_gen: v7x
topology: tpu7x:2x2x1
jax: 0.10.0
libtpu: 0.0.40
codegen_flags: <defaults>
</compile_context>

<pallas_src>
import functools
import jax
import jax.numpy as jnp
from jax.experimental import pallas as pl
from jax.experimental.pallas import tpu as pltpu

LANE = 128


def _round_up(x, m):
    return (x + m - 1) // m * m


# ----------------------------------------------------------------------------
# Fused conv kernel: matmul + bias + norm + activation (+ residual)
# ----------------------------------------------------------------------------

def _conv_fused_kernel(*refs, norm, act, eps, count, has_affine, has_res):
    """One conv tile: (rows,K)@(K,Npad)+bias -> norm -> affine -> act -> (+res).

    rows = Ho*Wo of one batch sample when norm != 'none' (grid over batch),
    otherwise all B*Ho*Wo rows in a single grid step.  Padded output channels
    carry zero weights/bias so they stay exactly zero through every epilogue.
    """
    it = iter(refs)
    x_ref = next(it)
    w_ref = next(it)
    b_ref = next(it)
    s_ref = next(it) if has_affine else None
    t_ref = next(it) if has_affine else None
    r_ref = next(it) if has_res else None
    o_ref = next(it)

    y = jnp.dot(x_ref[...], w_ref[...], preferred_element_type=jnp.float32)
    y = y + b_ref[...]

    if norm in ("in", "adain"):
        # Per-(batch, channel) stats over the spatial rows (biased var, torch IN).
        mean = jnp.mean(y, axis=0, keepdims=True)
        yc = y - mean
        var = jnp.mean(yc * yc, axis=0, keepdims=True)
        y = yc * jax.lax.rsqrt(var + eps)
        if has_affine:                                  # AdaIN affine from MLP
            s = s_ref[...][0]                           # (1, Npad)
            t = t_ref[...][0]
            y = y * s + t
    elif norm == "ln":
        # MUNIT LayerNorm: per-sample stats over (C, H, W), unbiased std,
        # eps added to std.  Padded channels are exactly zero, so plain sums
        # over the padded tile are correct when divided by the real count.
        total = jnp.sum(y)
        mean = total / count
        ssq = jnp.maximum(jnp.sum(y * y) - count * mean * mean, 0.0)
        var = ssq / (count - 1.0)
        y = (y - mean) / (jnp.sqrt(var) + eps)
        s = s_ref[...][0]
        t = t_ref[...][0]
        y = y * s + t

    if act == "relu":
        y = jnp.maximum(y, 0.0)
    elif act == "tanh":
        y = jnp.tanh(y)

    if has_res:
        y = y + r_ref[...]

    o_ref[...] = y.astype(o_ref.dtype)


def conv_fused(x_col, w_pad, b_pad, *, batch_groups, n_real, norm="none",
               act="none", scale=None, shift=None, residual=None, eps=1e-5):
    """x_col:(M,K) bf16, w_pad:(K,Npad) bf16, b_pad:(1,Npad) f32 -> (M,Npad) f32."""
    M, K = x_col.shape
    Npad = w_pad.shape[1]
    nb = batch_groups if norm != "none" else 1
    rows = M // nb
    has_affine = scale is not None
    has_res = residual is not None
    count = float(rows * n_real)                  # real elements per LN group
    orig_M = M

    # Tiny tails only (style encoder at 1x1 spatial): pad rows to a sublane
    # multiple.  Hot-path row counts are already multiples of 8 -> no copy.
    if rows % 8 != 0:
        assert nb == 1
        new_rows = _round_up(rows, 8)
        pad_r = new_rows - rows
        x_col = jnp.pad(x_col, ((0, pad_r), (0, 0)))
        if residual is not None:
            residual = jnp.pad(residual, ((0, pad_r), (0, 0)))
        rows = new_rows
        M = rows * nb

    in_specs = [
        pl.BlockSpec((rows, K), lambda b: (b, 0)),
        pl.BlockSpec((K, Npad), lambda b: (0, 0)),
        pl.BlockSpec((1, Npad), lambda b: (0, 0)),
    ]
    args = [x_col, w_pad, b_pad]
    if has_affine:
        in_specs += [pl.BlockSpec((1, 1, Npad), lambda b: (b, 0, 0)),
                     pl.BlockSpec((1, 1, Npad), lambda b: (b, 0, 0))]
        args += [scale, shift]
    if has_res:
        in_specs.append(pl.BlockSpec((rows, Npad), lambda b: (b, 0)))
        args.append(residual)

    out = pl.pallas_call(
        functools.partial(_conv_fused_kernel, norm=norm, act=act, eps=eps,
                          count=count, has_affine=has_affine, has_res=has_res),
        out_shape=jax.ShapeDtypeStruct((M, Npad), jnp.float32),
        grid=(nb,),
        in_specs=in_specs,
        out_specs=pl.BlockSpec((rows, Npad), lambda b: (b, 0)),
        compiler_params=pltpu.CompilerParams(dimension_semantics=("parallel",)),
    )(*args)
    return out[:orig_M]


# ----------------------------------------------------------------------------
# Fused 3-layer MLP kernel (style -> AdaIN parameters)
# ----------------------------------------------------------------------------

def _mlp_kernel(x_ref, w1_ref, b1_ref, w2_ref, b2_ref, w3_ref, b3_ref, o_ref):
    h = jnp.dot(x_ref[...], w1_ref[...], preferred_element_type=jnp.float32)
    h = jnp.maximum(h + b1_ref[...], 0.0)
    h = jnp.dot(h.astype(jnp.bfloat16), w2_ref[...],
                preferred_element_type=jnp.float32)
    h = jnp.maximum(h + b2_ref[...], 0.0)
    h = jnp.dot(h.astype(jnp.bfloat16), w3_ref[...],
                preferred_element_type=jnp.float32)
    o_ref[...] = h + b3_ref[...]


def mlp_forward(p_mlp, style):
    B = style.shape[0]
    x = style.reshape(B, -1).astype(jnp.bfloat16)
    rows = _round_up(B, 8)
    if rows != B:
        x = jnp.pad(x, ((0, rows - B), (0, 0)))
    w1, b1 = p_mlp[0]["w"], p_mlp[0]["b"]
    w2, b2 = p_mlp[1]["w"], p_mlp[1]["b"]
    w3, b3 = p_mlp[2]["w"], p_mlp[2]["b"]
    n_out = w3.shape[1]
    out = pl.pallas_call(
        _mlp_kernel,
        out_shape=jax.ShapeDtypeStruct((rows, n_out), jnp.float32),
        grid=(1,),
        in_specs=[pl.BlockSpec((rows, x.shape[1]), lambda i: (0, 0)),
                  pl.BlockSpec(w1.shape, lambda i: (0, 0)),
                  pl.BlockSpec(b1.shape, lambda i: (0, 0)),
                  pl.BlockSpec(w2.shape, lambda i: (0, 0)),
                  pl.BlockSpec(b2.shape, lambda i: (0, 0)),
                  pl.BlockSpec(w3.shape, lambda i: (0, 0)),
                  pl.BlockSpec(b3.shape, lambda i: (0, 0))],
        out_specs=pl.BlockSpec((rows, n_out), lambda i: (0, 0)),
        compiler_params=pltpu.CompilerParams(dimension_semantics=("arbitrary",)),
    )(x, w1, b1, w2, b2, w3, b3)
    return out[:B]


# ----------------------------------------------------------------------------
# Conv block wrapper (NHWC activations, im2col in the wrapper)
# ----------------------------------------------------------------------------

def conv_block(x_nhwc, layer, *, stride, padding, norm="none", act="none",
               scale=None, shift=None, residual_raw=None):
    """Returns (y_nhwc:(B,Ho,Wo,cout), y_raw:(B*Ho*Wo, LANEpad) f32)."""
    B, H, W, C = x_nhwc.shape
    k = layer["k"]
    cout = layer["cout"]
    xp = x_nhwc
    if padding > 0:
        xp = jnp.pad(xp, ((0, 0), (padding, padding), (padding, padding), (0, 0)),
                     mode="reflect")
    Hp, Wp = xp.shape[1], xp.shape[2]
    Ho = (Hp - k) // stride + 1
    Wo = (Wp - k) // stride + 1
    # im2col, K ordered (kh, kw, cin) to match the pre-transposed weights.
    # TODO(synk): at real MUNIT resolutions replace this with an in-kernel
    # gather / manual DMA so HBM traffic is not inflated by k*k.
    cols = []
    for i in range(k):
        for j in range(k):
            cols.append(xp[:, i:i + stride * Ho:stride, j:j + stride * Wo:stride, :])
    x_col = jnp.concatenate(cols, axis=-1).reshape(B * Ho * Wo, k * k * C)
    x_col = x_col.astype(jnp.bfloat16)

    y_raw = conv_fused(x_col, layer["w"], layer["b"], batch_groups=B,
                       n_real=cout, norm=norm, act=act,
                       scale=scale, shift=shift, residual=residual_raw)
    y_nhwc = y_raw[:, :cout].reshape(B, Ho, Wo, cout)
    return y_nhwc, y_raw


# ----------------------------------------------------------------------------
# Parameter init (weights pre-transposed, channel-padded to LANE, bf16)
# ----------------------------------------------------------------------------

def _prep_conv(key, cin, cout, k):
    w = jax.random.normal(key, (cout, cin, k, k), jnp.float32) * 0.1
    n_pad = _round_up(cout, LANE)
    w_mat = w.transpose(2, 3, 1, 0).reshape(k * k * cin, cout)      # (K, cout)
    w_mat = jnp.pad(w_mat, ((0, 0), (0, n_pad - cout))).astype(jnp.bfloat16)
    b_pad = jnp.zeros((1, n_pad), jnp.float32)
    return {"w": w_mat, "b": b_pad, "k": k, "cin": cin, "cout": cout}


def _prep_linear(key, din, dout):
    w = jax.random.normal(key, (dout, din), jnp.float32) * 0.1
    return {"w": w.T.astype(jnp.bfloat16), "b": jnp.zeros((1, dout), jnp.float32)}


def init_adain_gen(key, input_dim, hp):
    dim, style_dim = hp["dim"], hp["style_dim"]
    n_down, n_res, mlp_dim = hp["n_downsample"], hp["n_res"], hp["mlp_dim"]
    keys = iter(jax.random.split(key, 64))
    p = {}

    # Content encoder: conv7 + n_down x conv4s2 (IN+ReLU) + n_res ResBlocks (IN)
    d = dim
    ce_convs = [_prep_conv(next(keys), input_dim, d, 7)]
    for _ in range(n_down):
        ce_convs.append(_prep_conv(next(keys), d, 2 * d, 4))
        d *= 2
    ce_res = [[_prep_conv(next(keys), d, d, 3), _prep_conv(next(keys), d, d, 3)]
              for _ in range(n_res)]
    p["enc_content"] = {"convs": ce_convs, "res": ce_res}
    p["content_dim"] = d

    # Style encoder (norm='none') + global avg pool + 1x1 conv
    sd = dim
    se_convs = [_prep_conv(next(keys), input_dim, sd, 7)]
    for _ in range(2):
        se_convs.append(_prep_conv(next(keys), sd, 2 * sd, 4))
        sd *= 2
    for _ in range(2):
        se_convs.append(_prep_conv(next(keys), sd, sd, 4))
    p["enc_style"] = {"convs": se_convs, "out": _prep_conv(next(keys), sd, style_dim, 1)}

    # Decoder: n_res AdaIN ResBlocks + n_down x (up2, conv5, LN, ReLU) + conv7 tanh
    dd = d
    dec_res = [[_prep_conv(next(keys), dd, dd, 3), _prep_conv(next(keys), dd, dd, 3)]
               for _ in range(n_res)]
    dec_up = []
    for _ in range(n_down):
        k0, k1 = jax.random.split(next(keys))
        c = _prep_conv(k0, dd, dd // 2, 5)
        n_pad = _round_up(dd // 2, LANE)
        gamma = jnp.pad(jax.random.uniform(k1, (dd // 2,), jnp.float32),
                        (0, n_pad - dd // 2)).reshape(1, 1, n_pad)
        beta = jnp.zeros((1, 1, n_pad), jnp.float32)
        dec_up.append({"conv": c, "ln_gamma": gamma, "ln_beta": beta})
        dd //= 2
    p["dec"] = {"res": dec_res, "up": dec_up, "out": _prep_conv(next(keys), dd, input_dim, 7)}

    # MLP: style_dim -> mlp_dim (relu) -> mlp_dim (relu) -> num_adain (none)
    num_adain = 4 * d * n_res
    p["mlp"] = [_prep_linear(next(keys), style_dim, mlp_dim),
                _prep_linear(next(keys), mlp_dim, mlp_dim),
                _prep_linear(next(keys), mlp_dim, num_adain)]
    return p


# ----------------------------------------------------------------------------
# Forward
# ----------------------------------------------------------------------------

def content_encode(p, x_nhwc):
    ce = p["enc_content"]
    h, h_raw = conv_block(x_nhwc, ce["convs"][0], stride=1, padding=3,
                          norm="in", act="relu")
    for c in ce["convs"][1:]:
        h, h_raw = conv_block(h, c, stride=2, padding=1, norm="in", act="relu")
    for r in ce["res"]:
        h1, _ = conv_block(h, r[0], stride=1, padding=1, norm="in", act="relu")
        h, h_raw = conv_block(h1, r[1], stride=1, padding=1, norm="in",
                              act="none", residual_raw=h_raw)
    return h, h_raw


def style_encode(p, x_nhwc):
    se = p["enc_style"]
    h, _ = conv_block(x_nhwc, se["convs"][0], stride=1, padding=3, act="relu")
    for c in se["convs"][1:]:
        h, _ = conv_block(h, c, stride=2, padding=1, act="relu")
    pooled = jnp.mean(h, axis=(1, 2))                      # AdaptiveAvgPool2d(1)
    out_layer = se["out"]
    y_raw = conv_fused(pooled.astype(jnp.bfloat16), out_layer["w"], out_layer["b"],
                       batch_groups=pooled.shape[0], n_real=out_layer["cout"],
                       norm="none", act="none")
    s = y_raw[:pooled.shape[0], :out_layer["cout"]]
    return s.reshape(s.shape[0], -1, 1, 1)


def decode(p, content_nhwc, content_raw, style):
    adain_params = mlp_forward(p["mlp"], style)            # (B, num_adain)
    dec = p["dec"]
    C = p["content_dim"]
    B = content_nhwc.shape[0]
    n_pad = _round_up(C, LANE)

    def affine(v):                                         # (B,C) -> (B,1,Npad)
        return jnp.pad(v, ((0, 0), (0, n_pad - C))).reshape(B, 1, n_pad)

    h, h_raw = content_nhwc, content_raw
    off = 0
    for r in dec["res"]:
        # assign_adain_params: first C entries -> bias (mean), next C -> weight (std)
        bias1 = affine(adain_params[:, off:off + C])
        weight1 = affine(adain_params[:, off + C:off + 2 * C])
        off += 2 * C
        bias2 = affine(adain_params[:, off:off + C])
        weight2 = affine(adain_params[:, off + C:off + 2 * C])
        off += 2 * C
        h1, _ = conv_block(h, r[0], stride=1, padding=1, norm="adain", act="relu",
                           scale=weight1, shift=bias1)
        h, h_raw = conv_block(h1, r[1], stride=1, padding=1, norm="adain",
                              act="none", scale=weight2, shift=bias2,
                              residual_raw=h_raw)
    for u in dec["up"]:
        # TODO(synk): fold the 2x nearest upsample into the conv gather at real
        # MUNIT resolutions instead of materializing the repeated tensor.
        h = jnp.repeat(jnp.repeat(h, 2, axis=1), 2, axis=2)
        npad_u = u["ln_gamma"].shape[-1]
        gamma = jnp.broadcast_to(u["ln_gamma"], (B, 1, npad_u))
        beta = jnp.broadcast_to(u["ln_beta"], (B, 1, npad_u))
        h, h_raw = conv_block(h, u["conv"], stride=1, padding=2, norm="ln",
                              act="relu", scale=gamma, shift=beta)
    h, _ = conv_block(h, dec["out"], stride=1, padding=3, norm="none", act="tanh")
    return h


def munit_trainer1_forward(params, x_a, x_b):
    # forward(): eval(); s_a = self.s_a; s_b = self.s_b
    x_a_nhwc = jnp.transpose(x_a, (0, 2, 3, 1))
    x_b_nhwc = jnp.transpose(x_b, (0, 2, 3, 1))
    c_a, c_a_raw = content_encode(params["gen_a"], x_a_nhwc)
    _s_a_fake = style_encode(params["gen_a"], x_a_nhwc)    # unused by forward (DCE'd)
    c_b, c_b_raw = content_encode(params["gen_b"], x_b_nhwc)
    _s_b_fake = style_encode(params["gen_b"], x_b_nhwc)
    x_ba = decode(params["gen_a"], c_b, c_b_raw, params["s_a"])
    x_ab = decode(params["gen_b"], c_a, c_a_raw, params["s_b"])
    x_ab = jnp.transpose(x_ab, (0, 3, 1, 2))
    x_ba = jnp.transpose(x_ba, (0, 3, 1, 2))
    return x_ab, x_ba


# ----------------------------------------------------------------------------
# Main
# ----------------------------------------------------------------------------

if __name__ == "__main__":
    gen_hp = {"dim": 8, "style_dim": 8, "sensitive_dim": 4, "n_downsample": 2,
              "n_res": 2, "mlp_dim": 16}
    input_dim_a = input_dim_b = 3
    display_size = batch = 2
    H = Wd = 16

    key = jax.random.PRNGKey(0)
    k_ga, k_gb, k_sa, k_sb, k_xa, k_xb = jax.random.split(key, 6)

    params = {
        "gen_a": init_adain_gen(k_ga, input_dim_a, gen_hp),
        "gen_b": init_adain_gen(k_gb, input_dim_b, gen_hp),
        # fixed style codes from __init__: torch.randn(display_size, style_dim, 1, 1)
        "s_a": jax.random.normal(k_sa, (display_size, gen_hp["style_dim"], 1, 1), jnp.float32),
        "s_b": jax.random.normal(k_sb, (display_size, gen_hp["style_dim"], 1, 1), jnp.float32),
    }
    # TODO(synk): optimizers, schedulers, discriminators and the VGG loss are
    # training-only state and are intentionally not implemented (not in forward()).

    x_a = jax.random.normal(k_xa, (batch, input_dim_a, H, Wd), jnp.float32)
    x_b = jax.random.normal(k_xb, (batch, input_dim_b, H, Wd), jnp.float32)

    fwd = jax.jit(functools.partial(munit_trainer1_forward, params))
    x_ab, x_ba = fwd(x_a, x_b)
    jax.block_until_ready((x_ab, x_ba))

    assert x_ab.shape == (batch, input_dim_b, H, Wd)
    assert x_ba.shape == (batch, input_dim_a, H, Wd)
    print("KERNEL_OK")
</pallas_src>

<mosaic_0001>
module attributes {stable_mosaic.version = 11 : i64} {
  func.func @_conv_fused_kernel(%arg0: i32, %arg1: memref<256x147xbf16, #tpu.memory_space<vmem>>, %arg2: memref<147x128xbf16, #tpu.memory_space<vmem>>, %arg3: memref<1x128xf32, #tpu.memory_space<vmem>>, %arg4: memref<256x128xf32, #tpu.memory_space<vmem>>) attributes {dimension_semantics = [#tpu.dimension_semantics<parallel>], iteration_bounds = array<i64: 2>, scalar_prefetch = 0 : i64, scratch_operands = 0 : i64, tpu.core_type = #tpu.core_type<tc>, window_params = [{transform_indices = @transform_0, window_bounds = array<i64: 256, 147>}, {pipeline_mode = #tpu.pipeline_mode<synchronous>, transform_indices = @transform_1, window_bounds = array<i64: 147, 128>}, {pipeline_mode = #tpu.pipeline_mode<synchronous>, transform_indices = @transform_2, window_bounds = array<i64: 1, 128>}, {transform_indices = @transform_3, window_bounds = array<i64: 256, 128>}]} {
    %c0 = arith.constant 0 : index
    %c0_0 = arith.constant 0 : index
    %0 = vector.load %arg1[%c0, %c0_0] : memref<256x147xbf16, #tpu.memory_space<vmem>>, vector<256x147xbf16>
    %c0_1 = arith.constant 0 : index
    %c0_2 = arith.constant 0 : index
    %1 = vector.load %arg2[%c0_1, %c0_2] : memref<147x128xbf16, #tpu.memory_space<vmem>>, vector<147x128xbf16>
    %cst = arith.constant dense<0.000000e+00> : vector<256x128xf32>
    %2 = tpu.matmul %0, %1, %cst {dimension_numbers = #tpu.dot_dimension_numbers<[1], [0], [0], [1], [0, 0, 1, 1], [], []>} : vector<256x147xbf16>, vector<147x128xbf16>, vector<256x128xf32> -> vector<256x128xf32>
    %c0_3 = arith.constant 0 : index
    %c0_4 = arith.constant 0 : index
    %3 = vector.load %arg3[%c0_3, %c0_4] : memref<1x128xf32, #tpu.memory_space<vmem>>, vector<1x128xf32>
    %4 = vector.broadcast %3 : vector<1x128xf32> to vector<256x128xf32>
    %5 = arith.addf %2, %4 : vector<256x128xf32>
    %cst_5 = arith.constant dense<0.000000e+00> : vector<128xf32>
    %6 = vector.multi_reduction <add>, %5, %cst_5 [0] : vector<256x128xf32> to vector<128xf32>
    %7 = vector.shape_cast %6 : vector<128xf32> to vector<1x128xf32>
    %cst_6 = arith.constant 2.560000e+02 : f32
    %8 = vector.broadcast %cst_6 : f32 to vector<1x128xf32>
    %9 = arith.divf %7, %8 : vector<1x128xf32>
    %10 = vector.broadcast %9 : vector<1x128xf32> to vector<256x128xf32>
    %11 = arith.subf %5, %10 : vector<256x128xf32>
    %12 = arith.mulf %11, %11 : vector<256x128xf32>
    %cst_7 = arith.constant dense<0.000000e+00> : vector<128xf32>
    %13 = vector.multi_reduction <add>, %12, %cst_7 [0] : vector<256x128xf32> to vector<128xf32>
    %14 = vector.shape_cast %13 : vector<128xf32> to vector<1x128xf32>
    %cst_8 = arith.constant 2.560000e+02 : f32
    %15 = vector.broadcast %cst_8 : f32 to vector<1x128xf32>
    %16 = arith.divf %14, %15 : vector<1x128xf32>
    %cst_9 = arith.constant 9.99999974E-6 : f32
    %17 = vector.broadcast %cst_9 : f32 to vector<1x128xf32>
    %18 = arith.addf %16, %17 : vector<1x128xf32>
    %19 = math.rsqrt %18 : vector<1x128xf32>
    %20 = vector.broadcast %19 : vector<1x128xf32> to vector<256x128xf32>
    %21 = arith.mulf %11, %20 : vector<256x128xf32>
    %cst_10 = arith.constant 0.000000e+00 : f32
    %22 = vector.broadcast %cst_10 : f32 to vector<256x128xf32>
    %23 = arith.maximumf %21, %22 : vector<256x128xf32>
    %c0_11 = arith.constant 0 : index
    %c0_12 = arith.constant 0 : index
    %24 = vector.load %arg4[%c0_11, %c0_12] : memref<256x128xf32, #tpu.memory_space<vmem>>, vector<256x128xf32>
    tpu.vector_store %arg4[%c0_11, %c0_12], %23 {strides = array<i32>} : memref<256x128xf32, #tpu.memory_space<vmem>>, vector<256x128xf32>,
    return
  }
  func.func @transform_0(%arg0: i32) -> (i32, i32) {
    %c0_i32 = arith.constant 0 : i32
    %c0_i32_0 = arith.constant 0 : i32
    return %arg0, %c0_i32 : i32, i32
  }
  func.func @transform_1(%arg0: i32) -> (i32, i32) {
    %c0_i32 = arith.constant 0 : i32
    %c0_i32_0 = arith.constant 0 : i32
    %c0_i32_1 = arith.constant 0 : i32
    return %c0_i32, %c0_i32_0 : i32, i32
  }
  func.func @transform_2(%arg0: i32) -> (i32, i32) {
    %c0_i32 = arith.constant 0 : i32
    %c0_i32_0 = arith.constant 0 : i32
    %c0_i32_1 = arith.constant 0 : i32
    return %c0_i32, %c0_i32_0 : i32, i32
  }
  func.func @transform_3(%arg0: i32) -> (i32, i32) {
    %c0_i32 = arith.constant 0 : i32
    %c0_i32_0 = arith.constant 0 : i32
    return %arg0, %c0_i32 : i32, i32
  }
}

module attributes {stable_mosaic.version = 11 : i64} {
  func.func @_conv_fused_kernel(%arg0: i32, %arg1: memref<64x128xbf16, #tpu.memory_space<vmem>>, %arg2: memref<128x128xbf16, #tpu.memory_space<vmem>>, %arg3: memref<1x128xf32, #tpu.memory_space<vmem>>, %arg4: memref<64x128xf32, #tpu.memory_space<vmem>>) attributes {dimension_semantics = [#tpu.dimension_semantics<parallel>], iteration_bounds = array<i64: 2>, scalar_prefetch = 0 : i64, scratch_operands = 0 : i64, tpu.core_type = #tpu.core_type<tc>, window_params = [{transform_indices = @transform_0, window_bounds = array<i64: 64, 128>}, {pipeline_mode = #tpu.pipeline_mode<synchronous>, transform_indices = @transform_1, window_bounds = array<i64: 128, 128>}, {pipeline_mode = #tpu.pipeline_mode<synchronous>, transform_indices = @transform_2, window_bounds = array<i64: 1, 128>}, {transform_indices = @transform_3, window_bounds = array<i64: 64, 128>}]} {
    %c0 = arith.constant 0 : index
    %c0_0 = arith.constant 0 : index
    %0 = vector.load %arg1[%c0, %c0_0] : memref<64x128xbf16, #tpu.memory_space<vmem>>, vector<64x128xbf16>
    %c0_1 = arith.constant 0 : index
    %c0_2 = arith.constant 0 : index
    %1 = vector.load %arg2[%c0_1, %c0_2] : memref<128x128xbf16, #tpu.memory_space<vmem>>, vector<128x128xbf16>
    %cst = arith.constant dense<0.000000e+00> : vector<64x128xf32>
    %2 = tpu.matmul %0, %1, %cst {dimension_numbers = #tpu.dot_dimension_numbers<[1], [0], [0], [1], [0, 0, 1, 1], [], []>} : vector<64x128xbf16>, vector<128x128xbf16>, vector<64x128xf32> -> vector<64x128xf32>
    %c0_3 = arith.constant 0 : index
    %c0_4 = arith.constant 0 : index
    %3 = vector.load %arg3[%c0_3, %c0_4] : memref<1x128xf32, #tpu.memory_space<vmem>>, vector<1x128xf32>
    %4 = vector.broadcast %3 : vector<1x128xf32> to vector<64x128xf32>
    %5 = arith.addf %2, %4 : vector<64x128xf32>
    %cst_5 = arith.constant dense<0.000000e+00> : vector<128xf32>
    %6 = vector.multi_reduction <add>, %5, %cst_5 [0] : vector<64x128xf32> to vector<128xf32>
    %7 = vector.shape_cast %6 : vector<128xf32> to vector<1x128xf32>
    %cst_6 = arith.constant 6.400000e+01 : f32
    %8 = vector.broadcast %cst_6 : f32 to vector<1x128xf32>
    %9 = arith.divf %7, %8 : vector<1x128xf32>
    %10 = vector.broadcast %9 : vector<1x128xf32> to vector<64x128xf32>
    %11 = arith.subf %5, %10 : vector<64x128xf32>
    %12 = arith.mulf %11, %11 : vector<64x128xf32>
    %cst_7 = arith.constant dense<0.000000e+00> : vector<128xf32>
    %13 = vector.multi_reduction <add>, %12, %cst_7 [0] : vector<64x128xf32> to vector<128xf32>
    %14 = vector.shape_cast %13 : vector<128xf32> to vector<1x128xf32>
    %cst_8 = arith.constant 6.400000e+01 : f32
    %15 = vector.broadcast %cst_8 : f32 to vector<1x128xf32>
    %16 = arith.divf %14, %15 : vector<1x128xf32>
    %cst_9 = arith.constant 9.99999974E-6 : f32
    %17 = vector.broadcast %cst_9 : f32 to vector<1x128xf32>
    %18 = arith.addf %16, %17 : vector<1x128xf32>
    %19 = math.rsqrt %18 : vector<1x128xf32>
    %20 = vector.broadcast %19 : vector<1x128xf32> to vector<64x128xf32>
    %21 = arith.mulf %11, %20 : vector<64x128xf32>
    %cst_10 = arith.constant 0.000000e+00 : f32
    %22 = vector.broadcast %cst_10 : f32 to vector<64x128xf32>
    %23 = arith.maximumf %21, %22 : vector<64x128xf32>
    %c0_11 = arith.constant 0 : index
    %c0_12 = arith.constant 0 : index
    %24 = vector.load %arg4[%c0_11, %c0_12] : memref<64x128xf32, #tpu.memory_space<vmem>>, vector<64x128xf32>
    tpu.vector_store %arg4[%c0_11, %c0_12], %23 {strides = array<i32>} : memref<64x128xf32, #tpu.memory_space<vmem>>, vector<64x128xf32>,
    return
  }
  func.func @transform_0(%arg0: i32) -> (i32, i32) {
    %c0_i32 = arith.constant 0 : i32
    %c0_i32_0 = arith.constant 0 : i32
    return %arg0, %c0_i32 : i32, i32
  }
  func.func @transform_1(%arg0: i32) -> (i32, i32) {
    %c0_i32 = arith.constant 0 : i32
    %c0_i32_0 = arith.constant 0 : i32
    %c0_i32_1 = arith.constant 0 : i32
    return %c0_i32, %c0_i32_0 : i32, i32
  }
  func.func @transform_2(%arg0: i32) -> (i32, i32) {
    %c0_i32 = arith.constant 0 : i32
    %c0_i32_0 = arith.constant 0 : i32
    %c0_i32_1 = arith.constant 0 : i32
    return %c0_i32, %c0_i32_0 : i32, i32
  }
  func.func @transform_3(%arg0: i32) -> (i32, i32) {
    %c0_i32 = arith.constant 0 : i32
    %c0_i32_0 = arith.constant 0 : i32
    return %arg0, %c0_i32 : i32, i32
  }
}

module attributes {stable_mosaic.version = 11 : i64} {
  func.func @_conv_fused_kernel(%arg0: i32, %arg1: memref<16x256xbf16, #tpu.memory_space<vmem>>, %arg2: memref<256x128xbf16, #tpu.memory_space<vmem>>, %arg3: memref<1x128xf32, #tpu.memory_space<vmem>>, %arg4: memref<16x128xf32, #tpu.memory_space<vmem>>) attributes {dimension_semantics = [#tpu.dimension_semantics<parallel>], iteration_bounds = array<i64: 2>, scalar_prefetch = 0 : i64, scratch_operands = 0 : i64, tpu.core_type = #tpu.core_type<tc>, window_params = [{transform_indices = @transform_0, window_bounds = array<i64: 16, 256>}, {pipeline_mode = #tpu.pipeline_mode<synchronous>, transform_indices = @transform_1, window_bounds = array<i64: 256, 128>}, {pipeline_mode = #tpu.pipeline_mode<synchronous>, transform_indices = @transform_2, window_bounds = array<i64: 1, 128>}, {transform_indices = @transform_3, window_bounds = array<i64: 16, 128>}]} {
    %c0 = arith.constant 0 : index
    %c0_0 = arith.constant 0 : index
    %0 = vector.load %arg1[%c0, %c0_0] : memref<16x256xbf16, #tpu.memory_space<vmem>>, vector<16x256xbf16>
    %c0_1 = arith.constant 0 : index
    %c0_2 = arith.constant 0 : index
    %1 = vector.load %arg2[%c0_1, %c0_2] : memref<256x128xbf16, #tpu.memory_space<vmem>>, vector<256x128xbf16>
    %cst = arith.constant dense<0.000000e+00> : vector<16x128xf32>
    %2 = tpu.matmul %0, %1, %cst {dimension_numbers = #tpu.dot_dimension_numbers<[1], [0], [0], [1], [0, 0, 1, 1], [], []>} : vector<16x256xbf16>, vector<256x128xbf16>, vector<16x128xf32> -> vector<16x128xf32>
    %c0_3 = arith.constant 0 : index
    %c0_4 = arith.constant 0 : index
    %3 = vector.load %arg3[%c0_3, %c0_4] : memref<1x128xf32, #tpu.memory_space<vmem>>, vector<1x128xf32>
    %4 = vector.broadcast %3 : vector<1x128xf32> to vector<16x128xf32>
    %5 = arith.addf %2, %4 : vector<16x128xf32>
    %cst_5 = arith.constant dense<0.000000e+00> : vector<128xf32>
    %6 = vector.multi_reduction <add>, %5, %cst_5 [0] : vector<16x128xf32> to vector<128xf32>
    %7 = vector.shape_cast %6 : vector<128xf32> to vector<1x128xf32>
    %cst_6 = arith.constant 1.600000e+01 : f32
    %8 = vector.broadcast %cst_6 : f32 to vector<1x128xf32>
    %9 = arith.divf %7, %8 : vector<1x128xf32>
    %10 = vector.broadcast %9 : vector<1x128xf32> to vector<16x128xf32>
    %11 = arith.subf %5, %10 : vector<16x128xf32>
    %12 = arith.mulf %11, %11 : vector<16x128xf32>
    %cst_7 = arith.constant dense<0.000000e+00> : vector<128xf32>
    %13 = vector.multi_reduction <add>, %12, %cst_7 [0] : vector<16x128xf32> to vector<128xf32>
    %14 = vector.shape_cast %13 : vector<128xf32> to vector<1x128xf32>
    %cst_8 = arith.constant 1.600000e+01 : f32
    %15 = vector.broadcast %cst_8 : f32 to vector<1x128xf32>
    %16 = arith.divf %14, %15 : vector<1x128xf32>
    %cst_9 = arith.constant 9.99999974E-6 : f32
    %17 = vector.broadcast %cst_9 : f32 to vector<1x128xf32>
    %18 = arith.addf %16, %17 : vector<1x128xf32>
    %19 = math.rsqrt %18 : vector<1x128xf32>
    %20 = vector.broadcast %19 : vector<1x128xf32> to vector<16x128xf32>
    %21 = arith.mulf %11, %20 : vector<16x128xf32>
    %cst_10 = arith.constant 0.000000e+00 : f32
    %22 = vector.broadcast %cst_10 : f32 to vector<16x128xf32>
    %23 = arith.maximumf %21, %22 : vector<16x128xf32>
    %c0_11 = arith.constant 0 : index
    %c0_12 = arith.constant 0 : index
    %24 = vector.load %arg4[%c0_11, %c0_12] : memref<16x128xf32, #tpu.memory_space<vmem>>, vector<16x128xf32>
    tpu.vector_store %arg4[%c0_11, %c0_12], %23 {strides = array<i32>} : memref<16x128xf32, #tpu.memory_space<vmem>>, vector<16x128xf32>,
    return
  }
  func.func @transform_0(%arg0: i32) -> (i32, i32) {
    %c0_i32 = arith.constant 0 : i32
    %c0_i32_0 = arith.constant 0 : i32
    return %arg0, %c0_i32 : i32, i32
  }
  func.func @transform_1(%arg0: i32) -> (i32, i32) {
    %c0_i32 = arith.constant 0 : i32
    %c0_i32_0 = arith.constant 0 : i32
    %c0_i32_1 = arith.constant 0 : i32
    return %c0_i32, %c0_i32_0 : i32, i32
  }
  func.func @transform_2(%arg0: i32) -> (i32, i32) {
    %c0_i32 = arith.constant 0 : i32
    %c0_i32_0 = arith.constant 0 : i32
    %c0_i32_1 = arith.constant 0 : i32
    return %c0_i32, %c0_i32_0 : i32, i32
  }
  func.func @transform_3(%arg0: i32) -> (i32, i32) {
    %c0_i32 = arith.constant 0 : i32
    %c0_i32_0 = arith.constant 0 : i32
    return %arg0, %c0_i32 : i32, i32
  }
}

module attributes {stable_mosaic.version = 11 : i64} {
  func.func @_conv_fused_kernel(%arg0: i32, %arg1: memref<16x288xbf16, #tpu.memory_space<vmem>>, %arg2: memref<288x128xbf16, #tpu.memory_space<vmem>>, %arg3: memref<1x128xf32, #tpu.memory_space<vmem>>, %arg4: memref<16x128xf32, #tpu.memory_space<vmem>>, %arg5: memref<16x128xf32, #tpu.memory_space<vmem>>) attributes {dimension_semantics = [#tpu.dimension_semantics<parallel>], iteration_bounds = array<i64: 2>, scalar_prefetch = 0 : i64, scratch_operands = 0 : i64, tpu.core_type = #tpu.core_type<tc>, window_params = [{transform_indices = @transform_0, window_bounds = array<i64: 16, 288>}, {pipeline_mode = #tpu.pipeline_mode<synchronous>, transform_indices = @transform_1, window_bounds = array<i64: 288, 128>}, {pipeline_mode = #tpu.pipeline_mode<synchronous>, transform_indices = @transform_2, window_bounds = array<i64: 1, 128>}, {transform_indices = @transform_3, window_bounds = array<i64: 16, 128>}, {transform_indices = @transform_4, window_bounds = array<i64: 16, 128>}]} {
    %c0 = arith.constant 0 : index
    %c0_0 = arith.constant 0 : index
    %0 = vector.load %arg1[%c0, %c0_0] : memref<16x288xbf16, #tpu.memory_space<vmem>>, vector<16x288xbf16>
    %c0_1 = arith.constant 0 : index
    %c0_2 = arith.constant 0 : index
    %1 = vector.load %arg2[%c0_1, %c0_2] : memref<288x128xbf16, #tpu.memory_space<vmem>>, vector<288x128xbf16>
    %cst = arith.constant dense<0.000000e+00> : vector<16x128xf32>
    %2 = tpu.matmul %0, %1, %cst {dimension_numbers = #tpu.dot_dimension_numbers<[1], [0], [0], [1], [0, 0, 1, 1], [], []>} : vector<16x288xbf16>, vector<288x128xbf16>, vector<16x128xf32> -> vector<16x128xf32>
    %c0_3 = arith.constant 0 : index
    %c0_4 = arith.constant 0 : index
    %3 = vector.load %arg3[%c0_3, %c0_4] : memref<1x128xf32, #tpu.memory_space<vmem>>, vector<1x128xf32>
    %4 = vector.broadcast %3 : vector<1x128xf32> to vector<16x128xf32>
    %5 = arith.addf %2, %4 : vector<16x128xf32>
    %cst_5 = arith.constant dense<0.000000e+00> : vector<128xf32>
    %6 = vector.multi_reduction <add>, %5, %cst_5 [0] : vector<16x128xf32> to vector<128xf32>
    %7 = vector.shape_cast %6 : vector<128xf32> to vector<1x128xf32>
    %cst_6 = arith.constant 1.600000e+01 : f32
    %8 = vector.broadcast %cst_6 : f32 to vector<1x128xf32>
    %9 = arith.divf %7, %8 : vector<1x128xf32>
    %10 = vector.broadcast %9 : vector<1x128xf32> to vector<16x128xf32>
    %11 = arith.subf %5, %10 : vector<16x128xf32>
    %12 = arith.mulf %11, %11 : vector<16x128xf32>
    %cst_7 = arith.constant dense<0.000000e+00> : vector<128xf32>
    %13 = vector.multi_reduction <add>, %12, %cst_7 [0] : vector<16x128xf32> to vector<128xf32>
    %14 = vector.shape_cast %13 : vector<128xf32> to vector<1x128xf32>
    %cst_8 = arith.constant 1.600000e+01 : f32
    %15 = vector.broadcast %cst_8 : f32 to vector<1x128xf32>
    %16 = arith.divf %14, %15 : vector<1x128xf32>
    %cst_9 = arith.constant 9.99999974E-6 : f32
    %17 = vector.broadcast %cst_9 : f32 to vector<1x128xf32>
    %18 = arith.addf %16, %17 : vector<1x128xf32>
    %19 = math.rsqrt %18 : vector<1x128xf32>
    %20 = vector.broadcast %19 : vector<1x128xf32> to vector<16x128xf32>
    %21 = arith.mulf %11, %20 : vector<16x128xf32>
    %c0_10 = arith.constant 0 : index
    %c0_11 = arith.constant 0 : index
    %22 = vector.load %arg4[%c0_10, %c0_11] : memref<16x128xf32, #tpu.memory_space<vmem>>, vector<16x128xf32>
    %23 = arith.addf %21, %22 : vector<16x128xf32>
    %c0_12 = arith.constant 0 : index
    %c0_13 = arith.constant 0 : index
    %24 = vector.load %arg5[%c0_12, %c0_13] : memref<16x128xf32, #tpu.memory_space<vmem>>, vector<16x128xf32>
    tpu.vector_store %arg5[%c0_12, %c0_13], %23 {strides = array<i32>} : memref<16x128xf32, #tpu.memory_space<vmem>>, vector<16x128xf32>,
    return
  }
  func.func @transform_0(%arg0: i32) -> (i32, i32) {
    %c0_i32 = arith.constant 0 : i32
    %c0_i32_0 = arith.constant 0 : i32
    return %arg0, %c0_i32 : i32, i32
  }
  func.func @transform_1(%arg0: i32) -> (i32, i32) {
    %c0_i32 = arith.constant 0 : i32
    %c0_i32_0 = arith.constant 0 : i32
    %c0_i32_1 = arith.constant 0 : i32
    return %c0_i32, %c0_i32_0 : i32, i32
  }
  func.func @transform_2(%arg0: i32) -> (i32, i32) {
    %c0_i32 = arith.constant 0 : i32
    %c0_i32_0 = arith.constant 0 : i32
    %c0_i32_1 = arith.constant 0 : i32
    return %c0_i32, %c0_i32_0 : i32, i32
  }
  func.func @transform_3(%arg0: i32) -> (i32, i32) {
    %c0_i32 = arith.constant 0 : i32
    %c0_i32_0 = arith.constant 0 : i32
    return %arg0, %c0_i32 : i32, i32
  }
  func.func @transform_4(%arg0: i32) -> (i32, i32) {
    %c0_i32 = arith.constant 0 : i32
    %c0_i32_0 = arith.constant 0 : i32
    return %arg0, %c0_i32 : i32, i32
  }
}

module attributes {stable_mosaic.version = 11 : i64} {
  func.func @_mlp_kernel(%arg0: i32, %arg1: memref<8x8xbf16, #tpu.memory_space<vmem>>, %arg2: memref<8x16xbf16, #tpu.memory_space<vmem>>, %arg3: memref<1x16xf32, #tpu.memory_space<vmem>>, %arg4: memref<16x16xbf16, #tpu.memory_space<vmem>>, %arg5: memref<1x16xf32, #tpu.memory_space<vmem>>, %arg6: memref<16x256xbf16, #tpu.memory_space<vmem>>, %arg7: memref<1x256xf32, #tpu.memory_space<vmem>>, %arg8: memref<8x256xf32, #tpu.memory_space<vmem>>) attributes {dimension_semantics = [#tpu.dimension_semantics<arbitrary>], iteration_bounds = array<i64: 1>, scalar_prefetch = 0 : i64, scratch_operands = 0 : i64, tpu.core_type = #tpu.core_type<tc>, window_params = [{pipeline_mode = #tpu.pipeline_mode<synchronous>, transform_indices = @transform_0, window_bounds = array<i64: 8, 8>}, {pipeline_mode = #tpu.pipeline_mode<synchronous>, transform_indices = @transform_1, window_bounds = array<i64: 8, 16>}, {pipeline_mode = #tpu.pipeline_mode<synchronous>, transform_indices = @transform_2, window_bounds = array<i64: 1, 16>}, {pipeline_mode = #tpu.pipeline_mode<synchronous>, transform_indices = @transform_3, window_bounds = array<i64: 16, 16>}, {pipeline_mode = #tpu.pipeline_mode<synchronous>, transform_indices = @transform_4, window_bounds = array<i64: 1, 16>}, {pipeline_mode = #tpu.pipeline_mode<synchronous>, transform_indices = @transform_5, window_bounds = array<i64: 16, 256>}, {pipeline_mode = #tpu.pipeline_mode<synchronous>, transform_indices = @transform_6, window_bounds = array<i64: 1, 256>}, {pipeline_mode = #tpu.pipeline_mode<synchronous>, transform_indices = @transform_7, window_bounds = array<i64: 8, 256>}]} {
    %c0 = arith.constant 0 : index
    %c0_0 = arith.constant 0 : index
    %0 = vector.load %arg1[%c0, %c0_0] : memref<8x8xbf16, #tpu.memory_space<vmem>>, vector<8x8xbf16>
    %c0_1 = arith.constant 0 : index
    %c0_2 = arith.constant 0 : index
    %1 = vector.load %arg2[%c0_1, %c0_2] : memref<8x16xbf16, #tpu.memory_space<vmem>>, vector<8x16xbf16>
    %cst = arith.constant dense<0.000000e+00> : vector<8x16xf32>
    %2 = tpu.matmul %0, %1, %cst {dimension_numbers = #tpu.dot_dimension_numbers<[1], [0], [0], [1], [0, 0, 1, 1], [], []>} : vector<8x8xbf16>, vector<8x16xbf16>, vector<8x16xf32> -> vector<8x16xf32>
    %c0_3 = arith.constant 0 : index
    %c0_4 = arith.constant 0 : index
    %3 = vector.load %arg3[%c0_3, %c0_4] : memref<1x16xf32, #tpu.memory_space<vmem>>, vector<1x16xf32>
    %4 = vector.broadcast %3 : vector<1x16xf32> to vector<8x16xf32>
    %5 = arith.addf %2, %4 : vector<8x16xf32>
    %cst_5 = arith.constant 0.000000e+00 : f32
    %6 = vector.broadcast %cst_5 : f32 to vector<8x16xf32>
    %7 = arith.maximumf %5, %6 : vector<8x16xf32>
    %8 = arith.truncf %7 : vector<8x16xf32> to vector<8x16xbf16>
    %c0_6 = arith.constant 0 : index
    %c0_7 = arith.constant 0 : index
    %9 = vector.load %arg4[%c0_6, %c0_7] : memref<16x16xbf16, #tpu.memory_space<vmem>>, vector<16x16xbf16>
    %cst_8 = arith.constant dense<0.000000e+00> : vector<8x16xf32>
    %10 = tpu.matmul %8, %9, %cst_8 {dimension_numbers = #tpu.dot_dimension_numbers<[1], [0], [0], [1], [0, 0, 1, 1], [], []>} : vector<8x16xbf16>, vector<16x16xbf16>, vector<8x16xf32> -> vector<8x16xf32>
    %c0_9 = arith.constant 0 : index
    %c0_10 = arith.constant 0 : index
    %11 = vector.load %arg5[%c0_9, %c0_10] : memref<1x16xf32, #tpu.memory_space<vmem>>, vector<1x16xf32>
    %12 = vector.broadcast %11 : vector<1x16xf32> to vector<8x16xf32>
    %13 = arith.addf %10, %12 : vector<8x16xf32>
    %cst_11 = arith.constant 0.000000e+00 : f32
    %14 = vector.broadcast %cst_11 : f32 to vector<8x16xf32>
    %15 = arith.maximumf %13, %14 : vector<8x16xf32>
    %16 = arith.truncf %15 : vector<8x16xf32> to vector<8x16xbf16>
    %c0_12 = arith.constant 0 : index
    %c0_13 = arith.constant 0 : index
    %17 = vector.load %arg6[%c0_12, %c0_13] : memref<16x256xbf16, #tpu.memory_space<vmem>>, vector<16x256xbf16>
    %cst_14 = arith.constant dense<0.000000e+00> : vector<8x256xf32>
    %18 = tpu.matmul %16, %17, %cst_14 {dimension_numbers = #tpu.dot_dimension_numbers<[1], [0], [0], [1], [0, 0, 1, 1], [], []>} : vector<8x16xbf16>, vector<16x256xbf16>, vector<8x256xf32> -> vector<8x256xf32>
    %c0_15 = arith.constant 0 : index
    %c0_16 = arith.constant 0 : index
    %19 = vector.load %arg7[%c0_15, %c0_16] : memref<1x256xf32, #tpu.memory_space<vmem>>, vector<1x256xf32>
    %20 = vector.broadcast %19 : vector<1x256xf32> to vector<8x256xf32>
    %21 = arith.addf %18, %20 : vector<8x256xf32>
    %c0_17 = arith.constant 0 : index
    %c0_18 = arith.constant 0 : index
    %22 = vector.load %arg8[%c0_17, %c0_18] : memref<8x256xf32, #tpu.memory_space<vmem>>, vector<8x256xf32>
    tpu.vector_store %arg8[%c0_17, %c0_18], %21 {strides = array<i32>} : memref<8x256xf32, #tpu.memory_space<vmem>>, vector<8x256xf32>,
    return
  }
  func.func @transform_0(%arg0: i32) -> (i32, i32) {
    %c0_i32 = arith.constant 0 : i32
    %c0_i32_0 = arith.constant 0 : i32
    %c0_i32_1 = arith.constant 0 : i32
    return %c0_i32, %c0_i32_0 : i32, i32
  }
  func.func @transform_1(%arg0: i32) -> (i32, i32) {
    %c0_i32 = arith.constant 0 : i32
    %c0_i32_0 = arith.constant 0 : i32
    %c0_i32_1 = arith.constant 0 : i32
    return %c0_i32, %c0_i32_0 : i32, i32
  }
  func.func @transform_2(%arg0: i32) -> (i32, i32) {
    %c0_i32 = arith.constant 0 : i32
    %c0_i32_0 = arith.constant 0 : i32
    %c0_i32_1 = arith.constant 0 : i32
    return %c0_i32, %c0_i32_0 : i32, i32
  }
  func.func @transform_3(%arg0: i32) -> (i32, i32) {
    %c0_i32 = arith.constant 0 : i32
    %c0_i32_0 = arith.constant 0 : i32
    %c0_i32_1 = arith.constant 0 : i32
    return %c0_i32, %c0_i32_0 : i32, i32
  }
  func.func @transform_4(%arg0: i32) -> (i32, i32) {
    %c0_i32 = arith.constant 0 : i32
    %c0_i32_0 = arith.constant 0 : i32
    %c0_i32_1 = arith.constant 0 : i32
    return %c0_i32, %c0_i32_0 : i32, i32
  }
  func.func @transform_5(%arg0: i32) -> (i32, i32) {
    %c0_i32 = arith.constant 0 : i32
    %c0_i32_0 = arith.constant 0 : i32
    %c0_i32_1 = arith.constant 0 : i32
    return %c0_i32, %c0_i32_0 : i32, i32
  }
  func.func @transform_6(%arg0: i32) -> (i32, i32) {
    %c0_i32 = arith.constant 0 : i32
    %c0_i32_0 = arith.constant 0 : i32
    %c0_i32_1 = arith.constant 0 : i32
    return %c0_i32, %c0_i32_0 : i32, i32
  }
  func.func @transform_7(%arg0: i32) -> (i32, i32) {
    %c0_i32 = arith.constant 0 : i32
    %c0_i32_0 = arith.constant 0 : i32
    %c0_i32_1 = arith.constant 0 : i32
    return %c0_i32, %c0_i32_0 : i32, i32
  }
}

module attributes {stable_mosaic.version = 11 : i64} {
  func.func @_conv_fused_kernel(%arg0: i32, %arg1: memref<16x288xbf16, #tpu.memory_space<vmem>>, %arg2: memref<288x128xbf16, #tpu.memory_space<vmem>>, %arg3: memref<1x128xf32, #tpu.memory_space<vmem>>, %arg4: memref<16x128xf32, #tpu.memory_space<vmem>>) attributes {dimension_semantics = [#tpu.dimension_semantics<parallel>], iteration_bounds = array<i64: 2>, scalar_prefetch = 0 : i64, scratch_operands = 0 : i64, tpu.core_type = #tpu.core_type<tc>, window_params = [{transform_indices = @transform_0, window_bounds = array<i64: 16, 288>}, {pipeline_mode = #tpu.pipeline_mode<synchronous>, transform_indices = @transform_1, window_bounds = array<i64: 288, 128>}, {pipeline_mode = #tpu.pipeline_mode<synchronous>, transform_indices = @transform_2, window_bounds = array<i64: 1, 128>}, {transform_indices = @transform_3, window_bounds = array<i64: 16, 128>}]} {
    %c0 = arith.constant 0 : index
    %c0_0 = arith.constant 0 : index
    %0 = vector.load %arg1[%c0, %c0_0] : memref<16x288xbf16, #tpu.memory_space<vmem>>, vector<16x288xbf16>
    %c0_1 = arith.constant 0 : index
    %c0_2 = arith.constant 0 : index
    %1 = vector.load %arg2[%c0_1, %c0_2] : memref<288x128xbf16, #tpu.memory_space<vmem>>, vector<288x128xbf16>
    %cst = arith.constant dense<0.000000e+00> : vector<16x128xf32>
    %2 = tpu.matmul %0, %1, %cst {dimension_numbers = #tpu.dot_dimension_numbers<[1], [0], [0], [1], [0, 0, 1, 1], [], []>} : vector<16x288xbf16>, vector<288x128xbf16>, vector<16x128xf32> -> vector<16x128xf32>
    %c0_3 = arith.constant 0 : index
    %c0_4 = arith.constant 0 : index
    %3 = vector.load %arg3[%c0_3, %c0_4] : memref<1x128xf32, #tpu.memory_space<vmem>>, vector<1x128xf32>
    %4 = vector.broadcast %3 : vector<1x128xf32> to vector<16x128xf32>
    %5 = arith.addf %2, %4 : vector<16x128xf32>
    %cst_5 = arith.constant dense<0.000000e+00> : vector<128xf32>
    %6 = vector.multi_reduction <add>, %5, %cst_5 [0] : vector<16x128xf32> to vector<128xf32>
    %7 = vector.shape_cast %6 : vector<128xf32> to vector<1x128xf32>
    %cst_6 = arith.constant 1.600000e+01 : f32
    %8 = vector.broadcast %cst_6 : f32 to vector<1x128xf32>
    %9 = arith.divf %7, %8 : vector<1x128xf32>
    %10 = vector.broadcast %9 : vector<1x128xf32> to vector<16x128xf32>
    %11 = arith.subf %5, %10 : vector<16x128xf32>
    %12 = arith.mulf %11, %11 : vector<16x128xf32>
    %cst_7 = arith.constant dense<0.000000e+00> : vector<128xf32>
    %13 = vector.multi_reduction <add>, %12, %cst_7 [0] : vector<16x128xf32> to vector<128xf32>
    %14 = vector.shape_cast %13 : vector<128xf32> to vector<1x128xf32>
    %cst_8 = arith.constant 1.600000e+01 : f32
    %15 = vector.broadcast %cst_8 : f32 to vector<1x128xf32>
    %16 = arith.divf %14, %15 : vector<1x128xf32>
    %cst_9 = arith.constant 9.99999974E-6 : f32
    %17 = vector.broadcast %cst_9 : f32 to vector<1x128xf32>
    %18 = arith.addf %16, %17 : vector<1x128xf32>
    %19 = math.rsqrt %18 : vector<1x128xf32>
    %20 = vector.broadcast %19 : vector<1x128xf32> to vector<16x128xf32>
    %21 = arith.mulf %11, %20 : vector<16x128xf32>
    %cst_10 = arith.constant 0.000000e+00 : f32
    %22 = vector.broadcast %cst_10 : f32 to vector<16x128xf32>
    %23 = arith.maximumf %21, %22 : vector<16x128xf32>
    %c0_11 = arith.constant 0 : index
    %c0_12 = arith.constant 0 : index
    %24 = vector.load %arg4[%c0_11, %c0_12] : memref<16x128xf32, #tpu.memory_space<vmem>>, vector<16x128xf32>
    tpu.vector_store %arg4[%c0_11, %c0_12], %23 {strides = array<i32>} : memref<16x128xf32, #tpu.memory_space<vmem>>, vector<16x128xf32>,
    return
  }
  func.func @transform_0(%arg0: i32) -> (i32, i32) {
    %c0_i32 = arith.constant 0 : i32
    %c0_i32_0 = arith.constant 0 : i32
    return %arg0, %c0_i32 : i32, i32
  }
  func.func @transform_1(%arg0: i32) -> (i32, i32) {
    %c0_i32 = arith.constant 0 : i32
    %c0_i32_0 = arith.constant 0 : i32
    %c0_i32_1 = arith.constant 0 : i32
    return %c0_i32, %c0_i32_0 : i32, i32
  }
  func.func @transform_2(%arg0: i32) -> (i32, i32) {
    %c0_i32 = arith.constant 0 : i32
    %c0_i32_0 = arith.constant 0 : i32
    %c0_i32_1 = arith.constant 0 : i32
    return %c0_i32, %c0_i32_0 : i32, i32
  }
  func.func @transform_3(%arg0: i32) -> (i32, i32) {
    %c0_i32 = arith.constant 0 : i32
    %c0_i32_0 = arith.constant 0 : i32
    return %arg0, %c0_i32 : i32, i32
  }
}

module attributes {stable_mosaic.version = 11 : i64} {
  func.func @_conv_fused_kernel(%arg0: i32, %arg1: memref<16x288xbf16, #tpu.memory_space<vmem>>, %arg2: memref<288x128xbf16, #tpu.memory_space<vmem>>, %arg3: memref<1x128xf32, #tpu.memory_space<vmem>>, %arg4: memref<1x1x128xf32, #tpu.memory_space<vmem>>, %arg5: memref<1x1x128xf32, #tpu.memory_space<vmem>>, %arg6: memref<16x128xf32, #tpu.memory_space<vmem>>) attributes {dimension_semantics = [#tpu.dimension_semantics<parallel>], iteration_bounds = array<i64: 2>, scalar_prefetch = 0 : i64, scratch_operands = 0 : i64, tpu.core_type = #tpu.core_type<tc>, window_params = [{transform_indices = @transform_0, window_bounds = array<i64: 16, 288>}, {pipeline_mode = #tpu.pipeline_mode<synchronous>, transform_indices = @transform_1, window_bounds = array<i64: 288, 128>}, {pipeline_mode = #tpu.pipeline_mode<synchronous>, transform_indices = @transform_2, window_bounds = array<i64: 1, 128>}, {transform_indices = @transform_3, window_bounds = array<i64: 1, 1, 128>}, {transform_indices = @transform_4, window_bounds = array<i64: 1, 1, 128>}, {transform_indices = @transform_5, window_bounds = array<i64: 16, 128>}]} {
    %c0 = arith.constant 0 : index
    %c0_0 = arith.constant 0 : index
    %0 = vector.load %arg1[%c0, %c0_0] : memref<16x288xbf16, #tpu.memory_space<vmem>>, vector<16x288xbf16>
    %c0_1 = arith.constant 0 : index
    %c0_2 = arith.constant 0 : index
    %1 = vector.load %arg2[%c0_1, %c0_2] : memref<288x128xbf16, #tpu.memory_space<vmem>>, vector<288x128xbf16>
    %cst = arith.constant dense<0.000000e+00> : vector<16x128xf32>
    %2 = tpu.matmul %0, %1, %cst {dimension_numbers = #tpu.dot_dimension_numbers<[1], [0], [0], [1], [0, 0, 1, 1], [], []>} : vector<16x288xbf16>, vector<288x128xbf16>, vector<16x128xf32> -> vector<16x128xf32>
    %c0_3 = arith.constant 0 : index
    %c0_4 = arith.constant 0 : index
    %3 = vector.load %arg3[%c0_3, %c0_4] : memref<1x128xf32, #tpu.memory_space<vmem>>, vector<1x128xf32>
    %4 = vector.broadcast %3 : vector<1x128xf32> to vector<16x128xf32>
    %5 = arith.addf %2, %4 : vector<16x128xf32>
    %cst_5 = arith.constant dense<0.000000e+00> : vector<128xf32>
    %6 = vector.multi_reduction <add>, %5, %cst_5 [0] : vector<16x128xf32> to vector<128xf32>
    %7 = vector.shape_cast %6 : vector<128xf32> to vector<1x128xf32>
    %cst_6 = arith.constant 1.600000e+01 : f32
    %8 = vector.broadcast %cst_6 : f32 to vector<1x128xf32>
    %9 = arith.divf %7, %8 : vector<1x128xf32>
    %10 = vector.broadcast %9 : vector<1x128xf32> to vector<16x128xf32>
    %11 = arith.subf %5, %10 : vector<16x128xf32>
    %12 = arith.mulf %11, %11 : vector<16x128xf32>
    %cst_7 = arith.constant dense<0.000000e+00> : vector<128xf32>
    %13 = vector.multi_reduction <add>, %12, %cst_7 [0] : vector<16x128xf32> to vector<128xf32>
    %14 = vector.shape_cast %13 : vector<128xf32> to vector<1x128xf32>
    %cst_8 = arith.constant 1.600000e+01 : f32
    %15 = vector.broadcast %cst_8 : f32 to vector<1x128xf32>
    %16 = arith.divf %14, %15 : vector<1x128xf32>
    %cst_9 = arith.constant 9.99999974E-6 : f32
    %17 = vector.broadcast %cst_9 : f32 to vector<1x128xf32>
    %18 = arith.addf %16, %17 : vector<1x128xf32>
    %19 = math.rsqrt %18 : vector<1x128xf32>
    %20 = vector.broadcast %19 : vector<1x128xf32> to vector<16x128xf32>
    %21 = arith.mulf %11, %20 : vector<16x128xf32>
    %c0_10 = arith.constant 0 : index
    %c0_11 = arith.constant 0 : index
    %c0_12 = arith.constant 0 : index
    %22 = vector.load %arg4[%c0_10, %c0_11, %c0_12] : memref<1x1x128xf32, #tpu.memory_space<vmem>>, vector<1x1x128xf32>
    %23 = vector.shape_cast %22 : vector<1x1x128xf32> to vector<1x128xf32>
    %c0_13 = arith.constant 0 : index
    %c0_14 = arith.constant 0 : index
    %c0_15 = arith.constant 0 : index
    %24 = vector.load %arg5[%c0_13, %c0_14, %c0_15] : memref<1x1x128xf32, #tpu.memory_space<vmem>>, vector<1x1x128xf32>
    %25 = vector.shape_cast %24 : vector<1x1x128xf32> to vector<1x128xf32>
    %26 = vector.broadcast %23 : vector<1x128xf32> to vector<16x128xf32>
    %27 = arith.mulf %21, %26 : vector<16x128xf32>
    %28 = vector.broadcast %25 : vector<1x128xf32> to vector<16x128xf32>
    %29 = arith.addf %27, %28 : vector<16x128xf32>
    %cst_16 = arith.constant 0.000000e+00 : f32
    %30 = vector.broadcast %cst_16 : f32 to vector<16x128xf32>
    %31 = arith.maximumf %29, %30 : vector<16x128xf32>
    %c0_17 = arith.constant 0 : index
    %c0_18 = arith.constant 0 : index
    %32 = vector.load %arg6[%c0_17, %c0_18] : memref<16x128xf32, #tpu.memory_space<vmem>>, vector<16x128xf32>
    tpu.vector_store %arg6[%c0_17, %c0_18], %31 {strides = array<i32>} : memref<16x128xf32, #tpu.memory_space<vmem>>, vector<16x128xf32>,
    return
  }
  func.func @transform_0(%arg0: i32) -> (i32, i32) {
    %c0_i32 = arith.constant 0 : i32
    %c0_i32_0 = arith.constant 0 : i32
    return %arg0, %c0_i32 : i32, i32
  }
  func.func @transform_1(%arg0: i32) -> (i32, i32) {
    %c0_i32 = arith.constant 0 : i32
    %c0_i32_0 = arith.constant 0 : i32
    %c0_i32_1 = arith.constant 0 : i32
    return %c0_i32, %c0_i32_0 : i32, i32
  }
  func.func @transform_2(%arg0: i32) -> (i32, i32) {
    %c0_i32 = arith.constant 0 : i32
    %c0_i32_0 = arith.constant 0 : i32
    %c0_i32_1 = arith.constant 0 : i32
    return %c0_i32, %c0_i32_0 : i32, i32
  }
  func.func @transform_3(%arg0: i32) -> (i32, i32, i32) {
    %c0_i32 = arith.constant 0 : i32
    %c0_i32_0 = arith.constant 0 : i32
    %c0_i32_1 = arith.constant 0 : i32
    return %arg0, %c0_i32, %c0_i32_0 : i32, i32, i32
  }
  func.func @transform_4(%arg0: i32) -> (i32, i32, i32) {
    %c0_i32 = arith.constant 0 : i32
    %c0_i32_0 = arith.constant 0 : i32
    %c0_i32_1 = arith.constant 0 : i32
    return %arg0, %c0_i32, %c0_i32_0 : i32, i32, i32
  }
  func.func @transform_5(%arg0: i32) -> (i32, i32) {
    %c0_i32 = arith.constant 0 : i32
    %c0_i32_0 = arith.constant 0 : i32
    return %arg0, %c0_i32 : i32, i32
  }
}

module attributes {stable_mosaic.version = 11 : i64} {
  func.func @_conv_fused_kernel(%arg0: i32, %arg1: memref<16x288xbf16, #tpu.memory_space<vmem>>, %arg2: memref<288x128xbf16, #tpu.memory_space<vmem>>, %arg3: memref<1x128xf32, #tpu.memory_space<vmem>>, %arg4: memref<1x1x128xf32, #tpu.memory_space<vmem>>, %arg5: memref<1x1x128xf32, #tpu.memory_space<vmem>>, %arg6: memref<16x128xf32, #tpu.memory_space<vmem>>, %arg7: memref<16x128xf32, #tpu.memory_space<vmem>>) attributes {dimension_semantics = [#tpu.dimension_semantics<parallel>], iteration_bounds = array<i64: 2>, scalar_prefetch = 0 : i64, scratch_operands = 0 : i64, tpu.core_type = #tpu.core_type<tc>, window_params = [{transform_indices = @transform_0, window_bounds = array<i64: 16, 288>}, {pipeline_mode = #tpu.pipeline_mode<synchronous>, transform_indices = @transform_1, window_bounds = array<i64: 288, 128>}, {pipeline_mode = #tpu.pipeline_mode<synchronous>, transform_indices = @transform_2, window_bounds = array<i64: 1, 128>}, {transform_indices = @transform_3, window_bounds = array<i64: 1, 1, 128>}, {transform_indices = @transform_4, window_bounds = array<i64: 1, 1, 128>}, {transform_indices = @transform_5, window_bounds = array<i64: 16, 128>}, {transform_indices = @transform_6, window_bounds = array<i64: 16, 128>}]} {
    %c0 = arith.constant 0 : index
    %c0_0 = arith.constant 0 : index
    %0 = vector.load %arg1[%c0, %c0_0] : memref<16x288xbf16, #tpu.memory_space<vmem>>, vector<16x288xbf16>
    %c0_1 = arith.constant 0 : index
    %c0_2 = arith.constant 0 : index
    %1 = vector.load %arg2[%c0_1, %c0_2] : memref<288x128xbf16, #tpu.memory_space<vmem>>, vector<288x128xbf16>
    %cst = arith.constant dense<0.000000e+00> : vector<16x128xf32>
    %2 = tpu.matmul %0, %1, %cst {dimension_numbers = #tpu.dot_dimension_numbers<[1], [0], [0], [1], [0, 0, 1, 1], [], []>} : vector<16x288xbf16>, vector<288x128xbf16>, vector<16x128xf32> -> vector<16x128xf32>
    %c0_3 = arith.constant 0 : index
    %c0_4 = arith.constant 0 : index
    %3 = vector.load %arg3[%c0_3, %c0_4] : memref<1x128xf32, #tpu.memory_space<vmem>>, vector<1x128xf32>
    %4 = vector.broadcast %3 : vector<1x128xf32> to vector<16x128xf32>
    %5 = arith.addf %2, %4 : vector<16x128xf32>
    %cst_5 = arith.constant dense<0.000000e+00> : vector<128xf32>
    %6 = vector.multi_reduction <add>, %5, %cst_5 [0] : vector<16x128xf32> to vector<128xf32>
    %7 = vector.shape_cast %6 : vector<128xf32> to vector<1x128xf32>
    %cst_6 = arith.constant 1.600000e+01 : f32
    %8 = vector.broadcast %cst_6 : f32 to vector<1x128xf32>
    %9 = arith.divf %7, %8 : vector<1x128xf32>
    %10 = vector.broadcast %9 : vector<1x128xf32> to vector<16x128xf32>
    %11 = arith.subf %5, %10 : vector<16x128xf32>
    %12 = arith.mulf %11, %11 : vector<16x128xf32>
    %cst_7 = arith.constant dense<0.000000e+00> : vector<128xf32>
    %13 = vector.multi_reduction <add>, %12, %cst_7 [0] : vector<16x128xf32> to vector<128xf32>
    %14 = vector.shape_cast %13 : vector<128xf32> to vector<1x128xf32>
    %cst_8 = arith.constant 1.600000e+01 : f32
    %15 = vector.broadcast %cst_8 : f32 to vector<1x128xf32>
    %16 = arith.divf %14, %15 : vector<1x128xf32>
    %cst_9 = arith.constant 9.99999974E-6 : f32
    %17 = vector.broadcast %cst_9 : f32 to vector<1x128xf32>
    %18 = arith.addf %16, %17 : vector<1x128xf32>
    %19 = math.rsqrt %18 : vector<1x128xf32>
    %20 = vector.broadcast %19 : vector<1x128xf32> to vector<16x128xf32>
    %21 = arith.mulf %11, %20 : vector<16x128xf32>
    %c0_10 = arith.constant 0 : index
    %c0_11 = arith.constant 0 : index
    %c0_12 = arith.constant 0 : index
    %22 = vector.load %arg4[%c0_10, %c0_11, %c0_12] : memref<1x1x128xf32, #tpu.memory_space<vmem>>, vector<1x1x128xf32>
    %23 = vector.shape_cast %22 : vector<1x1x128xf32> to vector<1x128xf32>
    %c0_13 = arith.constant 0 : index
    %c0_14 = arith.constant 0 : index
    %c0_15 = arith.constant 0 : index
    %24 = vector.load %arg5[%c0_13, %c0_14, %c0_15] : memref<1x1x128xf32, #tpu.memory_space<vmem>>, vector<1x1x128xf32>
    %25 = vector.shape_cast %24 : vector<1x1x128xf32> to vector<1x128xf32>
    %26 = vector.broadcast %23 : vector<1x128xf32> to vector<16x128xf32>
    %27 = arith.mulf %21, %26 : vector<16x128xf32>
    %28 = vector.broadcast %25 : vector<1x128xf32> to vector<16x128xf32>
    %29 = arith.addf %27, %28 : vector<16x128xf32>
    %c0_16 = arith.constant 0 : index
    %c0_17 = arith.constant 0 : index
    %30 = vector.load %arg6[%c0_16, %c0_17] : memref<16x128xf32, #tpu.memory_space<vmem>>, vector<16x128xf32>
    %31 = arith.addf %29, %30 : vector<16x128xf32>
    %c0_18 = arith.constant 0 : index
    %c0_19 = arith.constant 0 : index
    %32 = vector.load %arg7[%c0_18, %c0_19] : memref<16x128xf32, #tpu.memory_space<vmem>>, vector<16x128xf32>
    tpu.vector_store %arg7[%c0_18, %c0_19], %31 {strides = array<i32>} : memref<16x128xf32, #tpu.memory_space<vmem>>, vector<16x128xf32>,
    return
  }
  func.func @transform_0(%arg0: i32) -> (i32, i32) {
    %c0_i32 = arith.constant 0 : i32
    %c0_i32_0 = arith.constant 0 : i32
    return %arg0, %c0_i32 : i32, i32
  }
  func.func @transform_1(%arg0: i32) -> (i32, i32) {
    %c0_i32 = arith.constant 0 : i32
    %c0_i32_0 = arith.constant 0 : i32
    %c0_i32_1 = arith.constant 0 : i32
    return %c0_i32, %c0_i32_0 : i32, i32
  }
  func.func @transform_2(%arg0: i32) -> (i32, i32) {
    %c0_i32 = arith.constant 0 : i32
    %c0_i32_0 = arith.constant 0 : i32
    %c0_i32_1 = arith.constant 0 : i32
    return %c0_i32, %c0_i32_0 : i32, i32
  }
  func.func @transform_3(%arg0: i32) -> (i32, i32, i32) {
    %c0_i32 = arith.constant 0 : i32
    %c0_i32_0 = arith.constant 0 : i32
    %c0_i32_1 = arith.constant 0 : i32
    return %arg0, %c0_i32, %c0_i32_0 : i32, i32, i32
  }
  func.func @transform_4(%arg0: i32) -> (i32, i32, i32) {
    %c0_i32 = arith.constant 0 : i32
    %c0_i32_0 = arith.constant 0 : i32
    %c0_i32_1 = arith.constant 0 : i32
    return %arg0, %c0_i32, %c0_i32_0 : i32, i32, i32
  }
  func.func @transform_5(%arg0: i32) -> (i32, i32) {
    %c0_i32 = arith.constant 0 : i32
    %c0_i32_0 = arith.constant 0 : i32
    return %arg0, %c0_i32 : i32, i32
  }
  func.func @transform_6(%arg0: i32) -> (i32, i32) {
    %c0_i32 = arith.constant 0 : i32
    %c0_i32_0 = arith.constant 0 : i32
    return %arg0, %c0_i32 : i32, i32
  }
}

module attributes {stable_mosaic.version = 11 : i64} {
  func.func @_conv_fused_kernel(%arg0: i32, %arg1: memref<64x800xbf16, #tpu.memory_space<vmem>>, %arg2: memref<800x128xbf16, #tpu.memory_space<vmem>>, %arg3: memref<1x128xf32, #tpu.memory_space<vmem>>, %arg4: memref<1x1x128xf32, #tpu.memory_space<vmem>>, %arg5: memref<1x1x128xf32, #tpu.memory_space<vmem>>, %arg6: memref<64x128xf32, #tpu.memory_space<vmem>>) attributes {dimension_semantics = [#tpu.dimension_semantics<parallel>], iteration_bounds = array<i64: 2>, scalar_prefetch = 0 : i64, scratch_operands = 0 : i64, tpu.core_type = #tpu.core_type<tc>, window_params = [{transform_indices = @transform_0, window_bounds = array<i64: 64, 800>}, {pipeline_mode = #tpu.pipeline_mode<synchronous>, transform_indices = @transform_1, window_bounds = array<i64: 800, 128>}, {pipeline_mode = #tpu.pipeline_mode<synchronous>, transform_indices = @transform_2, window_bounds = array<i64: 1, 128>}, {transform_indices = @transform_3, window_bounds = array<i64: 1, 1, 128>}, {transform_indices = @transform_4, window_bounds = array<i64: 1, 1, 128>}, {transform_indices = @transform_5, window_bounds = array<i64: 64, 128>}]} {
    %c0 = arith.constant 0 : index
    %c0_0 = arith.constant 0 : index
    %0 = vector.load %arg1[%c0, %c0_0] : memref<64x800xbf16, #tpu.memory_space<vmem>>, vector<64x800xbf16>
    %c0_1 = arith.constant 0 : index
    %c0_2 = arith.constant 0 : index
    %1 = vector.load %arg2[%c0_1, %c0_2] : memref<800x128xbf16, #tpu.memory_space<vmem>>, vector<800x128xbf16>
    %cst = arith.constant dense<0.000000e+00> : vector<64x128xf32>
    %2 = tpu.matmul %0, %1, %cst {dimension_numbers = #tpu.dot_dimension_numbers<[1], [0], [0], [1], [0, 0, 1, 1], [], []>} : vector<64x800xbf16>, vector<800x128xbf16>, vector<64x128xf32> -> vector<64x128xf32>
    %c0_3 = arith.constant 0 : index
    %c0_4 = arith.constant 0 : index
    %3 = vector.load %arg3[%c0_3, %c0_4] : memref<1x128xf32, #tpu.memory_space<vmem>>, vector<1x128xf32>
    %4 = vector.broadcast %3 : vector<1x128xf32> to vector<64x128xf32>
    %5 = arith.addf %2, %4 : vector<64x128xf32>
    %6 = vector.shape_cast %5 : vector<64x128xf32> to vector<1x64x128xf32>
    %cst_5 = arith.constant dense<0.000000e+00> : vector<1xf32>
    %7 = vector.multi_reduction <add>, %6, %cst_5 [1, 2] : vector<1x64x128xf32> to vector<1xf32>
    %8 = vector.shape_cast %7 : vector<1xf32> to vector<1x1x1xf32>
    %9 = vector.extract %8[0, 0, 0] : f32 from vector<1x1x1xf32>
    %cst_6 = arith.constant 1.024000e+03 : f32
    %10 = arith.divf %9, %cst_6 : f32
    %11 = arith.mulf %5, %5 : vector<64x128xf32>
    %12 = vector.shape_cast %11 : vector<64x128xf32> to vector<1x64x128xf32>
    %cst_7 = arith.constant dense<0.000000e+00> : vector<1xf32>
    %13 = vector.multi_reduction <add>, %12, %cst_7 [1, 2] : vector<1x64x128xf32> to vector<1xf32>
    %14 = vector.shape_cast %13 : vector<1xf32> to vector<1x1x1xf32>
    %15 = vector.extract %14[0, 0, 0] : f32 from vector<1x1x1xf32>
    %cst_8 = arith.constant 1.024000e+03 : f32
    %16 = arith.mulf %cst_8, %10 : f32
    %17 = arith.mulf %16, %10 : f32
    %18 = arith.subf %15, %17 : f32
    %cst_9 = arith.constant 0.000000e+00 : f32
    %19 = arith.maximumf %18, %cst_9 : f32
    %cst_10 = arith.constant 1.023000e+03 : f32
    %20 = arith.divf %19, %cst_10 : f32
    %21 = vector.broadcast %10 : f32 to vector<64x128xf32>
    %22 = arith.subf %5, %21 : vector<64x128xf32>
    %23 = math.sqrt %20 : f32
    %cst_11 = arith.constant 9.99999974E-6 : f32
    %24 = arith.addf %23, %cst_11 : f32
    %25 = vector.broadcast %24 : f32 to vector<64x128xf32>
    %26 = arith.divf %22, %25 : vector<64x128xf32>
    %c0_12 = arith.constant 0 : index
    %c0_13 = arith.constant 0 : index
    %c0_14 = arith.constant 0 : index
    %27 = vector.load %arg4[%c0_12, %c0_13, %c0_14] : memref<1x1x128xf32, #tpu.memory_space<vmem>>, vector<1x1x128xf32>
    %28 = vector.shape_cast %27 : vector<1x1x128xf32> to vector<1x128xf32>
    %c0_15 = arith.constant 0 : index
    %c0_16 = arith.constant 0 : index
    %c0_17 = arith.constant 0 : index
    %29 = vector.load %arg5[%c0_15, %c0_16, %c0_17] : memref<1x1x128xf32, #tpu.memory_space<vmem>>, vector<1x1x128xf32>
    %30 = vector.shape_cast %29 : vector<1x1x128xf32> to vector<1x128xf32>
    %31 = vector.broadcast %28 : vector<1x128xf32> to vector<64x128xf32>
    %32 = arith.mulf %26, %31 : vector<64x128xf32>
    %33 = vector.broadcast %30 : vector<1x128xf32> to vector<64x128xf32>
    %34 = arith.addf %32, %33 : vector<64x128xf32>
    %cst_18 = arith.constant 0.000000e+00 : f32
    %35 = vector.broadcast %cst_18 : f32 to vector<64x128xf32>
    %36 = arith.maximumf %34, %35 : vector<64x128xf32>
    %c0_19 = arith.constant 0 : index
    %c0_20 = arith.constant 0 : index
    %37 = vector.load %arg6[%c0_19, %c0_20] : memref<64x128xf32, #tpu.memory_space<vmem>>, vector<64x128xf32>
    tpu.vector_store %arg6[%c0_19, %c0_20], %36 {strides = array<i32>} : memref<64x128xf32, #tpu.memory_space<vmem>>, vector<64x128xf32>,
    return
  }
  func.func @transform_0(%arg0: i32) -> (i32, i32) {
    %c0_i32 = arith.constant 0 : i32
    %c0_i32_0 = arith.constant 0 : i32
    return %arg0, %c0_i32 : i32, i32
  }
  func.func @transform_1(%arg0: i32) -> (i32, i32) {
    %c0_i32 = arith.constant 0 : i32
    %c0_i32_0 = arith.constant 0 : i32
    %c0_i32_1 = arith.constant 0 : i32
    return %c0_i32, %c0_i32_0 : i32, i32
  }
  func.func @transform_2(%arg0: i32) -> (i32, i32) {
    %c0_i32 = arith.constant 0 : i32
    %c0_i32_0 = arith.constant 0 : i32
    %c0_i32_1 = arith.constant 0 : i32
    return %c0_i32, %c0_i32_0 : i32, i32
  }
  func.func @transform_3(%arg0: i32) -> (i32, i32, i32) {
    %c0_i32 = arith.constant 0 : i32
    %c0_i32_0 = arith.constant 0 : i32
    %c0_i32_1 = arith.constant 0 : i32
    return %arg0, %c0_i32, %c0_i32_0 : i32, i32, i32
  }
  func.func @transform_4(%arg0: i32) -> (i32, i32, i32) {
    %c0_i32 = arith.constant 0 : i32
    %c0_i32_0 = arith.constant 0 : i32
    %c0_i32_1 = arith.constant 0 : i32
    return %arg0, %c0_i32, %c0_i32_0 : i32, i32, i32
  }
  func.func @transform_5(%arg0: i32) -> (i32, i32) {
    %c0_i32 = arith.constant 0 : i32
    %c0_i32_0 = arith.constant 0 : i32
    return %arg0, %c0_i32 : i32, i32
  }
}

module attributes {stable_mosaic.version = 11 : i64} {
  func.func @_conv_fused_kernel(%arg0: i32, %arg1: memref<256x400xbf16, #tpu.memory_space<vmem>>, %arg2: memref<400x128xbf16, #tpu.memory_space<vmem>>, %arg3: memref<1x128xf32, #tpu.memory_space<vmem>>, %arg4: memref<1x1x128xf32, #tpu.memory_space<vmem>>, %arg5: memref<1x1x128xf32, #tpu.memory_space<vmem>>, %arg6: memref<256x128xf32, #tpu.memory_space<vmem>>) attributes {dimension_semantics = [#tpu.dimension_semantics<parallel>], iteration_bounds = array<i64: 2>, scalar_prefetch = 0 : i64, scratch_operands = 0 : i64, tpu.core_type = #tpu.core_type<tc>, window_params = [{transform_indices = @transform_0, window_bounds = array<i64: 256, 400>}, {pipeline_mode = #tpu.pipeline_mode<synchronous>, transform_indices = @transform_1, window_bounds = array<i64: 400, 128>}, {pipeline_mode = #tpu.pipeline_mode<synchronous>, transform_indices = @transform_2, window_bounds = array<i64: 1, 128>}, {transform_indices = @transform_3, window_bounds = array<i64: 1, 1, 128>}, {transform_indices = @transform_4, window_bounds = array<i64: 1, 1, 128>}, {transform_indices = @transform_5, window_bounds = array<i64: 256, 128>}]} {
    %c0 = arith.constant 0 : index
    %c0_0 = arith.constant 0 : index
    %0 = vector.load %arg1[%c0, %c0_0] : memref<256x400xbf16, #tpu.memory_space<vmem>>, vector<256x400xbf16>
    %c0_1 = arith.constant 0 : index
    %c0_2 = arith.constant 0 : index
    %1 = vector.load %arg2[%c0_1, %c0_2] : memref<400x128xbf16, #tpu.memory_space<vmem>>, vector<400x128xbf16>
    %cst = arith.constant dense<0.000000e+00> : vector<256x128xf32>
    %2 = tpu.matmul %0, %1, %cst {dimension_numbers = #tpu.dot_dimension_numbers<[1], [0], [0], [1], [0, 0, 1, 1], [], []>} : vector<256x400xbf16>, vector<400x128xbf16>, vector<256x128xf32> -> vector<256x128xf32>
    %c0_3 = arith.constant 0 : index
    %c0_4 = arith.constant 0 : index
    %3 = vector.load %arg3[%c0_3, %c0_4] : memref<1x128xf32, #tpu.memory_space<vmem>>, vector<1x128xf32>
    %4 = vector.broadcast %3 : vector<1x128xf32> to vector<256x128xf32>
    %5 = arith.addf %2, %4 : vector<256x128xf32>
    %6 = vector.shape_cast %5 : vector<256x128xf32> to vector<1x256x128xf32>
    %cst_5 = arith.constant dense<0.000000e+00> : vector<1xf32>
    %7 = vector.multi_reduction <add>, %6, %cst_5 [1, 2] : vector<1x256x128xf32> to vector<1xf32>
    %8 = vector.shape_cast %7 : vector<1xf32> to vector<1x1x1xf32>
    %9 = vector.extract %8[0, 0, 0] : f32 from vector<1x1x1xf32>
    %cst_6 = arith.constant 2.048000e+03 : f32
    %10 = arith.divf %9, %cst_6 : f32
    %11 = arith.mulf %5, %5 : vector<256x128xf32>
    %12 = vector.shape_cast %11 : vector<256x128xf32> to vector<1x256x128xf32>
    %cst_7 = arith.constant dense<0.000000e+00> : vector<1xf32>
    %13 = vector.multi_reduction <add>, %12, %cst_7 [1, 2] : vector<1x256x128xf32> to vector<1xf32>
    %14 = vector.shape_cast %13 : vector<1xf32> to vector<1x1x1xf32>
    %15 = vector.extract %14[0, 0, 0] : f32 from vector<1x1x1xf32>
    %cst_8 = arith.constant 2.048000e+03 : f32
    %16 = arith.mulf %cst_8, %10 : f32
    %17 = arith.mulf %16, %10 : f32
    %18 = arith.subf %15, %17 : f32
    %cst_9 = arith.constant 0.000000e+00 : f32
    %19 = arith.maximumf %18, %cst_9 : f32
    %cst_10 = arith.constant 2.047000e+03 : f32
    %20 = arith.divf %19, %cst_10 : f32
    %21 = vector.broadcast %10 : f32 to vector<256x128xf32>
    %22 = arith.subf %5, %21 : vector<256x128xf32>
    %23 = math.sqrt %20 : f32
    %cst_11 = arith.constant 9.99999974E-6 : f32
    %24 = arith.addf %23, %cst_11 : f32
    %25 = vector.broadcast %24 : f32 to vector<256x128xf32>
    %26 = arith.divf %22, %25 : vector<256x128xf32>
    %c0_12 = arith.constant 0 : index
    %c0_13 = arith.constant 0 : index
    %c0_14 = arith.constant 0 : index
    %27 = vector.load %arg4[%c0_12, %c0_13, %c0_14] : memref<1x1x128xf32, #tpu.memory_space<vmem>>, vector<1x1x128xf32>
    %28 = vector.shape_cast %27 : vector<1x1x128xf32> to vector<1x128xf32>
    %c0_15 = arith.constant 0 : index
    %c0_16 = arith.constant 0 : index
    %c0_17 = arith.constant 0 : index
    %29 = vector.load %arg5[%c0_15, %c0_16, %c0_17] : memref<1x1x128xf32, #tpu.memory_space<vmem>>, vector<1x1x128xf32>
    %30 = vector.shape_cast %29 : vector<1x1x128xf32> to vector<1x128xf32>
    %31 = vector.broadcast %28 : vector<1x128xf32> to vector<256x128xf32>
    %32 = arith.mulf %26, %31 : vector<256x128xf32>
    %33 = vector.broadcast %30 : vector<1x128xf32> to vector<256x128xf32>
    %34 = arith.addf %32, %33 : vector<256x128xf32>
    %cst_18 = arith.constant 0.000000e+00 : f32
    %35 = vector.broadcast %cst_18 : f32 to vector<256x128xf32>
    %36 = arith.maximumf %34, %35 : vector<256x128xf32>
    %c0_19 = arith.constant 0 : index
    %c0_20 = arith.constant 0 : index
    %37 = vector.load %arg6[%c0_19, %c0_20] : memref<256x128xf32, #tpu.memory_space<vmem>>, vector<256x128xf32>
    tpu.vector_store %arg6[%c0_19, %c0_20], %36 {strides = array<i32>} : memref<256x128xf32, #tpu.memory_space<vmem>>, vector<256x128xf32>,
    return
  }
  func.func @transform_0(%arg0: i32) -> (i32, i32) {
    %c0_i32 = arith.constant 0 : i32
    %c0_i32_0 = arith.constant 0 : i32
    return %arg0, %c0_i32 : i32, i32
  }
  func.func @transform_1(%arg0: i32) -> (i32, i32) {
    %c0_i32 = arith.constant 0 : i32
    %c0_i32_0 = arith.constant 0 : i32
    %c0_i32_1 = arith.constant 0 : i32
    return %c0_i32, %c0_i32_0 : i32, i32
  }
  func.func @transform_2(%arg0: i32) -> (i32, i32) {
    %c0_i32 = arith.constant 0 : i32
    %c0_i32_0 = arith.constant 0 : i32
    %c0_i32_1 = arith.constant 0 : i32
    return %c0_i32, %c0_i32_0 : i32, i32
  }
  func.func @transform_3(%arg0: i32) -> (i32, i32, i32) {
    %c0_i32 = arith.constant 0 : i32
    %c0_i32_0 = arith.constant 0 : i32
    %c0_i32_1 = arith.constant 0 : i32
    return %arg0, %c0_i32, %c0_i32_0 : i32, i32, i32
  }
  func.func @transform_4(%arg0: i32) -> (i32, i32, i32) {
    %c0_i32 = arith.constant 0 : i32
    %c0_i32_0 = arith.constant 0 : i32
    %c0_i32_1 = arith.constant 0 : i32
    return %arg0, %c0_i32, %c0_i32_0 : i32, i32, i32
  }
  func.func @transform_5(%arg0: i32) -> (i32, i32) {
    %c0_i32 = arith.constant 0 : i32
    %c0_i32_0 = arith.constant 0 : i32
    return %arg0, %c0_i32 : i32, i32
  }
}

module attributes {stable_mosaic.version = 11 : i64} {
  func.func @_conv_fused_kernel(%arg0: i32, %arg1: memref<512x392xbf16, #tpu.memory_space<vmem>>, %arg2: memref<392x128xbf16, #tpu.memory_space<vmem>>, %arg3: memref<1x128xf32, #tpu.memory_space<vmem>>, %arg4: memref<512x128xf32, #tpu.memory_space<vmem>>) attributes {dimension_semantics = [#tpu.dimension_semantics<parallel>], iteration_bounds = array<i64: 1>, scalar_prefetch = 0 : i64, scratch_operands = 0 : i64, tpu.core_type = #tpu.core_type<tc>, window_params = [{transform_indices = @transform_0, window_bounds = array<i64: 512, 392>}, {pipeline_mode = #tpu.pipeline_mode<synchronous>, transform_indices = @transform_1, window_bounds = array<i64: 392, 128>}, {pipeline_mode = #tpu.pipeline_mode<synchronous>, transform_indices = @transform_2, window_bounds = array<i64: 1, 128>}, {transform_indices = @transform_3, window_bounds = array<i64: 512, 128>}]} {
    %c0 = arith.constant 0 : index
    %c0_0 = arith.constant 0 : index
    %0 = vector.load %arg1[%c0, %c0_0] : memref<512x392xbf16, #tpu.memory_space<vmem>>, vector<512x392xbf16>
    %c0_1 = arith.constant 0 : index
    %c0_2 = arith.constant 0 : index
    %1 = vector.load %arg2[%c0_1, %c0_2] : memref<392x128xbf16, #tpu.memory_space<vmem>>, vector<392x128xbf16>
    %cst = arith.constant dense<0.000000e+00> : vector<512x128xf32>
    %2 = tpu.matmul %0, %1, %cst {dimension_numbers = #tpu.dot_dimension_numbers<[1], [0], [0], [1], [0, 0, 1, 1], [], []>} : vector<512x392xbf16>, vector<392x128xbf16>, vector<512x128xf32> -> vector<512x128xf32>
    %c0_3 = arith.constant 0 : index
    %c0_4 = arith.constant 0 : index
    %3 = vector.load %arg3[%c0_3, %c0_4] : memref<1x128xf32, #tpu.memory_space<vmem>>, vector<1x128xf32>
    %4 = vector.broadcast %3 : vector<1x128xf32> to vector<512x128xf32>
    %5 = arith.addf %2, %4 : vector<512x128xf32>
    %6 = math.tanh %5 : vector<512x128xf32>
    %c0_5 = arith.constant 0 : index
    %c0_6 = arith.constant 0 : index
    %7 = vector.load %arg4[%c0_5, %c0_6] : memref<512x128xf32, #tpu.memory_space<vmem>>, vector<512x128xf32>
    tpu.vector_store %arg4[%c0_5, %c0_6], %6 {strides = array<i32>} : memref<512x128xf32, #tpu.memory_space<vmem>>, vector<512x128xf32>,
    return
  }
  func.func @transform_0(%arg0: i32) -> (i32, i32) {
    %c0_i32 = arith.constant 0 : i32
    %c0_i32_0 = arith.constant 0 : i32
    return %arg0, %c0_i32 : i32, i32
  }
  func.func @transform_1(%arg0: i32) -> (i32, i32) {
    %c0_i32 = arith.constant 0 : i32
    %c0_i32_0 = arith.constant 0 : i32
    %c0_i32_1 = arith.constant 0 : i32
    return %c0_i32, %c0_i32_0 : i32, i32
  }
  func.func @transform_2(%arg0: i32) -> (i32, i32) {
    %c0_i32 = arith.constant 0 : i32
    %c0_i32_0 = arith.constant 0 : i32
    %c0_i32_1 = arith.constant 0 : i32
    return %c0_i32, %c0_i32_0 : i32, i32
  }
  func.func @transform_3(%arg0: i32) -> (i32, i32) {
    %c0_i32 = arith.constant 0 : i32
    %c0_i32_0 = arith.constant 0 : i32
    return %arg0, %c0_i32 : i32, i32
  }
}

</mosaic_0001>

<bundles_post_ra>
// kernel: munit_trainer1_forward.37
= control target key start
LH: loop header
LB: loop body
LE: loop exit
PB: predicated region body
PF: predicated region fallthrough
CT: control target
= control target key end

     0   :  { %s1141_s12 = smov 0   ;;  %s1587_s0 = inlined_call_operand.vmem [shape: bf16[512,147], index: 0, kind: input, shape index: {}]   ;;  %s1588_s1 = inlined_call_operand.vmem [shape: bf16[147,128], index: 1, kind: input, shape index: {}]   ;;  %s1589_s2 = inlined_call_operand.vmem [shape: f32[1,128], index: 2, kind: input, shape index: {}]   ;;  %s1590_s3 = inlined_call_operand.vmem [shape: f32[512,128], index: 3, kind: output, shape index: {}]  }
   0x1 LB: > { %s949_s13 = sadd.s32 4294967295, %s1117_s12   ;;  %p953_p0 = scmp.ge.s32.totalorder %s1117_s12, 1  ;;  %s1117_s12 = sphi %s1141_s12, %s13_s12  }
   0x2   : > { %p139_p1 = scmp.lt.s32.totalorder %s1117_s12, 3 }
   0x4   : > { %p140_p2 = pnand %p953_p0, %p139_p1 }
   0x5   : > { %v1051_v0 = vld [vmem:[%s1588_s1] sm:$0xff] (!%p140_p2)   ;;  %v1119_v1 = vmov (!%p140_p2), 0   ;;  %v1052_v2 = vld [vmem:[%s1588_s1 + $0x8] sm:$0xff] (!%p140_p2)   ;;  %v1053_v3 = vld [vmem:[%s1588_s1 + $0x10] sm:$0xff] (!%p140_p2)   ;;  %s954_s20 = sshll.u32 (!%p140_p2), %s949_s13, 5  ;;  %vm437_vm0 = vcmask (!%p140_p2), 154624  }
   0x6   : > { %143 = sbr.rel (%p140_p2) target bundleno = 490 (0x1ea), region = 32  ;;  %493 = vmatprep.subr.bf16.mxu0 (!%p140_p2), %v1119_v1  ;;  %1021 = vmatprep.subr.bf16.mxu1 (!%p140_p2), %v1119_v1  ;;  %p165_p3 = scmp.lt.s32.totalorder (!%p140_p2), %s954_s20, 63  ;;  %v1054_v4 = vld [vmem:[%s1588_s1 + $0x18] sm:$0xff] (!%p140_p2)   ;;  %v1055_v5 = vld [vmem:[%s1588_s1 + $0x20] sm:$0xff] (!%p140_p2)   ;;  %v1056_v7 = vld [vmem:[%s1588_s1 + $0x28] sm:$0xff] (!%p140_p2)   ;;  %vm486_vm1 = vcmask (!%p140_p2), 1040384  }
   0x7   : > { %494 = vmatpush1.bf16.msra.mxu0 (!%p140_p2), %v1051_v0  ;;  %1031 = vmatpush1.bf16.msra.mxu1 (!%p140_p2), %v1051_v0  ;;  %v1057_v9 = vld [vmem:[%s1588_s1 + $0x30] sm:$0xff] (!%p140_p2)   ;;  %v1058_v10 = vld [vmem:[%s1588_s1 + $0x38] sm:$0xff] (!%p140_p2)   ;;  %vm487_vm2 = vcmask (!%p140_p2), 1041408   ;;  %v1120_v11 = vmov (!%p140_p2), 65535   ;;  %v1059_v13 = vld [vmem:[%s1588_s1 + $0x40] sm:$0xff] (!%p140_p2)  }
   0x8   : > { %495 = vmatprep.subr.bf16.mxu0 (!%p140_p2), %v1119_v1  ;;  %1022 = vmatprep.subr.bf16.mxu1 (!%p140_p2), %v1119_v1  ;;  %v488_v12 = vsel (!%p140_p2), %vm486_vm1, 4294967295, %v1120_v11  ;;  %v1060_v14 = vld [vmem:[%s1588_s1 + $0x48] ss:$0 sps:$4 sm:$0x33] (!%p140_p2)   ;;  %v1248_v63 = vld [vmem:[%s1589_s2] ss:$0 sm:$0xff] (!%p140_p2) }
   0x9   : > { %v489_v15 = vsel (!%p140_p2), %vm487_vm2, %v488_v12, 0 }
   0xa   : > { %v491_v16 = vand.u32 (!%p140_p2), %v1060_v14, %v489_v15 }
   0xb   : > { %496 = vmatpush1.bf16.msra.mxu0 (!%p140_p2), %v1052_v2  ;;  %1032 = vmatpush1.bf16.msra.mxu1 (!%p140_p2), %v1052_v2 }
   0xc   : > { %497 = vmatprep.subr.bf16.mxu0 (!%p140_p2), %v1119_v1  ;;  %1023 = vmatprep.subr.bf16.mxu1 (!%p140_p2), %v1119_v1 }
   0xd   : > { %s1592_s20 = smov (!%p165_p3, %s954_s20), 63 }
   0xe   : > { %s1020_s23 = sshll.u32 %s1592_s20, 3 }
   0xf   : > { %498 = vmatpush1.bf16.msra.mxu0 %v1053_v3  ;;  %1033 = vmatpush1.bf16.msra.mxu1 %v1053_v3  ;;  %s1169_s26 = scalar_lea.vmem %s1587_s0, %s1020_s23  ;;  %s1526_s17 = scalar_lea.vmem %s1590_s3, %s1020_s23 }
  0x10   : > { %499 = vmatprep.subr.bf16.mxu0 %v1119_v1  ;;  %1024 = vmatprep.subr.bf16.mxu1 %v1119_v1  ;;  %v1063_v6 = vld [vmem:[%s1169_s26 + $0x4] ss:$8 sps:$4 sm:$0xff]   ;;  %v1061_v17 = vld [vmem:[%s1169_s26] ss:$8 sps:$4 sm:$0xff]   ;;  %v1064_v19 = vld [vmem:[%s1169_s26 + $0x14] ss:$8 sps:$4 sm:$0xff]  }
  0x11   : > { %1002 = vmatprep.mubr.msk.bf16.mxu0 %vm437_vm0, %v1063_v6  ;;  %v1075_v8 = vld [vmem:[%s1169_s26 + $0x84] ss:$8 sps:$4 sm:$0xff]   ;;  %v1073_v18 = vld [vmem:[%s1169_s26 + $0x80] ss:$8 sps:$4 sm:$0xff]   ;;  %v1079_v20 = vld [vmem:[%s1169_s26 + $0x94] ss:$8 sps:$4 sm:$0xff]  }
  0x12   : > { %1010 = vmatprep.mubr.msk.bf16.mxu1 %vm437_vm0, %v1075_v8  ;;  %v1066_v21 = vld [vmem:[%s1169_s26 + $0x10] ss:$8 sps:$4 sm:$0xff]   ;;  %v1067_v23 = vld [vmem:[%s1169_s26 + $0x24] ss:$8 sps:$4 sm:$0xff]   ;;  %v1069_v25 = vld [vmem:[%s1169_s26 + $0x20] ss:$8 sps:$4 sm:$0xff]  }
  0x13   : > { %500 = vmatpush1.bf16.msra.mxu0 %v1054_v4  ;;  %1034 = vmatpush1.bf16.msra.mxu1 %v1054_v4  ;;  %v1081_v22 = vld [vmem:[%s1169_s26 + $0x90] ss:$8 sps:$4 sm:$0xff]   ;;  %v1085_v24 = vld [vmem:[%s1169_s26 + $0xa4] ss:$8 sps:$4 sm:$0xff]   ;;  %v1087_v26 = vld [vmem:[%s1169_s26 + $0xa0] ss:$8 sps:$4 sm:$0xff]  }
  0x14   : > { %501 = vmatprep.subr.bf16.mxu0 %v1119_v1  ;;  %1025 = vmatprep.subr.bf16.mxu1 %v1119_v1  ;;  %v1070_v27 = vld [vmem:[%s1169_s26 + $0x34] ss:$8 sps:$4 sm:$0xff]   ;;  %v1072_v29 = vld [vmem:[%s1169_s26 + $0x30] ss:$8 sps:$4 sm:$0xff]   ;;  %v1076_v31 = vld [vmem:[%s1169_s26 + $0x44] ss:$8 sps:$4 sm:$0xff]  }
  0x15   : > { %v1091_v28 = vld [vmem:[%s1169_s26 + $0xb4] ss:$8 sps:$4 sm:$0xff]   ;;  %v1093_v30 = vld [vmem:[%s1169_s26 + $0xb0] ss:$8 sps:$4 sm:$0xff]   ;;  %v1097_v32 = vld [vmem:[%s1169_s26 + $0xc4] ss:$8 sps:$4 sm:$0xff]  }
  0x16   : > { %v1078_v33 = vld [vmem:[%s1169_s26 + $0x40] ss:$8 sps:$4 sm:$0xff]   ;;  %v1082_v35 = vld [vmem:[%s1169_s26 + $0x54] ss:$8 sps:$4 sm:$0xff]   ;;  %v1084_v37 = vld [vmem:[%s1169_s26 + $0x50] ss:$8 sps:$4 sm:$0xff]  }
  0x17   : > { %502 = vmatpush1.bf16.msra.mxu0 %v1055_v5  ;;  %1035 = vmatpush1.bf16.msra.mxu1 %v1055_v5  ;;  %v1099_v34 = vld [vmem:[%s1169_s26 + $0xc0] ss:$8 sps:$4 sm:$0xff]   ;;  %v1100_v36 = vld [vmem:[%s1169_s26 + $0xd4] ss:$8 sps:$4 sm:$0xff]   ;;  %v1102_v38 = vld [vmem:[%s1169_s26 + $0xd0] ss:$8 sps:$4 sm:$0xff]  }
  0x18   : > { %503 = vmatprep.subr.bf16.mxu0 %v1119_v1  ;;  %1026 = vmatprep.subr.bf16.mxu1 %v1119_v1  ;;  %v1088_v39 = vld [vmem:[%s1169_s26 + $0x64] ss:$8 sps:$4 sm:$0xff]   ;;  %v1090_v41 = vld [vmem:[%s1169_s26 + $0x60] ss:$8 sps:$4 sm:$0xff]   ;;  %v1094_v43 = vld [vmem:[%s1169_s26 + $0x74] ss:$8 sps:$4 sm:$0xff]  }
  0x19   : > { %v1103_v40 = vld [vmem:[%s1169_s26 + $0xe4] ss:$8 sps:$4 sm:$0xff]   ;;  %v1105_v42 = vld [vmem:[%s1169_s26 + $0xe0] ss:$8 sps:$4 sm:$0xff]   ;;  %v1106_v44 = vld [vmem:[%s1169_s26 + $0xf4] ss:$8 sps:$4 sm:$0xff]  }
  0x1a   : > { %v1096_v45 = vld [vmem:[%s1169_s26 + $0x70] ss:$8 sps:$4 sm:$0xff]  }
  0x1b   : > { %504 = vmatpush1.bf16.msra.mxu0 %v1056_v7  ;;  %1036 = vmatpush1.bf16.msra.mxu1 %v1056_v7  ;;  %v1108_v46 = vld [vmem:[%s1169_s26 + $0xf0] ss:$8 sps:$4 sm:$0xff]  }
  0x1c   : > { %505 = vmatprep.subr.bf16.mxu0 %v1119_v1  ;;  %1027 = vmatprep.subr.bf16.mxu1 %v1119_v1 }
  0x1f   : > { %506 = vmatpush1.bf16.msra.mxu0 %v1057_v9  ;;  %1037 = vmatpush1.bf16.msra.mxu1 %v1057_v9 }
  0x20   : > { %507 = vmatprep.subr.bf16.mxu0 %v1119_v1  ;;  %1028 = vmatprep.subr.bf16.mxu1 %v1119_v1 }
  0x23   : > { %508 = vmatpush1.bf16.msra.mxu0 %v1058_v10  ;;  %1038 = vmatpush1.bf16.msra.mxu1 %v1058_v10 }
  0x24   : > { %509 = vmatprep.subr.bf16.mxu0 %v1119_v1  ;;  %1029 = vmatprep.subr.bf16.mxu1 %v1119_v1 }
  0x27   : > { %510 = vmatpush1.bf16.msra.mxu0 %v1059_v13  ;;  %1039 = vmatpush1.bf16.msra.mxu1 %v1059_v13 }
  0x28   : > { %511 = vmatprep.subr.bf16.mxu0 %v1119_v1  ;;  %1030 = vmatprep.subr.bf16.mxu1 %v1119_v1 }
  0x2b   : > { %512 = vmatpush1.bf16.msra.mxu0 %v491_v16  ;;  %1040 = vmatpush1.bf16.msra.mxu1 %v491_v16 }
  0x2e   : > { %526 = vmatmul.mubr.bf16.vlgmr.msra.gmra.mrb[0].mxu0 %v1061_v17  ;;  %590 = vmatmul.mubr.bf16.vlgmr.msra.gmra.mrb[0].mxu1 %v1073_v18 }
  0x2f   : > { %1003 = vmatprep.mubr.msk.bf16.mxu0 %vm437_vm0, %v1064_v19  ;;  %1011 = vmatprep.mubr.msk.bf16.mxu1 %vm437_vm0, %v1079_v20 }
  0x36   : > { %534 = vmatmul.mubr.bf16.gmra.mrb[4].mxu0 %v1066_v21  ;;  %598 = vmatmul.mubr.bf16.gmra.mrb[4].mxu1 %v1081_v22 }
  0x37   : > { %1004 = vmatprep.mubr.msk.bf16.mxu0 %vm437_vm0, %v1067_v23  ;;  %1012 = vmatprep.mubr.msk.bf16.mxu1 %vm437_vm0, %v1085_v24 }
  0x3e   : > { %542 = vmatmul.mubr.bf16.gmra.mrb[8].mxu0 %v1069_v25  ;;  %606 = vmatmul.mubr.bf16.gmra.mrb[8].mxu1 %v1087_v26 }
  0x3f   : > { %1005 = vmatprep.mubr.msk.bf16.mxu0 %vm437_vm0, %v1070_v27  ;;  %1013 = vmatprep.mubr.msk.bf16.mxu1 %vm437_vm0, %v1091_v28 }
  0x46   : > { %550 = vmatmul.mubr.bf16.gmra.mrb[12].mxu0 %v1072_v29  ;;  %614 = vmatmul.mubr.bf16.gmra.mrb[12].mxu1 %v1093_v30 }
  0x47   : > { %1006 = vmatprep.mubr.msk.bf16.mxu0 %vm437_vm0, %v1076_v31  ;;  %1014 = vmatprep.mubr.msk.bf16.mxu1 %vm437_vm0, %v1097_v32 }
  0x4e   : > { %558 = vmatmul.mubr.bf16.gmra.mrb[16].mxu0 %v1078_v33  ;;  %622 = vmatmul.mubr.bf16.gmra.mrb[16].mxu1 %v1099_v34 }
  0x4f   : > { %1007 = vmatprep.mubr.msk.bf16.mxu0 %vm437_vm0, %v1082_v35  ;;  %1015 = vmatprep.mubr.msk.bf16.mxu1 %vm437_vm0, %v1100_v36 }
  0x56   : > { %566 = vmatmul.mubr.bf16.gmra.mrb[20].mxu0 %v1084_v37  ;;  %630 = vmatmul.mubr.bf16.gmra.mrb[20].mxu1 %v1102_v38 }
  0x57   : > { %1008 = vmatprep.mubr.msk.bf16.mxu0 %vm437_vm0, %v1088_v39  ;;  %1016 = vmatprep.mubr.msk.bf16.mxu1 %vm437_vm0, %v1103_v40 }
  0x5e   : > { %574 = vmatmul.mubr.bf16.gmra.mrb[24].mxu0 %v1090_v41  ;;  %638 = vmatmul.mubr.bf16.gmra.mrb[24].mxu1 %v1105_v42 }
  0x5f   : > { %1009 = vmatprep.mubr.msk.bf16.mxu0 %vm437_vm0, %v1094_v43  ;;  %1017 = vmatprep.mubr.msk.bf16.mxu1 %vm437_vm0, %v1106_v44 }
  0x66   : > { %582 = vmatmul.mubr.bf16.gmra.mrb[28].mxu0 %v1096_v45  ;;  %646 = vmatmul.mubr.bf16.gmra.mrb[28].mxu1 %v1108_v46 }
 0x101   : > { %v527_v47 = vpop.f32.mrb[0].mxu0  ;;  %v1237_v48 = vpop.f32.mrb[0].mxu1 }
 0x102   : > { %v529_v49 = vpop.f32.mrb[1].mxu0  ;;  %v593_v50 = vpop.f32.mrb[1].mxu1  ;;  %v1256_v3 = vadd.f32 %v1248_v63, %v527_v47 }
 0x103   : > { %v530_v51 = vpop.f32.mrb[2].mxu0  ;;  %v1239_v52 = vpop.f32.mrb[2].mxu1 }
 0x104   : > { %v532_v53 = vpop.f32.mrb[3].mxu0  ;;  %v596_v54 = vpop.f32.mrb[3].mxu1  ;;  %v1251_v0 = vadd.f32 %v1248_v63, %v530_v51 }
 0x106   : > { %v654_v9 = vadd.f32 %v1251_v0, %v1256_v3 }
 0x109   : > { %v535_v55 = vpop.f32.mrb[4].mxu0  ;;  %v1241_v56 = vpop.f32.mrb[4].mxu1 }
 0x10a   : > { %v537_v57 = vpop.f32.mrb[5].mxu0  ;;  %v601_v58 = vpop.f32.mrb[5].mxu1  ;;  %v1259_v4 = vadd.f32 %v1248_v63, %v535_v55 }
 0x10b   : > { %v538_v59 = vpop.f32.mrb[6].mxu0  ;;  %v1243_v60 = vpop.f32.mrb[6].mxu1 }
 0x10c   : > { %v540_v61 = vpop.f32.mrb[7].mxu0  ;;  %v604_v62 = vpop.f32.mrb[7].mxu1  ;;  %v655_v12 = vadd.f32 %v654_v9, %v1259_v4  ;;  %v1267_v13 = vadd.f32 %v1248_v63, %v538_v59 }
 0x10e   : > { %v656_v17 = vadd.f32 %v655_v12, %v1267_v13 }
 0x111   : > { %v543_v1 = vpop.f32.mrb[8].mxu0  ;;  %v1253_v2 = vpop.f32.mrb[8].mxu1 }
 0x112   : > { %v545_v5 = vpop.f32.mrb[9].mxu0  ;;  %v609_v6 = vpop.f32.mrb[9].mxu1  ;;  %v1270_v14 = vadd.f32 %v1248_v63, %v543_v1 }
 0x113   : > { %v546_v7 = vpop.f32.mrb[10].mxu0  ;;  %v1261_v8 = vpop.f32.mrb[10].mxu1 }
 0x114   : > { %v548_v10 = vpop.f32.mrb[11].mxu0  ;;  %v612_v11 = vpop.f32.mrb[11].mxu1  ;;  %v657_v22 = vadd.f32 %v656_v17, %v1270_v14  ;;  %v1279_v23 = vadd.f32 %v1248_v63, %v546_v7 }
 0x116   : > { %v658_v27 = vadd.f32 %v657_v22, %v1279_v23 }
 0x119   : > { %v551_v15 = vpop.f32.mrb[12].mxu0  ;;  %v1272_v16 = vpop.f32.mrb[12].mxu1 }
 0x11a   : > { %v553_v18 = vpop.f32.mrb[13].mxu0  ;;  %v617_v19 = vpop.f32.mrb[13].mxu1  ;;  %v1282_v26 = vadd.f32 %v1248_v63, %v551_v15 }
 0x11b   : > { %v554_v20 = vpop.f32.mrb[14].mxu0  ;;  %v1275_v21 = vpop.f32.mrb[14].mxu1 }
 0x11c   : > { %v556_v24 = vpop.f32.mrb[15].mxu0  ;;  %v620_v25 = vpop.f32.mrb[15].mxu1  ;;  %v659_v30 = vadd.f32 %v658_v27, %v1282_v26  ;;  %v1289_v31 = vadd.f32 %v1248_v63, %v554_v20 }
 0x11e   : > { %v660_v39 = vadd.f32 %v659_v30, %v1289_v31 }
 0x121   : > { %v559_v28 = vpop.f32.mrb[16].mxu0  ;;  %v1285_v29 = vpop.f32.mrb[16].mxu1 }
 0x122   : > { %v561_v32 = vpop.f32.mrb[17].mxu0  ;;  %v625_v33 = vpop.f32.mrb[17].mxu1  ;;  %v1292_v36 = vadd.f32 %v1248_v63, %v559_v28 }
 0x123   : > { %v562_v34 = vpop.f32.mrb[18].mxu0  ;;  %v626_v35 = vpop.f32.mrb[18].mxu1  ;;  %v592_v32 = vadd.f32 %v1248_v63, %v1237_v48  ;;  %v611_v48 = vadd.f32 %v1248_v63, %v1261_v8 }
 0x124   : > { %v564_v37 = vpop.f32.mrb[19].mxu0  ;;  %v628_v38 = vpop.f32.mrb[19].mxu1  ;;  %v661_v40 = vadd.f32 %v660_v39, %v1292_v36  ;;  %v1297_v41 = vadd.f32 %v1248_v63, %v562_v34  ;;  %v595_v34 = vadd.f32 %v1248_v63, %v1239_v52  ;;  %v616_v52 = vadd.f32 %v1248_v63, %v1272_v16 }
 0x125   : > { %v600_v38 = vadd.f32 %v1248_v63, %v1241_v56  ;;  %v619_v56 = vadd.f32 %v1248_v63, %v1275_v21 }
 0x126   : > { %v662_v50 = vadd.f32 %v661_v40, %v1297_v41  ;;  %v603_v40 = vadd.f32 %v1248_v63, %v1243_v60  ;;  %v624_v60 = vadd.f32 %v1248_v63, %v1285_v29 }
 0x129   : > { %v567_v42 = vpop.f32.mrb[20].mxu0  ;;  %v631_v43 = vpop.f32.mrb[20].mxu1 }
 0x12a   : > { %v1300_v44 = vadd.f32 %v1248_v63, %v567_v42  ;;  %v569_v45 = vpop.f32.mrb[21].mxu0  ;;  %v633_v46 = vpop.f32.mrb[21].mxu1 }
 0x12b   : > { %v570_v47 = vpop.f32.mrb[22].mxu0  ;;  %v634_v49 = vpop.f32.mrb[22].mxu1  ;;  %v608_v45 = vadd.f32 %v1248_v63, %v1253_v2  ;;  %v627_v2 = vadd.f32 %v1248_v63, %v626_v35 }
 0x12c   : > { %v572_v51 = vpop.f32.mrb[23].mxu0  ;;  %v636_v53 = vpop.f32.mrb[23].mxu1  ;;  %v663_v54 = vadd.f32 %v662_v50, %v1300_v44  ;;  %v1305_v55 = vadd.f32 %v1248_v63, %v570_v47 }
 0x12e   : > { %v664_v59 = vadd.f32 %v663_v54, %v1305_v55 }
 0x131   : > { %v575_v57 = vpop.f32.mrb[24].mxu0  ;;  %v639_v58 = vpop.f32.mrb[24].mxu1 }
 0x132   : > { %v576_v61 = vadd.f32 %v1248_v63, %v575_v57  ;;  %v577_v62 = vpop.f32.mrb[25].mxu0  ;;  %v641_v1 = vpop.f32.mrb[25].mxu1  ;;  %v640_v16 = vadd.f32 %v1248_v63, %v639_v58 }
 0x133   : > { %v578_v5 = vpop.f32.mrb[26].mxu0  ;;  %v642_v6 = vpop.f32.mrb[26].mxu1  ;;  %v635_v62 = vadd.f32 %v1248_v63, %v634_v49 }
 0x134   : > { %v665_v7 = vadd.f32 %v664_v59, %v576_v61  ;;  %v579_v9 = vadd.f32 %v1248_v63, %v578_v5  ;;  %v580_v10 = vpop.f32.mrb[27].mxu0  ;;  %v644_v11 = vpop.f32.mrb[27].mxu1  ;;  %v632_v59 = vadd.f32 %v1248_v63, %v631_v43  ;;  %v643_v21 = vadd.f32 %v1248_v63, %v642_v6 }
 0x136   : > { %v666_v12 = vadd.f32 %v665_v7, %v579_v9 }
 0x139   : > { %v583_v15 = vpop.f32.mrb[28].mxu0  ;;  %v647_v17 = vpop.f32.mrb[28].mxu1 }
 0x13a   : > { %v584_v18 = vadd.f32 %v1248_v63, %v583_v15  ;;  %v585_v19 = vpop.f32.mrb[29].mxu0  ;;  %v649_v20 = vpop.f32.mrb[29].mxu1  ;;  %v648_v7 = vadd.f32 %v1248_v63, %v647_v17 }
 0x13b   : > { %v586_v22 = vpop.f32.mrb[30].mxu0  ;;  %v650_v24 = vpop.f32.mrb[30].mxu1 }
 0x13c   : > { %v667_v25 = vadd.f32 %v666_v12, %v584_v18  ;;  %v587_v27 = vadd.f32 %v1248_v63, %v586_v22  ;;  %v588_v28 = vpop.f32.mrb[31].mxu0  ;;  %v652_v30 = vpop.f32.mrb[31].mxu1  ;;  %v651_v11 = vadd.f32 %v1248_v63, %v650_v24 }
 0x13e   : > { %v668_v33 = vadd.f32 %v667_v25, %v587_v27 }
 0x140   : > { %v669_v37 = vadd.f32 %v668_v33, %v592_v32 }
 0x142   : > { %v670_v39 = vadd.f32 %v669_v37, %v595_v34 }
 0x144   : > { %v671_v42 = vadd.f32 %v670_v39, %v600_v38 }
 0x146   : > { %v672_v46 = vadd.f32 %v671_v42, %v603_v40 }
 0x148   : > { %v673_v47 = vadd.f32 %v672_v46, %v608_v45 }
 0x14a   : > { %v674_v50 = vadd.f32 %v673_v47, %v611_v48 }
 0x14c   : > { %v675_v51 = vadd.f32 %v674_v50, %v616_v52 }
 0x14e   : > { %v676_v53 = vadd.f32 %v675_v51, %v619_v56 }
 0x150   : > { %v677_v54 = vadd.f32 %v676_v53, %v624_v60 }
 0x152   : > { %v678_v57 = vadd.f32 %v677_v54, %v627_v2 }
 0x154   : > { %v679_v8 = vadd.f32 %v678_v57, %v632_v59 }
 0x156   : > { %v680_v1 = vadd.f32 %v679_v8, %v635_v62 }
 0x158   : > { %v681_v5 = vadd.f32 %v680_v1, %v640_v16 }
 0x15a   : > { %v682_v10 = vadd.f32 %v681_v5, %v643_v21 }
 0x15c   : > { %v683_v29 = vadd.f32 %v682_v10, %v648_v7 }
 0x15e   : > { %v684_v12 = vadd.f32 %v683_v29, %v651_v11 }
 0x160   : > { %v685_v35 = vrot.slane %v684_v12, 4 }
 0x162   : > { %v686_v15 = vadd.f32 %v685_v35, %v684_v12 }
 0x164   : > { %v687_v19 = vrot.slane %v686_v15, 2 }
 0x166   : > { %v688_v43 = vadd.f32 %v687_v19, %v686_v15 }
 0x168   : > { %v689_v20 = vrot.slane %v688_v43, 1 }
 0x16a   : > { %v690_v22 = vadd.f32 %v689_v20, %v688_v43 }
 0x16c   : > { %v692_v49 = vmul.f32 0.00390625, %v690_v22 }
 0x16e   : > { %v1337_v25 = vsub.f32 %v576_v61, %v692_v49  ;;  %v1339_v58 = vsub.f32 %v579_v9, %v692_v49  ;;  %v1341_v28 = vsub.f32 %v584_v18, %v692_v49  ;;  %v1343_v6 = vsub.f32 %v587_v27, %v692_v49 }
 0x16f   : > { %v1345_v17 = vsub.f32 %v592_v32, %v692_v49  ;;  %v1347_v30 = vsub.f32 %v595_v34, %v692_v49  ;;  %v1349_v63 = vsub.f32 %v600_v38, %v692_v49  ;;  %v1351_v24 = vsub.f32 %v603_v40, %v692_v49 }
 0x170   : > { %v1353_v33 = vsub.f32 %v608_v45, %v692_v49  ;;  %v1355_v37 = vsub.f32 %v611_v48, %v692_v49  ;;  %v1357_v61 = vsub.f32 %v616_v52, %v692_v49  ;;  %v1359_v9 = vsub.f32 %v619_v56, %v692_v49 }
 0x171   : > { %v1361_v18 = vsub.f32 %v624_v60, %v692_v49  ;;  %v1363_v27 = vsub.f32 %v627_v2, %v692_v49  ;;  %v1365_v32 = vsub.f32 %v632_v59, %v692_v49  ;;  %v1367_v34 = vsub.f32 %v635_v62, %v692_v49 }
 0x172   : > { %v1369_v38 = vsub.f32 %v640_v16, %v692_v49  ;;  %v1371_v39 = vsub.f32 %v643_v21, %v692_v49  ;;  %v1373_v40 = vsub.f32 %v648_v7, %v692_v49  ;;  %v1375_v42 = vsub.f32 %v651_v11, %v692_v49 }
 0x173   : > { %v1378_v45 = vsub.f32 %v1256_v3, %v692_v49  ;;  %v1381_v46 = vsub.f32 %v1251_v0, %v692_v49  ;;  %v1384_v48 = vsub.f32 %v1259_v4, %v692_v49  ;;  %v1391_v50 = vsub.f32 %v1267_v13, %v692_v49 }
 0x174   : > { %v1394_v56 = vsub.f32 %v1270_v14, %v692_v49  ;;  %v1399_v51 = vsub.f32 %v1279_v23, %v692_v49  ;;  %v1404_v53 = vsub.f32 %v1282_v26, %v692_v49  ;;  %v1409_v14 = vsub.f32 %v1289_v31, %v692_v49 }
 0x175   : > { %v725_v47 = vmul.f32 %v1378_v45, %v1378_v45  ;;  %v726_v52 = vmul.f32 %v1381_v46, %v1381_v46  ;;  %v727_v3 = vmul.f32 %v1384_v48, %v1384_v48  ;;  %v728_v4 = vmul.f32 %v1391_v50, %v1391_v50 }
 0x176   : > { %v729_v13 = vmul.f32 %v1394_v56, %v1394_v56  ;;  %v730_v2 = vmul.f32 %v1399_v51, %v1399_v51  ;;  %v1414_v23 = vsub.f32 %v1292_v36, %v692_v49  ;;  %v731_v59 = vmul.f32 %v1404_v53, %v1404_v53 }
 0x177   : > { %v757_v0 = vadd.f32 %v726_v52, %v725_v47  ;;  %v1419_v26 = vsub.f32 %v1297_v41, %v692_v49  ;;  %v732_v62 = vmul.f32 %v1409_v14, %v1409_v14  ;;  %v1424_v31 = vsub.f32 %v1300_v44, %v692_v49 }
 0x178   : > { %v733_v16 = vmul.f32 %v1414_v23, %v1414_v23  ;;  %v1429_v36 = vsub.f32 %v1305_v55, %v692_v49  ;;  %v737_v11 = vmul.f32 %v1337_v25, %v1337_v25  ;;  %v738_v55 = vmul.f32 %v1339_v58, %v1339_v58 }
 0x179   : > { %v758_v60 = vadd.f32 %v757_v0, %v727_v3  ;;  %v734_v21 = vmul.f32 %v1419_v26, %v1419_v26  ;;  %v735_v41 = vmul.f32 %v1424_v31, %v1424_v31  ;;  %v739_v15 = vmul.f32 %v1341_v28, %v1341_v28 }
 0x17a   : > { %v736_v29 = vmul.f32 %v1429_v36, %v1429_v36  ;;  %v740_v43 = vmul.f32 %v1343_v6, %v1343_v6  ;;  %v741_v22 = vmul.f32 %v1345_v17, %v1345_v17  ;;  %v742_v47 = vmul.f32 %v1347_v30, %v1347_v30 }
 0x17b   : > { %v759_v54 = vadd.f32 %v758_v60, %v728_v4  ;;  %v743_v3 = vmul.f32 %v1349_v63, %v1349_v63  ;;  %v744_v4 = vmul.f32 %v1351_v24, %v1351_v24 }
 0x17d   : > { %v760_v57 = vadd.f32 %v759_v54, %v729_v13  ;;  %v745_v13 = vmul.f32 %v1353_v33, %v1353_v33 }
 0x17f   : > { %v761_v8 = vadd.f32 %v760_v57, %v730_v2  ;;  %v746_v2 = vmul.f32 %v1355_v37, %v1355_v37 }
 0x181   : > { %v762_v1 = vadd.f32 %v761_v8, %v731_v59  ;;  %v747_v59 = vmul.f32 %v1357_v61, %v1357_v61 }
 0x183   : > { %v763_v5 = vadd.f32 %v762_v1, %v732_v62  ;;  %v748_v62 = vmul.f32 %v1359_v9, %v1359_v9 }
 0x185   : > { %v764_v7 = vadd.f32 %v763_v5, %v733_v16  ;;  %v749_v16 = vmul.f32 %v1361_v18, %v1361_v18 }
 0x187   : > { %v765_v10 = vadd.f32 %v764_v7, %v734_v21  ;;  %v750_v21 = vmul.f32 %v1363_v27, %v1363_v27 }
 0x189   : > { %v766_v44 = vadd.f32 %v765_v10, %v735_v41  ;;  %v751_v41 = vmul.f32 %v1365_v32, %v1365_v32 }
 0x18b   : > { %v767_v12 = vadd.f32 %v766_v44, %v736_v29  ;;  %v752_v29 = vmul.f32 %v1367_v34, %v1367_v34 }
 0x18d   : > { %v768_v35 = vadd.f32 %v767_v12, %v737_v11  ;;  %v753_v11 = vmul.f32 %v1369_v38, %v1369_v38 }
 0x18f   : > { %v769_v19 = vadd.f32 %v768_v35, %v738_v55  ;;  %v754_v55 = vmul.f32 %v1371_v39, %v1371_v39 }
 0x191   : > { %v770_v20 = vadd.f32 %v769_v19, %v739_v15  ;;  %v755_v15 = vmul.f32 %v1373_v40, %v1373_v40 }
 0x193   : > { %v771_v49 = vadd.f32 %v770_v20, %v740_v43  ;;  %v756_v43 = vmul.f32 %v1375_v42, %v1375_v42 }
 0x195   : > { %v772_v52 = vadd.f32 %v771_v49, %v741_v22 }
 0x197   : > { %v773_v0 = vadd.f32 %v772_v52, %v742_v47 }
 0x199   : > { %v774_v60 = vadd.f32 %v773_v0, %v743_v3 }
 0x19b   : > { %v775_v54 = vadd.f32 %v774_v60, %v744_v4 }
 0x19d   : > { %v776_v57 = vadd.f32 %v775_v54, %v745_v13 }
 0x19f   : > { %v777_v8 = vadd.f32 %v776_v57, %v746_v2 }
 0x1a1   : > { %v778_v1 = vadd.f32 %v777_v8, %v747_v59 }
 0x1a3   : > { %v779_v5 = vadd.f32 %v778_v1, %v748_v62 }
 0x1a5   : > { %v780_v7 = vadd.f32 %v779_v5, %v749_v16 }
 0x1a7   : > { %v781_v10 = vadd.f32 %v780_v7, %v750_v21 }
 0x1a9   : > { %v782_v44 = vadd.f32 %v781_v10, %v751_v41 }
 0x1ab   : > { %v783_v12 = vadd.f32 %v782_v44, %v752_v29 }
 0x1ad   : > { %v784_v35 = vadd.f32 %v783_v12, %v753_v11 }
 0x1af   : > { %v785_v19 = vadd.f32 %v784_v35, %v754_v55 }
 0x1b1   : > { %v786_v20 = vadd.f32 %v785_v19, %v755_v15 }
 0x1b3   : > { %v787_v22 = vadd.f32 %v786_v20, %v756_v43 }
 0x1b5   : > { %v788_v49 = vrot.slane %v787_v22, 4 }
 0x1b7   : > { %v789_v47 = vadd.f32 %v788_v49, %v787_v22 }
 0x1b9   : > { %v790_v52 = vrot.slane %v789_v47, 2 }
 0x1bb   : > { %v791_v3 = vadd.f32 %v790_v52, %v789_v47 }
 0x1bd   : > { %v792_v0 = vrot.slane %v791_v3, 1 }
 0x1bf   : > { %v793_v4 = vadd.f32 %v792_v0, %v791_v3 }
 0x1c1   : > { %v794_v60 = vmul.f32 0.00390625, %v793_v4 }
 0x1c3   : > { %v795_v13 = vadd.f32 1e-05, %v794_v60 }
 0x1c5   : > { %1109 = vrsqrt.f32 %v795_v13 }
 0x1cf   : > { %v1110_v54 = vpop.eup %1109 }
 0x1d0   : > { %v797_v2 = vmul.f32 %v1110_v54, %v1378_v45  ;;  %v798_v57 = vmul.f32 %v1110_v54, %v1381_v46  ;;  %v799_v59 = vmul.f32 %v1110_v54, %v1384_v48  ;;  %v800_v8 = vmul.f32 %v1110_v54, %v1391_v50 }
 0x1d1   : > { %v801_v62 = vmul.f32 %v1110_v54, %v1394_v56  ;;  %v802_v1 = vmul.f32 %v1110_v54, %v1399_v51  ;;  %v803_v16 = vmul.f32 %v1110_v54, %v1404_v53  ;;  %v804_v5 = vmul.f32 %v1110_v54, %v1409_v14 }
 0x1d2   : > { %v805_v21 = vmul.f32 %v1110_v54, %v1414_v23  ;;  %v806_v7 = vmul.f32 %v1110_v54, %v1419_v26  ;;  %v807_v45 = vmul.f32 %v1110_v54, %v1424_v31  ;;  %v808_v46 = vmul.f32 %v1110_v54, %v1429_v36 }
 0x1d3   : > { %v809_v48 = vmul.f32 %v1110_v54, %v1337_v25  ;;  %v810_v50 = vmul.f32 %v1110_v54, %v1339_v58  ;;  %v811_v56 = vmul.f32 %v1110_v54, %v1341_v28  ;;  %v812_v51 = vmul.f32 %v1110_v54, %v1343_v6 }
 0x1d4   : > { %v813_v53 = vmul.f32 %v1110_v54, %v1345_v17  ;;  %v814_v14 = vmul.f32 %v1110_v54, %v1347_v30  ;;  %v815_v23 = vmul.f32 %v1110_v54, %v1349_v63  ;;  %v816_v26 = vmul.f32 %v1110_v54, %v1351_v24 }
 0x1d5   : > { %v1498_v31 = vmul.f32 %v1110_v54, %v1353_v33  ;;  %v1501_v25 = vmul.f32 %v1110_v54, %v1355_v37  ;;  %v1504_v58 = vmul.f32 %v1110_v54, %v1357_v61  ;;  %v1507_v28 = vmul.f32 %v1110_v54, %v1359_v9 }
 0x1d6   : > { %v1510_v6 = vmul.f32 %v1110_v54, %v1361_v18  ;;  %v1513_v17 = vmul.f32 %v1110_v54, %v1363_v27  ;;  %v1516_v30 = vmul.f32 %v1110_v54, %v1365_v32  ;;  %v1519_v63 = vmul.f32 %v1110_v54, %v1367_v34 }
 0x1d7   : > { %v1529_v24 = vmul.f32 %v1110_v54, %v1369_v38  ;;  %v1532_v33 = vmul.f32 %v1110_v54, %v1371_v39  ;;  %v1535_v37 = vmul.f32 %v1110_v54, %v1373_v40  ;;  %v1538_v61 = vmul.f32 %v1110_v54, %v1375_v42 }
 0x1d8   : > { %v829_v9 = vmax.f32 %v797_v2, 0.0  ;;  %v830_v18 = vmax.f32 %v798_v57, 0.0  ;;  %v831_v27 = vmax.f32 %v799_v59, 0.0  ;;  %v832_v32 = vmax.f32 %v800_v8, 0.0 }
 0x1d9   : > { %v833_v34 = vmax.f32 %v801_v62, 0.0  ;;  %v834_v38 = vmax.f32 %v802_v1, 0.0  ;;  %v835_v36 = vmax.f32 %v803_v16, 0.0  ;;  %v836_v39 = vmax.f32 %v804_v5, 0.0 }
 0x1da   : > { %v837_v41 = vmax.f32 %v805_v21, 0.0  ;;  %v838_v40 = vmax.f32 %v806_v7, 0.0  ;;  %v839_v10 = vmax.f32 %v807_v45, 0.0  ;;  %v840_v29 = vmax.f32 %v808_v46, 0.0  ;;  %861 = vst [vmem:[%s1526_s17] sm:$0xff] %v829_v9  ;;  %862 = vst [vmem:[%s1526_s17 + $0x8] sm:$0xff] %v830_v18 }
 0x1db   : > { %863 = vst [vmem:[%s1526_s17 + $0x10] sm:$0xff] %v831_v27  ;;  %864 = vst [vmem:[%s1526_s17 + $0x18] sm:$0xff] %v832_v32  ;;  %v841_v42 = vmax.f32 %v809_v48, 0.0  ;;  %v842_v44 = vmax.f32 %v810_v50, 0.0  ;;  %v843_v11 = vmax.f32 %v811_v56, 0.0  ;;  %v844_v12 = vmax.f32 %v812_v51, 0.0 }
 0x1dc   : > { %865 = vst [vmem:[%s1526_s17 + $0x20] sm:$0xff] %v833_v34  ;;  %866 = vst [vmem:[%s1526_s17 + $0x28] sm:$0xff] %v834_v38  ;;  %v845_v55 = vmax.f32 %v813_v53, 0.0  ;;  %v846_v35 = vmax.f32 %v814_v14, 0.0  ;;  %v847_v15 = vmax.f32 %v815_v23, 0.0  ;;  %v848_v19 = vmax.f32 %v816_v26, 0.0 }
 0x1dd   : > { %867 = vst [vmem:[%s1526_s17 + $0x30] sm:$0xff] %v835_v36  ;;  %868 = vst [vmem:[%s1526_s17 + $0x38] sm:$0xff] %v836_v39  ;;  %v849_v43 = vmax.f32 %v1498_v31, 0.0  ;;  %v850_v20 = vmax.f32 %v1501_v25, 0.0  ;;  %v851_v22 = vmax.f32 %v1504_v58, 0.0  ;;  %v852_v49 = vmax.f32 %v1507_v28, 0.0 }
 0x1de   : > { %869 = vst [vmem:[%s1526_s17 + $0x40] sm:$0xff] %v837_v41  ;;  %870 = vst [vmem:[%s1526_s17 + $0x48] sm:$0xff] %v838_v40  ;;  %v853_v47 = vmax.f32 %v1510_v6, 0.0  ;;  %v854_v52 = vmax.f32 %v1513_v17, 0.0  ;;  %v855_v3 = vmax.f32 %v1516_v30, 0.0  ;;  %v856_v0 = vmax.f32 %v1519_v63, 0.0 }
 0x1df   : > { %871 = vst [vmem:[%s1526_s17 + $0x50] sm:$0xff] %v839_v10  ;;  %872 = vst [vmem:[%s1526_s17 + $0x58] sm:$0xff] %v840_v29  ;;  %v857_v4 = vmax.f32 %v1529_v24, 0.0  ;;  %v858_v60 = vmax.f32 %v1532_v33, 0.0  ;;  %v859_v13 = vmax.f32 %v1535_v37, 0.0  ;;  %v860_v54 = vmax.f32 %v1538_v61, 0.0 }
 0x1e0   : > { %873 = vst [vmem:[%s1526_s17 + $0x60] sm:$0xff] %v841_v42  ;;  %874 = vst [vmem:[%s1526_s17 + $0x68] sm:$0xff] %v842_v44 }
 0x1e1   : > { %875 = vst [vmem:[%s1526_s17 + $0x70] sm:$0xff] %v843_v11  ;;  %876 = vst [vmem:[%s1526_s17 + $0x78] sm:$0xff] %v844_v12 }
 0x1e2   : > { %877 = vst [vmem:[%s1526_s17 + $0x80] sm:$0xff] %v845_v55  ;;  %878 = vst [vmem:[%s1526_s17 + $0x88] sm:$0xff] %v846_v35 }
 0x1e3   : > { %879 = vst [vmem:[%s1526_s17 + $0x90] sm:$0xff] %v847_v15  ;;  %880 = vst [vmem:[%s1526_s17 + $0x98] sm:$0xff] %v848_v19 }
 0x1e4   : > { %881 = vst [vmem:[%s1526_s17 + $0xa0] sm:$0xff] %v849_v43  ;;  %882 = vst [vmem:[%s1526_s17 + $0xa8] sm:$0xff] %v850_v20 }
 0x1e5   : > { %883 = vst [vmem:[%s1526_s17 + $0xb0] sm:$0xff] %v851_v22  ;;  %884 = vst [vmem:[%s1526_s17 + $0xb8] sm:$0xff] %v852_v49 }
 0x1e6   : > { %885 = vst [vmem:[%s1526_s17 + $0xc0] sm:$0xff] %v853_v47  ;;  %886 = vst [vmem:[%s1526_s17 + $0xc8] sm:$0xff] %v854_v52 }
 0x1e7   : > { %887 = vst [vmem:[%s1526_s17 + $0xd0] sm:$0xff] %v855_v3  ;;  %888 = vst [vmem:[%s1526_s17 + $0xd8] sm:$0xff] %v856_v0 }
 0x1e8   : > { %889 = vst [vmem:[%s1526_s17 + $0xe0] sm:$0xff] %v857_v4  ;;  %890 = vst [vmem:[%s1526_s17 + $0xe8] sm:$0xff] %v858_v60 }
 0x1e9   : > { %891 = vst [vmem:[%s1526_s17 + $0xf0] sm:$0xff] %v859_v13  ;;  %892 = vst [vmem:[%s1526_s17 + $0xf8] sm:$0xff] %v860_v54 }
 0x1ea PF: > { %s13_s12 = sadd.s32 1, %s1117_s12  }
 0x1eb   : > { %p10_p4 = scmp.ge.s32.totalorder %s13_s12, 4  }
 0x1ed   :  { %12 = sbr.rel (!%p10_p4) target bundleno = 1 (0x1), region = 62 }

// kernel: munit_trainer1_forward.38
= control target key start
LH: loop header
LB: loop body
LE: loop exit
PB: predicated region body
PF: predicated region fallthrough
CT: control target
= control target key end

     0   :  { %s596_s12 = smov 0   ;;  %s650_s0 = inlined_call_operand.vmem [shape: bf16[128,128], index: 0, kind: input, shape index: {}]   ;;  %s651_s1 = inlined_call_operand.vmem [shape: bf16[128,128], index: 1, kind: input, shape index: {}]   ;;  %s652_s2 = inlined_call_operand.vmem [shape: f32[1,128], index: 2, kind: input, shape index: {}]   ;;  %s653_s3 = inlined_call_operand.vmem [shape: f32[128,128], index: 3, kind: output, shape index: {}]  }
   0x1 LB: > { %s470_s13 = sadd.s32 4294967295, %s574_s12   ;;  %p474_p0 = scmp.ge.s32.totalorder %s574_s12, 1  ;;  %s574_s12 = sphi %s596_s12, %s13_s12  }
   0x2   : > { %p138_p1 = scmp.lt.s32.totalorder %s574_s12, 3 }
   0x4   : > { %p139_p2 = pnand %p474_p0, %p138_p1 }
   0x5   : > { %v554_v0 = vld [vmem:[%s651_s1] sm:$0xff] (!%p139_p2)   ;;  %s475_s16 = sshll.u32 (!%p139_p2), %s470_s13, 3  ;;  %v555_v1 = vld [vmem:[%s651_s1 + $0x8] sm:$0xff] (!%p139_p2)   ;;  %v556_v2 = vld [vmem:[%s651_s1 + $0x10] sm:$0xff] (!%p139_p2)  }
   0x6   : > { %142 = sbr.rel (%p139_p2) target bundleno = 336 (0x150), region = 32  ;;  %p163_p3 = scmp.lt.s32.totalorder (!%p139_p2), %s475_s16, 15  ;;  %506 = vmatprep.subr.bf16.mxu0 (!%p139_p2), %v554_v0  ;;  %530 = vmatprep.subr.bf16.mxu1 (!%p139_p2), %v554_v0  ;;  %v557_v3 = vld [vmem:[%s651_s1 + $0x18] sm:$0xff] (!%p139_p2)   ;;  %v558_v6 = vld [vmem:[%s651_s1 + $0x20] sm:$0xff] (!%p139_p2)   ;;  %v559_v7 = vld [vmem:[%s651_s1 + $0x28] sm:$0xff] (!%p139_p2)  }
   0x7   : > { %507 = vmatpush3.bf16.msra.mxu0 (!%p139_p2), %v554_v0  ;;  %538 = vmatpush3.bf16.msra.mxu1 (!%p139_p2), %v554_v0  ;;  %v560_v8 = vld [vmem:[%s651_s1 + $0x30] sm:$0xff] (!%p139_p2)   ;;  %v561_v9 = vld [vmem:[%s651_s1 + $0x38] sm:$0xff] (!%p139_p2)   ;;  %v479_v14 = vld [vmem:[%s652_s2] ss:$0 sm:$0xff] (!%p139_p2) }
   0x8   : > { %508 = vmatprep.subr.bf16.mxu0 (!%p139_p2), %v555_v1  ;;  %531 = vmatprep.subr.bf16.mxu1 (!%p139_p2), %v555_v1 }
   0xb   : > { %509 = vmatpush3.bf16.msra.mxu0 (!%p139_p2), %v555_v1  ;;  %539 = vmatpush3.bf16.msra.mxu1 (!%p139_p2), %v555_v1 }
   0xc   : > { %510 = vmatprep.subr.bf16.mxu0 (!%p139_p2), %v556_v2  ;;  %532 = vmatprep.subr.bf16.mxu1 (!%p139_p2), %v556_v2 }
   0xd   : > { %s655_s16 = smov (!%p163_p3, %s475_s16), 15 }
   0xe   : > { %s476_s21 = sshll.u32 %s655_s16, 2  ;;  %s478_s10 = sshll.u32 %s655_s16, 3 }
   0xf   : > { %s619_s24 = scalar_lea.vmem %s650_s0, %s476_s21  ;;  %511 = vmatpush3.bf16.msra.mxu0 %v556_v2  ;;  %540 = vmatpush3.bf16.msra.mxu1 %v556_v2  ;;  %s172_s14 = scalar_lea.vmem %s653_s3, %s478_s10 }
  0x10   : > { %v562_v4 = vld [vmem:[%s619_s24] sm:$0xff]   ;;  %v564_v5 = vld [vmem:[%s619_s24 + $0x10] sm:$0xff]   ;;  %512 = vmatprep.subr.bf16.mxu0 %v557_v3  ;;  %533 = vmatprep.subr.bf16.mxu1 %v557_v3  ;;  %v563_v10 = vld [vmem:[%s619_s24 + $0x8] sm:$0xff]  }
  0x11   : > { %522 = vmatprep.mubr.bf16.mxu0 %v562_v4  ;;  %526 = vmatprep.mubr.bf16.mxu1 %v564_v5  ;;  %v565_v11 = vld [vmem:[%s619_s24 + $0x18] sm:$0xff]  }
  0x13   : > { %513 = vmatpush3.bf16.msra.mxu0 %v557_v3  ;;  %541 = vmatpush3.bf16.msra.mxu1 %v557_v3 }
  0x14   : > { %514 = vmatprep.subr.bf16.mxu0 %v558_v6  ;;  %534 = vmatprep.subr.bf16.mxu1 %v558_v6 }
  0x17   : > { %515 = vmatpush3.bf16.msra.mxu0 %v558_v6  ;;  %542 = vmatpush3.bf16.msra.mxu1 %v558_v6 }
  0x18   : > { %516 = vmatprep.subr.bf16.mxu0 %v559_v7  ;;  %535 = vmatprep.subr.bf16.mxu1 %v559_v7 }
  0x1b   : > { %517 = vmatpush3.bf16.msra.mxu0 %v559_v7  ;;  %543 = vmatpush3.bf16.msra.mxu1 %v559_v7 }
  0x1c   : > { %518 = vmatprep.subr.bf16.mxu0 %v560_v8  ;;  %536 = vmatprep.subr.bf16.mxu1 %v560_v8 }
  0x1f   : > { %519 = vmatpush3.bf16.msra.mxu0 %v560_v8  ;;  %544 = vmatpush3.bf16.msra.mxu1 %v560_v8 }
  0x20   : > { %520 = vmatprep.subr.bf16.mxu0 %v561_v9  ;;  %537 = vmatprep.subr.bf16.mxu1 %v561_v9 }
  0x23   : > { %521 = vmatpush3.bf16.msra.mxu0 %v561_v9  ;;  %545 = vmatpush3.bf16.msra.mxu1 %v561_v9 }
  0x26   : > { %523 = vmatmul.mubr.bf16.vlgmr.msra.gmra.mrb[0].mxu0 %v563_v10  ;;  %527 = vmatmul.mubr.bf16.vlgmr.msra.gmra.mrb[0].mxu1 %v565_v11 }
  0xf9   : > { %v524_v12 = vpop.f32.mrb[0].mxu0  ;;  %v528_v13 = vpop.f32.mrb[0].mxu1 }
  0xfa   : > { %v312_v15 = vpop.f32.mrb[1].mxu0  ;;  %v328_v16 = vpop.f32.mrb[1].mxu1  ;;  %v321_v23 = vadd.f32 %v524_v12, %v479_v14  ;;  %v337_v31 = vadd.f32 %v528_v13, %v479_v14 }
  0xfb   : > { %v525_v17 = vpop.f32.mrb[2].mxu0  ;;  %v529_v18 = vpop.f32.mrb[2].mxu1  ;;  %v313_v21 = vadd.f32 %v479_v14, %v312_v15  ;;  %v329_v27 = vadd.f32 %v479_v14, %v328_v16 }
  0xfc   : > { %v315_v19 = vpop.f32.mrb[3].mxu0  ;;  %v331_v20 = vpop.f32.mrb[3].mxu1  ;;  %v324_v25 = vadd.f32 %v525_v17, %v479_v14  ;;  %v340_v33 = vadd.f32 %v529_v18, %v479_v14 }
  0xfd   : > { %v316_v22 = vadd.f32 %v479_v14, %v315_v19  ;;  %v332_v30 = vadd.f32 %v479_v14, %v331_v20 }
  0xff   : > { %v343_v24 = vadd.f32 %v316_v22, %v313_v21 }
 0x101   : > { %v344_v26 = vadd.f32 %v343_v24, %v321_v23 }
 0x103   : > { %v345_v28 = vadd.f32 %v344_v26, %v324_v25 }
 0x105   : > { %v346_v29 = vadd.f32 %v345_v28, %v329_v27 }
 0x107   : > { %v347_v32 = vadd.f32 %v346_v29, %v332_v30 }
 0x109   : > { %v348_v34 = vadd.f32 %v347_v32, %v337_v31 }
 0x10b   : > { %v349_v35 = vadd.f32 %v348_v34, %v340_v33 }
 0x10d   : > { %v350_v36 = vrot.slane %v349_v35, 4 }
 0x10f   : > { %v351_v37 = vadd.f32 %v350_v36, %v349_v35 }
 0x111   : > { %v352_v38 = vrot.slane %v351_v37, 2 }
 0x113   : > { %v353_v39 = vadd.f32 %v352_v38, %v351_v37 }
 0x115   : > { %v354_v40 = vrot.slane %v353_v39, 1 }
 0x117   : > { %v355_v41 = vadd.f32 %v354_v40, %v353_v39 }
 0x119   : > { %v357_v42 = vmul.f32 0.015625, %v355_v41 }
 0x11b   : > { %v358_v43 = vsub.f32 %v313_v21, %v357_v42  ;;  %v359_v44 = vsub.f32 %v316_v22, %v357_v42  ;;  %v360_v45 = vsub.f32 %v321_v23, %v357_v42  ;;  %v361_v46 = vsub.f32 %v324_v25, %v357_v42 }
 0x11c   : > { %v362_v47 = vsub.f32 %v329_v27, %v357_v42  ;;  %v363_v48 = vsub.f32 %v332_v30, %v357_v42  ;;  %v364_v49 = vsub.f32 %v337_v31, %v357_v42  ;;  %v365_v50 = vsub.f32 %v340_v33, %v357_v42 }
 0x11d   : > { %v366_v51 = vmul.f32 %v358_v43, %v358_v43  ;;  %v367_v52 = vmul.f32 %v359_v44, %v359_v44  ;;  %v368_v53 = vmul.f32 %v360_v45, %v360_v45  ;;  %v369_v55 = vmul.f32 %v361_v46, %v361_v46 }
 0x11e   : > { %v370_v57 = vmul.f32 %v362_v47, %v362_v47  ;;  %v371_v59 = vmul.f32 %v363_v48, %v363_v48  ;;  %v372_v61 = vmul.f32 %v364_v49, %v364_v49  ;;  %v373_v63 = vmul.f32 %v365_v50, %v365_v50 }
 0x11f   : > { %v374_v54 = vadd.f32 %v367_v52, %v366_v51 }
 0x121   : > { %v375_v56 = vadd.f32 %v374_v54, %v368_v53 }
 0x123   : > { %v376_v58 = vadd.f32 %v375_v56, %v369_v55 }
 0x125   : > { %v377_v60 = vadd.f32 %v376_v58, %v370_v57 }
 0x127   : > { %v378_v62 = vadd.f32 %v377_v60, %v371_v59 }
 0x129   : > { %v379_v0 = vadd.f32 %v378_v62, %v372_v61 }
 0x12b   : > { %v380_v1 = vadd.f32 %v379_v0, %v373_v63 }
 0x12d   : > { %v381_v2 = vrot.slane %v380_v1, 4 }
 0x12f   : > { %v382_v3 = vadd.f32 %v381_v2, %v380_v1 }
 0x131   : > { %v383_v4 = vrot.slane %v382_v3, 2 }
 0x133   : > { %v384_v5 = vadd.f32 %v383_v4, %v382_v3 }
 0x135   : > { %v385_v6 = vrot.slane %v384_v5, 1 }
 0x137   : > { %v386_v7 = vadd.f32 %v385_v6, %v384_v5 }
 0x139   : > { %v387_v8 = vmul.f32 0.015625, %v386_v7 }
 0x13b   : > { %v388_v9 = vadd.f32 1e-05, %v387_v8 }
 0x13d   : > { %566 = vrsqrt.f32 %v388_v9 }
 0x147   : > { %v567_v10 = vpop.eup %566 }
 0x148   : > { %v390_v11 = vmul.f32 %v567_v10, %v358_v43  ;;  %v391_v12 = vmul.f32 %v567_v10, %v359_v44  ;;  %v392_v13 = vmul.f32 %v567_v10, %v360_v45  ;;  %v393_v14 = vmul.f32 %v567_v10, %v361_v46 }
 0x149   : > { %v394_v15 = vmul.f32 %v567_v10, %v362_v47  ;;  %v395_v16 = vmul.f32 %v567_v10, %v363_v48  ;;  %v396_v17 = vmul.f32 %v567_v10, %v364_v49  ;;  %v397_v18 = vmul.f32 %v567_v10, %v365_v50 }
 0x14a   : > { %v398_v19 = vmax.f32 %v390_v11, 0.0  ;;  %v399_v20 = vmax.f32 %v391_v12, 0.0  ;;  %v400_v21 = vmax.f32 %v392_v13, 0.0  ;;  %v401_v22 = vmax.f32 %v393_v14, 0.0 }
 0x14b   : > { %v402_v23 = vmax.f32 %v394_v15, 0.0  ;;  %v403_v24 = vmax.f32 %v395_v16, 0.0  ;;  %v404_v25 = vmax.f32 %v396_v17, 0.0  ;;  %v405_v26 = vmax.f32 %v397_v18, 0.0 }
 0x14c   : > { %406 = vst [vmem:[%s172_s14] sm:$0xff] %v398_v19  ;;  %407 = vst [vmem:[%s172_s14 + $0x8] sm:$0xff] %v399_v20 }
 0x14d   : > { %408 = vst [vmem:[%s172_s14 + $0x10] sm:$0xff] %v400_v21  ;;  %409 = vst [vmem:[%s172_s14 + $0x18] sm:$0xff] %v401_v22 }
 0x14e   : > { %410 = vst [vmem:[%s172_s14 + $0x20] sm:$0xff] %v402_v23  ;;  %411 = vst [vmem:[%s172_s14 + $0x28] sm:$0xff] %v403_v24 }
 0x14f   : > { %412 = vst [vmem:[%s172_s14 + $0x30] sm:$0xff] %v404_v25  ;;  %413 = vst [vmem:[%s172_s14 + $0x38] sm:$0xff] %v405_v26 }
 0x150 PF: > { %s13_s12 = sadd.s32 1, %s574_s12  }
 0x151   : > { %p10_p4 = scmp.ge.s32.totalorder %s13_s12, 4  }
 0x153   :  { %12 = sbr.rel (!%p10_p4) target bundleno = 1 (0x1), region = 62 }

// kernel: munit_trainer1_forward.39
= control target key start
LH: loop header
LB: loop body
LE: loop exit
PB: predicated region body
PF: predicated region fallthrough
CT: control target
= control target key end

     0   :  { %s562_s12 = smov 0   ;;  %s637_s0 = inlined_call_operand.vmem [shape: bf16[32,256], index: 0, kind: input, shape index: {}]   ;;  %s638_s1 = inlined_call_operand.vmem [shape: bf16[256,128], index: 1, kind: input, shape index: {}]   ;;  %s639_s2 = inlined_call_operand.vmem [shape: f32[1,128], index: 2, kind: input, shape index: {}]   ;;  %s640_s3 = inlined_call_operand.vmem [shape: f32[32,128], index: 3, kind: output, shape index: {}]  }
   0x1 LB: > { %s451_s13 = sadd.s32 4294967295, %s540_s12   ;;  %p455_p0 = scmp.ge.s32.totalorder %s540_s12, 1  ;;  %s540_s12 = sphi %s562_s12, %s13_s12  }
   0x2   : > { %p139_p1 = scmp.lt.s32.totalorder %s540_s12, 3 }
   0x4   : > { %p140_p2 = pnand %p455_p0, %p139_p1 }
   0x5   : > { %v513_v0 = vld [vmem:[%s638_s1 + $0x40] sm:$0xff] (!%p140_p2)   ;;  %s456_s16 = sshll.u32 (!%p140_p2), %s451_s13, 1  ;;  %v515_v2 = vld [vmem:[%s638_s1 + $0x48] sm:$0xff] (!%p140_p2)   ;;  %v517_v4 = vld [vmem:[%s638_s1 + $0x50] sm:$0xff] (!%p140_p2)  }
   0x6   : > { %143 = sbr.rel (%p140_p2) target bundleno = 311 (0x137), region = 32  ;;  %v514_v1 = vld [vmem:[%s638_s1] sm:$0xff] (!%p140_p2)   ;;  %483 = vmatprep.subr.bf16.mxu0 (!%p140_p2), %v513_v0  ;;  %v516_v3 = vld [vmem:[%s638_s1 + $0x8] sm:$0xff] (!%p140_p2)   ;;  %p165_p3 = scmp.lt.s32.totalorder (!%p140_p2), %s456_s16, 3  ;;  %v518_v5 = vld [vmem:[%s638_s1 + $0x10] sm:$0xff] (!%p140_p2)  }
   0x7   : > { %484 = vmatpush3.bf16.msra.mxu0 (!%p140_p2), %v514_v1  ;;  %v519_v6 = vld [vmem:[%s638_s1 + $0x58] sm:$0xff] (!%p140_p2)   ;;  %v521_v8 = vld [vmem:[%s638_s1 + $0x60] sm:$0xff] (!%p140_p2)   ;;  %v523_v10 = vld [vmem:[%s638_s1 + $0x68] sm:$0xff] (!%p140_p2)  }
   0x8   : > { %485 = vmatprep.subr.bf16.mxu0 (!%p140_p2), %v515_v2  ;;  %v520_v7 = vld [vmem:[%s638_s1 + $0x18] sm:$0xff] (!%p140_p2)   ;;  %v522_v9 = vld [vmem:[%s638_s1 + $0x20] sm:$0xff] (!%p140_p2)   ;;  %v524_v12 = vld [vmem:[%s638_s1 + $0x28] sm:$0xff] (!%p140_p2)  }
   0x9   : > { %v525_v13 = vld [vmem:[%s638_s1 + $0x70] sm:$0xff] (!%p140_p2)   ;;  %v527_v15 = vld [vmem:[%s638_s1 + $0x78] sm:$0xff] (!%p140_p2)   ;;  %v461_v22 = vld [vmem:[%s639_s2] ss:$0 sm:$0xff] (!%p140_p2) }
   0xa   : > { %v526_v14 = vld [vmem:[%s638_s1 + $0x30] sm:$0xff] (!%p140_p2)   ;;  %v528_v16 = vld [vmem:[%s638_s1 + $0x38] sm:$0xff] (!%p140_p2)  }
   0xb   : > { %486 = vmatpush3.bf16.msra.mxu0 (!%p140_p2), %v516_v3 }
   0xc   : > { %487 = vmatprep.subr.bf16.mxu0 (!%p140_p2), %v517_v4 }
   0xd   : > { %s642_s16 = smov (!%p165_p3, %s456_s16), 3 }
   0xe   : > { %s482_s4 = sshll.u32 %s642_s16, 3 }
   0xf   : > { %488 = vmatpush3.bf16.msra.mxu0 %v518_v5  ;;  %s169_s9 = scalar_lea.vmem %s637_s0, %s482_s4  ;;  %s175_s30 = scalar_lea.vmem %s640_s3, %s482_s4 }
  0x10   : > { %489 = vmatprep.subr.bf16.mxu0 %v519_v6  ;;  %v531_v11 = vld [vmem:[%s169_s9 + $0x4] ss:$8 sps:$4 sm:$0xff]   ;;  %v529_v17 = vld [vmem:[%s169_s9] ss:$8 sps:$4 sm:$0xff]  }
  0x11   : > { %357 = vmatprep.mubr.bf16.mxu0 %v531_v11 }
  0x13   : > { %490 = vmatpush3.bf16.msra.mxu0 %v520_v7 }
  0x14   : > { %491 = vmatprep.subr.bf16.mxu0 %v521_v8 }
  0x17   : > { %492 = vmatpush3.bf16.msra.mxu0 %v522_v9 }
  0x18   : > { %493 = vmatprep.subr.bf16.mxu0 %v523_v10 }
  0x1b   : > { %494 = vmatpush3.bf16.msra.mxu0 %v524_v12 }
  0x1c   : > { %495 = vmatprep.subr.bf16.mxu0 %v525_v13 }
  0x1f   : > { %496 = vmatpush3.bf16.msra.mxu0 %v526_v14 }
  0x20   : > { %497 = vmatprep.subr.bf16.mxu0 %v527_v15 }
  0x23   : > { %498 = vmatpush3.bf16.msra.mxu0 %v528_v16 }
  0x26   : > { %358 = vmatmul.mubr.bf16.vlgmr.msra.gmra.mrb[0].mxu0 %v529_v17 }
  0xf9   : > { %v499_v18 = vpop.f32.mrb[0].mxu0 }
  0xfa   : > { %v500_v19 = vpop.f32.mrb[1].mxu0 }
  0xfb   : > { %v501_v20 = vadd.f32 %v500_v19, %v499_v18  ;;  %v502_v21 = vpop.f32.mrb[2].mxu0 }
  0xfc   : > { %v503_v23 = vpop.f32.mrb[3].mxu0 }
  0xfd   : > { %v504_v24 = vadd.f32 %v503_v23, %v502_v21  ;;  %v360_v25 = vadd.f32 %v501_v20, %v461_v22 }
  0xff   : > { %v363_v26 = vadd.f32 %v504_v24, %v461_v22 }
 0x101   : > { %v366_v27 = vadd.f32 %v363_v26, %v360_v25 }
 0x103   : > { %v367_v28 = vrot.slane %v366_v27, 4 }
 0x105   : > { %v368_v29 = vadd.f32 %v367_v28, %v366_v27 }
 0x107   : > { %v369_v30 = vrot.slane %v368_v29, 2 }
 0x109   : > { %v370_v31 = vadd.f32 %v369_v30, %v368_v29 }
 0x10b   : > { %v371_v32 = vrot.slane %v370_v31, 1 }
 0x10d   : > { %v372_v33 = vadd.f32 %v371_v32, %v370_v31 }
 0x10f   : > { %v374_v34 = vmul.f32 0.0625, %v372_v33 }
 0x111   : > { %v375_v35 = vsub.f32 %v360_v25, %v374_v34  ;;  %v376_v36 = vsub.f32 %v363_v26, %v374_v34 }
 0x113   : > { %v377_v37 = vmul.f32 %v375_v35, %v375_v35  ;;  %v378_v38 = vmul.f32 %v376_v36, %v376_v36 }
 0x115   : > { %v379_v39 = vadd.f32 %v378_v38, %v377_v37 }
 0x117   : > { %v380_v40 = vrot.slane %v379_v39, 4 }
 0x119   : > { %v381_v41 = vadd.f32 %v380_v40, %v379_v39 }
 0x11b   : > { %v382_v42 = vrot.slane %v381_v41, 2 }
 0x11d   : > { %v383_v43 = vadd.f32 %v382_v42, %v381_v41 }
 0x11f   : > { %v384_v44 = vrot.slane %v383_v43, 1 }
 0x121   : > { %v385_v45 = vadd.f32 %v384_v44, %v383_v43 }
 0x123   : > { %v386_v46 = vmul.f32 0.0625, %v385_v45 }
 0x125   : > { %v387_v47 = vadd.f32 1e-05, %v386_v46 }
 0x127   : > { %532 = vrsqrt.f32 %v387_v47 }
 0x131   : > { %v533_v48 = vpop.eup %532 }
 0x132   : > { %v389_v49 = vmul.f32 %v533_v48, %v375_v35  ;;  %v390_v50 = vmul.f32 %v533_v48, %v376_v36 }
 0x134   : > { %v391_v51 = vmax.f32 %v389_v49, 0.0  ;;  %v392_v52 = vmax.f32 %v390_v50, 0.0 }
 0x136   : > { %393 = vst [vmem:[%s175_s30] sm:$0xff] %v391_v51  ;;  %394 = vst [vmem:[%s175_s30 + $0x8] sm:$0xff] %v392_v52 }
 0x137 PF: > { %s13_s12 = sadd.s32 1, %s540_s12  }
 0x138   : > { %p10_p4 = scmp.ge.s32.totalorder %s13_s12, 4  }
 0x13a   :  { %12 = sbr.rel (!%p10_p4) target bundleno = 1 (0x1), region = 62 }

// kernel: munit_trainer1_forward.41
= control target key start
LH: loop header
LB: loop body
LE: loop exit
PB: predicated region body
PF: predicated region fallthrough
CT: control target
= control target key end

     0   :  { %s721_s15 = smov 0   ;;  %s802_s0 = inlined_call_operand.vmem [shape: bf16[32,288], index: 0, kind: input, shape index: {}]   ;;  %s803_s1 = inlined_call_operand.vmem [shape: bf16[288,128], index: 1, kind: input, shape index: {}]   ;;  %s804_s2 = inlined_call_operand.vmem [shape: f32[1,128], index: 2, kind: input, shape index: {}]   ;;  %s805_s3 = inlined_call_operand.vmem [shape: f32[32,128], index: 3, kind: input, shape index: {}]   ;;  %s806_s4 = inlined_call_operand.vmem [shape: f32[32,128], index: 4, kind: output, shape index: {}]  }
   0x1 LB: > { %s582_s16 = sadd.s32 4294967295, %s692_s15   ;;  %p586_p0 = scmp.ge.s32.totalorder %s692_s15, 1  ;;  %s692_s15 = sphi %s721_s15, %s14_s15  }
   0x2   : > { %p175_p1 = scmp.lt.s32.totalorder %s692_s15, 3 }
   0x4   : > { %p176_p2 = pnand %p586_p0, %p175_p1 }
   0x5   : > { %v662_v0 = vld [vmem:[%s803_s1 + $0x40] sm:$0xff] (!%p176_p2)   ;;  %v694_v2 = vmov (!%p176_p2), 0.0   ;;  %s587_s21 = sshll.u32 (!%p176_p2), %s582_s16, 1  ;;  %v664_v3 = vld [vmem:[%s803_s1 + $0x48] sm:$0xff] (!%p176_p2)   ;;  %v666_v5 = vld [vmem:[%s803_s1 + $0x50] sm:$0xff] (!%p176_p2)   ;;  %vm695_vm0 = vmmov (!%p176_p2), 0  }
   0x6   : > { %179 = sbr.rel (%p176_p2) target bundleno = 313 (0x139), region = 36  ;;  %v663_v1 = vld [vmem:[%s803_s1] sm:$0xff] (!%p176_p2)   ;;  %643 = vmatprep.subr.bf16.mxu1 (!%p176_p2), %v694_v2  ;;  %618 = vmatprep.subr.bf16.mxu0 (!%p176_p2), %v662_v0  ;;  %p208_p3 = scmp.lt.s32.totalorder (!%p176_p2), %s587_s21, 3  ;;  %v665_v4 = vld [vmem:[%s803_s1 + $0x8] sm:$0xff] (!%p176_p2)   ;;  %v667_v6 = vld [vmem:[%s803_s1 + $0x10] sm:$0xff] (!%p176_p2)   ;;  %vm397_vm1 = vcmask (!%p176_p2), 261120  }
   0x7   : > { %619 = vmatpush3.bf16.msra.mxu0 (!%p176_p2), %v663_v1  ;;  %647 = vmatprep.mubr.msk.bf16.mxu1 (!%p176_p2), %vm695_vm0, %v694_v2  ;;  %v668_v7 = vld [vmem:[%s803_s1 + $0x58] sm:$0xff] (!%p176_p2)   ;;  %v670_v9 = vld [vmem:[%s803_s1 + $0x60] sm:$0xff] (!%p176_p2)   ;;  %v672_v12 = vld [vmem:[%s803_s1 + $0x68] sm:$0xff] (!%p176_p2)  }
   0x8   : > { %620 = vmatprep.subr.bf16.mxu0 (!%p176_p2), %v664_v3  ;;  %v669_v8 = vld [vmem:[%s803_s1 + $0x18] sm:$0xff] (!%p176_p2)   ;;  %v676_v10 = vld [vmem:[%s803_s1 + $0x80] sm:$0xff] (!%p176_p2)   ;;  %v673_v13 = vld [vmem:[%s803_s1 + $0x28] sm:$0xff] (!%p176_p2)  }
   0x9   : > { %v671_v11 = vld [vmem:[%s803_s1 + $0x20] sm:$0xff] (!%p176_p2)   ;;  %644 = vmatpush3.bf16.msra.mxu1 (!%p176_p2), %v676_v10  ;;  %v682_v15 = vld [vmem:[%s803_s1 + $0x88] sm:$0xff] (!%p176_p2)   ;;  %v674_v16 = vld [vmem:[%s803_s1 + $0x70] sm:$0xff] (!%p176_p2)  }
   0xa   : > { %645 = vmatprep.subr.bf16.mxu1 (!%p176_p2), %v694_v2  ;;  %v675_v18 = vld [vmem:[%s803_s1 + $0x30] sm:$0xff] (!%p176_p2)   ;;  %v677_v19 = vld [vmem:[%s803_s1 + $0x78] sm:$0xff] (!%p176_p2)   ;;  %v593_v28 = vld [vmem:[%s804_s2] ss:$0 sm:$0xff] (!%p176_p2) }
   0xb   : > { %621 = vmatpush3.bf16.msra.mxu0 (!%p176_p2), %v665_v4  ;;  %v678_v20 = vld [vmem:[%s803_s1 + $0x38] sm:$0xff] (!%p176_p2)  }
   0xc   : > { %622 = vmatprep.subr.bf16.mxu0 (!%p176_p2), %v666_v5 }
   0xd   : > { %s808_s21 = smov (!%p208_p3, %s587_s21), 3  ;;  %646 = vmatpush3.bf16.msra.mxu1 %v682_v15 }
   0xe   : > { %s651_s8 = smul.u32 12, %s808_s21  ;;  %s590_s10 = sshll.u32 %s808_s21, 3 }
   0xf   : > { %623 = vmatpush3.bf16.msra.mxu0 %v667_v6  ;;  %s218_s13 = scalar_lea.vmem %s805_s3, %s590_s10  ;;  %s224_s17 = scalar_lea.vmem %s806_s4, %s590_s10 }
  0x10   : > { %624 = vmatprep.subr.bf16.mxu0 %v668_v7  ;;  %s212_s18 = scalar_lea.vmem %s802_s0, %s651_s8  ;;  %v508_v59 = vld [vmem:[%s218_s13] sm:$0xff]  ;;  %v509_v60 = vld [vmem:[%s218_s13 + $0x8] sm:$0xff] }
  0x11   : > { %v681_v14 = vld [vmem:[%s212_s18 + $0x4] ss:$12 sps:$4 sm:$0xff]   ;;  %v683_v17 = vld [vmem:[%s212_s18 + $0x8] ss:$12 sps:$4 sm:$0xff]   ;;  %v679_v21 = vld [vmem:[%s212_s18] ss:$12 sps:$4 sm:$0xff]  }
  0x12   : > { %433 = vmatprep.mubr.bf16.mxu0 %v681_v14  ;;  %648 = vmatmul.mubr.msk.bf16.vlgmr.msra.gmra.mrb[0].mxu1 %vm397_vm1, %v683_v17 }
  0x13   : > { %625 = vmatpush3.bf16.msra.mxu0 %v669_v8 }
  0x14   : > { %626 = vmatprep.subr.bf16.mxu0 %v670_v9 }
  0x17   : > { %627 = vmatpush3.bf16.msra.mxu0 %v671_v11 }
  0x18   : > { %628 = vmatprep.subr.bf16.mxu0 %v672_v12 }
  0x1b   : > { %629 = vmatpush3.bf16.msra.mxu0 %v673_v13 }
  0x1c   : > { %630 = vmatprep.subr.bf16.mxu0 %v674_v16 }
  0x1f   : > { %631 = vmatpush3.bf16.msra.mxu0 %v675_v18 }
  0x20   : > { %632 = vmatprep.subr.bf16.mxu0 %v677_v19 }
  0x23   : > { %633 = vmatpush3.bf16.msra.mxu0 %v678_v20 }
  0x26   : > { %434 = vmatmul.mubr.bf16.vlgmr.msra.gmra.mrb[0].mxu0 %v679_v21 }
  0xe5   : > { %v476_v22 = vpop.f32.mrb[0].mxu1 }
  0xe6   : > { %v649_v23 = vpop.f32.mrb[1].mxu1 }
  0xe7   : > { %v479_v24 = vpop.f32.mrb[2].mxu1 }
  0xe8   : > { %v650_v25 = vpop.f32.mrb[3].mxu1 }
  0xf9   : > { %v634_v26 = vpop.f32.mrb[0].mxu0 }
  0xfa   : > { %v635_v27 = vpop.f32.mrb[1].mxu0 }
  0xfb   : > { %v636_v29 = vadd.f32 %v635_v27, %v634_v26  ;;  %v637_v30 = vpop.f32.mrb[2].mxu0 }
  0xfc   : > { %v638_v31 = vpop.f32.mrb[3].mxu0 }
  0xfd   : > { %v436_v32 = vadd.f32 %v636_v29, %v593_v28  ;;  %v639_v33 = vadd.f32 %v638_v31, %v637_v30 }
  0xff   : > { %v477_v34 = vadd.f32 %v476_v22, %v436_v32  ;;  %v439_v35 = vadd.f32 %v639_v33, %v593_v28 }
 0x101   : > { %v480_v36 = vadd.f32 %v479_v24, %v439_v35 }
 0x103   : > { %v483_v37 = vadd.f32 %v480_v36, %v477_v34 }
 0x105   : > { %v484_v38 = vrot.slane %v483_v37, 4 }
 0x107   : > { %v485_v39 = vadd.f32 %v484_v38, %v483_v37 }
 0x109   : > { %v486_v40 = vrot.slane %v485_v39, 2 }
 0x10b   : > { %v487_v41 = vadd.f32 %v486_v40, %v485_v39 }
 0x10d   : > { %v488_v42 = vrot.slane %v487_v41, 1 }
 0x10f   : > { %v489_v43 = vadd.f32 %v488_v42, %v487_v41 }
 0x111   : > { %v491_v44 = vmul.f32 0.0625, %v489_v43 }
 0x113   : > { %v492_v45 = vsub.f32 %v477_v34, %v491_v44  ;;  %v493_v46 = vsub.f32 %v480_v36, %v491_v44 }
 0x115   : > { %v494_v47 = vmul.f32 %v492_v45, %v492_v45  ;;  %v495_v48 = vmul.f32 %v493_v46, %v493_v46 }
 0x117   : > { %v496_v49 = vadd.f32 %v495_v48, %v494_v47 }
 0x119   : > { %v497_v50 = vrot.slane %v496_v49, 4 }
 0x11b   : > { %v498_v51 = vadd.f32 %v497_v50, %v496_v49 }
 0x11d   : > { %v499_v52 = vrot.slane %v498_v51, 2 }
 0x11f   : > { %v500_v53 = vadd.f32 %v499_v52, %v498_v51 }
 0x121   : > { %v501_v54 = vrot.slane %v500_v53, 1 }
 0x123   : > { %v502_v55 = vadd.f32 %v501_v54, %v500_v53 }
 0x125   : > { %v503_v56 = vmul.f32 0.0625, %v502_v55 }
 0x127   : > { %v504_v57 = vadd.f32 1e-05, %v503_v56 }
 0x129   : > { %684 = vrsqrt.f32 %v504_v57 }
 0x133   : > { %v685_v58 = vpop.eup %684 }
 0x134   : > { %v506_v61 = vmul.f32 %v685_v58, %v492_v45  ;;  %v507_v62 = vmul.f32 %v685_v58, %v493_v46 }
 0x136   : > { %v510_v63 = vadd.f32 %v508_v59, %v506_v61  ;;  %v511_v0 = vadd.f32 %v509_v60, %v507_v62 }
 0x138   : > { %512 = vst [vmem:[%s224_s17] sm:$0xff] %v510_v63  ;;  %513 = vst [vmem:[%s224_s17 + $0x8] sm:$0xff] %v511_v0 }
 0x139 PF: > { %s14_s15 = sadd.s32 1, %s692_s15  }
 0x13a   : > { %p11_p4 = scmp.ge.s32.totalorder %s14_s15, 4  }
 0x13c   :  { %13 = sbr.rel (!%p11_p4) target bundleno = 1 (0x1), region = 69 }

// kernel: munit_trainer1_forward.44
= control target key start
LH: loop header
LB: loop body
LE: loop exit
PB: predicated region body
PF: predicated region fallthrough
CT: control target
= control target key end

     0   :  { %vm40_vm0 = vcmask 1043456   ;;  %v252_v0 = vmov 0.0   ;;  %vm253_vm1 = vmmov 0   ;;  %vm36_vm2 = vcmask 64512   ;;  %s325_s1 = inlined_call_operand.vmem [shape: bf16[8,16], index: 1, kind: input, shape index: {}]   ;;  %s326_s0 = inlined_call_operand.vmem [shape: bf16[8,8], index: 0, kind: input, shape index: {}]   ;;  %s327_s3 = inlined_call_operand.vmem [shape: bf16[16,16], index: 3, kind: input, shape index: {}]   ;;  %s328_s5 = inlined_call_operand.vmem [shape: bf16[16,256], index: 5, kind: input, shape index: {}]   ;;  %s329_s2 = inlined_call_operand.vmem [shape: f32[1,16], index: 2, kind: input, shape index: {}, may-alias: {2,4}]   ;;  %s330_s4 = inlined_call_operand.vmem [shape: f32[1,16], index: 4, kind: input, shape index: {}, may-alias: {2,4}]   ;;  %s331_s6 = inlined_call_operand.vmem [shape: f32[1,256], index: 6, kind: input, shape index: {}]   ;;  %s332_s7 = inlined_call_operand.vmem [shape: f32[8,256], index: 7, kind: output, shape index: {}]  }
   0x1   :  { %233 = vmatprep.subr.bf16.mxu0 %v252_v0  ;;  %v28_v1 = vld [vmem:[%s325_s1] sm:$0xf]  ;;  %235 = vmatprep.mubr.msk.bf16.mxu0 %vm253_vm1, %v252_v0  ;;  %v251_v6 = vld [vmem:[%s328_s5 + $0x4] ss:$8 sps:$4 sm:$0xff]   ;;  %vm101_vm3 = vcmask 130048   ;;  %v254_v15 = vmov 0   ;;  %v151_v24 = vlaneseq }
   0x2   :  { %v42_v2 = vsel %vm40_vm0, %v28_v1, 0  ;;  %239 = vmatprep.subr.bf16.mxu1 %v252_v0  ;;  %241 = vmatprep.mubr.msk.bf16.mxu1 %vm253_vm1, %v252_v0  ;;  %v27_v3 = vld [vmem:[%s326_s0] sm:$0xf] }
   0x3   :  { %234 = vmatpush3.bf16.msra.mxu0 %v42_v2  ;;  %v248_v4 = vld [vmem:[%s327_s3] sm:$0xff]   ;;  %v152_v25 = vshrl.u32 %v151_v24, 7 }
   0x4   :  { %240 = vmatpush3.bf16.msra.mxu1 %v248_v4  ;;  %v249_v5 = vld [vmem:[%s328_s5] ss:$8 sps:$4 sm:$0xff]   ;;  %174 = vmatprep.subr.bf16.mxu0 %v251_v6 }
   0x5   :  { %v221_v7 = vld [vmem:[%s329_s2] ss:$0 sm:$0xff]  ;;  %v153_v26 = vsub.s32 0, %v152_v25  ;;  %v157_v28 = vsub.s32 1, %v152_v25 }
   0x6   :  { %236 = vmatmul.mubr.msk.bf16.vlgmr.msra.gmra.mrb[0].mxu0 %vm36_vm2, %v27_v3  ;;  %v223_v16 = vld [vmem:[%s330_s4] ss:$0 sm:$0xff] }
   0x7   :  { %175 = vmatpush1.bf16.msra.mxu0 %v249_v5  ;;  %206 = vmatprep.mubr.bf16.mxu0 %v254_v15  ;;  %v149_v27 = vld [vmem:[%s331_s6] sm:$0x3] }
   0x8   :  { %v154_v29 = vrot.slane %v149_v27, %v153_v26  ;;  %v158_v30 = vrot.slane %v149_v27, %v157_v28 }
  0xd9   :  { %v78_v8 = vpop.f32.mrb[0].mxu0 }
  0xda   :  { %v79_v9 = vadd.f32 %v221_v7, %v78_v8  ;;  %v237_v10 = vpop.f32.mrb[1].mxu0 }
  0xdb   :  { %v81_v11 = vpop.f32.mrb[2].mxu0 }
  0xdc   :  { %v84_v12 = vmax.f32 %v79_v9, 0.0  ;;  %v238_v13 = vpop.f32.mrb[3].mxu0 }
  0xde   :  { %v85_v14 = vpack.c.bf16 %v84_v12, %v84_v12 }
  0xe0   :  { %242 = vmatmul.mubr.msk.bf16.vlgmr.msra.gmra.mrb[0].mxu1 %vm101_vm3, %v85_v14 }
 0x1b3   :  { %v139_v17 = vpop.f32.mrb[0].mxu1 }
 0x1b4   :  { %v140_v18 = vadd.f32 %v223_v16, %v139_v17  ;;  %v243_v19 = vpop.f32.mrb[1].mxu1 }
 0x1b5   :  { %v142_v20 = vpop.f32.mrb[2].mxu1 }
 0x1b6   :  { %v145_v21 = vmax.f32 %v140_v18, 0.0  ;;  %v244_v22 = vpop.f32.mrb[3].mxu1 }
 0x1b8   :  { %v146_v23 = vpack.c.bf16 %v145_v21, %v145_v21 }
 0x1ba   :  { %228 = vmatmul.mubr.msk.bf16.vlgmr.msra.gmra.mrb[4].mxu0 %vm101_vm3, %v146_v23 }
 0x28d   :  { %v208_v31 = vpop.f32.mrb[4].mxu0 }
 0x28e   :  { %v209_v32 = vadd.f32 %v208_v31, %v154_v29  ;;  %v210_v33 = vpop.f32.mrb[5].mxu0 }
 0x28f   :  { %v211_v34 = vadd.f32 %v210_v33, %v158_v30  ;;  %v212_v35 = vpop.f32.mrb[6].mxu0 }
 0x290   :  { %215 = vst [vmem:[%s332_s7] sm:$0xff] %v209_v32  ;;  %v213_v36 = vpop.f32.mrb[7].mxu0 }
 0x291   :  { %216 = vst [vmem:[%s332_s7 + $0x8] sm:$0xff] %v211_v34 }

// kernel: munit_trainer1_forward.40
= control target key start
LH: loop header
LB: loop body
LE: loop exit
PB: predicated region body
PF: predicated region fallthrough
CT: control target
= control target key end

     0   :  { %s651_s12 = smov 0   ;;  %s729_s0 = inlined_call_operand.vmem [shape: bf16[32,288], index: 0, kind: input, shape index: {}]   ;;  %s730_s1 = inlined_call_operand.vmem [shape: bf16[288,128], index: 1, kind: input, shape index: {}]   ;;  %s731_s2 = inlined_call_operand.vmem [shape: f32[1,128], index: 2, kind: input, shape index: {}]   ;;  %s732_s3 = inlined_call_operand.vmem [shape: f32[32,128], index: 3, kind: output, shape index: {}]  }
   0x1 LB: > { %s519_s13 = sadd.s32 4294967295, %s627_s12   ;;  %p523_p0 = scmp.ge.s32.totalorder %s627_s12, 1  ;;  %s627_s12 = sphi %s651_s12, %s13_s12  }
   0x2   : > { %p139_p1 = scmp.lt.s32.totalorder %s627_s12, 3 }
   0x4   : > { %p140_p2 = pnand %p523_p0, %p139_p1 }
   0x5   : > { %v597_v0 = vld [vmem:[%s730_s1 + $0x40] sm:$0xff] (!%p140_p2)   ;;  %v629_v2 = vmov (!%p140_p2), 0.0   ;;  %s524_s18 = sshll.u32 (!%p140_p2), %s519_s13, 1  ;;  %v599_v3 = vld [vmem:[%s730_s1 + $0x48] sm:$0xff] (!%p140_p2)   ;;  %v601_v5 = vld [vmem:[%s730_s1 + $0x50] sm:$0xff] (!%p140_p2)   ;;  %vm630_vm0 = vmmov (!%p140_p2), 0  }
   0x6   : > { %143 = sbr.rel (%p140_p2) target bundleno = 313 (0x139), region = 32  ;;  %v598_v1 = vld [vmem:[%s730_s1] sm:$0xff] (!%p140_p2)   ;;  %578 = vmatprep.subr.bf16.mxu1 (!%p140_p2), %v629_v2  ;;  %553 = vmatprep.subr.bf16.mxu0 (!%p140_p2), %v597_v0  ;;  %p165_p3 = scmp.lt.s32.totalorder (!%p140_p2), %s524_s18, 3  ;;  %v600_v4 = vld [vmem:[%s730_s1 + $0x8] sm:$0xff] (!%p140_p2)   ;;  %v602_v6 = vld [vmem:[%s730_s1 + $0x10] sm:$0xff] (!%p140_p2)   ;;  %vm348_vm1 = vcmask (!%p140_p2), 261120  }
   0x7   : > { %554 = vmatpush3.bf16.msra.mxu0 (!%p140_p2), %v598_v1  ;;  %582 = vmatprep.mubr.msk.bf16.mxu1 (!%p140_p2), %vm630_vm0, %v629_v2  ;;  %v603_v7 = vld [vmem:[%s730_s1 + $0x58] sm:$0xff] (!%p140_p2)   ;;  %v605_v9 = vld [vmem:[%s730_s1 + $0x60] sm:$0xff] (!%p140_p2)   ;;  %v607_v12 = vld [vmem:[%s730_s1 + $0x68] sm:$0xff] (!%p140_p2)  }
   0x8   : > { %555 = vmatprep.subr.bf16.mxu0 (!%p140_p2), %v599_v3  ;;  %v604_v8 = vld [vmem:[%s730_s1 + $0x18] sm:$0xff] (!%p140_p2)   ;;  %v611_v10 = vld [vmem:[%s730_s1 + $0x80] sm:$0xff] (!%p140_p2)   ;;  %v608_v13 = vld [vmem:[%s730_s1 + $0x28] sm:$0xff] (!%p140_p2)  }
   0x9   : > { %v606_v11 = vld [vmem:[%s730_s1 + $0x20] sm:$0xff] (!%p140_p2)   ;;  %579 = vmatpush3.bf16.msra.mxu1 (!%p140_p2), %v611_v10  ;;  %v617_v15 = vld [vmem:[%s730_s1 + $0x88] sm:$0xff] (!%p140_p2)   ;;  %v609_v16 = vld [vmem:[%s730_s1 + $0x70] sm:$0xff] (!%p140_p2)  }
   0xa   : > { %580 = vmatprep.subr.bf16.mxu1 (!%p140_p2), %v629_v2  ;;  %v610_v18 = vld [vmem:[%s730_s1 + $0x30] sm:$0xff] (!%p140_p2)   ;;  %v612_v19 = vld [vmem:[%s730_s1 + $0x78] sm:$0xff] (!%p140_p2)   ;;  %v528_v28 = vld [vmem:[%s731_s2] ss:$0 sm:$0xff] (!%p140_p2) }
   0xb   : > { %556 = vmatpush3.bf16.msra.mxu0 (!%p140_p2), %v600_v4  ;;  %v613_v20 = vld [vmem:[%s730_s1 + $0x38] sm:$0xff] (!%p140_p2)  }
   0xc   : > { %557 = vmatprep.subr.bf16.mxu0 (!%p140_p2), %v601_v5 }
   0xd   : > { %s734_s18 = smov (!%p165_p3, %s524_s18), 3  ;;  %581 = vmatpush3.bf16.msra.mxu1 %v617_v15 }
   0xe   : > { %s586_s4 = smul.u32 12, %s734_s18  ;;  %s527_s5 = sshll.u32 %s734_s18, 3 }
   0xf   : > { %558 = vmatpush3.bf16.msra.mxu0 %v602_v6  ;;  %s175_s8 = scalar_lea.vmem %s732_s3, %s527_s5 }
  0x10   : > { %559 = vmatprep.subr.bf16.mxu0 %v603_v7  ;;  %s169_s14 = scalar_lea.vmem %s729_s0, %s586_s4 }
  0x11   : > { %v616_v14 = vld [vmem:[%s169_s14 + $0x4] ss:$12 sps:$4 sm:$0xff]   ;;  %v618_v17 = vld [vmem:[%s169_s14 + $0x8] ss:$12 sps:$4 sm:$0xff]   ;;  %v614_v21 = vld [vmem:[%s169_s14] ss:$12 sps:$4 sm:$0xff]  }
  0x12   : > { %384 = vmatprep.mubr.bf16.mxu0 %v616_v14  ;;  %583 = vmatmul.mubr.msk.bf16.vlgmr.msra.gmra.mrb[0].mxu1 %vm348_vm1, %v618_v17 }
  0x13   : > { %560 = vmatpush3.bf16.msra.mxu0 %v604_v8 }
  0x14   : > { %561 = vmatprep.subr.bf16.mxu0 %v605_v9 }
  0x17   : > { %562 = vmatpush3.bf16.msra.mxu0 %v606_v11 }
  0x18   : > { %563 = vmatprep.subr.bf16.mxu0 %v607_v12 }
  0x1b   : > { %564 = vmatpush3.bf16.msra.mxu0 %v608_v13 }
  0x1c   : > { %565 = vmatprep.subr.bf16.mxu0 %v609_v16 }
  0x1f   : > { %566 = vmatpush3.bf16.msra.mxu0 %v610_v18 }
  0x20   : > { %567 = vmatprep.subr.bf16.mxu0 %v612_v19 }
  0x23   : > { %568 = vmatpush3.bf16.msra.mxu0 %v613_v20 }
  0x26   : > { %385 = vmatmul.mubr.bf16.vlgmr.msra.gmra.mrb[0].mxu0 %v614_v21 }
  0xe5   : > { %v427_v22 = vpop.f32.mrb[0].mxu1 }
  0xe6   : > { %v584_v23 = vpop.f32.mrb[1].mxu1 }
  0xe7   : > { %v430_v24 = vpop.f32.mrb[2].mxu1 }
  0xe8   : > { %v585_v25 = vpop.f32.mrb[3].mxu1 }
  0xf9   : > { %v569_v26 = vpop.f32.mrb[0].mxu0 }
  0xfa   : > { %v570_v27 = vpop.f32.mrb[1].mxu0 }
  0xfb   : > { %v571_v29 = vadd.f32 %v570_v27, %v569_v26  ;;  %v572_v30 = vpop.f32.mrb[2].mxu0 }
  0xfc   : > { %v573_v31 = vpop.f32.mrb[3].mxu0 }
  0xfd   : > { %v387_v32 = vadd.f32 %v571_v29, %v528_v28  ;;  %v574_v33 = vadd.f32 %v573_v31, %v572_v30 }
  0xff   : > { %v428_v34 = vadd.f32 %v427_v22, %v387_v32  ;;  %v390_v35 = vadd.f32 %v574_v33, %v528_v28 }
 0x101   : > { %v431_v36 = vadd.f32 %v430_v24, %v390_v35 }
 0x103   : > { %v434_v37 = vadd.f32 %v431_v36, %v428_v34 }
 0x105   : > { %v435_v38 = vrot.slane %v434_v37, 4 }
 0x107   : > { %v436_v39 = vadd.f32 %v435_v38, %v434_v37 }
 0x109   : > { %v437_v40 = vrot.slane %v436_v39, 2 }
 0x10b   : > { %v438_v41 = vadd.f32 %v437_v40, %v436_v39 }
 0x10d   : > { %v439_v42 = vrot.slane %v438_v41, 1 }
 0x10f   : > { %v440_v43 = vadd.f32 %v439_v42, %v438_v41 }
 0x111   : > { %v442_v44 = vmul.f32 0.0625, %v440_v43 }
 0x113   : > { %v443_v45 = vsub.f32 %v428_v34, %v442_v44  ;;  %v444_v46 = vsub.f32 %v431_v36, %v442_v44 }
 0x115   : > { %v445_v47 = vmul.f32 %v443_v45, %v443_v45  ;;  %v446_v48 = vmul.f32 %v444_v46, %v444_v46 }
 0x117   : > { %v447_v49 = vadd.f32 %v446_v48, %v445_v47 }
 0x119   : > { %v448_v50 = vrot.slane %v447_v49, 4 }
 0x11b   : > { %v449_v51 = vadd.f32 %v448_v50, %v447_v49 }
 0x11d   : > { %v450_v52 = vrot.slane %v449_v51, 2 }
 0x11f   : > { %v451_v53 = vadd.f32 %v450_v52, %v449_v51 }
 0x121   : > { %v452_v54 = vrot.slane %v451_v53, 1 }
 0x123   : > { %v453_v55 = vadd.f32 %v452_v54, %v451_v53 }
 0x125   : > { %v454_v56 = vmul.f32 0.0625, %v453_v55 }
 0x127   : > { %v455_v57 = vadd.f32 1e-05, %v454_v56 }
 0x129   : > { %619 = vrsqrt.f32 %v455_v57 }
 0x133   : > { %v620_v58 = vpop.eup %619 }
 0x134   : > { %v457_v59 = vmul.f32 %v620_v58, %v443_v45  ;;  %v458_v60 = vmul.f32 %v620_v58, %v444_v46 }
 0x136   : > { %v459_v61 = vmax.f32 %v457_v59, 0.0  ;;  %v460_v62 = vmax.f32 %v458_v60, 0.0 }
 0x138   : > { %461 = vst [vmem:[%s175_s8] sm:$0xff] %v459_v61  ;;  %462 = vst [vmem:[%s175_s8 + $0x8] sm:$0xff] %v460_v62 }
 0x139 PF: > { %s13_s12 = sadd.s32 1, %s627_s12  }
 0x13a   : > { %p10_p4 = scmp.ge.s32.totalorder %s13_s12, 4  }
 0x13c   :  { %12 = sbr.rel (!%p10_p4) target bundleno = 1 (0x1), region = 62 }

// kernel: munit_trainer1_forward.45
= control target key start
LH: loop header
LB: loop body
LE: loop exit
PB: predicated region body
PF: predicated region fallthrough
CT: control target
= control target key end

     0   :  { %s781_s18 = smov 0   ;;  %s870_s0 = inlined_call_operand.vmem [shape: bf16[32,288], index: 0, kind: input, shape index: {}]   ;;  %s871_s1 = inlined_call_operand.vmem [shape: bf16[288,128], index: 1, kind: input, shape index: {}]   ;;  %s872_s2 = inlined_call_operand.vmem [shape: f32[1,128], index: 2, kind: input, shape index: {}]   ;;  %s873_s3 = inlined_call_operand.vmem [shape: f32[2,1,128], index: 3, kind: input, shape index: {}]   ;;  %s874_s4 = inlined_call_operand.vmem [shape: f32[2,1,128], index: 4, kind: input, shape index: {}]   ;;  %s875_s5 = inlined_call_operand.vmem [shape: f32[32,128], index: 5, kind: output, shape index: {}]  }
   0x1 LB: > { %s787_s19 = sadd.s32 4294967295, %s747_s18   ;;  %p641_p0 = scmp.ge.s32.totalorder %s747_s18, 1  ;;  %s747_s18 = sphi %s781_s18, %s15_s18  }
   0x2   : > { %p205_p1 = scmp.lt.s32.totalorder %s747_s18, 3 }
   0x4   : > { %p206_p2 = pnand %p641_p0, %p205_p1 }
   0x5   : > { %v717_v0 = vld [vmem:[%s871_s1 + $0x40] sm:$0xff] (!%p206_p2)   ;;  %v749_v2 = vmov (!%p206_p2), 0.0   ;;  %s642_s24 = sshll.u32 (!%p206_p2), %s787_s19, 1  ;;  %v719_v3 = vld [vmem:[%s871_s1 + $0x48] sm:$0xff] (!%p206_p2)   ;;  %v721_v5 = vld [vmem:[%s871_s1 + $0x50] sm:$0xff] (!%p206_p2)   ;;  %vm750_vm0 = vmmov (!%p206_p2), 0  }
   0x6   : > { %209 = sbr.rel (%p206_p2) target bundleno = 317 (0x13d), region = 40  ;;  %v718_v1 = vld [vmem:[%s871_s1] sm:$0xff] (!%p206_p2)   ;;  %698 = vmatprep.subr.bf16.mxu1 (!%p206_p2), %v749_v2  ;;  %673 = vmatprep.subr.bf16.mxu0 (!%p206_p2), %v717_v0  ;;  %p241_p3 = scmp.lt.s32.totalorder (!%p206_p2), %s642_s24, 3  ;;  %v720_v4 = vld [vmem:[%s871_s1 + $0x8] sm:$0xff] (!%p206_p2)   ;;  %v722_v6 = vld [vmem:[%s871_s1 + $0x10] sm:$0xff] (!%p206_p2)   ;;  %vm430_vm1 = vcmask (!%p206_p2), 261120  }
   0x7   : > { %674 = vmatpush3.bf16.msra.mxu0 (!%p206_p2), %v718_v1  ;;  %702 = vmatprep.mubr.msk.bf16.mxu1 (!%p206_p2), %vm750_vm0, %v749_v2  ;;  %v723_v7 = vld [vmem:[%s871_s1 + $0x58] sm:$0xff] (!%p206_p2)   ;;  %v725_v9 = vld [vmem:[%s871_s1 + $0x60] sm:$0xff] (!%p206_p2)   ;;  %v727_v12 = vld [vmem:[%s871_s1 + $0x68] sm:$0xff] (!%p206_p2)   ;;  %p247_p4 = scmp.lt.s32.totalorder (!%p206_p2), %s787_s19, 1 }
   0x8   : > { %675 = vmatprep.subr.bf16.mxu0 (!%p206_p2), %v719_v3  ;;  %v724_v8 = vld [vmem:[%s871_s1 + $0x18] sm:$0xff] (!%p206_p2)   ;;  %v731_v10 = vld [vmem:[%s871_s1 + $0x80] sm:$0xff] (!%p206_p2)   ;;  %v728_v13 = vld [vmem:[%s871_s1 + $0x28] sm:$0xff] (!%p206_p2)  }
   0x9   : > { %v726_v11 = vld [vmem:[%s871_s1 + $0x20] sm:$0xff] (!%p206_p2)   ;;  %699 = vmatpush3.bf16.msra.mxu1 (!%p206_p2), %v731_v10  ;;  %v737_v15 = vld [vmem:[%s871_s1 + $0x88] sm:$0xff] (!%p206_p2)   ;;  %v729_v16 = vld [vmem:[%s871_s1 + $0x70] sm:$0xff] (!%p206_p2)  }
   0xa   : > { %700 = vmatprep.subr.bf16.mxu1 (!%p206_p2), %v749_v2  ;;  %v730_v18 = vld [vmem:[%s871_s1 + $0x30] sm:$0xff] (!%p206_p2)   ;;  %v732_v19 = vld [vmem:[%s871_s1 + $0x78] sm:$0xff] (!%p206_p2)   ;;  %v646_v28 = vld [vmem:[%s872_s2] ss:$0 sm:$0xff] (!%p206_p2) }
   0xb   : > { %676 = vmatpush3.bf16.msra.mxu0 (!%p206_p2), %v720_v4  ;;  %v733_v20 = vld [vmem:[%s871_s1 + $0x38] sm:$0xff] (!%p206_p2)  }
   0xc   : > { %677 = vmatprep.subr.bf16.mxu0 (!%p206_p2), %v721_v5 }
   0xd   : > { %s877_s24 = smov (!%p241_p3, %s642_s24), 3  ;;  %701 = vmatpush3.bf16.msra.mxu1 %v737_v15  ;;  %s879_s19 = smov (!%p247_p4, %s787_s19), 1 }
   0xe   : > { %s706_s12 = smul.u32 12, %s877_s24  ;;  %s249_s20 = scalar_lea.vmem %s873_s3, %s879_s19 }
   0xf   : > { %678 = vmatpush3.bf16.msra.mxu0 %v722_v6  ;;  %v669_v59 = vld [vmem:[%s249_s20] ss:$0 sm:$0xff]  ;;  %s645_s25 = sshll.u32 %s877_s24, 3 }
  0x10   : > { %679 = vmatprep.subr.bf16.mxu0 %v723_v7  ;;  %s245_s23 = scalar_lea.vmem %s870_s0, %s706_s12  ;;  %s257_s28 = scalar_lea.vmem %s875_s5, %s645_s25 }
  0x11   : > { %v736_v14 = vld [vmem:[%s245_s23 + $0x4] ss:$12 sps:$4 sm:$0xff]   ;;  %v738_v17 = vld [vmem:[%s245_s23 + $0x8] ss:$12 sps:$4 sm:$0xff]   ;;  %v734_v21 = vld [vmem:[%s245_s23] ss:$12 sps:$4 sm:$0xff]   ;;  %s252_s23 = scalar_lea.vmem %s874_s4, %s879_s19 }
  0x12   : > { %466 = vmatprep.mubr.bf16.mxu0 %v736_v14  ;;  %703 = vmatmul.mubr.msk.bf16.vlgmr.msra.gmra.mrb[0].mxu1 %vm430_vm1, %v738_v17  ;;  %v670_v62 = vld [vmem:[%s252_s23] ss:$0 sm:$0xff] }
  0x13   : > { %680 = vmatpush3.bf16.msra.mxu0 %v724_v8 }
  0x14   : > { %681 = vmatprep.subr.bf16.mxu0 %v725_v9 }
  0x17   : > { %682 = vmatpush3.bf16.msra.mxu0 %v726_v11 }
  0x18   : > { %683 = vmatprep.subr.bf16.mxu0 %v727_v12 }
  0x1b   : > { %684 = vmatpush3.bf16.msra.mxu0 %v728_v13 }
  0x1c   : > { %685 = vmatprep.subr.bf16.mxu0 %v729_v16 }
  0x1f   : > { %686 = vmatpush3.bf16.msra.mxu0 %v730_v18 }
  0x20   : > { %687 = vmatprep.subr.bf16.mxu0 %v732_v19 }
  0x23   : > { %688 = vmatpush3.bf16.msra.mxu0 %v733_v20 }
  0x26   : > { %467 = vmatmul.mubr.bf16.vlgmr.msra.gmra.mrb[0].mxu0 %v734_v21 }
  0xe5   : > { %v509_v22 = vpop.f32.mrb[0].mxu1 }
  0xe6   : > { %v704_v23 = vpop.f32.mrb[1].mxu1 }
  0xe7   : > { %v512_v24 = vpop.f32.mrb[2].mxu1 }
  0xe8   : > { %v705_v25 = vpop.f32.mrb[3].mxu1 }
  0xf9   : > { %v689_v26 = vpop.f32.mrb[0].mxu0 }
  0xfa   : > { %v690_v27 = vpop.f32.mrb[1].mxu0 }
  0xfb   : > { %v691_v29 = vadd.f32 %v690_v27, %v689_v26  ;;  %v692_v30 = vpop.f32.mrb[2].mxu0 }
  0xfc   : > { %v693_v31 = vpop.f32.mrb[3].mxu0 }
  0xfd   : > { %v469_v32 = vadd.f32 %v691_v29, %v646_v28  ;;  %v694_v33 = vadd.f32 %v693_v31, %v692_v30 }
  0xff   : > { %v510_v34 = vadd.f32 %v509_v22, %v469_v32  ;;  %v472_v35 = vadd.f32 %v694_v33, %v646_v28 }
 0x101   : > { %v513_v36 = vadd.f32 %v512_v24, %v472_v35 }
 0x103   : > { %v516_v37 = vadd.f32 %v513_v36, %v510_v34 }
 0x105   : > { %v517_v38 = vrot.slane %v516_v37, 4 }
 0x107   : > { %v518_v39 = vadd.f32 %v517_v38, %v516_v37 }
 0x109   : > { %v519_v40 = vrot.slane %v518_v39, 2 }
 0x10b   : > { %v520_v41 = vadd.f32 %v519_v40, %v518_v39 }
 0x10d   : > { %v521_v42 = vrot.slane %v520_v41, 1 }
 0x10f   : > { %v522_v43 = vadd.f32 %v521_v42, %v520_v41 }
 0x111   : > { %v524_v44 = vmul.f32 0.0625, %v522_v43 }
 0x113   : > { %v525_v45 = vsub.f32 %v510_v34, %v524_v44  ;;  %v526_v46 = vsub.f32 %v513_v36, %v524_v44 }
 0x115   : > { %v527_v47 = vmul.f32 %v525_v45, %v525_v45  ;;  %v528_v48 = vmul.f32 %v526_v46, %v526_v46 }
 0x117   : > { %v529_v49 = vadd.f32 %v528_v48, %v527_v47 }
 0x119   : > { %v530_v50 = vrot.slane %v529_v49, 4 }
 0x11b   : > { %v531_v51 = vadd.f32 %v530_v50, %v529_v49 }
 0x11d   : > { %v532_v52 = vrot.slane %v531_v51, 2 }
 0x11f   : > { %v533_v53 = vadd.f32 %v532_v52, %v531_v51 }
 0x121   : > { %v534_v54 = vrot.slane %v533_v53, 1 }
 0x123   : > { %v535_v55 = vadd.f32 %v534_v54, %v533_v53 }
 0x125   : > { %v536_v56 = vmul.f32 0.0625, %v535_v55 }
 0x127   : > { %v537_v57 = vadd.f32 1e-05, %v536_v56 }
 0x129   : > { %739 = vrsqrt.f32 %v537_v57 }
 0x133   : > { %v740_v58 = vpop.eup %739 }
 0x134   : > { %v539_v60 = vmul.f32 %v740_v58, %v525_v45  ;;  %v540_v61 = vmul.f32 %v740_v58, %v526_v46 }
 0x136   : > { %v549_v63 = vmul.f32 %v669_v59, %v539_v60  ;;  %v550_v0 = vmul.f32 %v669_v59, %v540_v61 }
 0x138   : > { %v557_v1 = vadd.f32 %v670_v62, %v549_v63  ;;  %v558_v2 = vadd.f32 %v670_v62, %v550_v0 }
 0x13a   : > { %v559_v3 = vmax.f32 %v557_v1, 0.0  ;;  %v560_v4 = vmax.f32 %v558_v2, 0.0 }
 0x13c   : > { %561 = vst [vmem:[%s257_s28] sm:$0xff] %v559_v3  ;;  %562 = vst [vmem:[%s257_s28 + $0x8] sm:$0xff] %v560_v4 }
 0x13d PF: > { %s15_s18 = sadd.s32 1, %s747_s18  }
 0x13e   : > { %p12_p5 = scmp.ge.s32.totalorder %s15_s18, 4  }
 0x140   :  { %14 = sbr.rel (!%p12_p5) target bundleno = 1 (0x1), region = 76 }

// kernel: munit_trainer1_forward.46
= control target key start
LH: loop header
LB: loop body
LE: loop exit
PB: predicated region body
PF: predicated region fallthrough
CT: control target
= control target key end

     0   :  { %s851_s21 = smov 0   ;;  %s943_s0 = inlined_call_operand.vmem [shape: bf16[32,288], index: 0, kind: input, shape index: {}]   ;;  %s944_s1 = inlined_call_operand.vmem [shape: bf16[288,128], index: 1, kind: input, shape index: {}]   ;;  %s945_s2 = inlined_call_operand.vmem [shape: f32[1,128], index: 2, kind: input, shape index: {}]   ;;  %s946_s3 = inlined_call_operand.vmem [shape: f32[2,1,128], index: 3, kind: input, shape index: {}]   ;;  %s947_s4 = inlined_call_operand.vmem [shape: f32[2,1,128], index: 4, kind: input, shape index: {}]   ;;  %s948_s5 = inlined_call_operand.vmem [shape: f32[32,128], index: 5, kind: input, shape index: {}]   ;;  %s949_s6 = inlined_call_operand.vmem [shape: f32[32,128], index: 6, kind: output, shape index: {}]  }
   0x1 LB: > { %s857_s22 = sadd.s32 4294967295, %s812_s21   ;;  %p704_p0 = scmp.ge.s32.totalorder %s812_s21, 1  ;;  %s812_s21 = sphi %s851_s21, %s16_s21  }
   0x2   : > { %p241_p1 = scmp.lt.s32.totalorder %s812_s21, 3 }
   0x4   : > { %p242_p2 = pnand %p704_p0, %p241_p1 }
   0x5   : > { %v782_v0 = vld [vmem:[%s944_s1 + $0x40] sm:$0xff] (!%p242_p2)   ;;  %v814_v2 = vmov (!%p242_p2), 0.0   ;;  %s705_s27 = sshll.u32 (!%p242_p2), %s857_s22, 1  ;;  %v784_v3 = vld [vmem:[%s944_s1 + $0x48] sm:$0xff] (!%p242_p2)   ;;  %v786_v5 = vld [vmem:[%s944_s1 + $0x50] sm:$0xff] (!%p242_p2)   ;;  %vm815_vm0 = vmmov (!%p242_p2), 0  }
   0x6   : > { %245 = sbr.rel (%p242_p2) target bundleno = 317 (0x13d), region = 44  ;;  %v783_v1 = vld [vmem:[%s944_s1] sm:$0xff] (!%p242_p2)   ;;  %763 = vmatprep.subr.bf16.mxu1 (!%p242_p2), %v814_v2  ;;  %738 = vmatprep.subr.bf16.mxu0 (!%p242_p2), %v782_v0  ;;  %p284_p3 = scmp.lt.s32.totalorder (!%p242_p2), %s705_s27, 3  ;;  %v785_v4 = vld [vmem:[%s944_s1 + $0x8] sm:$0xff] (!%p242_p2)   ;;  %v787_v6 = vld [vmem:[%s944_s1 + $0x10] sm:$0xff] (!%p242_p2)   ;;  %vm479_vm1 = vcmask (!%p242_p2), 261120  }
   0x7   : > { %739 = vmatpush3.bf16.msra.mxu0 (!%p242_p2), %v783_v1  ;;  %767 = vmatprep.mubr.msk.bf16.mxu1 (!%p242_p2), %vm815_vm0, %v814_v2  ;;  %v788_v7 = vld [vmem:[%s944_s1 + $0x58] sm:$0xff] (!%p242_p2)   ;;  %v790_v9 = vld [vmem:[%s944_s1 + $0x60] sm:$0xff] (!%p242_p2)   ;;  %v792_v12 = vld [vmem:[%s944_s1 + $0x68] sm:$0xff] (!%p242_p2)   ;;  %p290_p4 = scmp.lt.s32.totalorder (!%p242_p2), %s857_s22, 1 }
   0x8   : > { %740 = vmatprep.subr.bf16.mxu0 (!%p242_p2), %v784_v3  ;;  %v789_v8 = vld [vmem:[%s944_s1 + $0x18] sm:$0xff] (!%p242_p2)   ;;  %v796_v10 = vld [vmem:[%s944_s1 + $0x80] sm:$0xff] (!%p242_p2)   ;;  %v793_v13 = vld [vmem:[%s944_s1 + $0x28] sm:$0xff] (!%p242_p2)  }
   0x9   : > { %v791_v11 = vld [vmem:[%s944_s1 + $0x20] sm:$0xff] (!%p242_p2)   ;;  %764 = vmatpush3.bf16.msra.mxu1 (!%p242_p2), %v796_v10  ;;  %v802_v15 = vld [vmem:[%s944_s1 + $0x88] sm:$0xff] (!%p242_p2)   ;;  %v794_v16 = vld [vmem:[%s944_s1 + $0x70] sm:$0xff] (!%p242_p2)  }
   0xa   : > { %765 = vmatprep.subr.bf16.mxu1 (!%p242_p2), %v814_v2  ;;  %v795_v18 = vld [vmem:[%s944_s1 + $0x30] sm:$0xff] (!%p242_p2)   ;;  %v797_v19 = vld [vmem:[%s944_s1 + $0x78] sm:$0xff] (!%p242_p2)   ;;  %v711_v28 = vld [vmem:[%s945_s2] ss:$0 sm:$0xff] (!%p242_p2) }
   0xb   : > { %741 = vmatpush3.bf16.msra.mxu0 (!%p242_p2), %v785_v4  ;;  %v798_v20 = vld [vmem:[%s944_s1 + $0x38] sm:$0xff] (!%p242_p2)  }
   0xc   : > { %742 = vmatprep.subr.bf16.mxu0 (!%p242_p2), %v786_v5 }
   0xd   : > { %s951_s27 = smov (!%p284_p3, %s705_s27), 3  ;;  %766 = vmatpush3.bf16.msra.mxu1 %v802_v15  ;;  %s953_s22 = smov (!%p290_p4, %s857_s22), 1 }
   0xe   : > { %s771_s16 = smul.u32 12, %s951_s27  ;;  %s292_s25 = scalar_lea.vmem %s946_s3, %s953_s22 }
   0xf   : > { %743 = vmatpush3.bf16.msra.mxu0 %v787_v6  ;;  %s708_s26 = sshll.u32 %s951_s27, 3  ;;  %s295_s30 = scalar_lea.vmem %s947_s4, %s953_s22  ;;  %v734_v59 = vld [vmem:[%s292_s25] ss:$0 sm:$0xff] }
  0x10   : > { %744 = vmatprep.subr.bf16.mxu0 %v788_v7  ;;  %s288_s28 = scalar_lea.vmem %s943_s0, %s771_s16  ;;  %s300_s9 = scalar_lea.vmem %s948_s5, %s708_s26  ;;  %v735_v62 = vld [vmem:[%s295_s30] ss:$0 sm:$0xff] }
  0x11   : > { %v801_v14 = vld [vmem:[%s288_s28 + $0x4] ss:$12 sps:$4 sm:$0xff]   ;;  %v803_v17 = vld [vmem:[%s288_s28 + $0x8] ss:$12 sps:$4 sm:$0xff]   ;;  %v799_v21 = vld [vmem:[%s288_s28] ss:$12 sps:$4 sm:$0xff]   ;;  %s306_s11 = scalar_lea.vmem %s949_s6, %s708_s26 }
  0x12   : > { %515 = vmatprep.mubr.bf16.mxu0 %v801_v14  ;;  %768 = vmatmul.mubr.msk.bf16.vlgmr.msra.gmra.mrb[0].mxu1 %vm479_vm1, %v803_v17  ;;  %v608_v1 = vld [vmem:[%s300_s9] sm:$0xff]  ;;  %v609_v2 = vld [vmem:[%s300_s9 + $0x8] sm:$0xff] }
  0x13   : > { %745 = vmatpush3.bf16.msra.mxu0 %v789_v8 }
  0x14   : > { %746 = vmatprep.subr.bf16.mxu0 %v790_v9 }
  0x17   : > { %747 = vmatpush3.bf16.msra.mxu0 %v791_v11 }
  0x18   : > { %748 = vmatprep.subr.bf16.mxu0 %v792_v12 }
  0x1b   : > { %749 = vmatpush3.bf16.msra.mxu0 %v793_v13 }
  0x1c   : > { %750 = vmatprep.subr.bf16.mxu0 %v794_v16 }
  0x1f   : > { %751 = vmatpush3.bf16.msra.mxu0 %v795_v18 }
  0x20   : > { %752 = vmatprep.subr.bf16.mxu0 %v797_v19 }
  0x23   : > { %753 = vmatpush3.bf16.msra.mxu0 %v798_v20 }
  0x26   : > { %516 = vmatmul.mubr.bf16.vlgmr.msra.gmra.mrb[0].mxu0 %v799_v21 }
  0xe5   : > { %v558_v22 = vpop.f32.mrb[0].mxu1 }
  0xe6   : > { %v769_v23 = vpop.f32.mrb[1].mxu1 }
  0xe7   : > { %v561_v24 = vpop.f32.mrb[2].mxu1 }
  0xe8   : > { %v770_v25 = vpop.f32.mrb[3].mxu1 }
  0xf9   : > { %v754_v26 = vpop.f32.mrb[0].mxu0 }
  0xfa   : > { %v755_v27 = vpop.f32.mrb[1].mxu0 }
  0xfb   : > { %v756_v29 = vadd.f32 %v755_v27, %v754_v26  ;;  %v757_v30 = vpop.f32.mrb[2].mxu0 }
  0xfc   : > { %v758_v31 = vpop.f32.mrb[3].mxu0 }
  0xfd   : > { %v518_v32 = vadd.f32 %v756_v29, %v711_v28  ;;  %v759_v33 = vadd.f32 %v758_v31, %v757_v30 }
  0xff   : > { %v559_v34 = vadd.f32 %v558_v22, %v518_v32  ;;  %v521_v35 = vadd.f32 %v759_v33, %v711_v28 }
 0x101   : > { %v562_v36 = vadd.f32 %v561_v24, %v521_v35 }
 0x103   : > { %v565_v37 = vadd.f32 %v562_v36, %v559_v34 }
 0x105   : > { %v566_v38 = vrot.slane %v565_v37, 4 }
 0x107   : > { %v567_v39 = vadd.f32 %v566_v38, %v565_v37 }
 0x109   : > { %v568_v40 = vrot.slane %v567_v39, 2 }
 0x10b   : > { %v569_v41 = vadd.f32 %v568_v40, %v567_v39 }
 0x10d   : > { %v570_v42 = vrot.slane %v569_v41, 1 }
 0x10f   : > { %v571_v43 = vadd.f32 %v570_v42, %v569_v41 }
 0x111   : > { %v573_v44 = vmul.f32 0.0625, %v571_v43 }
 0x113   : > { %v574_v45 = vsub.f32 %v559_v34, %v573_v44  ;;  %v575_v46 = vsub.f32 %v562_v36, %v573_v44 }
 0x115   : > { %v576_v47 = vmul.f32 %v574_v45, %v574_v45  ;;  %v577_v48 = vmul.f32 %v575_v46, %v575_v46 }
 0x117   : > { %v578_v49 = vadd.f32 %v577_v48, %v576_v47 }
 0x119   : > { %v579_v50 = vrot.slane %v578_v49, 4 }
 0x11b   : > { %v580_v51 = vadd.f32 %v579_v50, %v578_v49 }
 0x11d   : > { %v581_v52 = vrot.slane %v580_v51, 2 }
 0x11f   : > { %v582_v53 = vadd.f32 %v581_v52, %v580_v51 }
 0x121   : > { %v583_v54 = vrot.slane %v582_v53, 1 }
 0x123   : > { %v584_v55 = vadd.f32 %v583_v54, %v582_v53 }
 0x125   : > { %v585_v56 = vmul.f32 0.0625, %v584_v55 }
 0x127   : > { %v586_v57 = vadd.f32 1e-05, %v585_v56 }
 0x129   : > { %804 = vrsqrt.f32 %v586_v57 }
 0x133   : > { %v805_v58 = vpop.eup %804 }
 0x134   : > { %v588_v60 = vmul.f32 %v805_v58, %v574_v45  ;;  %v589_v61 = vmul.f32 %v805_v58, %v575_v46 }
 0x136   : > { %v598_v63 = vmul.f32 %v734_v59, %v588_v60  ;;  %v599_v0 = vmul.f32 %v734_v59, %v589_v61 }
 0x138   : > { %v606_v3 = vadd.f32 %v735_v62, %v598_v63  ;;  %v607_v4 = vadd.f32 %v735_v62, %v599_v0 }
 0x13a   : > { %v610_v5 = vadd.f32 %v608_v1, %v606_v3  ;;  %v611_v6 = vadd.f32 %v609_v2, %v607_v4 }
 0x13c   : > { %612 = vst [vmem:[%s306_s11] sm:$0xff] %v610_v5  ;;  %613 = vst [vmem:[%s306_s11 + $0x8] sm:$0xff] %v611_v6 }
 0x13d PF: > { %s16_s21 = sadd.s32 1, %s812_s21  }
 0x13e   : > { %p13_p5 = scmp.ge.s32.totalorder %s16_s21, 4  }
 0x140   :  { %15 = sbr.rel (!%p13_p5) target bundleno = 1 (0x1), region = 83 }

// kernel: munit_trainer1_forward.49
= control target key start
LH: loop header
LB: loop body
LE: loop exit
PB: predicated region body
PF: predicated region fallthrough
CT: control target
= control target key end

     0   :  { %s1710_s18 = smov 0   ;;  %s1989_s0 = inlined_call_operand.vmem [shape: bf16[128,800], index: 0, kind: input, shape index: {}]   ;;  %s1990_s1 = inlined_call_operand.vmem [shape: bf16[800,128], index: 1, kind: input, shape index: {}]   ;;  %s1991_s2 = inlined_call_operand.vmem [shape: f32[1,128], index: 2, kind: input, shape index: {}]   ;;  %s1992_s3 = inlined_call_operand.vmem [shape: f32[2,1,128], index: 3, kind: input, shape index: {}]   ;;  %s1993_s4 = inlined_call_operand.vmem [shape: f32[2,1,128], index: 4, kind: input, shape index: {}]   ;;  %s1994_s5 = inlined_call_operand.vmem [shape: f32[128,128], index: 5, kind: output, shape index: {}]  }
   0x1 LB: > { %s1716_s19 = sadd.s32 4294967295, %s1677_s18   ;;  %p1315_p0 = scmp.ge.s32.totalorder %s1677_s18, 1  ;;  %s1677_s18 = sphi %s1710_s18, %s15_s18  }
   0x2   : > { %p205_p1 = scmp.lt.s32.totalorder %s1677_s18, 3 }
   0x4   : > { %p206_p2 = pnand %p1315_p0, %p205_p1 }
   0x5   : > { %v1577_v0 = vld [vmem:[%s1990_s1 + $0x40] sm:$0xff] (!%p206_p2)   ;;  %v1581_v4 = vld [vmem:[%s1990_s1 + $0x48] sm:$0xff] (!%p206_p2)   ;;  %v1585_v8 = vld [vmem:[%s1990_s1 + $0x50] sm:$0xff] (!%p206_p2)   ;;  %s1316_s27 = sshll.u32 (!%p206_p2), %s1716_s19, 3  ;;  %vm839_vm0 = vcmask (!%p206_p2), 261120   ;;  %s1679_s22 = smov (!%p206_p2), 0.0  }
   0x6   : > { %209 = sbr.rel (%p206_p2) target bundleno = 622 (0x26e), region = 40  ;;  %v1578_v1 = vld [vmem:[%s1990_s1 + $0xc0] sm:$0xff] (!%p206_p2)   ;;  %1407 = vmatprep.subr.bf16.mxu0 (!%p206_p2), %v1577_v0  ;;  %v1582_v5 = vld [vmem:[%s1990_s1 + $0xc8] sm:$0xff] (!%p206_p2)   ;;  %v1586_v9 = vld [vmem:[%s1990_s1 + $0xd0] sm:$0xff] (!%p206_p2)   ;;  %p241_p3 = scmp.lt.s32.totalorder (!%p206_p2), %s1316_s27, 15 }
   0x7   : > { %v1579_v2 = vld [vmem:[%s1990_s1] sm:$0xff] (!%p206_p2)   ;;  %1447 = vmatprep.subr.bf16.mxu1 (!%p206_p2), %v1578_v1  ;;  %v1583_v6 = vld [vmem:[%s1990_s1 + $0x8] sm:$0xff] (!%p206_p2)   ;;  %v1587_v10 = vld [vmem:[%s1990_s1 + $0x10] sm:$0xff] (!%p206_p2)   ;;  %p247_p4 = scmp.lt.s32.totalorder (!%p206_p2), %s1716_s19, 1 }
   0x8   : > { %v1580_v3 = vld [vmem:[%s1990_s1 + $0x80] sm:$0xff] (!%p206_p2)   ;;  %1408 = vmatpush3.bf16.msra.mxu0 (!%p206_p2), %v1579_v2  ;;  %v1584_v7 = vld [vmem:[%s1990_s1 + $0x88] sm:$0xff] (!%p206_p2)   ;;  %v1588_v11 = vld [vmem:[%s1990_s1 + $0x90] sm:$0xff] (!%p206_p2)  }
   0x9   : > { %1448 = vmatpush3.bf16.msra.mxu1 (!%p206_p2), %v1580_v3  ;;  %1409 = vmatprep.subr.bf16.mxu0 (!%p206_p2), %v1581_v4  ;;  %v1589_v12 = vld [vmem:[%s1990_s1 + $0x58] sm:$0xff] (!%p206_p2)   ;;  %v1593_v16 = vld [vmem:[%s1990_s1 + $0x60] sm:$0xff] (!%p206_p2)   ;;  %v1597_v20 = vld [vmem:[%s1990_s1 + $0x68] sm:$0xff] (!%p206_p2)  }
   0xa   : > { %1449 = vmatprep.subr.bf16.mxu1 (!%p206_p2), %v1582_v5  ;;  %v1590_v13 = vld [vmem:[%s1990_s1 + $0xd8] sm:$0xff] (!%p206_p2)   ;;  %v1594_v17 = vld [vmem:[%s1990_s1 + $0xe0] sm:$0xff] (!%p206_p2)   ;;  %v1598_v21 = vld [vmem:[%s1990_s1 + $0xe8] sm:$0xff] (!%p206_p2)  }
   0xb   : > { %v1591_v14 = vld [vmem:[%s1990_s1 + $0x18] sm:$0xff] (!%p206_p2)   ;;  %v1595_v18 = vld [vmem:[%s1990_s1 + $0x20] sm:$0xff] (!%p206_p2)   ;;  %v1599_v22 = vld [vmem:[%s1990_s1 + $0x28] sm:$0xff] (!%p206_p2)  }
   0xc   : > { %1410 = vmatpush3.bf16.msra.mxu0 (!%p206_p2), %v1583_v6  ;;  %v1592_v15 = vld [vmem:[%s1990_s1 + $0x98] sm:$0xff] (!%p206_p2)   ;;  %v1596_v19 = vld [vmem:[%s1990_s1 + $0xa0] sm:$0xff] (!%p206_p2)   ;;  %v1600_v23 = vld [vmem:[%s1990_s1 + $0xa8] sm:$0xff] (!%p206_p2)  }
   0xd   : > { %1450 = vmatpush3.bf16.msra.mxu1 %v1584_v7  ;;  %1411 = vmatprep.subr.bf16.mxu0 %v1585_v8  ;;  %s1996_s27 = smov (!%p241_p3, %s1316_s27), 15  ;;  %v1601_v24 = vld [vmem:[%s1990_s1 + $0x70] sm:$0xff]   ;;  %v1605_v28 = vld [vmem:[%s1990_s1 + $0x78] sm:$0xff]   ;;  %v1615_v36 = vld [vmem:[%s1990_s1 + $0x140] sm:$0xff]   ;;  %s1998_s19 = smov (!%p247_p4, %s1716_s19), 1 }
   0xe   : > { %1451 = vmatprep.subr.bf16.mxu1 %v1586_v9  ;;  %v1602_v25 = vld [vmem:[%s1990_s1 + $0xf0] sm:$0xff]   ;;  %s1561_s28 = smul.u32 28, %s1996_s27  ;;  %v1606_v29 = vld [vmem:[%s1990_s1 + $0xf8] sm:$0xff]   ;;  %v1616_v37 = vld [vmem:[%s1990_s1 + $0x100] sm:$0xff]   ;;  %s249_s30 = scalar_lea.vmem %s1992_s3, %s1998_s19 }
   0xf   : > { %v1603_v26 = vld [vmem:[%s1990_s1 + $0x30] sm:$0xff]   ;;  %v1607_v30 = vld [vmem:[%s1990_s1 + $0x38] sm:$0xff]   ;;  %v1617_v38 = vld [vmem:[%s1990_s1 + $0x148] sm:$0xff]   ;;  %s252_s8 = scalar_lea.vmem %s1993_s4, %s1998_s19  ;;  %s1319_s19 = sshll.u32 %s1996_s27, 3 }
  0x10   : > { %1412 = vmatpush3.bf16.msra.mxu0 %v1587_v10  ;;  %v1604_v27 = vld [vmem:[%s1990_s1 + $0xb0] sm:$0xff]   ;;  %s1817_s14 = scalar_lea.vmem %s1989_s0, %s1561_s28  ;;  %v1608_v31 = vld [vmem:[%s1990_s1 + $0xb8] sm:$0xff]   ;;  %v1618_v39 = vld [vmem:[%s1990_s1 + $0x108] sm:$0xff]   ;;  %s257_s11 = scalar_lea.vmem %s1994_s5, %s1319_s19 }
  0x11   : > { %1452 = vmatpush3.bf16.msra.mxu1 %v1588_v11  ;;  %1413 = vmatprep.subr.bf16.mxu0 %v1589_v12  ;;  %v1609_v32 = vld [vmem:[%s1817_s14] ss:$28 sps:$4 sm:$0xff]   ;;  %v1612_v34 = vld [vmem:[%s1817_s14 + $0x8] ss:$28 sps:$4 sm:$0xff]   ;;  %v1623_v42 = vld [vmem:[%s1817_s14 + $0x38] ss:$28 sps:$4 sm:$0xff]  }
  0x12   : > { %1453 = vmatprep.subr.bf16.mxu1 %v1590_v13  ;;  %v1611_v33 = vld [vmem:[%s1817_s14 + $0x4] ss:$28 sps:$4 sm:$0xff]   ;;  %v1614_v35 = vld [vmem:[%s1817_s14 + $0xc] ss:$28 sps:$4 sm:$0xff]   ;;  %v1619_v40 = vld [vmem:[%s1817_s14 + $0x3c] ss:$28 sps:$4 sm:$0xff]  }
  0x13   : > { %884 = vmatprep.mubr.bf16.mxu0 %v1611_v33  ;;  %949 = vmatprep.mubr.bf16.mxu1 %v1614_v35  ;;  %v1621_v41 = vld [vmem:[%s1817_s14 + $0x44] ss:$28 sps:$4 sm:$0xff]   ;;  %v1625_v44 = vld [vmem:[%s1990_s1 + $0x150] sm:$0xff]   ;;  %v1627_v46 = vld [vmem:[%s1990_s1 + $0x158] sm:$0xff]  }
  0x14   : > { %1414 = vmatpush3.bf16.msra.mxu0 %v1591_v14  ;;  %v1624_v43 = vld [vmem:[%s1817_s14 + $0x40] ss:$28 sps:$4 sm:$0xff]   ;;  %v1626_v45 = vld [vmem:[%s1990_s1 + $0x110] sm:$0xff]   ;;  %v1637_v54 = vld [vmem:[%s1990_s1 + $0x168] sm:$0xff]  }
  0x15   : > { %1454 = vmatpush3.bf16.msra.mxu1 %v1592_v15  ;;  %1415 = vmatprep.subr.bf16.mxu0 %v1593_v16  ;;  %v1628_v47 = vld [vmem:[%s1990_s1 + $0x118] sm:$0xff]   ;;  %v1629_v48 = vld [vmem:[%s1817_s14 + $0x74] ss:$28 sps:$4 sm:$0xff]   ;;  %v1635_v51 = vld [vmem:[%s1990_s1 + $0x160] sm:$0xff]  }
  0x16   : > { %1455 = vmatprep.subr.bf16.mxu1 %v1594_v17  ;;  %v1631_v49 = vld [vmem:[%s1817_s14 + $0x7c] ss:$28 sps:$4 sm:$0xff]   ;;  %v1633_v50 = vld [vmem:[%s1817_s14 + $0x70] ss:$28 sps:$4 sm:$0xff]   ;;  %v1636_v53 = vld [vmem:[%s1990_s1 + $0x120] sm:$0xff]  }
  0x17   : > { %v1634_v52 = vld [vmem:[%s1817_s14 + $0x78] ss:$28 sps:$4 sm:$0xff]   ;;  %v1639_v55 = vld [vmem:[%s1817_s14 + $0xac] ss:$28 sps:$4 sm:$0xff]   ;;  %v1655_v2 = vld [vmem:[%s1990_s1 + $0x180] sm:$0xff]  }
  0x18   : > { %1416 = vmatpush3.bf16.msra.mxu0 %v1595_v18  ;;  %v1641_v56 = vld [vmem:[%s1817_s14 + $0xb4] ss:$28 sps:$4 sm:$0xff]   ;;  %v1638_v57 = vld [vmem:[%s1990_s1 + $0x128] sm:$0xff]   ;;  %v1647_v62 = vld [vmem:[%s1990_s1 + $0x178] sm:$0xff]  }
  0x19   : > { %1456 = vmatpush3.bf16.msra.mxu1 %v1596_v19  ;;  %1417 = vmatprep.subr.bf16.mxu0 %v1597_v20  ;;  %v1645_v58 = vld [vmem:[%s1990_s1 + $0x170] sm:$0xff]   ;;  %v1643_v59 = vld [vmem:[%s1817_s14 + $0xa8] ss:$28 sps:$4 sm:$0xff]   ;;  %v1654_v0 = vld [vmem:[%s1817_s14 + $0xbc] ss:$28 sps:$4 sm:$0xff]  }
  0x1a   : > { %1457 = vmatprep.subr.bf16.mxu1 %v1598_v21  ;;  %v1644_v60 = vld [vmem:[%s1817_s14 + $0xb0] ss:$28 sps:$4 sm:$0xff]   ;;  %v1648_v1 = vld [vmem:[%s1990_s1 + $0x138] sm:$0xff]   ;;  %v1660_v8 = vld [vmem:[%s1817_s14 + $0x48] ss:$28 sps:$4 sm:$0xff]  }
  0x1b   : > { %v1646_v61 = vld [vmem:[%s1990_s1 + $0x130] sm:$0xff]   ;;  %v1657_v5 = vld [vmem:[%s1817_s14 + $0x4c] ss:$28 sps:$4 sm:$0xff]   ;;  %v1662_v10 = vld [vmem:[%s1817_s14 + $0x84] ss:$28 sps:$4 sm:$0xff]  }
  0x1c   : > { %1418 = vmatpush3.bf16.msra.mxu0 %v1599_v22  ;;  %v1651_v63 = vld [vmem:[%s1817_s14 + $0x14] ss:$28 sps:$4 sm:$0xff]   ;;  %v1656_v7 = vld [vmem:[%s1990_s1 + $0x188] sm:$0xff]   ;;  %v1665_v12 = vld [vmem:[%s1817_s14 + $0x80] ss:$28 sps:$4 sm:$0xff]  }
  0x1d   : > { %1458 = vmatpush3.bf16.msra.mxu1 %v1600_v23  ;;  %1419 = vmatprep.subr.bf16.mxu0 %v1601_v24  ;;  %v1649_v3 = vld [vmem:[%s1817_s14 + $0x10] ss:$28 sps:$4 sm:$0xff]   ;;  %v1652_v4 = vld [vmem:[%s1817_s14 + $0xb8] ss:$28 sps:$4 sm:$0xff]   ;;  %v1664_v11 = vld [vmem:[%s1817_s14 + $0x88] ss:$28 sps:$4 sm:$0xff]  }
  0x1e   : > { %1459 = vmatprep.subr.bf16.mxu1 %v1602_v25  ;;  %v1659_v6 = vld [vmem:[%s1817_s14 + $0x18] ss:$28 sps:$4 sm:$0xff]   ;;  %v1661_v9 = vld [vmem:[%s1817_s14 + $0x50] ss:$28 sps:$4 sm:$0xff]   ;;  %v1666_v13 = vld [vmem:[%s1817_s14 + $0xc0] ss:$28 sps:$4 sm:$0xff]  }
  0x1f   : > { %v1320_v15 = vld [vmem:[%s1991_s2] ss:$0 sm:$0xff] }
  0x20   : > { %1420 = vmatpush3.bf16.msra.mxu0 %v1603_v26 }
  0x21   : > { %1460 = vmatpush3.bf16.msra.mxu1 %v1604_v27  ;;  %1421 = vmatprep.subr.bf16.mxu0 %v1605_v28 }
  0x22   : > { %1461 = vmatprep.subr.bf16.mxu1 %v1606_v29 }
  0x24   : > { %1422 = vmatpush3.bf16.msra.mxu0 %v1607_v30 }
  0x25   : > { %1462 = vmatpush3.bf16.msra.mxu1 %v1608_v31  ;;  %1487 = vmatprep.subr.bf16.mxu0 %v1615_v36 }
  0x26   : > { %1545 = vmatprep.subr.bf16.mxu1 %v1615_v36 }
  0x27   : > { %885 = vmatmul.mubr.bf16.vlgmr.msra.gmra.mrb[0].mxu0 %v1609_v32 }
  0x28   : > { %950 = vmatmul.mubr.bf16.vlgmr.msra.gmra.mrb[0].mxu1 %v1612_v34  ;;  %1488 = vmatpush3.bf16.msra.mxu0 %v1616_v37 }
  0x29   : > { %1553 = vmatpush3.bf16.msra.mxu1 %v1616_v37  ;;  %1489 = vmatprep.subr.bf16.mxu0 %v1617_v38 }
  0x2a   : > { %1546 = vmatprep.subr.bf16.mxu1 %v1617_v38  ;;  %892 = vmatprep.mubr.bf16.mxu0 %v1619_v40 }
  0x2b   : > { %957 = vmatprep.mubr.bf16.mxu1 %v1621_v41 }
  0x2c   : > { %1490 = vmatpush3.bf16.msra.mxu0 %v1618_v39 }
  0x2d   : > { %1554 = vmatpush3.bf16.msra.mxu1 %v1618_v39  ;;  %1491 = vmatprep.subr.bf16.mxu0 %v1625_v44 }
  0x2e   : > { %1547 = vmatprep.subr.bf16.mxu1 %v1625_v44 }
  0x2f   : > { %893 = vmatmul.mubr.bf16.gmra.mrb[4].mxu0 %v1623_v42 }
  0x30   : > { %958 = vmatmul.mubr.bf16.gmra.mrb[4].mxu1 %v1624_v43  ;;  %1492 = vmatpush3.bf16.msra.mxu0 %v1626_v45 }
  0x31   : > { %1555 = vmatpush3.bf16.msra.mxu1 %v1626_v45  ;;  %1493 = vmatprep.subr.bf16.mxu0 %v1627_v46 }
  0x32   : > { %1548 = vmatprep.subr.bf16.mxu1 %v1627_v46  ;;  %900 = vmatprep.mubr.bf16.mxu0 %v1629_v48 }
  0x33   : > { %965 = vmatprep.mubr.bf16.mxu1 %v1631_v49 }
  0x34   : > { %1494 = vmatpush3.bf16.msra.mxu0 %v1628_v47 }
  0x35   : > { %1556 = vmatpush3.bf16.msra.mxu1 %v1628_v47  ;;  %1495 = vmatprep.subr.bf16.mxu0 %v1635_v51 }
  0x36   : > { %1549 = vmatprep.subr.bf16.mxu1 %v1635_v51 }
  0x37   : > { %901 = vmatmul.mubr.bf16.gmra.mrb[8].mxu0 %v1633_v50 }
  0x38   : > { %966 = vmatmul.mubr.bf16.gmra.mrb[8].mxu1 %v1634_v52  ;;  %1496 = vmatpush3.bf16.msra.mxu0 %v1636_v53 }
  0x39   : > { %908 = vmatprep.mubr.bf16.mxu0 %v1639_v55  ;;  %1557 = vmatpush3.bf16.msra.mxu1 %v1636_v53 }
  0x3a   : > { %1497 = vmatprep.subr.bf16.mxu0 %v1637_v54  ;;  %1550 = vmatprep.subr.bf16.mxu1 %v1637_v54 }
  0x3b   : > { %973 = vmatprep.mubr.bf16.mxu1 %v1641_v56 }
  0x3c   : > { %1498 = vmatpush3.bf16.msra.mxu0 %v1638_v57 }
  0x3d   : > { %1558 = vmatpush3.bf16.msra.mxu1 %v1638_v57  ;;  %1499 = vmatprep.subr.bf16.mxu0 %v1645_v58 }
  0x3e   : > { %1551 = vmatprep.subr.bf16.mxu1 %v1645_v58 }
  0x3f   : > { %909 = vmatmul.mubr.bf16.gmra.mrb[12].mxu0 %v1643_v59 }
  0x40   : > { %974 = vmatmul.mubr.bf16.gmra.mrb[12].mxu1 %v1644_v60  ;;  %1014 = vmatprep.mubr.bf16.mxu0 %v1651_v63 }
  0x41   : > { %1500 = vmatpush3.bf16.msra.mxu0 %v1646_v61  ;;  %1559 = vmatpush3.bf16.msra.mxu1 %v1646_v61 }
  0x42   : > { %1501 = vmatprep.subr.bf16.mxu0 %v1647_v62  ;;  %1552 = vmatprep.subr.bf16.mxu1 %v1647_v62 }
  0x43   : > { %1038 = vmatprep.mubr.bf16.mxu1 %v1654_v0 }
  0x45   : > { %1502 = vmatpush3.bf16.msra.mxu0 %v1648_v1  ;;  %1560 = vmatpush3.bf16.msra.mxu1 %v1648_v1 }
  0x46   : > { %1533 = vmatprep.subr.bf16.mxu1 %v1655_v2 }
  0x48   : > { %1015 = vmatmul.mubr.bf16.vlgmr.msra.gmra.mrb[16].mxu0 %v1649_v3  ;;  %1039 = vmatmul.mubr.bf16.vlgmr.msra.gmra.mrb[16].mxu1 %v1652_v4 }
  0x49   : > { %1022 = vmatprep.mubr.bf16.mxu0 %v1657_v5  ;;  %1534 = vmatpush3.bf16.msra.mxu1 %v1655_v2 }
  0x4a   : > { %1537 = vmatprep.mubr.msk.bf16.mxu1 %vm839_vm0, %v1659_v6  ;;  %1535 = vmatprep.subr.bf16.mxu1 %v1656_v7 }
  0x4d   : > { %1536 = vmatpush3.bf16.msra.mxu1 %v1656_v7 }
  0x50   : > { %1023 = vmatmul.mubr.bf16.gmra.mrb[20].mxu0 %v1660_v8  ;;  %1538 = vmatmul.mubr.msk.bf16.vlgmr.msra.gmra.mrb[20].mxu1 %vm839_vm0, %v1661_v9 }
  0x51   : > { %1030 = vmatprep.mubr.bf16.mxu0 %v1662_v10  ;;  %1541 = vmatprep.mubr.msk.bf16.mxu1 %vm839_vm0, %v1664_v11 }
  0x58   : > { %1031 = vmatmul.mubr.bf16.gmra.mrb[24].mxu0 %v1665_v12  ;;  %1542 = vmatmul.mubr.msk.bf16.gmra.mrb[24].mxu1 %vm839_vm0, %v1666_v13 }
  0xfa   : > { %v1423_v14 = vpop.f32.mrb[0].mxu0 }
  0xfb   : > { %v1424_v16 = vpop.f32.mrb[1].mxu0  ;;  %v1463_v17 = vpop.f32.mrb[0].mxu1 }
  0xfc   : > { %v1425_v18 = vadd.f32 %v1424_v16, %v1423_v14  ;;  %v1426_v19 = vpop.f32.mrb[2].mxu0  ;;  %v1464_v20 = vpop.f32.mrb[1].mxu1 }
  0xfd   : > { %v1427_v21 = vpop.f32.mrb[3].mxu0  ;;  %v1465_v22 = vadd.f32 %v1464_v20, %v1463_v17  ;;  %v1466_v23 = vpop.f32.mrb[2].mxu1 }
  0xfe   : > { %v887_v24 = vadd.f32 %v1425_v18, %v1320_v15  ;;  %v1428_v25 = vadd.f32 %v1427_v21, %v1426_v19  ;;  %v1467_v26 = vpop.f32.mrb[3].mxu1 }
  0xff   : > { %v1468_v27 = vadd.f32 %v1467_v26, %v1466_v23 }
 0x100   : > { %v890_v28 = vadd.f32 %v1428_v25, %v1320_v15  ;;  %v952_v29 = vadd.f32 %v1465_v22, %v887_v24 }
 0x102   : > { %v1914_v30 = vadd.f32 %v1468_v27, %v890_v28  ;;  %v1429_v31 = vpop.f32.mrb[4].mxu0 }
 0x103   : > { %v1430_v32 = vpop.f32.mrb[5].mxu0  ;;  %v1469_v33 = vpop.f32.mrb[4].mxu1 }
 0x104   : > { %v1431_v34 = vadd.f32 %v1430_v32, %v1429_v31  ;;  %v1432_v35 = vpop.f32.mrb[6].mxu0  ;;  %v1470_v36 = vpop.f32.mrb[5].mxu1 }
 0x105   : > { %v1433_v37 = vpop.f32.mrb[7].mxu0  ;;  %v1471_v38 = vadd.f32 %v1470_v36, %v1469_v33  ;;  %v1472_v39 = vpop.f32.mrb[6].mxu1 }
 0x106   : > { %v895_v40 = vadd.f32 %v1431_v34, %v1320_v15  ;;  %v1434_v41 = vadd.f32 %v1433_v37, %v1432_v35  ;;  %v1473_v42 = vpop.f32.mrb[7].mxu1 }
 0x107   : > { %v1474_v43 = vadd.f32 %v1473_v42, %v1472_v39 }
 0x108   : > { %v898_v44 = vadd.f32 %v1434_v41, %v1320_v15  ;;  %v960_v45 = vadd.f32 %v1471_v38, %v895_v40 }
 0x10a   : > { %v1916_v46 = vadd.f32 %v1474_v43, %v898_v44  ;;  %v1435_v47 = vpop.f32.mrb[8].mxu0 }
 0x10b   : > { %v1436_v48 = vpop.f32.mrb[9].mxu0  ;;  %v1475_v49 = vpop.f32.mrb[8].mxu1 }
 0x10c   : > { %v1437_v50 = vadd.f32 %v1436_v48, %v1435_v47  ;;  %v1438_v51 = vpop.f32.mrb[10].mxu0  ;;  %v1476_v52 = vpop.f32.mrb[9].mxu1 }
 0x10d   : > { %v1439_v53 = vpop.f32.mrb[11].mxu0  ;;  %v1477_v54 = vadd.f32 %v1476_v52, %v1475_v49  ;;  %v1478_v55 = vpop.f32.mrb[10].mxu1 }
 0x10e   : > { %v903_v56 = vadd.f32 %v1437_v50, %v1320_v15  ;;  %v1440_v57 = vadd.f32 %v1439_v53, %v1438_v51  ;;  %v1479_v58 = vpop.f32.mrb[11].mxu1 }
 0x10f   : > { %v1480_v59 = vadd.f32 %v1479_v58, %v1478_v55 }
 0x110   : > { %v906_v60 = vadd.f32 %v1440_v57, %v1320_v15  ;;  %v1918_v61 = vadd.f32 %v1477_v54, %v903_v56 }
 0x112   : > { %v1920_v62 = vadd.f32 %v1480_v59, %v906_v60  ;;  %v1441_v63 = vpop.f32.mrb[12].mxu0 }
 0x113   : > { %v1442_v0 = vpop.f32.mrb[13].mxu0  ;;  %v1481_v1 = vpop.f32.mrb[12].mxu1 }
 0x114   : > { %v1443_v2 = vadd.f32 %v1442_v0, %v1441_v63  ;;  %v1444_v3 = vpop.f32.mrb[14].mxu0  ;;  %v1482_v4 = vpop.f32.mrb[13].mxu1 }
 0x115   : > { %v1445_v5 = vpop.f32.mrb[15].mxu0  ;;  %v1483_v6 = vadd.f32 %v1482_v4, %v1481_v1  ;;  %v1484_v7 = vpop.f32.mrb[14].mxu1 }
 0x116   : > { %v911_v8 = vadd.f32 %v1443_v2, %v1320_v15  ;;  %v1446_v9 = vadd.f32 %v1445_v5, %v1444_v3  ;;  %v1485_v10 = vpop.f32.mrb[15].mxu1 }
 0x117   : > { %v1486_v11 = vadd.f32 %v1485_v10, %v1484_v7 }
 0x118   : > { %v914_v12 = vadd.f32 %v1446_v9, %v1320_v15  ;;  %v976_v13 = vadd.f32 %v1483_v6, %v911_v8 }
 0x11a   : > { %v979_v14 = vadd.f32 %v1486_v11, %v914_v12 }
 0x11b   : > { %v1503_v16 = vpop.f32.mrb[16].mxu0  ;;  %v1521_v17 = vpop.f32.mrb[16].mxu1 }
 0x11c   : > { %v1504_v18 = vpop.f32.mrb[17].mxu0  ;;  %v1522_v20 = vpop.f32.mrb[17].mxu1 }
 0x11d   : > { %v1505_v19 = vadd.f32 %v1504_v18, %v1503_v16  ;;  %v1506_v21 = vpop.f32.mrb[18].mxu0  ;;  %v1523_v22 = vadd.f32 %v1522_v20, %v1521_v17  ;;  %v1524_v23 = vpop.f32.mrb[18].mxu1 }
 0x11e   : > { %v1507_v24 = vpop.f32.mrb[19].mxu0  ;;  %v1525_v26 = vpop.f32.mrb[19].mxu1 }
 0x11f   : > { %v1508_v25 = vadd.f32 %v1507_v24, %v1506_v21  ;;  %v1017_v27 = vadd.f32 %v1505_v19, %v952_v29  ;;  %v1526_v28 = vadd.f32 %v1525_v26, %v1524_v23  ;;  %v1041_v31 = vadd.f32 %v1523_v22, %v976_v13 }
 0x121   : > { %v1020_v32 = vadd.f32 %v1508_v25, %v1914_v30  ;;  %v1044_v33 = vadd.f32 %v1526_v28, %v979_v14 }
 0x123   : > { %v1509_v15 = vpop.f32.mrb[20].mxu0  ;;  %v1539_v34 = vpop.f32.mrb[20].mxu1 }
 0x124   : > { %v1510_v35 = vpop.f32.mrb[21].mxu0  ;;  %v1081_v37 = vpop.f32.mrb[21].mxu1 }
 0x125   : > { %v1511_v36 = vadd.f32 %v1510_v35, %v1509_v15  ;;  %v1512_v38 = vpop.f32.mrb[22].mxu0  ;;  %v1923_v39 = vadd.f32 %v1081_v37, %v1017_v27  ;;  %v1540_v40 = vpop.f32.mrb[22].mxu1 }
 0x126   : > { %v1513_v41 = vpop.f32.mrb[23].mxu0  ;;  %v1084_v44 = vpop.f32.mrb[23].mxu1 }
 0x127   : > { %v1025_v42 = vadd.f32 %v1511_v36, %v960_v45  ;;  %v1514_v43 = vadd.f32 %v1513_v41, %v1512_v38  ;;  %v1925_v47 = vadd.f32 %v1084_v44, %v1020_v32  ;;  %v1131_v48 = vmul.f32 %v1923_v39, %v1923_v39 }
 0x129   : > { %v1927_v29 = vadd.f32 %v1539_v34, %v1025_v42  ;;  %v1028_v30 = vadd.f32 %v1514_v43, %v1916_v46  ;;  %v1112_v49 = vadd.f32 %v1925_v47, %v1923_v39  ;;  %v1132_v50 = vmul.f32 %v1925_v47, %v1925_v47 }
 0x12b   : > { %v1133_v45 = vmul.f32 %v1927_v29, %v1927_v29  ;;  %v1938_v51 = vadd.f32 %v1540_v40, %v1028_v30  ;;  %v1515_v52 = vpop.f32.mrb[24].mxu0  ;;  %v1139_v53 = vadd.f32 %v1132_v50, %v1131_v48  ;;  %v1543_v54 = vpop.f32.mrb[24].mxu1  ;;  %v1113_v46 = vadd.f32 %v1112_v49, %v1927_v29 }
 0x12c   : > { %v1516_v55 = vpop.f32.mrb[25].mxu0  ;;  %v1941_v56 = vadd.f32 %v1543_v54, %v1041_v31  ;;  %v1097_v58 = vpop.f32.mrb[25].mxu1 }
 0x12d   : > { %v1517_v57 = vadd.f32 %v1516_v55, %v1515_v52  ;;  %v1518_v59 = vpop.f32.mrb[26].mxu0  ;;  %v1134_v60 = vmul.f32 %v1938_v51, %v1938_v51  ;;  %v1544_v63 = vpop.f32.mrb[26].mxu1  ;;  %v1140_v1 = vadd.f32 %v1139_v53, %v1133_v45  ;;  %v1114_v7 = vadd.f32 %v1113_v46, %v1938_v51  ;;  %v1403_v46 = vld [vmem:[%s249_s30] ss:$0 sm:$0xff] }
 0x12e   : > { %v1519_v0 = vpop.f32.mrb[27].mxu0  ;;  %v1946_v3 = vadd.f32 %v1544_v63, %v1044_v33  ;;  %v1100_v5 = vpop.f32.mrb[27].mxu1  ;;  %v1137_v16 = vmul.f32 %v1941_v56, %v1941_v56 }
 0x12f   : > { %v1033_v2 = vadd.f32 %v1517_v57, %v1918_v61  ;;  %v1520_v4 = vadd.f32 %v1519_v0, %v1518_v59  ;;  %v1141_v11 = vadd.f32 %v1140_v1, %v1134_v60  ;;  %v1404_v0 = vld [vmem:[%s252_s8] ss:$0 sm:$0xff] }
 0x130   : > { %v1138_v20 = vmul.f32 %v1946_v3, %v1946_v3 }
 0x131   : > { %v1948_v6 = vadd.f32 %v1097_v58, %v1033_v2  ;;  %v1036_v8 = vadd.f32 %v1520_v4, %v1920_v62 }
 0x133   : > { %v1115_v9 = vadd.f32 %v1114_v7, %v1948_v6  ;;  %v1135_v10 = vmul.f32 %v1948_v6, %v1948_v6  ;;  %v1955_v12 = vadd.f32 %v1100_v5, %v1036_v8 }
 0x135   : > { %v1142_v13 = vadd.f32 %v1141_v11, %v1135_v10  ;;  %v1136_v61 = vmul.f32 %v1955_v12, %v1955_v12  ;;  %v1116_v14 = vadd.f32 %v1115_v9, %v1955_v12 }
 0x137   : > { %v1117_v17 = vadd.f32 %v1116_v14, %v1941_v56  ;;  %v1143_v62 = vadd.f32 %v1142_v13, %v1136_v61 }
 0x139   : > { %v1118_v18 = vadd.f32 %v1117_v17, %v1946_v3  ;;  %v1144_v19 = vadd.f32 %v1143_v62, %v1137_v16 }
 0x13b   : > { %1119 = vadd.xlane.f32.xlu0 %v1118_v18  ;;  %v1145_v21 = vadd.f32 %v1144_v19, %v1138_v20 }
 0x13f   : > { %1146 = vadd.xlane.f32.xlu0 %v1145_v21 }
 0x1c8   : > { %v1120_v22 = vpop.xlane.xlu0 %1119 }
 0x1c9   : > { %v1121_v23 = vrot.slane %v1120_v22, 4 }
 0x1cb   : > { %v1122_v24 = vadd.f32 %v1121_v23, %v1120_v22 }
 0x1cc   : > { %v1147_v25 = vpop.xlane.xlu0 %1146 }
 0x1cd   : > { %v1123_v26 = vrot.slane %v1122_v24, 2  ;;  %v1148_v27 = vrot.slane %v1147_v25, 4 }
 0x1cf   : > { %v1149_v28 = vadd.f32 %v1148_v27, %v1147_v25  ;;  %v1124_v31 = vadd.f32 %v1123_v26, %v1122_v24 }
 0x1d1   : > { %v1150_v32 = vrot.slane %v1149_v28, 2  ;;  %v1125_v33 = vrot.slane %v1124_v31, 1 }
 0x1d3   : > { %v1151_v15 = vadd.f32 %v1150_v32, %v1149_v28  ;;  %v1126_v34 = vadd.f32 %v1125_v33, %v1124_v31 }
 0x1d5   : > { %1562 = vpush %v1126_v34  ;;  %v1152_v35 = vrot.slane %v1151_v15, 1 }
 0x1d7   : > { %v1153_v36 = vadd.f32 %v1152_v35, %v1151_v15 }
 0x1d9   : > { %1564 = vpush %v1153_v36 }
 0x206   : > { %s1563_s14 = spop %1562 }
 0x207   : > { %s1130_s15 = smul.f32 0.0009765625, %s1563_s14 }
 0x209   : > { %s1155_s16 = smul.f32 1024.0, %s1130_s15  ;;  %v1162_v30 = vstv %s1130_s15 }
 0x20a   : > { %s1565_s20 = spop %1564  ;;  %v1163_v48 = vsub.f32 %v1923_v39, %v1162_v30  ;;  %v1164_v49 = vsub.f32 %v1925_v47, %v1162_v30  ;;  %v1165_v50 = vsub.f32 %v1927_v29, %v1162_v30  ;;  %v1166_v45 = vsub.f32 %v1938_v51, %v1162_v30 }
 0x20b   : > { %s1156_s17 = smul.f32 %s1155_s16, %s1130_s15  ;;  %v1167_v53 = vsub.f32 %v1948_v6, %v1162_v30  ;;  %v1168_v54 = vsub.f32 %v1955_v12, %v1162_v30  ;;  %v1169_v55 = vsub.f32 %v1941_v56, %v1162_v30  ;;  %v1170_v39 = vsub.f32 %v1946_v3, %v1162_v30 }
 0x20d   : > { %s1157_s21 = ssub.f32 %s1565_s20, %s1156_s17 }
 0x20f   : > { %s1158_s23 = smax.f32 %s1679_s22, %s1157_s21 }
 0x210   : > { %s1161_s24 = smul.f32 0.0009775171, %s1158_s23 }
 0x212   : > { %v1171_v37 = vstv %s1161_s24 }
 0x213   : > { %1667 = vrsqrt.f32 %v1171_v37  ;;  %vm1174_vm1 = vcmp.eq.f32.partialorder %v1171_v37, inf  ;;  %v1177_v41 = vand.u32 2147483648, %v1171_v37  ;;  %vm1176_vm2 = vcmp.eq.f32.partialorder %v1171_v37, 0.0 }
 0x21d   : > { %v1668_v38 = vpop.eup %1667 }
 0x21e   : > { %v1173_v40 = vmul.f32 %v1668_v38, %v1171_v37 }
 0x220   : > { %v1175_v42 = vsel %vm1174_vm1, %v1171_v37, %v1173_v40 }
 0x221   : > { %v1178_v43 = vsel %vm1176_vm2, %v1177_v41, %v1175_v42 }
 0x222   : > { %1566 = vpush %v1178_v43 }
 0x253   : > { %s1567_s25 = spop %1566 }
 0x254   : > { %s1180_s26 = sadd.f32 1e-05, %s1567_s25 }
 0x256   : > { %v1181_v44 = vstv %s1180_s26 }
 0x257   : > { %1669 = vrcp.f32 %v1181_v44 }
 0x261   : > { %v1670_v52 = vpop.eup %1669 }
 0x262   : > { %v1183_v47 = vmul.f32 %v1670_v52, %v1163_v48  ;;  %v1184_v57 = vmul.f32 %v1670_v52, %v1164_v49  ;;  %v1185_v29 = vmul.f32 %v1670_v52, %v1165_v50  ;;  %v1186_v58 = vmul.f32 %v1670_v52, %v1166_v45 }
 0x263   : > { %v1187_v51 = vmul.f32 %v1670_v52, %v1167_v53  ;;  %v1188_v59 = vmul.f32 %v1670_v52, %v1168_v54  ;;  %v1189_v60 = vmul.f32 %v1670_v52, %v1169_v55  ;;  %v1190_v63 = vmul.f32 %v1670_v52, %v1170_v39 }
 0x264   : > { %v1199_v1 = vmul.f32 %v1403_v46, %v1183_v47  ;;  %v1200_v2 = vmul.f32 %v1403_v46, %v1184_v57  ;;  %v1201_v4 = vmul.f32 %v1403_v46, %v1185_v29  ;;  %v1202_v5 = vmul.f32 %v1403_v46, %v1186_v58 }
 0x265   : > { %v1203_v6 = vmul.f32 %v1403_v46, %v1187_v51  ;;  %v1204_v7 = vmul.f32 %v1403_v46, %v1188_v59  ;;  %v1205_v56 = vmul.f32 %v1403_v46, %v1189_v60  ;;  %v1206_v8 = vmul.f32 %v1403_v46, %v1190_v63 }
 0x266   : > { %v1213_v3 = vadd.f32 %v1404_v0, %v1199_v1  ;;  %v1214_v9 = vadd.f32 %v1404_v0, %v1200_v2  ;;  %v1215_v10 = vadd.f32 %v1404_v0, %v1201_v4  ;;  %v1216_v11 = vadd.f32 %v1404_v0, %v1202_v5 }
 0x267   : > { %v1217_v12 = vadd.f32 %v1404_v0, %v1203_v6  ;;  %v1218_v13 = vadd.f32 %v1404_v0, %v1204_v7  ;;  %v1219_v61 = vadd.f32 %v1404_v0, %v1205_v56  ;;  %v1220_v14 = vadd.f32 %v1404_v0, %v1206_v8 }
 0x268   : > { %v1221_v16 = vmax.f32 %v1213_v3, 0.0  ;;  %v1222_v17 = vmax.f32 %v1214_v9, 0.0  ;;  %v1223_v62 = vmax.f32 %v1215_v10, 0.0  ;;  %v1224_v18 = vmax.f32 %v1216_v11, 0.0 }
 0x269   : > { %v1225_v19 = vmax.f32 %v1217_v12, 0.0  ;;  %v1226_v20 = vmax.f32 %v1218_v13, 0.0  ;;  %v1227_v21 = vmax.f32 %v1219_v61, 0.0  ;;  %v1228_v22 = vmax.f32 %v1220_v14, 0.0 }
 0x26a   : > { %1229 = vst [vmem:[%s257_s11] sm:$0xff] %v1221_v16  ;;  %1230 = vst [vmem:[%s257_s11 + $0x8] sm:$0xff] %v1222_v17 }
 0x26b   : > { %1231 = vst [vmem:[%s257_s11 + $0x10] sm:$0xff] %v1223_v62  ;;  %1232 = vst [vmem:[%s257_s11 + $0x18] sm:$0xff] %v1224_v18 }
 0x26c   : > { %1233 = vst [vmem:[%s257_s11 + $0x20] sm:$0xff] %v1225_v19  ;;  %1234 = vst [vmem:[%s257_s11 + $0x28] sm:$0xff] %v1226_v20 }
 0x26d   : > { %1235 = vst [vmem:[%s257_s11 + $0x30] sm:$0xff] %v1227_v21  ;;  %1236 = vst [vmem:[%s257_s11 + $0x38] sm:$0xff] %v1228_v22 }
 0x26e PF: > { %s15_s18 = sadd.s32 1, %s1677_s18  }
 0x26f   : > { %p12_p5 = scmp.ge.s32.totalorder %s15_s18, 4  }
 0x271   :  { %14 = sbr.rel (!%p12_p5) target bundleno = 1 (0x1), region = 76 }

// kernel: munit_trainer1_forward.50
= control target key start
LH: loop header
LB: loop body
LE: loop exit
PB: predicated region body
PF: predicated region fallthrough
CT: control target
= control target key end

     0   :  { %s2035_s18 = smov 0   ;;  %s2572_s0 = inlined_call_operand.vmem [shape: bf16[512,400], index: 0, kind: input, shape index: {}]   ;;  %s2573_s1 = inlined_call_operand.vmem [shape: bf16[400,128], index: 1, kind: input, shape index: {}]   ;;  %s2574_s2 = inlined_call_operand.vmem [shape: f32[1,128], index: 2, kind: input, shape index: {}]   ;;  %s2575_s3 = inlined_call_operand.vmem [shape: f32[2,1,128], index: 3, kind: input, shape index: {}]   ;;  %s2576_s4 = inlined_call_operand.vmem [shape: f32[2,1,128], index: 4, kind: input, shape index: {}]   ;;  %s2577_s5 = inlined_call_operand.vmem [shape: f32[512,128], index: 5, kind: output, shape index: {}]  }
   0x1 LB: > { %s2041_s19 = sadd.s32 4294967295, %s2001_s18   ;;  %p1625_p0 = scmp.ge.s32.totalorder %s2001_s18, 1  ;;  %s2001_s18 = sphi %s2035_s18, %s15_s18  }
   0x2   : > { %p205_p1 = scmp.lt.s32.totalorder %s2001_s18, 3 }
   0x4   : > { %p206_p2 = pnand %p1625_p0, %p205_p1 }
   0x5   : > { %v1870_v0 = vld [vmem:[%s2573_s1 + $0x40] sm:$0xff] (!%p206_p2)   ;;  %v2003_v1 = vmov (!%p206_p2), 0   ;;  %v1873_v4 = vld [vmem:[%s2573_s1 + $0x48] sm:$0xff] (!%p206_p2)   ;;  %v1876_v7 = vld [vmem:[%s2573_s1 + $0x50] sm:$0xff] (!%p206_p2)   ;;  %s1626_s13 = sshll.u32 (!%p206_p2), %s2041_s19, 5  ;;  %vm835_vm0 = vcmask (!%p206_p2), 130048  }
   0x6   : > { %209 = sbr.rel (%p206_p2) target bundleno = 719 (0x2cf), region = 40  ;;  %1045 = vmatprep.subr.bf16.mxu1 (!%p206_p2), %v2003_v1  ;;  %v1871_v2 = vld [vmem:[%s2573_s1 + $0x80] sm:$0xff] (!%p206_p2)   ;;  %1742 = vmatprep.subr.bf16.mxu0 (!%p206_p2), %v1870_v0  ;;  %v1874_v5 = vld [vmem:[%s2573_s1 + $0x88] sm:$0xff] (!%p206_p2)   ;;  %v1877_v8 = vld [vmem:[%s2573_s1 + $0x90] sm:$0xff] (!%p206_p2)   ;;  %p241_p3 = scmp.lt.s32.totalorder (!%p206_p2), %s1626_s13, 63 }
   0x7   : > { %v1872_v3 = vld [vmem:[%s2573_s1] sm:$0xff] (!%p206_p2)   ;;  %1046 = vmatpush1.bf16.msra.mxu1 (!%p206_p2), %v1871_v2  ;;  %v1875_v6 = vld [vmem:[%s2573_s1 + $0x8] sm:$0xff] (!%p206_p2)   ;;  %v1878_v9 = vld [vmem:[%s2573_s1 + $0x10] sm:$0xff] (!%p206_p2)   ;;  %s2004_s14 = smov (!%p206_p2), 0.0   ;;  %p247_p4 = scmp.lt.s32.totalorder (!%p206_p2), %s2041_s19, 1 }
   0x8   : > { %1743 = vmatpush3.bf16.msra.mxu0 (!%p206_p2), %v1872_v3  ;;  %1047 = vmatprep.subr.bf16.mxu1 (!%p206_p2), %v2003_v1  ;;  %v1879_v10 = vld [vmem:[%s2573_s1 + $0x58] sm:$0xff] (!%p206_p2)   ;;  %v1882_v13 = vld [vmem:[%s2573_s1 + $0x60] sm:$0xff] (!%p206_p2)   ;;  %v1885_v16 = vld [vmem:[%s2573_s1 + $0x68] sm:$0xff] (!%p206_p2)  }
   0x9   : > { %1744 = vmatprep.subr.bf16.mxu0 (!%p206_p2), %v1873_v4  ;;  %v1880_v11 = vld [vmem:[%s2573_s1 + $0x98] sm:$0xff] (!%p206_p2)   ;;  %v1883_v14 = vld [vmem:[%s2573_s1 + $0xa0] sm:$0xff] (!%p206_p2)   ;;  %v1886_v17 = vld [vmem:[%s2573_s1 + $0xa8] sm:$0xff] (!%p206_p2)  }
   0xa   : > { %v1881_v12 = vld [vmem:[%s2573_s1 + $0x18] sm:$0xff] (!%p206_p2)   ;;  %v1884_v15 = vld [vmem:[%s2573_s1 + $0x20] sm:$0xff] (!%p206_p2)   ;;  %v1887_v18 = vld [vmem:[%s2573_s1 + $0x28] sm:$0xff] (!%p206_p2)  }
   0xb   : > { %1048 = vmatpush1.bf16.msra.mxu1 (!%p206_p2), %v1874_v5  ;;  %v1888_v19 = vld [vmem:[%s2573_s1 + $0x70] sm:$0xff] (!%p206_p2)   ;;  %v1891_v22 = vld [vmem:[%s2573_s1 + $0x78] sm:$0xff] (!%p206_p2)   ;;  %v1897_v28 = vld [vmem:[%s2573_s1 + $0xc0] sm:$0xff] (!%p206_p2)  }
   0xc   : > { %1745 = vmatpush3.bf16.msra.mxu0 (!%p206_p2), %v1875_v6  ;;  %1049 = vmatprep.subr.bf16.mxu1 (!%p206_p2), %v2003_v1  ;;  %v1889_v20 = vld [vmem:[%s2573_s1 + $0xb0] sm:$0xff] (!%p206_p2)   ;;  %v1892_v24 = vld [vmem:[%s2573_s1 + $0xb8] sm:$0xff] (!%p206_p2)  }
   0xd   : > { %1746 = vmatprep.subr.bf16.mxu0 %v1876_v7  ;;  %s2579_s13 = smov (!%p241_p3, %s1626_s13), 63  ;;  %v1890_v21 = vld [vmem:[%s2573_s1 + $0x30] sm:$0xff]   ;;  %v1893_v26 = vld [vmem:[%s2573_s1 + $0x38] sm:$0xff]   ;;  %s2581_s19 = smov (!%p247_p4, %s2041_s19), 1 }
   0xe   : > { %s1741_s7 = sshll.u32 %s2579_s13, 4  ;;  %s249_s23 = scalar_lea.vmem %s2575_s3, %s2581_s19 }
   0xf   : > { %1050 = vmatpush1.bf16.msra.mxu1 %v1877_v8  ;;  %s2118_s17 = scalar_lea.vmem %s2572_s0, %s1741_s7  ;;  %s252_s26 = scalar_lea.vmem %s2576_s4, %s2581_s19 }
  0x10   : > { %1747 = vmatpush3.bf16.msra.mxu0 %v1878_v9  ;;  %1051 = vmatprep.subr.bf16.mxu1 %v2003_v1  ;;  %v1896_v23 = vld [vmem:[%s2118_s17 + $0x4] ss:$16 sps:$4 sm:$0xff]   ;;  %v1900_v25 = vld [vmem:[%s2118_s17 + $0xc] ss:$16 sps:$4 sm:$0xff]   ;;  %v1894_v27 = vld [vmem:[%s2118_s17] ss:$16 sps:$4 sm:$0xff]  }
  0x11   : > { %1748 = vmatprep.subr.bf16.mxu0 %v1879_v10  ;;  %916 = vmatprep.mubr.bf16.mxu0 %v1896_v23  ;;  %v1901_v29 = vld [vmem:[%s2118_s17 + $0x24] ss:$16 sps:$4 sm:$0xff]   ;;  %v1898_v30 = vld [vmem:[%s2118_s17 + $0x8] ss:$16 sps:$4 sm:$0xff]   ;;  %v1904_v31 = vld [vmem:[%s2118_s17 + $0x2c] ss:$16 sps:$4 sm:$0xff]  }
  0x12   : > { %1721 = vmatprep.mubr.msk.bf16.mxu1 %vm835_vm0, %v1900_v25  ;;  %v1903_v32 = vld [vmem:[%s2118_s17 + $0x20] ss:$16 sps:$4 sm:$0xff]   ;;  %v1907_v33 = vld [vmem:[%s2118_s17 + $0x44] ss:$16 sps:$4 sm:$0xff]   ;;  %v1906_v34 = vld [vmem:[%s2118_s17 + $0x28] ss:$16 sps:$4 sm:$0xff]  }
  0x13   : > { %1052 = vmatpush1.bf16.msra.mxu1 %v1880_v11  ;;  %v1910_v35 = vld [vmem:[%s2118_s17 + $0x4c] ss:$16 sps:$4 sm:$0xff]   ;;  %v1909_v36 = vld [vmem:[%s2118_s17 + $0x40] ss:$16 sps:$4 sm:$0xff]   ;;  %v1913_v37 = vld [vmem:[%s2118_s17 + $0x64] ss:$16 sps:$4 sm:$0xff]  }
  0x14   : > { %1749 = vmatpush3.bf16.msra.mxu0 %v1881_v12  ;;  %1053 = vmatprep.subr.bf16.mxu1 %v2003_v1  ;;  %v1912_v38 = vld [vmem:[%s2118_s17 + $0x48] ss:$16 sps:$4 sm:$0xff]   ;;  %v1916_v39 = vld [vmem:[%s2118_s17 + $0x6c] ss:$16 sps:$4 sm:$0xff]   ;;  %v1915_v40 = vld [vmem:[%s2118_s17 + $0x60] ss:$16 sps:$4 sm:$0xff]  }
  0x15   : > { %1750 = vmatprep.subr.bf16.mxu0 %v1882_v13  ;;  %v1919_v41 = vld [vmem:[%s2118_s17 + $0x84] ss:$16 sps:$4 sm:$0xff]   ;;  %v1918_v42 = vld [vmem:[%s2118_s17 + $0x68] ss:$16 sps:$4 sm:$0xff]   ;;  %v1922_v43 = vld [vmem:[%s2118_s17 + $0x8c] ss:$16 sps:$4 sm:$0xff]  }
  0x16   : > { %v1921_v44 = vld [vmem:[%s2118_s17 + $0x80] ss:$16 sps:$4 sm:$0xff]   ;;  %v1925_v45 = vld [vmem:[%s2118_s17 + $0xa4] ss:$16 sps:$4 sm:$0xff]   ;;  %v1924_v46 = vld [vmem:[%s2118_s17 + $0x88] ss:$16 sps:$4 sm:$0xff]  }
  0x17   : > { %1054 = vmatpush1.bf16.msra.mxu1 %v1883_v14  ;;  %v1928_v47 = vld [vmem:[%s2118_s17 + $0xac] ss:$16 sps:$4 sm:$0xff]   ;;  %v1927_v48 = vld [vmem:[%s2118_s17 + $0xa0] ss:$16 sps:$4 sm:$0xff]   ;;  %v1931_v49 = vld [vmem:[%s2118_s17 + $0xc4] ss:$16 sps:$4 sm:$0xff]  }
  0x18   : > { %1751 = vmatpush3.bf16.msra.mxu0 %v1884_v15  ;;  %1055 = vmatprep.subr.bf16.mxu1 %v2003_v1  ;;  %v1930_v50 = vld [vmem:[%s2118_s17 + $0xa8] ss:$16 sps:$4 sm:$0xff]   ;;  %v1934_v51 = vld [vmem:[%s2118_s17 + $0xcc] ss:$16 sps:$4 sm:$0xff]   ;;  %v1933_v52 = vld [vmem:[%s2118_s17 + $0xc0] ss:$16 sps:$4 sm:$0xff]  }
  0x19   : > { %1752 = vmatprep.subr.bf16.mxu0 %v1885_v16  ;;  %v1937_v53 = vld [vmem:[%s2118_s17 + $0xe4] ss:$16 sps:$4 sm:$0xff]   ;;  %v1936_v54 = vld [vmem:[%s2118_s17 + $0xc8] ss:$16 sps:$4 sm:$0xff]   ;;  %v1940_v55 = vld [vmem:[%s2118_s17 + $0xec] ss:$16 sps:$4 sm:$0xff]  }
  0x1a   : > { %v1939_v56 = vld [vmem:[%s2118_s17 + $0xe0] ss:$16 sps:$4 sm:$0xff]   ;;  %v1943_v57 = vld [vmem:[%s2118_s17 + $0x104] ss:$16 sps:$4 sm:$0xff]   ;;  %v1942_v58 = vld [vmem:[%s2118_s17 + $0xe8] ss:$16 sps:$4 sm:$0xff]  }
  0x1b   : > { %1056 = vmatpush1.bf16.msra.mxu1 %v1886_v17  ;;  %v1946_v59 = vld [vmem:[%s2118_s17 + $0x10c] ss:$16 sps:$4 sm:$0xff]   ;;  %v1945_v60 = vld [vmem:[%s2118_s17 + $0x100] ss:$16 sps:$4 sm:$0xff]   ;;  %v1949_v61 = vld [vmem:[%s2118_s17 + $0x124] ss:$16 sps:$4 sm:$0xff]  }
  0x1c   : > { %1753 = vmatpush3.bf16.msra.mxu0 %v1887_v18  ;;  %1057 = vmatprep.subr.bf16.mxu1 %v2003_v1  ;;  %v1948_v62 = vld [vmem:[%s2118_s17 + $0x108] ss:$16 sps:$4 sm:$0xff]   ;;  %v1952_v63 = vld [vmem:[%s2118_s17 + $0x12c] ss:$16 sps:$4 sm:$0xff]   ;;  %v1951_v0 = vld [vmem:[%s2118_s17 + $0x120] ss:$16 sps:$4 sm:$0xff]  }
  0x1d   : > { %1754 = vmatprep.subr.bf16.mxu0 %v1888_v19  ;;  %v1954_v2 = vld [vmem:[%s2118_s17 + $0x128] ss:$16 sps:$4 sm:$0xff]   ;;  %v1958_v3 = vld [vmem:[%s2118_s17 + $0x14c] ss:$16 sps:$4 sm:$0xff]   ;;  %v1957_v4 = vld [vmem:[%s2118_s17 + $0x140] ss:$16 sps:$4 sm:$0xff]  }
  0x1e   : > { %v1961_v5 = vld [vmem:[%s2118_s17 + $0x164] ss:$16 sps:$4 sm:$0xff]   ;;  %v1960_v6 = vld [vmem:[%s2118_s17 + $0x148] ss:$16 sps:$4 sm:$0xff]   ;;  %v1964_v7 = vld [vmem:[%s2118_s17 + $0x16c] ss:$16 sps:$4 sm:$0xff]  }
  0x1f   : > { %1058 = vmatpush1.bf16.msra.mxu1 %v1889_v20  ;;  %v1963_v8 = vld [vmem:[%s2118_s17 + $0x160] ss:$16 sps:$4 sm:$0xff]   ;;  %v1967_v9 = vld [vmem:[%s2118_s17 + $0x184] ss:$16 sps:$4 sm:$0xff]   ;;  %v1966_v10 = vld [vmem:[%s2118_s17 + $0x168] ss:$16 sps:$4 sm:$0xff]  }
  0x20   : > { %1755 = vmatpush3.bf16.msra.mxu0 %v1890_v21  ;;  %1059 = vmatprep.subr.bf16.mxu1 %v2003_v1  ;;  %v1970_v11 = vld [vmem:[%s2118_s17 + $0x18c] ss:$16 sps:$4 sm:$0xff]   ;;  %v1969_v12 = vld [vmem:[%s2118_s17 + $0x180] ss:$16 sps:$4 sm:$0xff]   ;;  %v1973_v13 = vld [vmem:[%s2118_s17 + $0x1a4] ss:$16 sps:$4 sm:$0xff]  }
  0x21   : > { %1756 = vmatprep.subr.bf16.mxu0 %v1891_v22  ;;  %v1972_v14 = vld [vmem:[%s2118_s17 + $0x188] ss:$16 sps:$4 sm:$0xff]   ;;  %v1976_v15 = vld [vmem:[%s2118_s17 + $0x1ac] ss:$16 sps:$4 sm:$0xff]   ;;  %v1975_v16 = vld [vmem:[%s2118_s17 + $0x1a0] ss:$16 sps:$4 sm:$0xff]  }
  0x22   : > { %v1979_v17 = vld [vmem:[%s2118_s17 + $0x1c4] ss:$16 sps:$4 sm:$0xff]   ;;  %v1978_v18 = vld [vmem:[%s2118_s17 + $0x1a8] ss:$16 sps:$4 sm:$0xff]   ;;  %v1982_v19 = vld [vmem:[%s2118_s17 + $0x1cc] ss:$16 sps:$4 sm:$0xff]  }
  0x23   : > { %1060 = vmatpush1.bf16.msra.mxu1 %v1892_v24  ;;  %v1981_v20 = vld [vmem:[%s2118_s17 + $0x1c0] ss:$16 sps:$4 sm:$0xff]   ;;  %v1985_v21 = vld [vmem:[%s2118_s17 + $0x1e4] ss:$16 sps:$4 sm:$0xff]   ;;  %v1984_v22 = vld [vmem:[%s2118_s17 + $0x1c8] ss:$16 sps:$4 sm:$0xff]  }
  0x24   : > { %1757 = vmatpush3.bf16.msra.mxu0 %v1893_v26  ;;  %1061 = vmatprep.subr.bf16.mxu1 %v2003_v1  ;;  %v1955_v1 = vld [vmem:[%s2118_s17 + $0x144] ss:$16 sps:$4 sm:$0xff]   ;;  %v1988_v23 = vld [vmem:[%s2118_s17 + $0x1ec] ss:$16 sps:$4 sm:$0xff]   ;;  %v1987_v24 = vld [vmem:[%s2118_s17 + $0x1e0] ss:$16 sps:$4 sm:$0xff]  }
  0x25   : > { %v1990_v25 = vld [vmem:[%s2118_s17 + $0x1e8] ss:$16 sps:$4 sm:$0xff]   ;;  %s1630_s19 = sshll.u32 %s2579_s13, 3 }
  0x26   : > { %s2515_s28 = scalar_lea.vmem %s2577_s5, %s1630_s19 }
  0x27   : > { %917 = vmatmul.mubr.bf16.vlgmr.msra.gmra.mrb[0].mxu0 %v1894_v27  ;;  %1062 = vmatpush1.bf16.msra.mxu1 %v1897_v28  ;;  %v2221_v28 = vld [vmem:[%s2574_s2] ss:$0 sm:$0xff] }
  0x28   : > { %924 = vmatprep.mubr.bf16.mxu0 %v1901_v29 }
  0x2a   : > { %1078 = vmatmul.mubr.bf16.vlgmr.msra.gmra.mrb[0].mxu1 %v1898_v30 }
  0x2b   : > { %1722 = vmatprep.mubr.msk.bf16.mxu1 %vm835_vm0, %v1904_v31 }
  0x2f   : > { %925 = vmatmul.mubr.bf16.gmra.mrb[4].mxu0 %v1903_v32 }
  0x30   : > { %932 = vmatprep.mubr.bf16.mxu0 %v1907_v33 }
  0x32   : > { %1086 = vmatmul.mubr.bf16.gmra.mrb[4].mxu1 %v1906_v34 }
  0x33   : > { %1723 = vmatprep.mubr.msk.bf16.mxu1 %vm835_vm0, %v1910_v35 }
  0x37   : > { %933 = vmatmul.mubr.bf16.gmra.mrb[8].mxu0 %v1909_v36 }
  0x38   : > { %940 = vmatprep.mubr.bf16.mxu0 %v1913_v37 }
  0x3a   : > { %1094 = vmatmul.mubr.bf16.gmra.mrb[8].mxu1 %v1912_v38 }
  0x3b   : > { %1724 = vmatprep.mubr.msk.bf16.mxu1 %vm835_vm0, %v1916_v39 }
  0x3f   : > { %941 = vmatmul.mubr.bf16.gmra.mrb[12].mxu0 %v1915_v40 }
  0x40   : > { %948 = vmatprep.mubr.bf16.mxu0 %v1919_v41 }
  0x42   : > { %1102 = vmatmul.mubr.bf16.gmra.mrb[12].mxu1 %v1918_v42 }
  0x43   : > { %1725 = vmatprep.mubr.msk.bf16.mxu1 %vm835_vm0, %v1922_v43 }
  0x47   : > { %949 = vmatmul.mubr.bf16.gmra.mrb[16].mxu0 %v1921_v44 }
  0x48   : > { %956 = vmatprep.mubr.bf16.mxu0 %v1925_v45 }
  0x4a   : > { %1110 = vmatmul.mubr.bf16.gmra.mrb[16].mxu1 %v1924_v46 }
  0x4b   : > { %1726 = vmatprep.mubr.msk.bf16.mxu1 %vm835_vm0, %v1928_v47 }
  0x4f   : > { %957 = vmatmul.mubr.bf16.gmra.mrb[20].mxu0 %v1927_v48 }
  0x50   : > { %964 = vmatprep.mubr.bf16.mxu0 %v1931_v49 }
  0x52   : > { %1118 = vmatmul.mubr.bf16.gmra.mrb[20].mxu1 %v1930_v50 }
  0x53   : > { %1727 = vmatprep.mubr.msk.bf16.mxu1 %vm835_vm0, %v1934_v51 }
  0x57   : > { %965 = vmatmul.mubr.bf16.gmra.mrb[24].mxu0 %v1933_v52 }
  0x58   : > { %972 = vmatprep.mubr.bf16.mxu0 %v1937_v53 }
  0x5a   : > { %1126 = vmatmul.mubr.bf16.gmra.mrb[24].mxu1 %v1936_v54 }
  0x5b   : > { %1728 = vmatprep.mubr.msk.bf16.mxu1 %vm835_vm0, %v1940_v55 }
  0x5f   : > { %973 = vmatmul.mubr.bf16.gmra.mrb[28].mxu0 %v1939_v56 }
  0x60   : > { %980 = vmatprep.mubr.bf16.mxu0 %v1943_v57 }
  0x62   : > { %1134 = vmatmul.mubr.bf16.gmra.mrb[28].mxu1 %v1942_v58 }
  0x63   : > { %1729 = vmatprep.mubr.msk.bf16.mxu1 %vm835_vm0, %v1946_v59 }
  0x67   : > { %981 = vmatmul.mubr.bf16.gmra.mrb[32].mxu0 %v1945_v60 }
  0x68   : > { %988 = vmatprep.mubr.bf16.mxu0 %v1949_v61 }
  0x6a   : > { %1142 = vmatmul.mubr.bf16.gmra.mrb[32].mxu1 %v1948_v62 }
  0x6b   : > { %1730 = vmatprep.mubr.msk.bf16.mxu1 %vm835_vm0, %v1952_v63 }
  0x6f   : > { %989 = vmatmul.mubr.bf16.gmra.mrb[36].mxu0 %v1951_v0 }
  0x70   : > { %996 = vmatprep.mubr.bf16.mxu0 %v1955_v1 }
  0x72   : > { %1150 = vmatmul.mubr.bf16.gmra.mrb[36].mxu1 %v1954_v2 }
  0x73   : > { %1731 = vmatprep.mubr.msk.bf16.mxu1 %vm835_vm0, %v1958_v3 }
  0x77   : > { %997 = vmatmul.mubr.bf16.gmra.mrb[40].mxu0 %v1957_v4 }
  0x78   : > { %1004 = vmatprep.mubr.bf16.mxu0 %v1961_v5 }
  0x7a   : > { %1158 = vmatmul.mubr.bf16.gmra.mrb[40].mxu1 %v1960_v6 }
  0x7b   : > { %1732 = vmatprep.mubr.msk.bf16.mxu1 %vm835_vm0, %v1964_v7 }
  0x7f   : > { %1005 = vmatmul.mubr.bf16.gmra.mrb[44].mxu0 %v1963_v8 }
  0x80   : > { %1012 = vmatprep.mubr.bf16.mxu0 %v1967_v9 }
  0x82   : > { %1166 = vmatmul.mubr.bf16.gmra.mrb[44].mxu1 %v1966_v10 }
  0x83   : > { %1733 = vmatprep.mubr.msk.bf16.mxu1 %vm835_vm0, %v1970_v11 }
  0x87   : > { %1013 = vmatmul.mubr.bf16.gmra.mrb[48].mxu0 %v1969_v12 }
  0x88   : > { %1020 = vmatprep.mubr.bf16.mxu0 %v1973_v13 }
  0x8a   : > { %1174 = vmatmul.mubr.bf16.gmra.mrb[48].mxu1 %v1972_v14 }
  0x8b   : > { %1734 = vmatprep.mubr.msk.bf16.mxu1 %vm835_vm0, %v1976_v15 }
  0x8f   : > { %1021 = vmatmul.mubr.bf16.gmra.mrb[52].mxu0 %v1975_v16 }
  0x90   : > { %1028 = vmatprep.mubr.bf16.mxu0 %v1979_v17 }
  0x92   : > { %1182 = vmatmul.mubr.bf16.gmra.mrb[52].mxu1 %v1978_v18 }
  0x93   : > { %1735 = vmatprep.mubr.msk.bf16.mxu1 %vm835_vm0, %v1982_v19 }
  0x97   : > { %1029 = vmatmul.mubr.bf16.gmra.mrb[56].mxu0 %v1981_v20 }
  0x98   : > { %1036 = vmatprep.mubr.bf16.mxu0 %v1985_v21 }
  0x9a   : > { %1190 = vmatmul.mubr.bf16.gmra.mrb[56].mxu1 %v1984_v22 }
  0x9b   : > { %1736 = vmatprep.mubr.msk.bf16.mxu1 %vm835_vm0, %v1988_v23 }
  0x9f   : > { %1037 = vmatmul.mubr.bf16.gmra.mrb[60].mxu0 %v1987_v24 }
  0xa2   : > { %1198 = vmatmul.mubr.bf16.gmra.mrb[60].mxu1 %v1990_v25 }
  0xfa   : > { %v1758_v26 = vpop.f32.mrb[0].mxu0 }
  0xfb   : > { %v1759_v27 = vpop.f32.mrb[1].mxu0 }
  0xfc   : > { %v1760_v29 = vadd.f32 %v1759_v27, %v1758_v26  ;;  %v1761_v30 = vpop.f32.mrb[2].mxu0 }
  0xfd   : > { %v1762_v31 = vpop.f32.mrb[3].mxu0  ;;  %v1079_v32 = vpop.f32.mrb[0].mxu1 }
  0xfe   : > { %v1763_v33 = vadd.f32 %v1762_v31, %v1761_v30  ;;  %v919_v34 = vadd.f32 %v1760_v29, %v2221_v28  ;;  %v1081_v35 = vpop.f32.mrb[1].mxu1 }
  0xff   : > { %v1082_v36 = vpop.f32.mrb[2].mxu1 }
 0x100   : > { %v2224_v37 = vadd.f32 %v1079_v32, %v919_v34  ;;  %v922_v38 = vadd.f32 %v1763_v33, %v2221_v28  ;;  %v1084_v39 = vpop.f32.mrb[3].mxu1 }
 0x102   : > { %v2227_v40 = vadd.f32 %v1082_v36, %v922_v38  ;;  %v1764_v41 = vpop.f32.mrb[4].mxu0  ;;  %v1249_v38 = vmul.f32 %v2224_v37, %v2224_v37 }
 0x103   : > { %v1765_v42 = vpop.f32.mrb[5].mxu0 }
 0x104   : > { %v1766_v43 = vadd.f32 %v1765_v42, %v1764_v41  ;;  %v1767_v44 = vpop.f32.mrb[6].mxu0  ;;  %v1250_v33 = vmul.f32 %v2227_v40, %v2227_v40  ;;  %v1206_v39 = vadd.f32 %v2227_v40, %v2224_v37 }
 0x105   : > { %v1768_v45 = vpop.f32.mrb[7].mxu0  ;;  %v1087_v46 = vpop.f32.mrb[4].mxu1 }
 0x106   : > { %v1769_v47 = vadd.f32 %v1768_v45, %v1767_v44  ;;  %v927_v48 = vadd.f32 %v1766_v43, %v2221_v28  ;;  %v1089_v49 = vpop.f32.mrb[5].mxu1 }
 0x107   : > { %v1090_v50 = vpop.f32.mrb[6].mxu1 }
 0x108   : > { %v2230_v51 = vadd.f32 %v1087_v46, %v927_v48  ;;  %v930_v52 = vadd.f32 %v1769_v47, %v2221_v28  ;;  %v1092_v53 = vpop.f32.mrb[7].mxu1  ;;  %v1281_v46 = vadd.f32 %v1250_v33, %v1249_v38 }
 0x10a   : > { %v2233_v54 = vadd.f32 %v1090_v50, %v930_v52  ;;  %v1770_v55 = vpop.f32.mrb[8].mxu0  ;;  %v1251_v41 = vmul.f32 %v2230_v51, %v2230_v51  ;;  %v1207_v47 = vadd.f32 %v1206_v39, %v2230_v51 }
 0x10b   : > { %v1771_v56 = vpop.f32.mrb[9].mxu0 }
 0x10c   : > { %v1772_v57 = vadd.f32 %v1771_v56, %v1770_v55  ;;  %v1773_v58 = vpop.f32.mrb[10].mxu0  ;;  %v1282_v53 = vadd.f32 %v1281_v46, %v1251_v41  ;;  %v1252_v55 = vmul.f32 %v2233_v54, %v2233_v54 }
 0x10d   : > { %v1774_v59 = vpop.f32.mrb[11].mxu0  ;;  %v1095_v60 = vpop.f32.mrb[8].mxu1 }
 0x10e   : > { %v1775_v61 = vadd.f32 %v1774_v59, %v1773_v58  ;;  %v935_v62 = vadd.f32 %v1772_v57, %v2221_v28  ;;  %v1097_v63 = vpop.f32.mrb[9].mxu1  ;;  %v1208_v59 = vadd.f32 %v1207_v47, %v2233_v54 }
 0x10f   : > { %v1098_v0 = vpop.f32.mrb[10].mxu1 }
 0x110   : > { %v2236_v1 = vadd.f32 %v1095_v60, %v935_v62  ;;  %v938_v2 = vadd.f32 %v1775_v61, %v2221_v28  ;;  %v1100_v3 = vpop.f32.mrb[11].mxu1 }
 0x112   : > { %v2239_v4 = vadd.f32 %v1098_v0, %v938_v2  ;;  %v1776_v5 = vpop.f32.mrb[12].mxu0  ;;  %v1253_v60 = vmul.f32 %v2236_v1, %v2236_v1  ;;  %v1283_v0 = vadd.f32 %v1282_v53, %v1252_v55  ;;  %v1209_v2 = vadd.f32 %v1208_v59, %v2236_v1 }
 0x113   : > { %v1777_v6 = vpop.f32.mrb[13].mxu0 }
 0x114   : > { %v1778_v7 = vadd.f32 %v1777_v6, %v1776_v5  ;;  %v1779_v8 = vpop.f32.mrb[14].mxu0 }
 0x115   : > { %v1780_v9 = vpop.f32.mrb[15].mxu0  ;;  %v1103_v10 = vpop.f32.mrb[12].mxu1 }
 0x116   : > { %v1781_v11 = vadd.f32 %v1780_v9, %v1779_v8  ;;  %v943_v12 = vadd.f32 %v1778_v7, %v2221_v28  ;;  %v1105_v13 = vpop.f32.mrb[13].mxu1  ;;  %v1284_v8 = vadd.f32 %v1283_v0, %v1253_v60  ;;  %v1254_v9 = vmul.f32 %v2239_v4, %v2239_v4 }
 0x117   : > { %v1106_v14 = vpop.f32.mrb[14].mxu1 }
 0x118   : > { %v2242_v15 = vadd.f32 %v1103_v10, %v943_v12  ;;  %v946_v16 = vadd.f32 %v1781_v11, %v2221_v28  ;;  %v1108_v17 = vpop.f32.mrb[15].mxu1 }
 0x11a   : > { %v2245_v18 = vadd.f32 %v1106_v14, %v946_v16  ;;  %v1782_v19 = vpop.f32.mrb[16].mxu0  ;;  %v1210_v14 = vadd.f32 %v1209_v2, %v2239_v4  ;;  %v1255_v16 = vmul.f32 %v2242_v15, %v2242_v15 }
 0x11b   : > { %v1783_v20 = vpop.f32.mrb[17].mxu0 }
 0x11c   : > { %v1784_v21 = vadd.f32 %v1783_v20, %v1782_v19  ;;  %v1785_v22 = vpop.f32.mrb[18].mxu0 }
 0x11d   : > { %v1786_v23 = vpop.f32.mrb[19].mxu0  ;;  %v1111_v24 = vpop.f32.mrb[16].mxu1 }
 0x11e   : > { %v1787_v25 = vadd.f32 %v1786_v23, %v1785_v22  ;;  %v951_v26 = vadd.f32 %v1784_v21, %v2221_v28  ;;  %v1113_v27 = vpop.f32.mrb[17].mxu1  ;;  %v1285_v21 = vadd.f32 %v1284_v8, %v1254_v9  ;;  %v1211_v22 = vadd.f32 %v1210_v14, %v2242_v15 }
 0x11f   : > { %v1114_v29 = vpop.f32.mrb[18].mxu1  ;;  %v1256_v27 = vmul.f32 %v2245_v18, %v2245_v18 }
 0x120   : > { %v2248_v30 = vadd.f32 %v1111_v24, %v951_v26  ;;  %v954_v31 = vadd.f32 %v1787_v25, %v2221_v28  ;;  %v1116_v32 = vpop.f32.mrb[19].mxu1  ;;  %v1286_v26 = vadd.f32 %v1285_v21, %v1255_v16 }
 0x122   : > { %v2253_v34 = vadd.f32 %v1114_v29, %v954_v31  ;;  %v1788_v35 = vpop.f32.mrb[20].mxu0 }
 0x123   : > { %v1789_v36 = vpop.f32.mrb[21].mxu0 }
 0x124   : > { %v1790_v42 = vadd.f32 %v1789_v36, %v1788_v35  ;;  %v1791_v43 = vpop.f32.mrb[22].mxu0  ;;  %v1212_v35 = vadd.f32 %v1211_v22, %v2245_v18  ;;  %v1257_v36 = vmul.f32 %v2248_v30, %v2248_v30 }
 0x125   : > { %v1792_v44 = vpop.f32.mrb[23].mxu0  ;;  %v1119_v45 = vpop.f32.mrb[20].mxu1 }
 0x126   : > { %v1793_v48 = vadd.f32 %v1792_v44, %v1791_v43  ;;  %v959_v49 = vadd.f32 %v1790_v42, %v2221_v28  ;;  %v1121_v50 = vpop.f32.mrb[21].mxu1  ;;  %v1287_v43 = vadd.f32 %v1286_v26, %v1256_v27  ;;  %v1213_v44 = vadd.f32 %v1212_v35, %v2248_v30 }
 0x127   : > { %v1122_v52 = vpop.f32.mrb[22].mxu1 }
 0x128   : > { %v2265_v56 = vadd.f32 %v1119_v45, %v959_v49  ;;  %v962_v57 = vadd.f32 %v1793_v48, %v2221_v28  ;;  %v1124_v58 = vpop.f32.mrb[23].mxu1  ;;  %v1288_v48 = vadd.f32 %v1287_v43, %v1257_v36  ;;  %v1258_v49 = vmul.f32 %v2253_v34, %v2253_v34 }
 0x129   : > { %v1214_v55 = vadd.f32 %v1213_v44, %v2253_v34 }
 0x12a   : > { %v2271_v61 = vadd.f32 %v1122_v52, %v962_v57  ;;  %v1794_v62 = vpop.f32.mrb[24].mxu0  ;;  %v1259_v57 = vmul.f32 %v2265_v56, %v2265_v56 }
 0x12b   : > { %v1795_v63 = vpop.f32.mrb[25].mxu0  ;;  %v1215_v0 = vadd.f32 %v1214_v55, %v2265_v56 }
 0x12c   : > { %v1796_v3 = vadd.f32 %v1795_v63, %v1794_v62  ;;  %v1797_v5 = vpop.f32.mrb[26].mxu0  ;;  %v1289_v63 = vadd.f32 %v1288_v48, %v1258_v49  ;;  %v1260_v8 = vmul.f32 %v2271_v61, %v2271_v61 }
 0x12d   : > { %v1798_v6 = vpop.f32.mrb[27].mxu0  ;;  %v1127_v7 = vpop.f32.mrb[24].mxu1 }
 0x12e   : > { %v1799_v10 = vadd.f32 %v1798_v6, %v1797_v5  ;;  %v967_v11 = vadd.f32 %v1796_v3, %v2221_v28  ;;  %v1129_v12 = vpop.f32.mrb[25].mxu1 }
 0x12f   : > { %v1130_v13 = vpop.f32.mrb[26].mxu1  ;;  %v1216_v12 = vadd.f32 %v1215_v0, %v2271_v61 }
 0x130   : > { %v2280_v17 = vadd.f32 %v1127_v7, %v967_v11  ;;  %v970_v19 = vadd.f32 %v1799_v10, %v2221_v28  ;;  %v1132_v20 = vpop.f32.mrb[27].mxu1  ;;  %v1290_v7 = vadd.f32 %v1289_v63, %v1259_v57 }
 0x132   : > { %v2284_v23 = vadd.f32 %v1130_v13, %v970_v19  ;;  %v1800_v24 = vpop.f32.mrb[28].mxu0  ;;  %v1261_v13 = vmul.f32 %v2280_v17, %v2280_v17  ;;  %v1291_v20 = vadd.f32 %v1290_v7, %v1260_v8  ;;  %v1217_v21 = vadd.f32 %v1216_v12, %v2280_v17 }
 0x133   : > { %v1801_v25 = vpop.f32.mrb[29].mxu0 }
 0x134   : > { %v1802_v29 = vadd.f32 %v1801_v25, %v1800_v24  ;;  %v1803_v31 = vpop.f32.mrb[30].mxu0  ;;  %v1292_v27 = vadd.f32 %v1291_v20, %v1261_v13  ;;  %v1218_v36 = vadd.f32 %v1217_v21, %v2284_v23 }
 0x135   : > { %v1804_v32 = vpop.f32.mrb[31].mxu0  ;;  %v1135_v33 = vpop.f32.mrb[28].mxu1 }
 0x136   : > { %v1805_v38 = vadd.f32 %v1804_v32, %v1803_v31  ;;  %v975_v39 = vadd.f32 %v1802_v29, %v2221_v28  ;;  %v1137_v41 = vpop.f32.mrb[29].mxu1  ;;  %v1262_v29 = vmul.f32 %v2284_v23, %v2284_v23 }
 0x137   : > { %v1138_v42 = vpop.f32.mrb[30].mxu1 }
 0x138   : > { %v2293_v45 = vadd.f32 %v1135_v33, %v975_v39  ;;  %v978_v46 = vadd.f32 %v1805_v38, %v2221_v28  ;;  %v1140_v47 = vpop.f32.mrb[31].mxu1  ;;  %v1293_v43 = vadd.f32 %v1292_v27, %v1262_v29 }
 0x13a   : > { %v2298_v50 = vadd.f32 %v1138_v42, %v978_v46  ;;  %v1806_v52 = vpop.f32.mrb[32].mxu0  ;;  %v1263_v38 = vmul.f32 %v2293_v45, %v2293_v45  ;;  %v1219_v44 = vadd.f32 %v1218_v36, %v2293_v45 }
 0x13b   : > { %v1807_v53 = vpop.f32.mrb[33].mxu0 }
 0x13c   : > { %v1808_v58 = vadd.f32 %v1807_v53, %v1806_v52  ;;  %v1809_v59 = vpop.f32.mrb[34].mxu0  ;;  %v1294_v49 = vadd.f32 %v1293_v43, %v1263_v38  ;;  %v1264_v52 = vmul.f32 %v2298_v50, %v2298_v50 }
 0x13d   : > { %v1810_v60 = vpop.f32.mrb[35].mxu0  ;;  %v1143_v62 = vpop.f32.mrb[32].mxu1 }
 0x13e   : > { %v1811_v2 = vadd.f32 %v1810_v60, %v1809_v59  ;;  %v983_v3 = vadd.f32 %v1808_v58, %v2221_v28  ;;  %v1145_v5 = vpop.f32.mrb[33].mxu1  ;;  %v1220_v59 = vadd.f32 %v1219_v44, %v2298_v50 }
 0x13f   : > { %v1146_v6 = vpop.f32.mrb[34].mxu1 }
 0x140   : > { %v2307_v9 = vadd.f32 %v1143_v62, %v983_v3  ;;  %v986_v10 = vadd.f32 %v1811_v2, %v2221_v28  ;;  %v1148_v11 = vpop.f32.mrb[35].mxu1  ;;  %v1295_v3 = vadd.f32 %v1294_v49, %v1264_v52 }
 0x142   : > { %v2313_v14 = vadd.f32 %v1146_v6, %v986_v10  ;;  %v1812_v16 = vpop.f32.mrb[36].mxu0  ;;  %v1265_v60 = vmul.f32 %v2307_v9, %v2307_v9  ;;  %v1221_v5 = vadd.f32 %v1220_v59, %v2307_v9 }
 0x143   : > { %v1813_v19 = vpop.f32.mrb[37].mxu0 }
 0x144   : > { %v1814_v22 = vadd.f32 %v1813_v19, %v1812_v16  ;;  %v1815_v24 = vpop.f32.mrb[38].mxu0  ;;  %v1296_v10 = vadd.f32 %v1295_v3, %v1265_v60  ;;  %v1266_v11 = vmul.f32 %v2313_v14, %v2313_v14  ;;  %v1222_v19 = vadd.f32 %v1221_v5, %v2313_v14 }
 0x145   : > { %v1816_v25 = vpop.f32.mrb[39].mxu0  ;;  %v1151_v26 = vpop.f32.mrb[36].mxu1 }
 0x146   : > { %v1817_v31 = vadd.f32 %v1816_v25, %v1815_v24  ;;  %v991_v32 = vadd.f32 %v1814_v22, %v2221_v28  ;;  %v1153_v33 = vpop.f32.mrb[37].mxu1 }
 0x147   : > { %v1154_v35 = vpop.f32.mrb[38].mxu1 }
 0x148   : > { %v2322_v39 = vadd.f32 %v1151_v26, %v991_v32  ;;  %v994_v41 = vadd.f32 %v1817_v31, %v2221_v28  ;;  %v1156_v42 = vpop.f32.mrb[39].mxu1  ;;  %v1297_v26 = vadd.f32 %v1296_v10, %v1266_v11 }
 0x14a   : > { %v2326_v46 = vadd.f32 %v1154_v35, %v994_v41  ;;  %v1818_v47 = vpop.f32.mrb[40].mxu0  ;;  %v1267_v20 = vmul.f32 %v2322_v39, %v2322_v39  ;;  %v1223_v27 = vadd.f32 %v1222_v19, %v2322_v39 }
 0x14b   : > { %v1819_v48 = vpop.f32.mrb[41].mxu0 }
 0x14c   : > { %v1820_v53 = vadd.f32 %v1819_v48, %v1818_v47  ;;  %v1821_v55 = vpop.f32.mrb[42].mxu0  ;;  %v1298_v35 = vadd.f32 %v1297_v26, %v1267_v20  ;;  %v1268_v36 = vmul.f32 %v2326_v46, %v2326_v46  ;;  %v1224_v43 = vadd.f32 %v1223_v27, %v2326_v46 }
 0x14d   : > { %v1822_v57 = vpop.f32.mrb[43].mxu0  ;;  %v1159_v58 = vpop.f32.mrb[40].mxu1 }
 0x14e   : > { %v1823_v62 = vadd.f32 %v1822_v57, %v1821_v55  ;;  %v999_v63 = vadd.f32 %v1820_v53, %v2221_v28  ;;  %v1161_v0 = vpop.f32.mrb[41].mxu1  ;;  %v1299_v52 = vadd.f32 %v1298_v35, %v1268_v36 }
 0x14f   : > { %v1162_v2 = vpop.f32.mrb[42].mxu1 }
 0x150   : > { %v2335_v6 = vadd.f32 %v1159_v58, %v999_v63  ;;  %v1002_v7 = vadd.f32 %v1823_v62, %v2221_v28  ;;  %v1164_v8 = vpop.f32.mrb[43].mxu1 }
 0x152   : > { %v2340_v12 = vadd.f32 %v1162_v2, %v1002_v7  ;;  %v1824_v13 = vpop.f32.mrb[44].mxu0  ;;  %v1269_v44 = vmul.f32 %v2335_v6, %v2335_v6  ;;  %v1225_v53 = vadd.f32 %v1224_v43, %v2335_v6 }
 0x153   : > { %v1825_v16 = vpop.f32.mrb[45].mxu0 }
 0x154   : > { %v1826_v21 = vadd.f32 %v1825_v16, %v1824_v13  ;;  %v1827_v22 = vpop.f32.mrb[46].mxu0  ;;  %v1300_v60 = vadd.f32 %v1299_v52, %v1269_v44  ;;  %v1270_v62 = vmul.f32 %v2340_v12, %v2340_v12  ;;  %v1226_v5 = vadd.f32 %v1225_v53, %v2340_v12 }
 0x155   : > { %v1828_v24 = vpop.f32.mrb[47].mxu0  ;;  %v1167_v25 = vpop.f32.mrb[44].mxu1 }
 0x156   : > { %v1829_v29 = vadd.f32 %v1828_v24, %v1827_v22  ;;  %v1007_v31 = vadd.f32 %v1826_v21, %v2221_v28  ;;  %v1169_v32 = vpop.f32.mrb[45].mxu1  ;;  %v1301_v13 = vadd.f32 %v1300_v60, %v1270_v62 }
 0x157   : > { %v1170_v33 = vpop.f32.mrb[46].mxu1 }
 0x158   : > { %v2349_v38 = vadd.f32 %v1167_v25, %v1007_v31  ;;  %v1010_v41 = vadd.f32 %v1829_v29, %v2221_v28  ;;  %v1172_v42 = vpop.f32.mrb[47].mxu1 }
 0x15a   : > { %v2355_v47 = vadd.f32 %v1170_v33, %v1010_v41  ;;  %v1830_v48 = vpop.f32.mrb[48].mxu0  ;;  %v1271_v7 = vmul.f32 %v2349_v38, %v2349_v38  ;;  %v1227_v16 = vadd.f32 %v1226_v5, %v2349_v38 }
 0x15b   : > { %v1831_v49 = vpop.f32.mrb[49].mxu0 }
 0x15c   : > { %v1832_v55 = vadd.f32 %v1831_v49, %v1830_v48  ;;  %v1833_v57 = vpop.f32.mrb[50].mxu0  ;;  %v1302_v22 = vadd.f32 %v1301_v13, %v1271_v7  ;;  %v1272_v24 = vmul.f32 %v2355_v47, %v2355_v47  ;;  %v1228_v31 = vadd.f32 %v1227_v16, %v2355_v47 }
 0x15d   : > { %v1834_v58 = vpop.f32.mrb[51].mxu0  ;;  %v1175_v59 = vpop.f32.mrb[48].mxu1 }
 0x15e   : > { %v1835_v63 = vadd.f32 %v1834_v58, %v1833_v57  ;;  %v1015_v0 = vadd.f32 %v1832_v55, %v2221_v28  ;;  %v1177_v2 = vpop.f32.mrb[49].mxu1  ;;  %v1303_v42 = vadd.f32 %v1302_v22, %v1272_v24 }
 0x15f   : > { %v1178_v3 = vpop.f32.mrb[50].mxu1 }
 0x160   : > { %v2364_v8 = vadd.f32 %v1175_v59, %v1015_v0  ;;  %v1018_v10 = vadd.f32 %v1835_v63, %v2221_v28  ;;  %v1180_v11 = vpop.f32.mrb[51].mxu1 }
 0x162   : > { %v2368_v19 = vadd.f32 %v1178_v3, %v1018_v10  ;;  %v1836_v20 = vpop.f32.mrb[52].mxu0  ;;  %v1273_v32 = vmul.f32 %v2364_v8, %v2364_v8  ;;  %v1229_v43 = vadd.f32 %v1228_v31, %v2364_v8 }
 0x163   : > { %v1837_v21 = vpop.f32.mrb[53].mxu0 }
 0x164   : > { %v1838_v25 = vadd.f32 %v1837_v21, %v1836_v20  ;;  %v1839_v26 = vpop.f32.mrb[54].mxu0  ;;  %v1304_v52 = vadd.f32 %v1303_v42, %v1273_v32  ;;  %v1274_v53 = vmul.f32 %v2368_v19, %v2368_v19  ;;  %v1230_v59 = vadd.f32 %v1229_v43, %v2368_v19 }
 0x165   : > { %v1840_v27 = vpop.f32.mrb[55].mxu0  ;;  %v1183_v29 = vpop.f32.mrb[52].mxu1 }
 0x166   : > { %v1841_v33 = vadd.f32 %v1840_v27, %v1839_v26  ;;  %v1023_v35 = vadd.f32 %v1838_v25, %v2221_v28  ;;  %v1185_v36 = vpop.f32.mrb[53].mxu1  ;;  %v1305_v3 = vadd.f32 %v1304_v52, %v1274_v53 }
 0x167   : > { %v1186_v41 = vpop.f32.mrb[54].mxu1 }
 0x168   : > { %v2377_v44 = vadd.f32 %v1183_v29, %v1023_v35  ;;  %v1026_v48 = vadd.f32 %v1841_v33, %v2221_v28  ;;  %v1188_v49 = vpop.f32.mrb[55].mxu1 }
 0x16a   : > { %v2382_v55 = vadd.f32 %v1186_v41, %v1026_v48  ;;  %v1842_v57 = vpop.f32.mrb[56].mxu0  ;;  %v1275_v60 = vmul.f32 %v2377_v44, %v2377_v44  ;;  %v1231_v5 = vadd.f32 %v1230_v59, %v2377_v44 }
 0x16b   : > { %v1843_v58 = vpop.f32.mrb[57].mxu0 }
 0x16c   : > { %v1844_v62 = vadd.f32 %v1843_v58, %v1842_v57  ;;  %v1845_v63 = vpop.f32.mrb[58].mxu0  ;;  %v1306_v16 = vadd.f32 %v1305_v3, %v1275_v60  ;;  %v1276_v20 = vmul.f32 %v2382_v55, %v2382_v55  ;;  %v1232_v25 = vadd.f32 %v1231_v5, %v2382_v55 }
 0x16d   : > { %v1846_v0 = vpop.f32.mrb[59].mxu0  ;;  %v1191_v2 = vpop.f32.mrb[56].mxu1 }
 0x16e   : > { %v1847_v7 = vadd.f32 %v1846_v0, %v1845_v63  ;;  %v1031_v10 = vadd.f32 %v1844_v62, %v2221_v28  ;;  %v1193_v11 = vpop.f32.mrb[57].mxu1  ;;  %v1307_v32 = vadd.f32 %v1306_v16, %v1276_v20 }
 0x16f   : > { %v1194_v13 = vpop.f32.mrb[58].mxu1 }
 0x170   : > { %v2391_v21 = vadd.f32 %v1191_v2, %v1031_v10  ;;  %v1034_v22 = vadd.f32 %v1847_v7, %v2221_v28  ;;  %v1196_v24 = vpop.f32.mrb[59].mxu1 }
 0x172   : > { %v1277_v26 = vmul.f32 %v2391_v21, %v2391_v21  ;;  %v2397_v27 = vadd.f32 %v1194_v13, %v1034_v22  ;;  %v1848_v29 = vpop.f32.mrb[60].mxu0  ;;  %v1233_v33 = vadd.f32 %v1232_v25, %v2391_v21 }
 0x173   : > { %v1849_v31 = vpop.f32.mrb[61].mxu0 }
 0x174   : > { %v1850_v35 = vadd.f32 %v1849_v31, %v1848_v29  ;;  %v1851_v36 = vpop.f32.mrb[62].mxu0  ;;  %v1308_v43 = vadd.f32 %v1307_v32, %v1277_v26  ;;  %v1278_v48 = vmul.f32 %v2397_v27, %v2397_v27  ;;  %v1234_v62 = vadd.f32 %v1233_v33, %v2397_v27 }
 0x175   : > { %v1852_v41 = vpop.f32.mrb[63].mxu0  ;;  %v1199_v42 = vpop.f32.mrb[60].mxu1 }
 0x176   : > { %v1853_v49 = vadd.f32 %v1852_v41, %v1851_v36  ;;  %v1039_v52 = vadd.f32 %v1850_v35, %v2221_v28  ;;  %v1201_v53 = vpop.f32.mrb[61].mxu1  ;;  %v1309_v3 = vadd.f32 %v1308_v43, %v1278_v48 }
 0x177   : > { %v1202_v57 = vpop.f32.mrb[62].mxu1 }
 0x178   : > { %v2403_v58 = vadd.f32 %v1199_v42, %v1039_v52  ;;  %v1042_v59 = vadd.f32 %v1853_v49, %v2221_v28  ;;  %v1204_v60 = vpop.f32.mrb[63].mxu1 }
 0x17a   : > { %v1279_v63 = vmul.f32 %v2403_v58, %v2403_v58  ;;  %v2409_v0 = vadd.f32 %v1202_v57, %v1042_v59  ;;  %v1235_v2 = vadd.f32 %v1234_v62, %v2403_v58 }
 0x17c   : > { %v1236_v5 = vadd.f32 %v1235_v2, %v2409_v0  ;;  %v1280_v7 = vmul.f32 %v2409_v0, %v2409_v0  ;;  %v1310_v10 = vadd.f32 %v1309_v3, %v1279_v63 }
 0x17e   : > { %1237 = vadd.xlane.f32.xlu0 %v1236_v5  ;;  %v1311_v11 = vadd.f32 %v1310_v10, %v1280_v7 }
 0x182   : > { %1312 = vadd.xlane.f32.xlu0 %v1311_v11 }
 0x20b   : > { %v1238_v28 = vpop.xlane.xlu0 %1237 }
 0x20c   : > { %v1239_v13 = vrot.slane %v1238_v28, 4 }
 0x20e   : > { %v1240_v16 = vadd.f32 %v1239_v13, %v1238_v28 }
 0x20f   : > { %v1313_v20 = vpop.xlane.xlu0 %1312 }
 0x210   : > { %v1241_v22 = vrot.slane %v1240_v16, 2  ;;  %v1314_v24 = vrot.slane %v1313_v20, 4 }
 0x212   : > { %v1315_v25 = vadd.f32 %v1314_v24, %v1313_v20  ;;  %v1242_v26 = vadd.f32 %v1241_v22, %v1240_v16 }
 0x214   : > { %v1316_v29 = vrot.slane %v1315_v25, 2  ;;  %v1243_v31 = vrot.slane %v1242_v26, 1 }
 0x216   : > { %v1317_v32 = vadd.f32 %v1316_v29, %v1315_v25  ;;  %v1244_v33 = vadd.f32 %v1243_v31, %v1242_v26 }
 0x218   : > { %1854 = vpush %v1244_v33  ;;  %v1318_v35 = vrot.slane %v1317_v32, 1 }
 0x21a   : > { %v1319_v36 = vadd.f32 %v1318_v35, %v1317_v32 }
 0x21c   : > { %1856 = vpush %v1319_v36 }
 0x249   : > { %s1855_s7 = spop %1854 }
 0x24a   : > { %s1248_s8 = smul.f32 0.00048828125, %s1855_s7 }
 0x24c   : > { %s1321_s9 = smul.f32 2048.0, %s1248_s8  ;;  %v2415_v57 = vstv %s1248_s8 }
 0x24d   : > { %s1857_s11 = spop %1856  ;;  %v1329_v59 = vsub.f32 %v2224_v37, %v2415_v57  ;;  %v1330_v60 = vsub.f32 %v2227_v40, %v2415_v57  ;;  %v1331_v62 = vsub.f32 %v2230_v51, %v2415_v57  ;;  %v1332_v63 = vsub.f32 %v2233_v54, %v2415_v57 }
 0x24e   : > { %s1322_s10 = smul.f32 %s1321_s9, %s1248_s8  ;;  %v1333_v2 = vsub.f32 %v2236_v1, %v2415_v57  ;;  %v1334_v3 = vsub.f32 %v2239_v4, %v2415_v57  ;;  %v1335_v5 = vsub.f32 %v2242_v15, %v2415_v57  ;;  %v1336_v37 = vsub.f32 %v2245_v18, %v2415_v57 }
 0x24f   : > { %v1337_v40 = vsub.f32 %v2248_v30, %v2415_v57  ;;  %v1338_v51 = vsub.f32 %v2253_v34, %v2415_v57  ;;  %v1339_v54 = vsub.f32 %v2265_v56, %v2415_v57  ;;  %v1340_v1 = vsub.f32 %v2271_v61, %v2415_v57 }
 0x250   : > { %s1323_s12 = ssub.f32 %s1857_s11, %s1322_s10  ;;  %v1341_v4 = vsub.f32 %v2280_v17, %v2415_v57  ;;  %v1342_v15 = vsub.f32 %v2284_v23, %v2415_v57  ;;  %v1343_v18 = vsub.f32 %v2293_v45, %v2415_v57  ;;  %v1344_v30 = vsub.f32 %v2298_v50, %v2415_v57 }
 0x251   : > { %v1345_v34 = vsub.f32 %v2307_v9, %v2415_v57  ;;  %v1346_v56 = vsub.f32 %v2313_v14, %v2415_v57  ;;  %v1347_v61 = vsub.f32 %v2322_v39, %v2415_v57  ;;  %v1348_v17 = vsub.f32 %v2326_v46, %v2415_v57 }
 0x252   : > { %s1324_s15 = smax.f32 %s2004_s14, %s1323_s12  ;;  %v1349_v23 = vsub.f32 %v2335_v6, %v2415_v57  ;;  %v1350_v45 = vsub.f32 %v2340_v12, %v2415_v57  ;;  %v1351_v50 = vsub.f32 %v2349_v38, %v2415_v57  ;;  %v1352_v9 = vsub.f32 %v2355_v47, %v2415_v57 }
 0x253   : > { %s1327_s16 = smul.f32 0.0004885198, %s1324_s15  ;;  %v1353_v14 = vsub.f32 %v2364_v8, %v2415_v57  ;;  %v1354_v39 = vsub.f32 %v2368_v19, %v2415_v57  ;;  %v1355_v46 = vsub.f32 %v2377_v44, %v2415_v57  ;;  %v1356_v6 = vsub.f32 %v2382_v55, %v2415_v57 }
 0x254   : > { %v1357_v38 = vsub.f32 %v2391_v21, %v2415_v57  ;;  %v1358_v47 = vsub.f32 %v2397_v27, %v2415_v57  ;;  %v1359_v8 = vsub.f32 %v2403_v58, %v2415_v57  ;;  %v1360_v19 = vsub.f32 %v2409_v0, %v2415_v57 }
 0x255   : > { %v1361_v41 = vstv %s1327_s16 }
 0x256   : > { %1991 = vrsqrt.f32 %v1361_v41  ;;  %vm1364_vm1 = vcmp.eq.f32.partialorder %v1361_v41, inf  ;;  %v1367_v48 = vand.u32 2147483648, %v1361_v41  ;;  %vm1366_vm2 = vcmp.eq.f32.partialorder %v1361_v41, 0.0 }
 0x260   : > { %v1992_v42 = vpop.eup %1991 }
 0x261   : > { %v1363_v43 = vmul.f32 %v1992_v42, %v1361_v41  ;;  %v1737_v42 = vld [vmem:[%s249_s23] ss:$0 sm:$0xff] }
 0x263   : > { %v1365_v49 = vsel %vm1364_vm1, %v1361_v41, %v1363_v43 }
 0x264   : > { %v1368_v52 = vsel %vm1366_vm2, %v1367_v48, %v1365_v49 }
 0x265   : > { %1858 = vpush %v1368_v52 }
 0x296   : > { %s1859_s17 = spop %1858 }
 0x297   : > { %s1370_s20 = sadd.f32 1e-05, %s1859_s17 }
 0x299   : > { %v1371_v53 = vstv %s1370_s20 }
 0x29a   : > { %1993 = vrcp.f32 %v1371_v53 }
 0x2a4   : > { %v1994_v12 = vpop.eup %1993 }
 0x2a5   : > { %v1373_v44 = vmul.f32 %v1994_v12, %v1329_v59  ;;  %v1374_v7 = vmul.f32 %v1994_v12, %v1330_v60  ;;  %v1375_v55 = vmul.f32 %v1994_v12, %v1331_v62  ;;  %v1376_v10 = vmul.f32 %v1994_v12, %v1332_v63 }
 0x2a6   : > { %v1377_v11 = vmul.f32 %v1994_v12, %v1333_v2  ;;  %v1378_v28 = vmul.f32 %v1994_v12, %v1334_v3  ;;  %v1379_v13 = vmul.f32 %v1994_v12, %v1335_v5  ;;  %v1380_v16 = vmul.f32 %v1994_v12, %v1336_v37 }
 0x2a7   : > { %v1381_v21 = vmul.f32 %v1994_v12, %v1337_v40  ;;  %v1382_v27 = vmul.f32 %v1994_v12, %v1338_v51  ;;  %v1383_v20 = vmul.f32 %v1994_v12, %v1339_v54  ;;  %v1384_v22 = vmul.f32 %v1994_v12, %v1340_v1 }
 0x2a8   : > { %v1385_v58 = vmul.f32 %v1994_v12, %v1341_v4  ;;  %v1386_v24 = vmul.f32 %v1994_v12, %v1342_v15  ;;  %v1387_v25 = vmul.f32 %v1994_v12, %v1343_v18  ;;  %v1388_v0 = vmul.f32 %v1994_v12, %v1344_v30 }
 0x2a9   : > { %v1389_v26 = vmul.f32 %v1994_v12, %v1345_v34  ;;  %v1390_v29 = vmul.f32 %v1994_v12, %v1346_v56  ;;  %v1391_v31 = vmul.f32 %v1994_v12, %v1347_v61  ;;  %v1392_v32 = vmul.f32 %v1994_v12, %v1348_v17 }
 0x2aa   : > { %v1393_v33 = vmul.f32 %v1994_v12, %v1349_v23  ;;  %v1394_v35 = vmul.f32 %v1994_v12, %v1350_v45  ;;  %v1395_v36 = vmul.f32 %v1994_v12, %v1351_v50  ;;  %v1396_v41 = vmul.f32 %v1994_v12, %v1352_v9  ;;  %v1738_v50 = vld [vmem:[%s252_s26] ss:$0 sm:$0xff] }
 0x2ab   : > { %v1397_v43 = vmul.f32 %v1994_v12, %v1353_v14  ;;  %v1398_v48 = vmul.f32 %v1994_v12, %v1354_v39  ;;  %v1399_v49 = vmul.f32 %v1994_v12, %v1355_v46  ;;  %v1400_v52 = vmul.f32 %v1994_v12, %v1356_v6 }
 0x2ac   : > { %v1401_v53 = vmul.f32 %v1994_v12, %v1357_v38  ;;  %v1402_v57 = vmul.f32 %v1994_v12, %v1358_v47  ;;  %v1403_v59 = vmul.f32 %v1994_v12, %v1359_v8  ;;  %v1404_v60 = vmul.f32 %v1994_v12, %v1360_v19 }
 0x2ad   : > { %v1413_v62 = vmul.f32 %v1737_v42, %v1373_v44  ;;  %v1414_v63 = vmul.f32 %v1737_v42, %v1374_v7  ;;  %v1415_v2 = vmul.f32 %v1737_v42, %v1375_v55  ;;  %v1416_v3 = vmul.f32 %v1737_v42, %v1376_v10 }
 0x2ae   : > { %v1417_v5 = vmul.f32 %v1737_v42, %v1377_v11  ;;  %v1418_v37 = vmul.f32 %v1737_v42, %v1378_v28  ;;  %v1419_v40 = vmul.f32 %v1737_v42, %v1379_v13  ;;  %v1420_v51 = vmul.f32 %v1737_v42, %v1380_v16 }
 0x2af   : > { %v1421_v54 = vmul.f32 %v1737_v42, %v1381_v21  ;;  %v1422_v1 = vmul.f32 %v1737_v42, %v1382_v27  ;;  %v1423_v4 = vmul.f32 %v1737_v42, %v1383_v20  ;;  %v1424_v15 = vmul.f32 %v1737_v42, %v1384_v22 }
 0x2b0   : > { %v1425_v18 = vmul.f32 %v1737_v42, %v1385_v58  ;;  %v1426_v30 = vmul.f32 %v1737_v42, %v1386_v24  ;;  %v1427_v34 = vmul.f32 %v1737_v42, %v1387_v25  ;;  %v1428_v56 = vmul.f32 %v1737_v42, %v1388_v0 }
 0x2b1   : > { %v1429_v61 = vmul.f32 %v1737_v42, %v1389_v26  ;;  %v1430_v17 = vmul.f32 %v1737_v42, %v1390_v29  ;;  %v1431_v23 = vmul.f32 %v1737_v42, %v1391_v31  ;;  %v1432_v45 = vmul.f32 %v1737_v42, %v1392_v32 }
 0x2b2   : > { %v1433_v9 = vmul.f32 %v1737_v42, %v1393_v33  ;;  %v1434_v14 = vmul.f32 %v1737_v42, %v1394_v35  ;;  %v1435_v39 = vmul.f32 %v1737_v42, %v1395_v36  ;;  %v1436_v46 = vmul.f32 %v1737_v42, %v1396_v41 }
 0x2b3   : > { %v1437_v6 = vmul.f32 %v1737_v42, %v1397_v43  ;;  %v1438_v12 = vmul.f32 %v1737_v42, %v1398_v48  ;;  %v1439_v38 = vmul.f32 %v1737_v42, %v1399_v49  ;;  %v1440_v47 = vmul.f32 %v1737_v42, %v1400_v52 }
 0x2b4   : > { %v1441_v8 = vmul.f32 %v1737_v42, %v1401_v53  ;;  %v1442_v19 = vmul.f32 %v1737_v42, %v1402_v57  ;;  %v1443_v44 = vmul.f32 %v1737_v42, %v1403_v59  ;;  %v1444_v7 = vmul.f32 %v1737_v42, %v1404_v60 }
 0x2b5   : > { %v1451_v55 = vadd.f32 %v1738_v50, %v1413_v62  ;;  %v1452_v10 = vadd.f32 %v1738_v50, %v1414_v63  ;;  %v1453_v11 = vadd.f32 %v1738_v50, %v1415_v2  ;;  %v1454_v28 = vadd.f32 %v1738_v50, %v1416_v3 }
 0x2b6   : > { %v1455_v13 = vadd.f32 %v1738_v50, %v1417_v5  ;;  %v1456_v16 = vadd.f32 %v1738_v50, %v1418_v37  ;;  %v1457_v21 = vadd.f32 %v1738_v50, %v1419_v40  ;;  %v1458_v27 = vadd.f32 %v1738_v50, %v1420_v51 }
 0x2b7   : > { %v1459_v20 = vadd.f32 %v1738_v50, %v1421_v54  ;;  %v1460_v22 = vadd.f32 %v1738_v50, %v1422_v1  ;;  %v1461_v58 = vadd.f32 %v1738_v50, %v1423_v4  ;;  %v1462_v24 = vadd.f32 %v1738_v50, %v1424_v15 }
 0x2b8   : > { %v1463_v25 = vadd.f32 %v1738_v50, %v1425_v18  ;;  %v1464_v0 = vadd.f32 %v1738_v50, %v1426_v30  ;;  %v1465_v26 = vadd.f32 %v1738_v50, %v1427_v34  ;;  %v1466_v29 = vadd.f32 %v1738_v50, %v1428_v56 }
 0x2b9   : > { %v1467_v31 = vadd.f32 %v1738_v50, %v1429_v61  ;;  %v1468_v32 = vadd.f32 %v1738_v50, %v1430_v17  ;;  %v1469_v33 = vadd.f32 %v1738_v50, %v1431_v23  ;;  %v1470_v35 = vadd.f32 %v1738_v50, %v1432_v45 }
 0x2ba   : > { %v2496_v36 = vadd.f32 %v1738_v50, %v1433_v9  ;;  %v2498_v41 = vadd.f32 %v1738_v50, %v1434_v14  ;;  %v2500_v42 = vadd.f32 %v1738_v50, %v1435_v39  ;;  %v2502_v43 = vadd.f32 %v1738_v50, %v1436_v46 }
 0x2bb   : > { %v2504_v48 = vadd.f32 %v1738_v50, %v1437_v6  ;;  %v2506_v49 = vadd.f32 %v1738_v50, %v1438_v12  ;;  %v2508_v52 = vadd.f32 %v1738_v50, %v1439_v38  ;;  %v2510_v53 = vadd.f32 %v1738_v50, %v1440_v47 }
 0x2bc   : > { %v2517_v57 = vadd.f32 %v1738_v50, %v1441_v8  ;;  %v2519_v59 = vadd.f32 %v1738_v50, %v1442_v19  ;;  %v2521_v60 = vadd.f32 %v1738_v50, %v1443_v44  ;;  %v2523_v62 = vadd.f32 %v1738_v50, %v1444_v7 }
 0x2bd   : > { %v1483_v63 = vmax.f32 %v1451_v55, 0.0  ;;  %v1484_v2 = vmax.f32 %v1452_v10, 0.0  ;;  %v1485_v3 = vmax.f32 %v1453_v11, 0.0  ;;  %v1486_v5 = vmax.f32 %v1454_v28, 0.0 }
 0x2be   : > { %v1487_v37 = vmax.f32 %v1455_v13, 0.0  ;;  %v1488_v40 = vmax.f32 %v1456_v16, 0.0  ;;  %v1489_v51 = vmax.f32 %v1457_v21, 0.0  ;;  %v1490_v54 = vmax.f32 %v1458_v27, 0.0 }
 0x2bf   : > { %v1491_v1 = vmax.f32 %v1459_v20, 0.0  ;;  %v1492_v4 = vmax.f32 %v1460_v22, 0.0  ;;  %v1493_v15 = vmax.f32 %v1461_v58, 0.0  ;;  %v1494_v18 = vmax.f32 %v1462_v24, 0.0  ;;  %1515 = vst [vmem:[%s2515_s28] sm:$0xff] %v1483_v63  ;;  %1516 = vst [vmem:[%s2515_s28 + $0x8] sm:$0xff] %v1484_v2 }
 0x2c0   : > { %1517 = vst [vmem:[%s2515_s28 + $0x10] sm:$0xff] %v1485_v3  ;;  %1518 = vst [vmem:[%s2515_s28 + $0x18] sm:$0xff] %v1486_v5  ;;  %v1495_v30 = vmax.f32 %v1463_v25, 0.0  ;;  %v1496_v34 = vmax.f32 %v1464_v0, 0.0  ;;  %v1497_v56 = vmax.f32 %v1465_v26, 0.0  ;;  %v1498_v61 = vmax.f32 %v1466_v29, 0.0 }
 0x2c1   : > { %1519 = vst [vmem:[%s2515_s28 + $0x20] sm:$0xff] %v1487_v37  ;;  %1520 = vst [vmem:[%s2515_s28 + $0x28] sm:$0xff] %v1488_v40  ;;  %v1499_v17 = vmax.f32 %v1467_v31, 0.0  ;;  %v1500_v23 = vmax.f32 %v1468_v32, 0.0  ;;  %v1501_v45 = vmax.f32 %v1469_v33, 0.0  ;;  %v1502_v50 = vmax.f32 %v1470_v35, 0.0 }
 0x2c2   : > { %1521 = vst [vmem:[%s2515_s28 + $0x30] sm:$0xff] %v1489_v51  ;;  %1522 = vst [vmem:[%s2515_s28 + $0x38] sm:$0xff] %v1490_v54  ;;  %v1503_v9 = vmax.f32 %v2496_v36, 0.0  ;;  %v1504_v14 = vmax.f32 %v2498_v41, 0.0  ;;  %v1505_v39 = vmax.f32 %v2500_v42, 0.0  ;;  %v1506_v46 = vmax.f32 %v2502_v43, 0.0 }
 0x2c3   : > { %1523 = vst [vmem:[%s2515_s28 + $0x40] sm:$0xff] %v1491_v1  ;;  %1524 = vst [vmem:[%s2515_s28 + $0x48] sm:$0xff] %v1492_v4  ;;  %v1507_v6 = vmax.f32 %v2504_v48, 0.0  ;;  %v1508_v12 = vmax.f32 %v2506_v49, 0.0  ;;  %v1509_v38 = vmax.f32 %v2508_v52, 0.0  ;;  %v1510_v47 = vmax.f32 %v2510_v53, 0.0 }
 0x2c4   : > { %1525 = vst [vmem:[%s2515_s28 + $0x50] sm:$0xff] %v1493_v15  ;;  %1526 = vst [vmem:[%s2515_s28 + $0x58] sm:$0xff] %v1494_v18  ;;  %v1511_v8 = vmax.f32 %v2517_v57, 0.0  ;;  %v1512_v19 = vmax.f32 %v2519_v59, 0.0  ;;  %v1513_v44 = vmax.f32 %v2521_v60, 0.0  ;;  %v1514_v7 = vmax.f32 %v2523_v62, 0.0 }
 0x2c5   : > { %1527 = vst [vmem:[%s2515_s28 + $0x60] sm:$0xff] %v1495_v30  ;;  %1528 = vst [vmem:[%s2515_s28 + $0x68] sm:$0xff] %v1496_v34 }
 0x2c6   : > { %1529 = vst [vmem:[%s2515_s28 + $0x70] sm:$0xff] %v1497_v56  ;;  %1530 = vst [vmem:[%s2515_s28 + $0x78] sm:$0xff] %v1498_v61 }
 0x2c7   : > { %1531 = vst [vmem:[%s2515_s28 + $0x80] sm:$0xff] %v1499_v17  ;;  %1532 = vst [vmem:[%s2515_s28 + $0x88] sm:$0xff] %v1500_v23 }
 0x2c8   : > { %1533 = vst [vmem:[%s2515_s28 + $0x90] sm:$0xff] %v1501_v45  ;;  %1534 = vst [vmem:[%s2515_s28 + $0x98] sm:$0xff] %v1502_v50 }
 0x2c9   : > { %1535 = vst [vmem:[%s2515_s28 + $0xa0] sm:$0xff] %v1503_v9  ;;  %1536 = vst [vmem:[%s2515_s28 + $0xa8] sm:$0xff] %v1504_v14 }
 0x2ca   : > { %1537 = vst [vmem:[%s2515_s28 + $0xb0] sm:$0xff] %v1505_v39  ;;  %1538 = vst [vmem:[%s2515_s28 + $0xb8] sm:$0xff] %v1506_v46 }
 0x2cb   : > { %1539 = vst [vmem:[%s2515_s28 + $0xc0] sm:$0xff] %v1507_v6  ;;  %1540 = vst [vmem:[%s2515_s28 + $0xc8] sm:$0xff] %v1508_v12 }
 0x2cc   : > { %1541 = vst [vmem:[%s2515_s28 + $0xd0] sm:$0xff] %v1509_v38  ;;  %1542 = vst [vmem:[%s2515_s28 + $0xd8] sm:$0xff] %v1510_v47 }
 0x2cd   : > { %1543 = vst [vmem:[%s2515_s28 + $0xe0] sm:$0xff] %v1511_v8  ;;  %1544 = vst [vmem:[%s2515_s28 + $0xe8] sm:$0xff] %v1512_v19 }
 0x2ce   : > { %1545 = vst [vmem:[%s2515_s28 + $0xf0] sm:$0xff] %v1513_v44  ;;  %1546 = vst [vmem:[%s2515_s28 + $0xf8] sm:$0xff] %v1514_v7 }
 0x2cf PF: > { %s15_s18 = sadd.s32 1, %s2001_s18  }
 0x2d0   : > { %p12_p5 = scmp.ge.s32.totalorder %s15_s18, 4  }
 0x2d2   :  { %14 = sbr.rel (!%p12_p5) target bundleno = 1 (0x1), region = 76 }

// kernel: munit_trainer1_forward.51
= control target key start
LH: loop header
LB: loop body
LE: loop exit
PB: predicated region body
PF: predicated region fallthrough
CT: control target
= control target key end

     0   :  { %v2426_v0 = vmov 0   ;;  %vm954_vm0 = vcmask 64512   ;;  %vm1051_vm1 = vcmask 1043456   ;;  %s3247_s1 = inlined_call_operand.vmem [shape: bf16[392,128], index: 1, kind: input, shape index: {}]   ;;  %s3248_s0 = inlined_call_operand.vmem [shape: bf16[512,392], index: 0, kind: input, shape index: {}]   ;;  %s3249_s2 = inlined_call_operand.vmem [shape: f32[1,128], index: 2, kind: input, shape index: {}]   ;;  %s3250_s3 = inlined_call_operand.vmem [shape: f32[512,128], index: 3, kind: output, shape index: {}]  }
   0x1   :  { %1055 = vmatprep.subr.bf16.mxu1 %v2426_v0  ;;  %v2080_v1 = vld [vmem:[%s3247_s1] sm:$0xff]   ;;  %1344 = vmatprep.subr.bf16.mxu0 %v2426_v0  ;;  %v2081_v2 = vld [vmem:[%s3247_s1 + $0x8] sm:$0xff]   ;;  %v2082_v3 = vld [vmem:[%s3247_s1 + $0x10] sm:$0xff]  }
   0x2   :  { %1056 = vmatpush1.bf16.msra.mxu1 %v2080_v1  ;;  %v2087_v4 = vld [vmem:[%s3247_s1 + $0x80] sm:$0xff]   ;;  %v2089_v5 = vld [vmem:[%s3247_s1 + $0x88] sm:$0xff]   ;;  %v2083_v6 = vld [vmem:[%s3247_s1 + $0x18] sm:$0xff]  }
   0x3   :  { %1057 = vmatprep.subr.bf16.mxu1 %v2426_v0  ;;  %1345 = vmatpush1.bf16.msra.mxu0 %v2087_v4  ;;  %v2091_v7 = vld [vmem:[%s3247_s1 + $0x90] sm:$0xff]   ;;  %v2084_v8 = vld [vmem:[%s3247_s1 + $0x20] sm:$0xff]   ;;  %v2093_v9 = vld [vmem:[%s3247_s1 + $0x98] sm:$0xff]  }
   0x4   :  { %1346 = vmatprep.subr.bf16.mxu0 %v2426_v0  ;;  %v2085_v10 = vld [vmem:[%s3247_s1 + $0x28] sm:$0xff]   ;;  %v2095_v11 = vld [vmem:[%s3247_s1 + $0xa0] sm:$0xff]   ;;  %v2086_v12 = vld [vmem:[%s3247_s1 + $0x30] sm:$0xff]  }
   0x5   :  { %v2097_v13 = vld [vmem:[%s3247_s1 + $0xa8] sm:$0xff]   ;;  %v2088_v15 = vld [vmem:[%s3247_s1 + $0x38] sm:$0xff]   ;;  %v2110_v16 = vld [vmem:[%s3248_s0 + $0x4] ss:$16 sps:$4 sm:$0xff]  }
   0x6   :  { %1058 = vmatpush1.bf16.msra.mxu1 %v2081_v2  ;;  %v2107_v14 = vld [vmem:[%s3248_s0 + $0xc] ss:$16 sps:$4 sm:$0xff]   ;;  %v2099_v17 = vld [vmem:[%s3247_s1 + $0xb0] sm:$0xff]   ;;  %1087 = vmatprep.mubr.bf16.mxu1 %v2110_v16  ;;  %v2090_v18 = vld [vmem:[%s3247_s1 + $0x40] sm:$0xff]  }
   0x7   :  { %1059 = vmatprep.subr.bf16.mxu1 %v2426_v0  ;;  %1347 = vmatpush1.bf16.msra.mxu0 %v2089_v5  ;;  %v2101_v19 = vld [vmem:[%s3247_s1 + $0xb8] sm:$0xff]   ;;  %v2092_v20 = vld [vmem:[%s3247_s1 + $0x48] sm:$0xff]   ;;  %v2103_v21 = vld [vmem:[%s3247_s1 + $0xc0] ss:$0 sps:$4 sm:$0xff]  }
   0x8   :  { %1348 = vmatprep.subr.bf16.mxu0 %v2426_v0  ;;  %1919 = vmatprep.mubr.msk.bf16.mxu0 %vm954_vm0, %v2107_v14  ;;  %v2094_v22 = vld [vmem:[%s3247_s1 + $0x50] sm:$0xff]   ;;  %v1053_v23 = vsel %vm1051_vm1, %v2103_v21, 0  ;;  %v2105_v24 = vld [vmem:[%s3248_s0 + $0x8] ss:$16 sps:$4 sm:$0xff]   ;;  %v2111_v25 = vld [vmem:[%s3248_s0 + $0x2c] ss:$16 sps:$4 sm:$0xff]  }
   0x9   :  { %v2096_v26 = vld [vmem:[%s3247_s1 + $0x58] sm:$0xff]   ;;  %v2098_v27 = vld [vmem:[%s3247_s1 + $0x60] sm:$0xff]   ;;  %v2100_v30 = vld [vmem:[%s3247_s1 + $0x68] sm:$0xff]  }
   0xa   :  { %1060 = vmatpush1.bf16.msra.mxu1 %v2082_v3  ;;  %v2115_v28 = vld [vmem:[%s3248_s0 + $0x28] ss:$16 sps:$4 sm:$0xff]   ;;  %v2117_v29 = vld [vmem:[%s3248_s0 + $0x4c] ss:$16 sps:$4 sm:$0xff]   ;;  %v2102_v31 = vld [vmem:[%s3247_s1 + $0x70] sm:$0xff]  }
   0xb   :  { %1061 = vmatprep.subr.bf16.mxu1 %v2426_v0  ;;  %1349 = vmatpush1.bf16.msra.mxu0 %v2091_v7  ;;  %v2121_v32 = vld [vmem:[%s3248_s0 + $0x48] ss:$16 sps:$4 sm:$0xff]   ;;  %v2123_v33 = vld [vmem:[%s3248_s0 + $0x6c] ss:$16 sps:$4 sm:$0xff]   ;;  %v2108_v35 = vld [vmem:[%s3248_s0] ss:$16 sps:$4 sm:$0xff]  }
   0xc   :  { %1350 = vmatprep.subr.bf16.mxu0 %v2426_v0  ;;  %v2104_v34 = vld [vmem:[%s3247_s1 + $0x78] sm:$0xff]   ;;  %v2113_v36 = vld [vmem:[%s3248_s0 + $0x24] ss:$16 sps:$4 sm:$0xff]   ;;  %v2116_v39 = vld [vmem:[%s3248_s0 + $0x20] ss:$16 sps:$4 sm:$0xff]  }
   0xd   :  { %v2127_v37 = vld [vmem:[%s3248_s0 + $0x68] ss:$16 sps:$4 sm:$0xff]   ;;  %v2129_v38 = vld [vmem:[%s3248_s0 + $0x8c] ss:$16 sps:$4 sm:$0xff]   ;;  %v2119_v40 = vld [vmem:[%s3248_s0 + $0x44] ss:$16 sps:$4 sm:$0xff]  }
   0xe   :  { %1062 = vmatpush1.bf16.msra.mxu1 %v2083_v6  ;;  %v2133_v41 = vld [vmem:[%s3248_s0 + $0x88] ss:$16 sps:$4 sm:$0xff]   ;;  %v2135_v42 = vld [vmem:[%s3248_s0 + $0xac] ss:$16 sps:$4 sm:$0xff]   ;;  %v2122_v43 = vld [vmem:[%s3248_s0 + $0x40] ss:$16 sps:$4 sm:$0xff]  }
   0xf   :  { %1063 = vmatprep.subr.bf16.mxu1 %v2426_v0  ;;  %1351 = vmatpush1.bf16.msra.mxu0 %v2093_v9  ;;  %v2125_v44 = vld [vmem:[%s3248_s0 + $0x64] ss:$16 sps:$4 sm:$0xff]   ;;  %v2139_v45 = vld [vmem:[%s3248_s0 + $0xa8] ss:$16 sps:$4 sm:$0xff]   ;;  %v2141_v46 = vld [vmem:[%s3248_s0 + $0xcc] ss:$16 sps:$4 sm:$0xff]  }
  0x10   :  { %1352 = vmatprep.subr.bf16.mxu0 %v2426_v0  ;;  %v2128_v47 = vld [vmem:[%s3248_s0 + $0x60] ss:$16 sps:$4 sm:$0xff]   ;;  %v2131_v48 = vld [vmem:[%s3248_s0 + $0x84] ss:$16 sps:$4 sm:$0xff]   ;;  %v2145_v49 = vld [vmem:[%s3248_s0 + $0xc8] ss:$16 sps:$4 sm:$0xff]  }
  0x11   :  { %v2147_v50 = vld [vmem:[%s3248_s0 + $0xec] ss:$16 sps:$4 sm:$0xff]   ;;  %v2134_v51 = vld [vmem:[%s3248_s0 + $0x80] ss:$16 sps:$4 sm:$0xff]   ;;  %v2137_v52 = vld [vmem:[%s3248_s0 + $0xa4] ss:$16 sps:$4 sm:$0xff]  }
  0x12   :  { %1064 = vmatpush1.bf16.msra.mxu1 %v2084_v8  ;;  %v2151_v53 = vld [vmem:[%s3248_s0 + $0xe8] ss:$16 sps:$4 sm:$0xff]   ;;  %v2153_v54 = vld [vmem:[%s3248_s0 + $0x10c] ss:$16 sps:$4 sm:$0xff]   ;;  %v2140_v55 = vld [vmem:[%s3248_s0 + $0xa0] ss:$16 sps:$4 sm:$0xff]  }
  0x13   :  { %1065 = vmatprep.subr.bf16.mxu1 %v2426_v0  ;;  %1353 = vmatpush1.bf16.msra.mxu0 %v2095_v11  ;;  %v2143_v56 = vld [vmem:[%s3248_s0 + $0xc4] ss:$16 sps:$4 sm:$0xff]   ;;  %v2157_v57 = vld [vmem:[%s3248_s0 + $0x108] ss:$16 sps:$4 sm:$0xff]   ;;  %v2159_v58 = vld [vmem:[%s3248_s0 + $0x12c] ss:$16 sps:$4 sm:$0xff]  }
  0x14   :  { %1354 = vmatprep.subr.bf16.mxu0 %v2426_v0  ;;  %v2146_v59 = vld [vmem:[%s3248_s0 + $0xc0] ss:$16 sps:$4 sm:$0xff]   ;;  %v2149_v60 = vld [vmem:[%s3248_s0 + $0xe4] ss:$16 sps:$4 sm:$0xff]   ;;  %v2163_v61 = vld [vmem:[%s3248_s0 + $0x128] ss:$16 sps:$4 sm:$0xff]  }
  0x15   :  { %v2165_v62 = vld [vmem:[%s3248_s0 + $0x14c] ss:$16 sps:$4 sm:$0xff]   ;;  %v2152_v63 = vld [vmem:[%s3248_s0 + $0xe0] ss:$16 sps:$4 sm:$0xff]   ;;  %v2169_v1 = vld [vmem:[%s3248_s0 + $0x148] ss:$16 sps:$4 sm:$0xff]  }
  0x16   :  { %1066 = vmatpush1.bf16.msra.mxu1 %v2085_v10  ;;  %v2171_v2 = vld [vmem:[%s3248_s0 + $0x16c] ss:$16 sps:$4 sm:$0xff]   ;;  %v2158_v3 = vld [vmem:[%s3248_s0 + $0x100] ss:$16 sps:$4 sm:$0xff]   ;;  %v2161_v4 = vld [vmem:[%s3248_s0 + $0x124] ss:$16 sps:$4 sm:$0xff]  }
  0x17   :  { %1067 = vmatprep.subr.bf16.mxu1 %v2426_v0  ;;  %1355 = vmatpush1.bf16.msra.mxu0 %v2097_v13  ;;  %v2175_v5 = vld [vmem:[%s3248_s0 + $0x168] ss:$16 sps:$4 sm:$0xff]   ;;  %v2177_v6 = vld [vmem:[%s3248_s0 + $0x18c] ss:$16 sps:$4 sm:$0xff]   ;;  %v2164_v7 = vld [vmem:[%s3248_s0 + $0x120] ss:$16 sps:$4 sm:$0xff]  }
  0x18   :  { %1356 = vmatprep.subr.bf16.mxu0 %v2426_v0  ;;  %v2167_v8 = vld [vmem:[%s3248_s0 + $0x144] ss:$16 sps:$4 sm:$0xff]   ;;  %v2181_v9 = vld [vmem:[%s3248_s0 + $0x188] ss:$16 sps:$4 sm:$0xff]   ;;  %v2183_v10 = vld [vmem:[%s3248_s0 + $0x1ac] ss:$16 sps:$4 sm:$0xff]  }
  0x19   :  { %v2170_v11 = vld [vmem:[%s3248_s0 + $0x140] ss:$16 sps:$4 sm:$0xff]   ;;  %v2187_v13 = vld [vmem:[%s3248_s0 + $0x1a8] ss:$16 sps:$4 sm:$0xff]   ;;  %v2189_v14 = vld [vmem:[%s3248_s0 + $0x1cc] ss:$16 sps:$4 sm:$0xff]  }
  0x1a   :  { %1068 = vmatpush1.bf16.msra.mxu1 %v2086_v12  ;;  %v2173_v12 = vld [vmem:[%s3248_s0 + $0x164] ss:$16 sps:$4 sm:$0xff]   ;;  %v2199_v21 = vld [vmem:[%s3248_s0 + $0x1e8] ss:$16 sps:$4 sm:$0xff]  }
  0x1b   :  { %1069 = vmatprep.subr.bf16.mxu1 %v2426_v0  ;;  %1357 = vmatpush1.bf16.msra.mxu0 %v2099_v17  ;;  %v2179_v16 = vld [vmem:[%s3248_s0 + $0x184] ss:$16 sps:$4 sm:$0xff]   ;;  %v2193_v17 = vld [vmem:[%s3248_s0 + $0x1c8] ss:$16 sps:$4 sm:$0xff]  }
  0x1c   :  { %1358 = vmatprep.subr.bf16.mxu0 %v2426_v0 }
  0x1e   :  { %1070 = vmatpush1.bf16.msra.mxu1 %v2088_v15  ;;  %v2176_v15 = vld [vmem:[%s3248_s0 + $0x160] ss:$16 sps:$4 sm:$0xff]  }
  0x1f   :  { %1071 = vmatprep.subr.bf16.mxu1 %v2426_v0  ;;  %1359 = vmatpush1.bf16.msra.mxu0 %v2101_v19  ;;  %v2182_v19 = vld [vmem:[%s3248_s0 + $0x180] ss:$16 sps:$4 sm:$0xff]  }
  0x20   :  { %1360 = vmatprep.subr.bf16.mxu0 %v2426_v0 }
  0x22   :  { %1072 = vmatpush1.bf16.msra.mxu1 %v2090_v18  ;;  %v2195_v18 = vld [vmem:[%s3248_s0 + $0x1ec] ss:$16 sps:$4 sm:$0xff]  }
  0x23   :  { %1073 = vmatprep.subr.bf16.mxu1 %v2426_v0  ;;  %1361 = vmatpush1.bf16.msra.mxu0 %v1053_v23  ;;  %v2188_v23 = vld [vmem:[%s3248_s0 + $0x1a0] ss:$16 sps:$4 sm:$0xff]  }
  0x26   :  { %1074 = vmatpush1.bf16.msra.mxu1 %v2092_v20  ;;  %1377 = vmatmul.mubr.bf16.vlgmr.msra.gmra.mrb[0].mxu0 %v2105_v24  ;;  %v2185_v20 = vld [vmem:[%s3248_s0 + $0x1a4] ss:$16 sps:$4 sm:$0xff]  }
  0x27   :  { %1075 = vmatprep.subr.bf16.mxu1 %v2426_v0  ;;  %1920 = vmatprep.mubr.msk.bf16.mxu0 %vm954_vm0, %v2111_v25  ;;  %v2191_v24 = vld [vmem:[%s3248_s0 + $0x1c4] ss:$16 sps:$4 sm:$0xff]   ;;  %v2205_v25 = vld [vmem:[%s3248_s0 + $0x208] ss:$16 sps:$4 sm:$0xff]  }
  0x2a   :  { %1076 = vmatpush1.bf16.msra.mxu1 %v2094_v22  ;;  %v2201_v22 = vld [vmem:[%s3248_s0 + $0x20c] ss:$16 sps:$4 sm:$0xff]  }
  0x2b   :  { %1077 = vmatprep.subr.bf16.mxu1 %v2426_v0 }
  0x2e   :  { %1078 = vmatpush1.bf16.msra.mxu1 %v2096_v26  ;;  %1385 = vmatmul.mubr.bf16.gmra.mrb[4].mxu0 %v2115_v28  ;;  %v2207_v26 = vld [vmem:[%s3248_s0 + $0x22c] ss:$16 sps:$4 sm:$0xff]   ;;  %v2197_v28 = vld [vmem:[%s3248_s0 + $0x1e4] ss:$16 sps:$4 sm:$0xff]  }
  0x2f   :  { %1079 = vmatprep.subr.bf16.mxu1 %v2426_v0  ;;  %1921 = vmatprep.mubr.msk.bf16.mxu0 %vm954_vm0, %v2117_v29  ;;  %v2211_v29 = vld [vmem:[%s3248_s0 + $0x228] ss:$16 sps:$4 sm:$0xff]  }
  0x32   :  { %1080 = vmatpush1.bf16.msra.mxu1 %v2098_v27  ;;  %v2194_v27 = vld [vmem:[%s3248_s0 + $0x1c0] ss:$16 sps:$4 sm:$0xff]  }
  0x33   :  { %1081 = vmatprep.subr.bf16.mxu1 %v2426_v0 }
  0x36   :  { %1082 = vmatpush1.bf16.msra.mxu1 %v2100_v30  ;;  %1393 = vmatmul.mubr.bf16.gmra.mrb[8].mxu0 %v2121_v32  ;;  %v2213_v30 = vld [vmem:[%s3248_s0 + $0x24c] ss:$16 sps:$4 sm:$0xff]   ;;  %v2203_v32 = vld [vmem:[%s3248_s0 + $0x204] ss:$16 sps:$4 sm:$0xff]  }
  0x37   :  { %1083 = vmatprep.subr.bf16.mxu1 %v2426_v0  ;;  %1922 = vmatprep.mubr.msk.bf16.mxu0 %vm954_vm0, %v2123_v33  ;;  %v2217_v33 = vld [vmem:[%s3248_s0 + $0x248] ss:$16 sps:$4 sm:$0xff]  }
  0x3a   :  { %1084 = vmatpush1.bf16.msra.mxu1 %v2102_v31  ;;  %v2200_v31 = vld [vmem:[%s3248_s0 + $0x1e0] ss:$16 sps:$4 sm:$0xff]  }
  0x3b   :  { %1085 = vmatprep.subr.bf16.mxu1 %v2426_v0  ;;  %v2155_v0 = vld [vmem:[%s3248_s0 + $0x104] ss:$16 sps:$4 sm:$0xff]  }
  0x3e   :  { %1086 = vmatpush1.bf16.msra.mxu1 %v2104_v34  ;;  %1401 = vmatmul.mubr.bf16.gmra.mrb[12].mxu0 %v2127_v37  ;;  %v2219_v34 = vld [vmem:[%s3248_s0 + $0x26c] ss:$16 sps:$4 sm:$0xff]   ;;  %v2223_v37 = vld [vmem:[%s3248_s0 + $0x268] ss:$16 sps:$4 sm:$0xff]  }
  0x3f   :  { %1923 = vmatprep.mubr.msk.bf16.mxu0 %vm954_vm0, %v2129_v38  ;;  %v2225_v38 = vld [vmem:[%s3248_s0 + $0x28c] ss:$16 sps:$4 sm:$0xff]  }
  0x41   :  { %1088 = vmatmul.mubr.bf16.vlgmr.msra.gmra.mrb[0].mxu1 %v2108_v35  ;;  %v2206_v35 = vld [vmem:[%s3248_s0 + $0x200] ss:$16 sps:$4 sm:$0xff]  }
  0x42   :  { %1095 = vmatprep.mubr.bf16.mxu1 %v2113_v36  ;;  %v2209_v36 = vld [vmem:[%s3248_s0 + $0x224] ss:$16 sps:$4 sm:$0xff]  }
  0x46   :  { %1409 = vmatmul.mubr.bf16.gmra.mrb[16].mxu0 %v2133_v41  ;;  %v2229_v41 = vld [vmem:[%s3248_s0 + $0x288] ss:$16 sps:$4 sm:$0xff]  }
  0x47   :  { %1924 = vmatprep.mubr.msk.bf16.mxu0 %vm954_vm0, %v2135_v42  ;;  %v2231_v42 = vld [vmem:[%s3248_s0 + $0x2ac] ss:$16 sps:$4 sm:$0xff]  }
  0x49   :  { %1096 = vmatmul.mubr.bf16.gmra.mrb[4].mxu1 %v2116_v39  ;;  %v2212_v39 = vld [vmem:[%s3248_s0 + $0x220] ss:$16 sps:$4 sm:$0xff]  }
  0x4a   :  { %1103 = vmatprep.mubr.bf16.mxu1 %v2119_v40  ;;  %v2215_v40 = vld [vmem:[%s3248_s0 + $0x244] ss:$16 sps:$4 sm:$0xff]  }
  0x4e   :  { %1417 = vmatmul.mubr.bf16.gmra.mrb[20].mxu0 %v2139_v45  ;;  %v2235_v45 = vld [vmem:[%s3248_s0 + $0x2a8] ss:$16 sps:$4 sm:$0xff]  }
  0x4f   :  { %1925 = vmatprep.mubr.msk.bf16.mxu0 %vm954_vm0, %v2141_v46  ;;  %v2237_v46 = vld [vmem:[%s3248_s0 + $0x2cc] ss:$16 sps:$4 sm:$0xff]  }
  0x51   :  { %1104 = vmatmul.mubr.bf16.gmra.mrb[8].mxu1 %v2122_v43  ;;  %v2218_v43 = vld [vmem:[%s3248_s0 + $0x240] ss:$16 sps:$4 sm:$0xff]  }
  0x52   :  { %1111 = vmatprep.mubr.bf16.mxu1 %v2125_v44  ;;  %v2221_v44 = vld [vmem:[%s3248_s0 + $0x264] ss:$16 sps:$4 sm:$0xff]  }
  0x56   :  { %1425 = vmatmul.mubr.bf16.gmra.mrb[24].mxu0 %v2145_v49  ;;  %v2241_v49 = vld [vmem:[%s3248_s0 + $0x2c8] ss:$16 sps:$4 sm:$0xff]  }
  0x57   :  { %1926 = vmatprep.mubr.msk.bf16.mxu0 %vm954_vm0, %v2147_v50  ;;  %v2243_v50 = vld [vmem:[%s3248_s0 + $0x2ec] ss:$16 sps:$4 sm:$0xff]  }
  0x59   :  { %1112 = vmatmul.mubr.bf16.gmra.mrb[12].mxu1 %v2128_v47  ;;  %v2224_v47 = vld [vmem:[%s3248_s0 + $0x260] ss:$16 sps:$4 sm:$0xff]  }
  0x5a   :  { %1119 = vmatprep.mubr.bf16.mxu1 %v2131_v48  ;;  %v2227_v48 = vld [vmem:[%s3248_s0 + $0x284] ss:$16 sps:$4 sm:$0xff]  }
  0x5e   :  { %1433 = vmatmul.mubr.bf16.gmra.mrb[28].mxu0 %v2151_v53  ;;  %v2247_v53 = vld [vmem:[%s3248_s0 + $0x2e8] ss:$16 sps:$4 sm:$0xff]  }
  0x5f   :  { %1927 = vmatprep.mubr.msk.bf16.mxu0 %vm954_vm0, %v2153_v54  ;;  %v2249_v54 = vld [vmem:[%s3248_s0 + $0x30c] ss:$16 sps:$4 sm:$0xff]  }
  0x61   :  { %1120 = vmatmul.mubr.bf16.gmra.mrb[16].mxu1 %v2134_v51  ;;  %v2230_v51 = vld [vmem:[%s3248_s0 + $0x280] ss:$16 sps:$4 sm:$0xff]  }
  0x62   :  { %1127 = vmatprep.mubr.bf16.mxu1 %v2137_v52  ;;  %v2233_v52 = vld [vmem:[%s3248_s0 + $0x2a4] ss:$16 sps:$4 sm:$0xff]  }
  0x66   :  { %1441 = vmatmul.mubr.bf16.gmra.mrb[32].mxu0 %v2157_v57  ;;  %v2253_v57 = vld [vmem:[%s3248_s0 + $0x308] ss:$16 sps:$4 sm:$0xff]  }
  0x67   :  { %1928 = vmatprep.mubr.msk.bf16.mxu0 %vm954_vm0, %v2159_v58  ;;  %v2255_v58 = vld [vmem:[%s3248_s0 + $0x32c] ss:$16 sps:$4 sm:$0xff]  }
  0x69   :  { %1128 = vmatmul.mubr.bf16.gmra.mrb[20].mxu1 %v2140_v55  ;;  %v2236_v55 = vld [vmem:[%s3248_s0 + $0x2a0] ss:$16 sps:$4 sm:$0xff]  }
  0x6a   :  { %1135 = vmatprep.mubr.bf16.mxu1 %v2143_v56  ;;  %v2239_v56 = vld [vmem:[%s3248_s0 + $0x2c4] ss:$16 sps:$4 sm:$0xff]  }
  0x6e   :  { %1449 = vmatmul.mubr.bf16.gmra.mrb[36].mxu0 %v2163_v61  ;;  %v2259_v61 = vld [vmem:[%s3248_s0 + $0x328] ss:$16 sps:$4 sm:$0xff]  }
  0x6f   :  { %1929 = vmatprep.mubr.msk.bf16.mxu0 %vm954_vm0, %v2165_v62  ;;  %v2261_v62 = vld [vmem:[%s3248_s0 + $0x34c] ss:$16 sps:$4 sm:$0xff]  }
  0x71   :  { %1136 = vmatmul.mubr.bf16.gmra.mrb[24].mxu1 %v2146_v59  ;;  %v2242_v59 = vld [vmem:[%s3248_s0 + $0x2c0] ss:$16 sps:$4 sm:$0xff]  }
  0x72   :  { %1143 = vmatprep.mubr.bf16.mxu1 %v2149_v60  ;;  %v2245_v60 = vld [vmem:[%s3248_s0 + $0x2e4] ss:$16 sps:$4 sm:$0xff]  }
  0x76   :  { %1457 = vmatmul.mubr.bf16.gmra.mrb[40].mxu0 %v2169_v1  ;;  %v2265_v1 = vld [vmem:[%s3248_s0 + $0x348] ss:$16 sps:$4 sm:$0xff]  }
  0x77   :  { %1930 = vmatprep.mubr.msk.bf16.mxu0 %vm954_vm0, %v2171_v2  ;;  %v2267_v2 = vld [vmem:[%s3248_s0 + $0x36c] ss:$16 sps:$4 sm:$0xff]  }
  0x79   :  { %1144 = vmatmul.mubr.bf16.gmra.mrb[28].mxu1 %v2152_v63  ;;  %v2248_v63 = vld [vmem:[%s3248_s0 + $0x2e0] ss:$16 sps:$4 sm:$0xff]  }
  0x7a   :  { %1151 = vmatprep.mubr.bf16.mxu1 %v2155_v0  ;;  %v2251_v0 = vld [vmem:[%s3248_s0 + $0x304] ss:$16 sps:$4 sm:$0xff]  }
  0x7e   :  { %1465 = vmatmul.mubr.bf16.gmra.mrb[44].mxu0 %v2175_v5 }
  0x7f   :  { %1931 = vmatprep.mubr.msk.bf16.mxu0 %vm954_vm0, %v2177_v6 }
  0x81   :  { %1152 = vmatmul.mubr.bf16.gmra.mrb[32].mxu1 %v2158_v3  ;;  %v2254_v3 = vld [vmem:[%s3248_s0 + $0x300] ss:$16 sps:$4 sm:$0xff]  }
  0x82   :  { %1159 = vmatprep.mubr.bf16.mxu1 %v2161_v4  ;;  %v2257_v4 = vld [vmem:[%s3248_s0 + $0x324] ss:$16 sps:$4 sm:$0xff]  }
  0x86   :  { %1473 = vmatmul.mubr.bf16.gmra.mrb[48].mxu0 %v2181_v9  ;;  %v2273_v9 = vld [vmem:[%s3248_s0 + $0x38c] ss:$16 sps:$4 sm:$0xff]  }
  0x87   :  { %1932 = vmatprep.mubr.msk.bf16.mxu0 %vm954_vm0, %v2183_v10 }
  0x89   :  { %1160 = vmatmul.mubr.bf16.gmra.mrb[36].mxu1 %v2164_v7  ;;  %v2271_v7 = vld [vmem:[%s3248_s0 + $0x368] ss:$16 sps:$4 sm:$0xff]  }
  0x8a   :  { %1167 = vmatprep.mubr.bf16.mxu1 %v2167_v8 }
  0x8e   :  { %1481 = vmatmul.mubr.bf16.gmra.mrb[52].mxu0 %v2187_v13 }
  0x8f   :  { %1933 = vmatprep.mubr.msk.bf16.mxu0 %vm954_vm0, %v2189_v14 }
  0x91   :  { %1168 = vmatmul.mubr.bf16.gmra.mrb[40].mxu1 %v2170_v11  ;;  %v2260_v11 = vld [vmem:[%s3248_s0 + $0x320] ss:$16 sps:$4 sm:$0xff]  }
  0x92   :  { %1175 = vmatprep.mubr.bf16.mxu1 %v2173_v12  ;;  %v2263_v12 = vld [vmem:[%s3248_s0 + $0x344] ss:$16 sps:$4 sm:$0xff]  }
  0x96   :  { %1489 = vmatmul.mubr.bf16.gmra.mrb[56].mxu0 %v2193_v17  ;;  %v2279_v17 = vld [vmem:[%s3248_s0 + $0x3ac] ss:$16 sps:$4 sm:$0xff]  }
  0x97   :  { %1934 = vmatprep.mubr.msk.bf16.mxu0 %vm954_vm0, %v2195_v18 }
  0x99   :  { %1176 = vmatmul.mubr.bf16.gmra.mrb[44].mxu1 %v2176_v15  ;;  %v2277_v15 = vld [vmem:[%s3248_s0 + $0x388] ss:$16 sps:$4 sm:$0xff]  }
  0x9a   :  { %1183 = vmatprep.mubr.bf16.mxu1 %v2179_v16 }
  0x9e   :  { %1497 = vmatmul.mubr.bf16.gmra.mrb[60].mxu0 %v2199_v21 }
  0x9f   :  { %1935 = vmatprep.mubr.msk.bf16.mxu0 %vm954_vm0, %v2201_v22 }
  0xa1   :  { %1184 = vmatmul.mubr.bf16.gmra.mrb[48].mxu1 %v2182_v19  ;;  %v2266_v19 = vld [vmem:[%s3248_s0 + $0x340] ss:$16 sps:$4 sm:$0xff]  }
  0xa2   :  { %1191 = vmatprep.mubr.bf16.mxu1 %v2185_v20  ;;  %v2269_v20 = vld [vmem:[%s3248_s0 + $0x364] ss:$16 sps:$4 sm:$0xff]  }
  0xa6   :  { %1505 = vmatmul.mubr.bf16.gmra.mrb[64].mxu0 %v2205_v25  ;;  %v2285_v25 = vld [vmem:[%s3248_s0 + $0x3cc] ss:$16 sps:$4 sm:$0xff]  }
  0xa7   :  { %1936 = vmatprep.mubr.msk.bf16.mxu0 %vm954_vm0, %v2207_v26  ;;  %v2932_v26 = vld [vmem:[%s3249_s2] ss:$0 sm:$0xff] }
  0xa9   :  { %1192 = vmatmul.mubr.bf16.gmra.mrb[52].mxu1 %v2188_v23  ;;  %v2283_v23 = vld [vmem:[%s3248_s0 + $0x3a8] ss:$16 sps:$4 sm:$0xff]  }
  0xaa   :  { %1199 = vmatprep.mubr.bf16.mxu1 %v2191_v24 }
  0xae   :  { %1513 = vmatmul.mubr.bf16.gmra.mrb[68].mxu0 %v2211_v29 }
  0xaf   :  { %1937 = vmatprep.mubr.msk.bf16.mxu0 %vm954_vm0, %v2213_v30 }
  0xb1   :  { %1200 = vmatmul.mubr.bf16.gmra.mrb[56].mxu1 %v2194_v27 }
  0xb2   :  { %1207 = vmatprep.mubr.bf16.mxu1 %v2197_v28 }
  0xb6   :  { %1521 = vmatmul.mubr.bf16.gmra.mrb[72].mxu0 %v2217_v33  ;;  %v2275_v33 = vld [vmem:[%s3248_s0 + $0x384] ss:$16 sps:$4 sm:$0xff]  }
  0xb7   :  { %1938 = vmatprep.mubr.msk.bf16.mxu0 %vm954_vm0, %v2219_v34 }
  0xb9   :  { %1208 = vmatmul.mubr.bf16.gmra.mrb[60].mxu1 %v2200_v31  ;;  %v2272_v31 = vld [vmem:[%s3248_s0 + $0x360] ss:$16 sps:$4 sm:$0xff]  }
  0xba   :  { %1215 = vmatprep.mubr.bf16.mxu1 %v2203_v32 }
  0xbe   :  { %1529 = vmatmul.mubr.bf16.gmra.mrb[76].mxu0 %v2223_v37 }
  0xbf   :  { %1939 = vmatprep.mubr.msk.bf16.mxu0 %vm954_vm0, %v2225_v38 }
  0xc1   :  { %1216 = vmatmul.mubr.bf16.gmra.mrb[64].mxu1 %v2206_v35 }
  0xc2   :  { %1223 = vmatprep.mubr.bf16.mxu1 %v2209_v36 }
  0xc6   :  { %1537 = vmatmul.mubr.bf16.gmra.mrb[80].mxu0 %v2229_v41 }
  0xc7   :  { %1940 = vmatprep.mubr.msk.bf16.mxu0 %vm954_vm0, %v2231_v42  ;;  %v2291_v42 = vld [vmem:[%s3248_s0 + $0x3ec] ss:$16 sps:$4 sm:$0xff]  }
  0xc9   :  { %1224 = vmatmul.mubr.bf16.gmra.mrb[68].mxu1 %v2212_v39  ;;  %v2289_v39 = vld [vmem:[%s3248_s0 + $0x3c8] ss:$16 sps:$4 sm:$0xff]  }
  0xca   :  { %1231 = vmatprep.mubr.bf16.mxu1 %v2215_v40 }
  0xce   :  { %1545 = vmatmul.mubr.bf16.gmra.mrb[84].mxu0 %v2235_v45 }
  0xcf   :  { %1941 = vmatprep.mubr.msk.bf16.mxu0 %vm954_vm0, %v2237_v46 }
  0xd1   :  { %1232 = vmatmul.mubr.bf16.gmra.mrb[72].mxu1 %v2218_v43 }
  0xd2   :  { %1239 = vmatprep.mubr.bf16.mxu1 %v2221_v44 }
  0xd6   :  { %1553 = vmatmul.mubr.bf16.gmra.mrb[88].mxu0 %v2241_v49  ;;  %v2281_v49 = vld [vmem:[%s3248_s0 + $0x3a4] ss:$16 sps:$4 sm:$0xff]  }
  0xd7   :  { %1942 = vmatprep.mubr.msk.bf16.mxu0 %vm954_vm0, %v2243_v50 }
  0xd9   :  { %1240 = vmatmul.mubr.bf16.gmra.mrb[76].mxu1 %v2224_v47  ;;  %v2278_v47 = vld [vmem:[%s3248_s0 + $0x380] ss:$16 sps:$4 sm:$0xff]  }
  0xda   :  { %1247 = vmatprep.mubr.bf16.mxu1 %v2227_v48 }
  0xde   :  { %1561 = vmatmul.mubr.bf16.gmra.mrb[92].mxu0 %v2247_v53 }
  0xdf   :  { %1943 = vmatprep.mubr.msk.bf16.mxu0 %vm954_vm0, %v2249_v54 }
  0xe1   :  { %1248 = vmatmul.mubr.bf16.gmra.mrb[80].mxu1 %v2230_v51 }
  0xe2   :  { %1255 = vmatprep.mubr.bf16.mxu1 %v2233_v52 }
  0xe6   :  { %1569 = vmatmul.mubr.bf16.gmra.mrb[96].mxu0 %v2253_v57 }
  0xe7   :  { %1944 = vmatprep.mubr.msk.bf16.mxu0 %vm954_vm0, %v2255_v58 }
  0xe9   :  { %1256 = vmatmul.mubr.bf16.gmra.mrb[84].mxu1 %v2236_v55  ;;  %v2295_v55 = vld [vmem:[%s3248_s0 + $0x3e8] ss:$16 sps:$4 sm:$0xff]  }
  0xea   :  { %1263 = vmatprep.mubr.bf16.mxu1 %v2239_v56 }
  0xee   :  { %1577 = vmatmul.mubr.bf16.gmra.mrb[100].mxu0 %v2259_v61 }
  0xef   :  { %1945 = vmatprep.mubr.msk.bf16.mxu0 %vm954_vm0, %v2261_v62 }
  0xf1   :  { %1264 = vmatmul.mubr.bf16.gmra.mrb[88].mxu1 %v2242_v59 }
  0xf2   :  { %1271 = vmatprep.mubr.bf16.mxu1 %v2245_v60 }
  0xf6   :  { %1585 = vmatmul.mubr.bf16.gmra.mrb[104].mxu0 %v2265_v1 }
  0xf7   :  { %1946 = vmatprep.mubr.msk.bf16.mxu0 %vm954_vm0, %v2267_v2  ;;  %v2287_v2 = vld [vmem:[%s3248_s0 + $0x3c4] ss:$16 sps:$4 sm:$0xff]  }
  0xf9   :  { %1272 = vmatmul.mubr.bf16.gmra.mrb[92].mxu1 %v2248_v63  ;;  %v1378_v5 = vpop.f32.mrb[0].mxu0 }
  0xfa   :  { %1279 = vmatprep.mubr.bf16.mxu1 %v2251_v0  ;;  %v1380_v6 = vpop.f32.mrb[1].mxu0  ;;  %v2284_v0 = vld [vmem:[%s3248_s0 + $0x3a0] ss:$16 sps:$4 sm:$0xff]  }
  0xfb   :  { %v1381_v8 = vpop.f32.mrb[2].mxu0 }
  0xfc   :  { %v1383_v10 = vpop.f32.mrb[3].mxu0 }
  0xfe   :  { %1593 = vmatmul.mubr.bf16.gmra.mrb[108].mxu0 %v2271_v7 }
  0xff   :  { %1947 = vmatprep.mubr.msk.bf16.mxu0 %vm954_vm0, %v2273_v9 }
 0x101   :  { %1280 = vmatmul.mubr.bf16.gmra.mrb[96].mxu1 %v2254_v3  ;;  %v1386_v13 = vpop.f32.mrb[4].mxu0 }
 0x102   :  { %1287 = vmatprep.mubr.bf16.mxu1 %v2257_v4  ;;  %v1388_v14 = vpop.f32.mrb[5].mxu0 }
 0x103   :  { %v1389_v16 = vpop.f32.mrb[6].mxu0 }
 0x104   :  { %v1391_v18 = vpop.f32.mrb[7].mxu0 }
 0x105   :  { %v2293_v18 = vld [vmem:[%s3248_s0 + $0x3e4] ss:$16 sps:$4 sm:$0xff]  }
 0x106   :  { %1601 = vmatmul.mubr.bf16.gmra.mrb[112].mxu0 %v2277_v15 }
 0x107   :  { %1948 = vmatprep.mubr.msk.bf16.mxu0 %vm954_vm0, %v2279_v17 }
 0x109   :  { %1288 = vmatmul.mubr.bf16.gmra.mrb[100].mxu1 %v2260_v11  ;;  %v2919_v21 = vpop.f32.mrb[8].mxu0 }
 0x10a   :  { %1295 = vmatprep.mubr.bf16.mxu1 %v2263_v12  ;;  %v1396_v22 = vpop.f32.mrb[9].mxu0 }
 0x10b   :  { %v2924_v24 = vpop.f32.mrb[10].mxu0 }
 0x10c   :  { %v1399_v27 = vpop.f32.mrb[11].mxu0 }
 0x10e   :  { %1609 = vmatmul.mubr.bf16.gmra.mrb[116].mxu0 %v2283_v23 }
 0x10f   :  { %1949 = vmatprep.mubr.msk.bf16.mxu0 %vm954_vm0, %v2285_v25 }
 0x111   :  { %1296 = vmatmul.mubr.bf16.gmra.mrb[104].mxu1 %v2266_v19  ;;  %v2943_v37 = vpop.f32.mrb[12].mxu0 }
 0x112   :  { %1303 = vmatprep.mubr.bf16.mxu1 %v2269_v20  ;;  %v1404_v38 = vpop.f32.mrb[13].mxu0 }
 0x113   :  { %v2948_v41 = vpop.f32.mrb[14].mxu0 }
 0x114   :  { %v1089_v28 = vpop.f32.mrb[0].mxu1  ;;  %v1407_v43 = vpop.f32.mrb[15].mxu0 }
 0x115   :  { %v1090_v29 = vadd.f32 %v2932_v26, %v1089_v28  ;;  %v1091_v30 = vpop.f32.mrb[1].mxu1 }
 0x116   :  { %v1092_v32 = vpop.f32.mrb[2].mxu1  ;;  %1617 = vmatmul.mubr.bf16.gmra.mrb[120].mxu0 %v2289_v39 }
 0x117   :  { %v1379_v34 = vadd.f32 %v1378_v5, %v1090_v29  ;;  %v1093_v35 = vadd.f32 %v2932_v26, %v1092_v32  ;;  %v1094_v36 = vpop.f32.mrb[3].mxu1  ;;  %1950 = vmatprep.mubr.msk.bf16.mxu0 %vm954_vm0, %v2291_v42 }
 0x119   :  { %2297 = vtanh.f32 %v1379_v34  ;;  %v1382_v40 = vadd.f32 %v1381_v8, %v1093_v35  ;;  %1304 = vmatmul.mubr.bf16.gmra.mrb[108].mxu1 %v2272_v31  ;;  %v2962_v53 = vpop.f32.mrb[16].mxu0 }
 0x11a   :  { %1311 = vmatprep.mubr.bf16.mxu1 %v2275_v33  ;;  %v1412_v54 = vpop.f32.mrb[17].mxu0  ;;  %v2296_v33 = vld [vmem:[%s3248_s0 + $0x3e0] ss:$16 sps:$4 sm:$0xff]  }
 0x11b   :  { %2299 = vtanh.f32 %v1382_v40  ;;  %v2967_v57 = vpop.f32.mrb[18].mxu0 }
 0x11c   :  { %v1097_v44 = vpop.f32.mrb[4].mxu1  ;;  %v1415_v58 = vpop.f32.mrb[19].mxu0 }
 0x11d   :  { %v1098_v45 = vadd.f32 %v2932_v26, %v1097_v44  ;;  %v1099_v46 = vpop.f32.mrb[5].mxu1 }
 0x11e   :  { %v1100_v48 = vpop.f32.mrb[6].mxu1  ;;  %1625 = vmatmul.mubr.bf16.gmra.mrb[124].mxu0 %v2295_v55 }
 0x11f   :  { %v1387_v50 = vadd.f32 %v1386_v13, %v1098_v45  ;;  %v1101_v51 = vadd.f32 %v2932_v26, %v1100_v48  ;;  %v1102_v52 = vpop.f32.mrb[7].mxu1 }
 0x121   :  { %2301 = vtanh.f32 %v1387_v50  ;;  %v1390_v56 = vadd.f32 %v1389_v16, %v1101_v51  ;;  %1312 = vmatmul.mubr.bf16.gmra.mrb[112].mxu1 %v2278_v47  ;;  %v1418_v6 = vpop.f32.mrb[20].mxu0  ;;  %v2290_v16 = vld [vmem:[%s3248_s0 + $0x3c0] ss:$16 sps:$4 sm:$0xff]  }
 0x122   :  { %1319 = vmatprep.mubr.bf16.mxu1 %v2281_v49  ;;  %v1420_v7 = vpop.f32.mrb[21].mxu0 }
 0x123   :  { %v2298_v59 = vpop.eup %2297  ;;  %2303 = vtanh.f32 %v1390_v56  ;;  %v1421_v9 = vpop.f32.mrb[22].mxu0 }
 0x124   :  { %1697 = vst [vmem:[%s3250_s3] sm:$0xff] %v2298_v59  ;;  %v1105_v60 = vpop.f32.mrb[8].mxu1  ;;  %v1423_v10 = vpop.f32.mrb[23].mxu0 }
 0x125   :  { %v2300_v61 = vpop.eup %2299  ;;  %v1106_v62 = vadd.f32 %v2932_v26, %v1105_v60  ;;  %v1107_v63 = vpop.f32.mrb[9].mxu1 }
 0x126   :  { %1698 = vst [vmem:[%s3250_s3 + $0x8] sm:$0xff] %v2300_v61  ;;  %v1108_v1 = vpop.f32.mrb[10].mxu1 }
 0x127   :  { %v1395_v3 = vadd.f32 %v2919_v21, %v1106_v62  ;;  %v1109_v4 = vadd.f32 %v2932_v26, %v1108_v1  ;;  %v1110_v5 = vpop.f32.mrb[11].mxu1 }
 0x129   :  { %2305 = vtanh.f32 %v1395_v3  ;;  %v1398_v8 = vadd.f32 %v2924_v24, %v1109_v4  ;;  %1320 = vmatmul.mubr.bf16.gmra.mrb[116].mxu1 %v2284_v0  ;;  %v1426_v22 = vpop.f32.mrb[24].mxu0 }
 0x12a   :  { %1327 = vmatprep.mubr.bf16.mxu1 %v2287_v2  ;;  %v1428_v23 = vpop.f32.mrb[25].mxu0 }
 0x12b   :  { %v2302_v11 = vpop.eup %2301  ;;  %2307 = vtanh.f32 %v1398_v8  ;;  %v1429_v25 = vpop.f32.mrb[26].mxu0 }
 0x12c   :  { %1699 = vst [vmem:[%s3250_s3 + $0x10] sm:$0xff] %v2302_v11  ;;  %v1113_v12 = vpop.f32.mrb[12].mxu1  ;;  %v1431_v27 = vpop.f32.mrb[27].mxu0 }
 0x12d   :  { %v2304_v13 = vpop.eup %2303  ;;  %v1114_v14 = vadd.f32 %v2932_v26, %v1113_v12  ;;  %v1115_v15 = vpop.f32.mrb[13].mxu1 }
 0x12e   :  { %1700 = vst [vmem:[%s3250_s3 + $0x18] sm:$0xff] %v2304_v13  ;;  %v1116_v17 = vpop.f32.mrb[14].mxu1 }
 0x12f   :  { %v1403_v19 = vadd.f32 %v2943_v37, %v1114_v14  ;;  %v1117_v20 = vadd.f32 %v2932_v26, %v1116_v17  ;;  %v1118_v21 = vpop.f32.mrb[15].mxu1 }
 0x131   :  { %2309 = vtanh.f32 %v1403_v19  ;;  %v1406_v24 = vadd.f32 %v2948_v41, %v1117_v20  ;;  %1328 = vmatmul.mubr.bf16.gmra.mrb[120].mxu1 %v2290_v16  ;;  %v1434_v38 = vpop.f32.mrb[28].mxu0 }
 0x132   :  { %1335 = vmatprep.mubr.bf16.mxu1 %v2293_v18  ;;  %v1436_v39 = vpop.f32.mrb[29].mxu0 }
 0x133   :  { %v2306_v28 = vpop.eup %2305  ;;  %2311 = vtanh.f32 %v1406_v24  ;;  %v1437_v41 = vpop.f32.mrb[30].mxu0 }
 0x134   :  { %1701 = vst [vmem:[%s3250_s3 + $0x20] sm:$0xff] %v2306_v28  ;;  %v1121_v29 = vpop.f32.mrb[16].mxu1  ;;  %v1439_v42 = vpop.f32.mrb[31].mxu0 }
 0x135   :  { %v2308_v30 = vpop.eup %2307  ;;  %v1122_v31 = vadd.f32 %v2932_v26, %v1121_v29  ;;  %v1123_v32 = vpop.f32.mrb[17].mxu1 }
 0x136   :  { %1702 = vst [vmem:[%s3250_s3 + $0x28] sm:$0xff] %v2308_v30  ;;  %v1124_v34 = vpop.f32.mrb[18].mxu1 }
 0x137   :  { %v1411_v35 = vadd.f32 %v2962_v53, %v1122_v31  ;;  %v1125_v36 = vadd.f32 %v2932_v26, %v1124_v34  ;;  %v1126_v37 = vpop.f32.mrb[19].mxu1 }
 0x139   :  { %2313 = vtanh.f32 %v1411_v35  ;;  %v1414_v40 = vadd.f32 %v2967_v57, %v1125_v36  ;;  %1336 = vmatmul.mubr.bf16.gmra.mrb[124].mxu1 %v2296_v33  ;;  %v1442_v52 = vpop.f32.mrb[32].mxu0 }
 0x13a   :  { %v1444_v53 = vpop.f32.mrb[33].mxu0 }
 0x13b   :  { %v2310_v43 = vpop.eup %2309  ;;  %2315 = vtanh.f32 %v1414_v40  ;;  %v1445_v55 = vpop.f32.mrb[34].mxu0 }
 0x13c   :  { %1703 = vst [vmem:[%s3250_s3 + $0x30] sm:$0xff] %v2310_v43  ;;  %v1129_v44 = vpop.f32.mrb[20].mxu1  ;;  %v1447_v56 = vpop.f32.mrb[35].mxu0 }
 0x13d   :  { %v2312_v45 = vpop.eup %2311  ;;  %v1130_v46 = vadd.f32 %v2932_v26, %v1129_v44  ;;  %v1131_v47 = vpop.f32.mrb[21].mxu1 }
 0x13e   :  { %1704 = vst [vmem:[%s3250_s3 + $0x38] sm:$0xff] %v2312_v45  ;;  %v1132_v48 = vpop.f32.mrb[22].mxu1 }
 0x13f   :  { %v1419_v49 = vadd.f32 %v1418_v6, %v1130_v46  ;;  %v1133_v50 = vadd.f32 %v2932_v26, %v1132_v48  ;;  %v1134_v51 = vpop.f32.mrb[23].mxu1 }
 0x141   :  { %2317 = vtanh.f32 %v1419_v49  ;;  %v1422_v54 = vadd.f32 %v1421_v9, %v1133_v50  ;;  %v1450_v2 = vpop.f32.mrb[36].mxu0 }
 0x142   :  { %v1452_v3 = vpop.f32.mrb[37].mxu0 }
 0x143   :  { %v2314_v57 = vpop.eup %2313  ;;  %2319 = vtanh.f32 %v1422_v54  ;;  %v1453_v5 = vpop.f32.mrb[38].mxu0 }
 0x144   :  { %1705 = vst [vmem:[%s3250_s3 + $0x40] sm:$0xff] %v2314_v57  ;;  %v1137_v58 = vpop.f32.mrb[24].mxu1  ;;  %v1455_v6 = vpop.f32.mrb[39].mxu0 }
 0x145   :  { %v2316_v59 = vpop.eup %2315  ;;  %v1138_v60 = vadd.f32 %v2932_v26, %v1137_v58  ;;  %v1139_v61 = vpop.f32.mrb[25].mxu1 }
 0x146   :  { %1706 = vst [vmem:[%s3250_s3 + $0x48] sm:$0xff] %v2316_v59  ;;  %v1140_v62 = vpop.f32.mrb[26].mxu1 }
 0x147   :  { %v1427_v63 = vadd.f32 %v1426_v22, %v1138_v60  ;;  %v1141_v0 = vadd.f32 %v2932_v26, %v1140_v62  ;;  %v1142_v1 = vpop.f32.mrb[27].mxu1 }
 0x149   :  { %2321 = vtanh.f32 %v1427_v63  ;;  %v1430_v4 = vadd.f32 %v1429_v25, %v1141_v0  ;;  %v1458_v16 = vpop.f32.mrb[40].mxu0 }
 0x14a   :  { %v1460_v17 = vpop.f32.mrb[41].mxu0 }
 0x14b   :  { %v2318_v7 = vpop.eup %2317  ;;  %2323 = vtanh.f32 %v1430_v4  ;;  %v1461_v19 = vpop.f32.mrb[42].mxu0 }
 0x14c   :  { %1707 = vst [vmem:[%s3250_s3 + $0x50] sm:$0xff] %v2318_v7  ;;  %v1145_v8 = vpop.f32.mrb[28].mxu1  ;;  %v1463_v20 = vpop.f32.mrb[43].mxu0 }
 0x14d   :  { %v2320_v9 = vpop.eup %2319  ;;  %v1146_v10 = vadd.f32 %v2932_v26, %v1145_v8  ;;  %v1147_v11 = vpop.f32.mrb[29].mxu1 }
 0x14e   :  { %1708 = vst [vmem:[%s3250_s3 + $0x58] sm:$0xff] %v2320_v9  ;;  %v1148_v12 = vpop.f32.mrb[30].mxu1 }
 0x14f   :  { %v1435_v13 = vadd.f32 %v1434_v38, %v1146_v10  ;;  %v1149_v14 = vadd.f32 %v2932_v26, %v1148_v12  ;;  %v1150_v15 = vpop.f32.mrb[31].mxu1 }
 0x151   :  { %2325 = vtanh.f32 %v1435_v13  ;;  %v1438_v18 = vadd.f32 %v1437_v41, %v1149_v14  ;;  %v1466_v31 = vpop.f32.mrb[44].mxu0 }
 0x152   :  { %v1468_v32 = vpop.f32.mrb[45].mxu0 }
 0x153   :  { %v2322_v21 = vpop.eup %2321  ;;  %2327 = vtanh.f32 %v1438_v18  ;;  %v1469_v34 = vpop.f32.mrb[46].mxu0 }
 0x154   :  { %1709 = vst [vmem:[%s3250_s3 + $0x60] sm:$0xff] %v2322_v21  ;;  %v1153_v22 = vpop.f32.mrb[32].mxu1  ;;  %v1471_v35 = vpop.f32.mrb[47].mxu0 }
 0x155   :  { %v2324_v23 = vpop.eup %2323  ;;  %v1154_v24 = vadd.f32 %v2932_v26, %v1153_v22  ;;  %v1155_v25 = vpop.f32.mrb[33].mxu1 }
 0x156   :  { %1710 = vst [vmem:[%s3250_s3 + $0x68] sm:$0xff] %v2324_v23  ;;  %v1156_v27 = vpop.f32.mrb[34].mxu1 }
 0x157   :  { %v1443_v28 = vadd.f32 %v1442_v52, %v1154_v24  ;;  %v1157_v29 = vadd.f32 %v2932_v26, %v1156_v27  ;;  %v1158_v30 = vpop.f32.mrb[35].mxu1 }
 0x159   :  { %2329 = vtanh.f32 %v1443_v28  ;;  %v1446_v33 = vadd.f32 %v1445_v55, %v1157_v29  ;;  %v1474_v45 = vpop.f32.mrb[48].mxu0 }
 0x15a   :  { %v1476_v46 = vpop.f32.mrb[49].mxu0 }
 0x15b   :  { %v2326_v36 = vpop.eup %2325  ;;  %2331 = vtanh.f32 %v1446_v33  ;;  %v1477_v48 = vpop.f32.mrb[50].mxu0 }
 0x15c   :  { %1711 = vst [vmem:[%s3250_s3 + $0x70] sm:$0xff] %v2326_v36  ;;  %v1161_v37 = vpop.f32.mrb[36].mxu1  ;;  %v1479_v49 = vpop.f32.mrb[51].mxu0 }
 0x15d   :  { %v2328_v38 = vpop.eup %2327  ;;  %v1162_v39 = vadd.f32 %v2932_v26, %v1161_v37  ;;  %v1163_v40 = vpop.f32.mrb[37].mxu1 }
 0x15e   :  { %1712 = vst [vmem:[%s3250_s3 + $0x78] sm:$0xff] %v2328_v38  ;;  %v1164_v41 = vpop.f32.mrb[38].mxu1 }
 0x15f   :  { %v1451_v42 = vadd.f32 %v1450_v2, %v1162_v39  ;;  %v1165_v43 = vadd.f32 %v2932_v26, %v1164_v41  ;;  %v1166_v44 = vpop.f32.mrb[39].mxu1 }
 0x161   :  { %2333 = vtanh.f32 %v1451_v42  ;;  %v1454_v47 = vadd.f32 %v1453_v5, %v1165_v43  ;;  %v1482_v59 = vpop.f32.mrb[52].mxu0 }
 0x162   :  { %v1484_v60 = vpop.f32.mrb[53].mxu0 }
 0x163   :  { %v2330_v50 = vpop.eup %2329  ;;  %2335 = vtanh.f32 %v1454_v47  ;;  %v1485_v62 = vpop.f32.mrb[54].mxu0 }
 0x164   :  { %1713 = vst [vmem:[%s3250_s3 + $0x80] sm:$0xff] %v2330_v50  ;;  %v1169_v51 = vpop.f32.mrb[40].mxu1  ;;  %v1487_v63 = vpop.f32.mrb[55].mxu0 }
 0x165   :  { %v2332_v52 = vpop.eup %2331  ;;  %v1170_v53 = vadd.f32 %v2932_v26, %v1169_v51  ;;  %v1171_v54 = vpop.f32.mrb[41].mxu1 }
 0x166   :  { %1714 = vst [vmem:[%s3250_s3 + $0x88] sm:$0xff] %v2332_v52  ;;  %v1172_v55 = vpop.f32.mrb[42].mxu1 }
 0x167   :  { %v1459_v56 = vadd.f32 %v1458_v16, %v1170_v53  ;;  %v1173_v57 = vadd.f32 %v2932_v26, %v1172_v55  ;;  %v1174_v58 = vpop.f32.mrb[43].mxu1 }
 0x169   :  { %2337 = vtanh.f32 %v1459_v56  ;;  %v1462_v61 = vadd.f32 %v1461_v19, %v1173_v57  ;;  %v1490_v9 = vpop.f32.mrb[56].mxu0 }
 0x16a   :  { %v1492_v10 = vpop.f32.mrb[57].mxu0 }
 0x16b   :  { %v2334_v0 = vpop.eup %2333  ;;  %2339 = vtanh.f32 %v1462_v61  ;;  %v1493_v12 = vpop.f32.mrb[58].mxu0 }
 0x16c   :  { %1715 = vst [vmem:[%s3250_s3 + $0x90] sm:$0xff] %v2334_v0  ;;  %v1177_v1 = vpop.f32.mrb[44].mxu1  ;;  %v1495_v13 = vpop.f32.mrb[59].mxu0 }
 0x16d   :  { %v2336_v2 = vpop.eup %2335  ;;  %v1178_v3 = vadd.f32 %v2932_v26, %v1177_v1  ;;  %v1179_v4 = vpop.f32.mrb[45].mxu1 }
 0x16e   :  { %1716 = vst [vmem:[%s3250_s3 + $0x98] sm:$0xff] %v2336_v2  ;;  %v1180_v5 = vpop.f32.mrb[46].mxu1 }
 0x16f   :  { %v1467_v6 = vadd.f32 %v1466_v31, %v1178_v3  ;;  %v1181_v7 = vadd.f32 %v2932_v26, %v1180_v5  ;;  %v1182_v8 = vpop.f32.mrb[47].mxu1 }
 0x171   :  { %2341 = vtanh.f32 %v1467_v6  ;;  %v1470_v11 = vadd.f32 %v1469_v34, %v1181_v7  ;;  %v1498_v23 = vpop.f32.mrb[60].mxu0 }
 0x172   :  { %v1500_v24 = vpop.f32.mrb[61].mxu0 }
 0x173   :  { %v2338_v14 = vpop.eup %2337  ;;  %2343 = vtanh.f32 %v1470_v11  ;;  %v1501_v27 = vpop.f32.mrb[62].mxu0 }
 0x174   :  { %1717 = vst [vmem:[%s3250_s3 + $0xa0] sm:$0xff] %v2338_v14  ;;  %v1185_v15 = vpop.f32.mrb[48].mxu1  ;;  %v1503_v28 = vpop.f32.mrb[63].mxu0 }
 0x175   :  { %v2340_v16 = vpop.eup %2339  ;;  %v1186_v17 = vadd.f32 %v2932_v26, %v1185_v15  ;;  %v1187_v18 = vpop.f32.mrb[49].mxu1 }
 0x176   :  { %1718 = vst [vmem:[%s3250_s3 + $0xa8] sm:$0xff] %v2340_v16  ;;  %v1188_v19 = vpop.f32.mrb[50].mxu1 }
 0x177   :  { %v1475_v20 = vadd.f32 %v1474_v45, %v1186_v17  ;;  %v1189_v21 = vadd.f32 %v2932_v26, %v1188_v19  ;;  %v1190_v22 = vpop.f32.mrb[51].mxu1 }
 0x179   :  { %2345 = vtanh.f32 %v1475_v20  ;;  %v1478_v25 = vadd.f32 %v1477_v48, %v1189_v21  ;;  %v1506_v38 = vpop.f32.mrb[64].mxu0 }
 0x17a   :  { %v1508_v39 = vpop.f32.mrb[65].mxu0 }
 0x17b   :  { %v2342_v29 = vpop.eup %2341  ;;  %2347 = vtanh.f32 %v1478_v25  ;;  %v1509_v41 = vpop.f32.mrb[66].mxu0 }
 0x17c   :  { %1719 = vst [vmem:[%s3250_s3 + $0xb0] sm:$0xff] %v2342_v29  ;;  %v1193_v30 = vpop.f32.mrb[52].mxu1  ;;  %v1511_v42 = vpop.f32.mrb[67].mxu0 }
 0x17d   :  { %v2344_v31 = vpop.eup %2343  ;;  %v1194_v32 = vadd.f32 %v2932_v26, %v1193_v30  ;;  %v1195_v33 = vpop.f32.mrb[53].mxu1 }
 0x17e   :  { %1720 = vst [vmem:[%s3250_s3 + $0xb8] sm:$0xff] %v2344_v31  ;;  %v1196_v34 = vpop.f32.mrb[54].mxu1 }
 0x17f   :  { %v1483_v35 = vadd.f32 %v1482_v59, %v1194_v32  ;;  %v1197_v36 = vadd.f32 %v2932_v26, %v1196_v34  ;;  %v1198_v37 = vpop.f32.mrb[55].mxu1 }
 0x181   :  { %2349 = vtanh.f32 %v1483_v35  ;;  %v1486_v40 = vadd.f32 %v1485_v62, %v1197_v36  ;;  %v1514_v52 = vpop.f32.mrb[68].mxu0 }
 0x182   :  { %v1516_v53 = vpop.f32.mrb[69].mxu0 }
 0x183   :  { %v2346_v43 = vpop.eup %2345  ;;  %2351 = vtanh.f32 %v1486_v40  ;;  %v1517_v55 = vpop.f32.mrb[70].mxu0 }
 0x184   :  { %1721 = vst [vmem:[%s3250_s3 + $0xc0] sm:$0xff] %v2346_v43  ;;  %v1201_v44 = vpop.f32.mrb[56].mxu1  ;;  %v1519_v56 = vpop.f32.mrb[71].mxu0 }
 0x185   :  { %v2348_v45 = vpop.eup %2347  ;;  %v1202_v46 = vadd.f32 %v2932_v26, %v1201_v44  ;;  %v1203_v47 = vpop.f32.mrb[57].mxu1 }
 0x186   :  { %1722 = vst [vmem:[%s3250_s3 + $0xc8] sm:$0xff] %v2348_v45  ;;  %v1204_v48 = vpop.f32.mrb[58].mxu1 }
 0x187   :  { %v1491_v49 = vadd.f32 %v1490_v9, %v1202_v46  ;;  %v1205_v50 = vadd.f32 %v2932_v26, %v1204_v48  ;;  %v1206_v51 = vpop.f32.mrb[59].mxu1 }
 0x189   :  { %2353 = vtanh.f32 %v1491_v49  ;;  %v1494_v54 = vadd.f32 %v1493_v12, %v1205_v50  ;;  %v1522_v2 = vpop.f32.mrb[72].mxu0 }
 0x18a   :  { %v1524_v3 = vpop.f32.mrb[73].mxu0 }
 0x18b   :  { %v2350_v57 = vpop.eup %2349  ;;  %2355 = vtanh.f32 %v1494_v54  ;;  %v1525_v5 = vpop.f32.mrb[74].mxu0 }
 0x18c   :  { %1723 = vst [vmem:[%s3250_s3 + $0xd0] sm:$0xff] %v2350_v57  ;;  %v1209_v58 = vpop.f32.mrb[60].mxu1  ;;  %v1527_v6 = vpop.f32.mrb[75].mxu0 }
 0x18d   :  { %v2352_v59 = vpop.eup %2351  ;;  %v1210_v60 = vadd.f32 %v2932_v26, %v1209_v58  ;;  %v1211_v61 = vpop.f32.mrb[61].mxu1 }
 0x18e   :  { %1724 = vst [vmem:[%s3250_s3 + $0xd8] sm:$0xff] %v2352_v59  ;;  %v1212_v62 = vpop.f32.mrb[62].mxu1 }
 0x18f   :  { %v1499_v63 = vadd.f32 %v1498_v23, %v1210_v60  ;;  %v1213_v0 = vadd.f32 %v2932_v26, %v1212_v62  ;;  %v1214_v1 = vpop.f32.mrb[63].mxu1 }
 0x191   :  { %2357 = vtanh.f32 %v1499_v63  ;;  %v1502_v4 = vadd.f32 %v1501_v27, %v1213_v0  ;;  %v1530_v16 = vpop.f32.mrb[76].mxu0 }
 0x192   :  { %v1532_v17 = vpop.f32.mrb[77].mxu0 }
 0x193   :  { %v2354_v7 = vpop.eup %2353  ;;  %2359 = vtanh.f32 %v1502_v4  ;;  %v1533_v19 = vpop.f32.mrb[78].mxu0 }
 0x194   :  { %1725 = vst [vmem:[%s3250_s3 + $0xe0] sm:$0xff] %v2354_v7  ;;  %v1217_v8 = vpop.f32.mrb[64].mxu1  ;;  %v1535_v20 = vpop.f32.mrb[79].mxu0 }
 0x195   :  { %v2356_v9 = vpop.eup %2355  ;;  %v1218_v10 = vadd.f32 %v2932_v26, %v1217_v8  ;;  %v1219_v11 = vpop.f32.mrb[65].mxu1 }
 0x196   :  { %1726 = vst [vmem:[%s3250_s3 + $0xe8] sm:$0xff] %v2356_v9  ;;  %v1220_v12 = vpop.f32.mrb[66].mxu1 }
 0x197   :  { %v1507_v13 = vadd.f32 %v1506_v38, %v1218_v10  ;;  %v1221_v14 = vadd.f32 %v2932_v26, %v1220_v12  ;;  %v1222_v15 = vpop.f32.mrb[67].mxu1 }
 0x199   :  { %2361 = vtanh.f32 %v1507_v13  ;;  %v1510_v18 = vadd.f32 %v1509_v41, %v1221_v14  ;;  %v1538_v31 = vpop.f32.mrb[80].mxu0 }
 0x19a   :  { %v1540_v32 = vpop.f32.mrb[81].mxu0 }
 0x19b   :  { %v2358_v21 = vpop.eup %2357  ;;  %2363 = vtanh.f32 %v1510_v18  ;;  %v1541_v34 = vpop.f32.mrb[82].mxu0 }
 0x19c   :  { %1727 = vst [vmem:[%s3250_s3 + $0xf0] sm:$0xff] %v2358_v21  ;;  %v1225_v22 = vpop.f32.mrb[68].mxu1  ;;  %v1543_v35 = vpop.f32.mrb[83].mxu0 }
 0x19d   :  { %v2360_v23 = vpop.eup %2359  ;;  %v1226_v24 = vadd.f32 %v2932_v26, %v1225_v22  ;;  %v1227_v25 = vpop.f32.mrb[69].mxu1 }
 0x19e   :  { %1728 = vst [vmem:[%s3250_s3 + $0xf8] sm:$0xff] %v2360_v23  ;;  %v1228_v27 = vpop.f32.mrb[70].mxu1 }
 0x19f   :  { %v1515_v28 = vadd.f32 %v1514_v52, %v1226_v24  ;;  %v1229_v29 = vadd.f32 %v2932_v26, %v1228_v27  ;;  %v1230_v30 = vpop.f32.mrb[71].mxu1 }
 0x1a1   :  { %2365 = vtanh.f32 %v1515_v28  ;;  %v1518_v33 = vadd.f32 %v1517_v55, %v1229_v29  ;;  %v1546_v45 = vpop.f32.mrb[84].mxu0 }
 0x1a2   :  { %v1548_v46 = vpop.f32.mrb[85].mxu0 }
 0x1a3   :  { %v2362_v36 = vpop.eup %2361  ;;  %2367 = vtanh.f32 %v1518_v33  ;;  %v1549_v48 = vpop.f32.mrb[86].mxu0 }
 0x1a4   :  { %1729 = vst [vmem:[%s3250_s3 + $0x100] sm:$0xff] %v2362_v36  ;;  %v1233_v37 = vpop.f32.mrb[72].mxu1  ;;  %v1551_v49 = vpop.f32.mrb[87].mxu0 }
 0x1a5   :  { %v2364_v38 = vpop.eup %2363  ;;  %v1234_v39 = vadd.f32 %v2932_v26, %v1233_v37  ;;  %v1235_v40 = vpop.f32.mrb[73].mxu1 }
 0x1a6   :  { %1730 = vst [vmem:[%s3250_s3 + $0x108] sm:$0xff] %v2364_v38  ;;  %v1236_v41 = vpop.f32.mrb[74].mxu1 }
 0x1a7   :  { %v1523_v42 = vadd.f32 %v1522_v2, %v1234_v39  ;;  %v1237_v43 = vadd.f32 %v2932_v26, %v1236_v41  ;;  %v1238_v44 = vpop.f32.mrb[75].mxu1 }
 0x1a9   :  { %2369 = vtanh.f32 %v1523_v42  ;;  %v1526_v47 = vadd.f32 %v1525_v5, %v1237_v43  ;;  %v1554_v59 = vpop.f32.mrb[88].mxu0 }
 0x1aa   :  { %v1556_v60 = vpop.f32.mrb[89].mxu0 }
 0x1ab   :  { %v2366_v50 = vpop.eup %2365  ;;  %2371 = vtanh.f32 %v1526_v47  ;;  %v1557_v62 = vpop.f32.mrb[90].mxu0 }
 0x1ac   :  { %1731 = vst [vmem:[%s3250_s3 + $0x110] sm:$0xff] %v2366_v50  ;;  %v1241_v51 = vpop.f32.mrb[76].mxu1  ;;  %v1559_v63 = vpop.f32.mrb[91].mxu0 }
 0x1ad   :  { %v2368_v52 = vpop.eup %2367  ;;  %v1242_v53 = vadd.f32 %v2932_v26, %v1241_v51  ;;  %v1243_v54 = vpop.f32.mrb[77].mxu1 }
 0x1ae   :  { %1732 = vst [vmem:[%s3250_s3 + $0x118] sm:$0xff] %v2368_v52  ;;  %v1244_v55 = vpop.f32.mrb[78].mxu1 }
 0x1af   :  { %v1531_v56 = vadd.f32 %v1530_v16, %v1242_v53  ;;  %v1245_v57 = vadd.f32 %v2932_v26, %v1244_v55  ;;  %v1246_v58 = vpop.f32.mrb[79].mxu1 }
 0x1b1   :  { %2373 = vtanh.f32 %v1531_v56  ;;  %v1534_v61 = vadd.f32 %v1533_v19, %v1245_v57  ;;  %v1562_v9 = vpop.f32.mrb[92].mxu0 }
 0x1b2   :  { %v1564_v10 = vpop.f32.mrb[93].mxu0 }
 0x1b3   :  { %v2370_v0 = vpop.eup %2369  ;;  %2375 = vtanh.f32 %v1534_v61  ;;  %v1565_v12 = vpop.f32.mrb[94].mxu0 }
 0x1b4   :  { %1733 = vst [vmem:[%s3250_s3 + $0x120] sm:$0xff] %v2370_v0  ;;  %v1249_v1 = vpop.f32.mrb[80].mxu1  ;;  %v1567_v13 = vpop.f32.mrb[95].mxu0 }
 0x1b5   :  { %v2372_v2 = vpop.eup %2371  ;;  %v1250_v3 = vadd.f32 %v2932_v26, %v1249_v1  ;;  %v1251_v4 = vpop.f32.mrb[81].mxu1 }
 0x1b6   :  { %1734 = vst [vmem:[%s3250_s3 + $0x128] sm:$0xff] %v2372_v2  ;;  %v1252_v5 = vpop.f32.mrb[82].mxu1 }
 0x1b7   :  { %v1539_v6 = vadd.f32 %v1538_v31, %v1250_v3  ;;  %v1253_v7 = vadd.f32 %v2932_v26, %v1252_v5  ;;  %v1254_v8 = vpop.f32.mrb[83].mxu1 }
 0x1b9   :  { %2377 = vtanh.f32 %v1539_v6  ;;  %v1542_v11 = vadd.f32 %v1541_v34, %v1253_v7  ;;  %v1570_v23 = vpop.f32.mrb[96].mxu0 }
 0x1ba   :  { %v1572_v24 = vpop.f32.mrb[97].mxu0 }
 0x1bb   :  { %v2374_v14 = vpop.eup %2373  ;;  %2379 = vtanh.f32 %v1542_v11  ;;  %v1573_v27 = vpop.f32.mrb[98].mxu0 }
 0x1bc   :  { %1735 = vst [vmem:[%s3250_s3 + $0x130] sm:$0xff] %v2374_v14  ;;  %v1257_v15 = vpop.f32.mrb[84].mxu1  ;;  %v1575_v28 = vpop.f32.mrb[99].mxu0 }
 0x1bd   :  { %v2376_v16 = vpop.eup %2375  ;;  %v1258_v17 = vadd.f32 %v2932_v26, %v1257_v15  ;;  %v1259_v18 = vpop.f32.mrb[85].mxu1 }
 0x1be   :  { %1736 = vst [vmem:[%s3250_s3 + $0x138] sm:$0xff] %v2376_v16  ;;  %v1260_v19 = vpop.f32.mrb[86].mxu1 }
 0x1bf   :  { %v1547_v20 = vadd.f32 %v1546_v45, %v1258_v17  ;;  %v1261_v21 = vadd.f32 %v2932_v26, %v1260_v19  ;;  %v1262_v22 = vpop.f32.mrb[87].mxu1 }
 0x1c1   :  { %2381 = vtanh.f32 %v1547_v20  ;;  %v1550_v25 = vadd.f32 %v1549_v48, %v1261_v21  ;;  %v1578_v38 = vpop.f32.mrb[100].mxu0 }
 0x1c2   :  { %v1580_v39 = vpop.f32.mrb[101].mxu0 }
 0x1c3   :  { %v2378_v29 = vpop.eup %2377  ;;  %2383 = vtanh.f32 %v1550_v25  ;;  %v1581_v41 = vpop.f32.mrb[102].mxu0  ;;  %v3196_v39 = vld [vmem:[%s3249_s2] ss:$0 sm:$0xff] }
 0x1c4   :  { %1737 = vst [vmem:[%s3250_s3 + $0x140] sm:$0xff] %v2378_v29  ;;  %v1265_v30 = vpop.f32.mrb[88].mxu1  ;;  %v1583_v42 = vpop.f32.mrb[103].mxu0 }
 0x1c5   :  { %v2380_v31 = vpop.eup %2379  ;;  %v1266_v32 = vadd.f32 %v2932_v26, %v1265_v30  ;;  %v1267_v33 = vpop.f32.mrb[89].mxu1 }
 0x1c6   :  { %1738 = vst [vmem:[%s3250_s3 + $0x148] sm:$0xff] %v2380_v31  ;;  %v1268_v34 = vpop.f32.mrb[90].mxu1 }
 0x1c7   :  { %v1555_v35 = vadd.f32 %v1554_v59, %v1266_v32  ;;  %v1269_v36 = vadd.f32 %v2932_v26, %v1268_v34  ;;  %v1270_v37 = vpop.f32.mrb[91].mxu1 }
 0x1c9   :  { %2385 = vtanh.f32 %v1555_v35  ;;  %v1558_v40 = vadd.f32 %v1557_v62, %v1269_v36  ;;  %v1586_v52 = vpop.f32.mrb[104].mxu0 }
 0x1ca   :  { %v1588_v53 = vpop.f32.mrb[105].mxu0 }
 0x1cb   :  { %v2382_v43 = vpop.eup %2381  ;;  %2387 = vtanh.f32 %v1558_v40  ;;  %v1589_v55 = vpop.f32.mrb[106].mxu0 }
 0x1cc   :  { %1739 = vst [vmem:[%s3250_s3 + $0x150] sm:$0xff] %v2382_v43  ;;  %v1273_v44 = vpop.f32.mrb[92].mxu1  ;;  %v1591_v56 = vpop.f32.mrb[107].mxu0 }
 0x1cd   :  { %v2384_v45 = vpop.eup %2383  ;;  %v1274_v46 = vadd.f32 %v2932_v26, %v1273_v44  ;;  %v1275_v47 = vpop.f32.mrb[93].mxu1 }
 0x1ce   :  { %1740 = vst [vmem:[%s3250_s3 + $0x158] sm:$0xff] %v2384_v45  ;;  %v1276_v48 = vpop.f32.mrb[94].mxu1 }
 0x1cf   :  { %v1563_v49 = vadd.f32 %v1562_v9, %v1274_v46  ;;  %v1277_v50 = vadd.f32 %v2932_v26, %v1276_v48  ;;  %v1278_v51 = vpop.f32.mrb[95].mxu1 }
 0x1d1   :  { %2389 = vtanh.f32 %v1563_v49  ;;  %v1566_v54 = vadd.f32 %v1565_v12, %v1277_v50  ;;  %v1594_v2 = vpop.f32.mrb[108].mxu0 }
 0x1d2   :  { %v1596_v3 = vpop.f32.mrb[109].mxu0 }
 0x1d3   :  { %v2386_v57 = vpop.eup %2385  ;;  %2391 = vtanh.f32 %v1566_v54  ;;  %v1597_v5 = vpop.f32.mrb[110].mxu0 }
 0x1d4   :  { %1741 = vst [vmem:[%s3250_s3 + $0x160] sm:$0xff] %v2386_v57  ;;  %v1281_v58 = vpop.f32.mrb[96].mxu1  ;;  %v1599_v6 = vpop.f32.mrb[111].mxu0 }
 0x1d5   :  { %v2388_v59 = vpop.eup %2387  ;;  %v1282_v60 = vadd.f32 %v2932_v26, %v1281_v58  ;;  %v1283_v61 = vpop.f32.mrb[97].mxu1 }
 0x1d6   :  { %1742 = vst [vmem:[%s3250_s3 + $0x168] sm:$0xff] %v2388_v59  ;;  %v1284_v62 = vpop.f32.mrb[98].mxu1 }
 0x1d7   :  { %v1571_v63 = vadd.f32 %v1570_v23, %v1282_v60  ;;  %v1285_v0 = vadd.f32 %v2932_v26, %v1284_v62  ;;  %v1286_v1 = vpop.f32.mrb[99].mxu1 }
 0x1d9   :  { %2393 = vtanh.f32 %v1571_v63  ;;  %v1574_v4 = vadd.f32 %v1573_v27, %v1285_v0  ;;  %v1602_v16 = vpop.f32.mrb[112].mxu0 }
 0x1da   :  { %v1604_v17 = vpop.f32.mrb[113].mxu0 }
 0x1db   :  { %v2390_v7 = vpop.eup %2389  ;;  %2395 = vtanh.f32 %v1574_v4  ;;  %v1605_v19 = vpop.f32.mrb[114].mxu0 }
 0x1dc   :  { %1743 = vst [vmem:[%s3250_s3 + $0x170] sm:$0xff] %v2390_v7  ;;  %v1289_v8 = vpop.f32.mrb[100].mxu1  ;;  %v1607_v20 = vpop.f32.mrb[115].mxu0 }
 0x1dd   :  { %v2392_v9 = vpop.eup %2391  ;;  %v1290_v10 = vadd.f32 %v2932_v26, %v1289_v8  ;;  %v1291_v11 = vpop.f32.mrb[101].mxu1 }
 0x1de   :  { %1744 = vst [vmem:[%s3250_s3 + $0x178] sm:$0xff] %v2392_v9  ;;  %v1292_v12 = vpop.f32.mrb[102].mxu1 }
 0x1df   :  { %v1579_v13 = vadd.f32 %v1578_v38, %v1290_v10  ;;  %v1293_v14 = vadd.f32 %v2932_v26, %v1292_v12  ;;  %v1294_v15 = vpop.f32.mrb[103].mxu1 }
 0x1e1   :  { %2397 = vtanh.f32 %v1579_v13  ;;  %v1582_v18 = vadd.f32 %v1581_v41, %v1293_v14  ;;  %v1610_v31 = vpop.f32.mrb[116].mxu0 }
 0x1e2   :  { %v1612_v32 = vpop.f32.mrb[117].mxu0 }
 0x1e3   :  { %v2394_v21 = vpop.eup %2393  ;;  %2399 = vtanh.f32 %v1582_v18  ;;  %v1613_v34 = vpop.f32.mrb[118].mxu0 }
 0x1e4   :  { %1745 = vst [vmem:[%s3250_s3 + $0x180] sm:$0xff] %v2394_v21  ;;  %v1297_v22 = vpop.f32.mrb[104].mxu1  ;;  %v1615_v35 = vpop.f32.mrb[119].mxu0 }
 0x1e5   :  { %v2396_v23 = vpop.eup %2395  ;;  %v1298_v24 = vadd.f32 %v2932_v26, %v1297_v22  ;;  %v1299_v25 = vpop.f32.mrb[105].mxu1 }
 0x1e6   :  { %1746 = vst [vmem:[%s3250_s3 + $0x188] sm:$0xff] %v2396_v23  ;;  %v1300_v27 = vpop.f32.mrb[106].mxu1 }
 0x1e7   :  { %v1587_v28 = vadd.f32 %v1586_v52, %v1298_v24  ;;  %v1301_v29 = vadd.f32 %v2932_v26, %v1300_v27  ;;  %v1302_v30 = vpop.f32.mrb[107].mxu1 }
 0x1e9   :  { %2401 = vtanh.f32 %v1587_v28  ;;  %v1590_v33 = vadd.f32 %v1589_v55, %v1301_v29  ;;  %v1618_v45 = vpop.f32.mrb[120].mxu0 }
 0x1ea   :  { %v1620_v46 = vpop.f32.mrb[121].mxu0 }
 0x1eb   :  { %v2398_v36 = vpop.eup %2397  ;;  %2403 = vtanh.f32 %v1590_v33  ;;  %v1621_v48 = vpop.f32.mrb[122].mxu0 }
 0x1ec   :  { %1747 = vst [vmem:[%s3250_s3 + $0x190] sm:$0xff] %v2398_v36  ;;  %v1305_v37 = vpop.f32.mrb[108].mxu1  ;;  %v1623_v49 = vpop.f32.mrb[123].mxu0 }
 0x1ed   :  { %v2400_v38 = vpop.eup %2399  ;;  %v1306_v26 = vadd.f32 %v3196_v39, %v1305_v37  ;;  %v1307_v40 = vpop.f32.mrb[109].mxu1 }
 0x1ee   :  { %1748 = vst [vmem:[%s3250_s3 + $0x198] sm:$0xff] %v2400_v38  ;;  %v1308_v41 = vpop.f32.mrb[110].mxu1 }
 0x1ef   :  { %v1595_v42 = vadd.f32 %v1594_v2, %v1306_v26  ;;  %v1309_v43 = vadd.f32 %v3196_v39, %v1308_v41  ;;  %v1310_v44 = vpop.f32.mrb[111].mxu1 }
 0x1f1   :  { %2405 = vtanh.f32 %v1595_v42  ;;  %v1598_v47 = vadd.f32 %v1597_v5, %v1309_v43  ;;  %v1626_v59 = vpop.f32.mrb[124].mxu0 }
 0x1f2   :  { %v1628_v60 = vpop.f32.mrb[125].mxu0 }
 0x1f3   :  { %v2402_v50 = vpop.eup %2401  ;;  %2407 = vtanh.f32 %v1598_v47  ;;  %v1629_v62 = vpop.f32.mrb[126].mxu0 }
 0x1f4   :  { %1749 = vst [vmem:[%s3250_s3 + $0x1a0] sm:$0xff] %v2402_v50  ;;  %v1313_v51 = vpop.f32.mrb[112].mxu1  ;;  %v1631_v63 = vpop.f32.mrb[127].mxu0 }
 0x1f5   :  { %v2404_v52 = vpop.eup %2403  ;;  %v1314_v53 = vadd.f32 %v3196_v39, %v1313_v51  ;;  %v1315_v54 = vpop.f32.mrb[113].mxu1 }
 0x1f6   :  { %1750 = vst [vmem:[%s3250_s3 + $0x1a8] sm:$0xff] %v2404_v52  ;;  %v1316_v55 = vpop.f32.mrb[114].mxu1 }
 0x1f7   :  { %v1603_v56 = vadd.f32 %v1602_v16, %v1314_v53  ;;  %v1317_v57 = vadd.f32 %v3196_v39, %v1316_v55  ;;  %v1318_v58 = vpop.f32.mrb[115].mxu1 }
 0x1f9   :  { %2409 = vtanh.f32 %v1603_v56  ;;  %v1606_v61 = vadd.f32 %v1605_v19, %v1317_v57 }
 0x1fb   :  { %v2406_v0 = vpop.eup %2405  ;;  %2411 = vtanh.f32 %v1606_v61 }
 0x1fc   :  { %1751 = vst [vmem:[%s3250_s3 + $0x1b0] sm:$0xff] %v2406_v0  ;;  %v1321_v1 = vpop.f32.mrb[116].mxu1 }
 0x1fd   :  { %v2408_v2 = vpop.eup %2407  ;;  %v1322_v3 = vadd.f32 %v3196_v39, %v1321_v1  ;;  %v1323_v4 = vpop.f32.mrb[117].mxu1 }
 0x1fe   :  { %1752 = vst [vmem:[%s3250_s3 + $0x1b8] sm:$0xff] %v2408_v2  ;;  %v1324_v5 = vpop.f32.mrb[118].mxu1 }
 0x1ff   :  { %v1611_v6 = vadd.f32 %v1610_v31, %v1322_v3  ;;  %v1325_v7 = vadd.f32 %v3196_v39, %v1324_v5  ;;  %v1326_v8 = vpop.f32.mrb[119].mxu1 }
 0x201   :  { %2413 = vtanh.f32 %v1611_v6  ;;  %v1614_v9 = vadd.f32 %v1613_v34, %v1325_v7 }
 0x203   :  { %v2410_v10 = vpop.eup %2409  ;;  %2415 = vtanh.f32 %v1614_v9 }
 0x204   :  { %1753 = vst [vmem:[%s3250_s3 + $0x1c0] sm:$0xff] %v2410_v10  ;;  %v1329_v11 = vpop.f32.mrb[120].mxu1 }
 0x205   :  { %v2412_v12 = vpop.eup %2411  ;;  %v1330_v13 = vadd.f32 %v3196_v39, %v1329_v11  ;;  %v1331_v14 = vpop.f32.mrb[121].mxu1 }
 0x206   :  { %1754 = vst [vmem:[%s3250_s3 + $0x1c8] sm:$0xff] %v2412_v12  ;;  %v1332_v15 = vpop.f32.mrb[122].mxu1 }
 0x207   :  { %v1619_v16 = vadd.f32 %v1618_v45, %v1330_v13  ;;  %v1333_v17 = vadd.f32 %v3196_v39, %v1332_v15  ;;  %v1334_v18 = vpop.f32.mrb[123].mxu1 }
 0x209   :  { %2417 = vtanh.f32 %v1619_v16  ;;  %v1622_v19 = vadd.f32 %v1621_v48, %v1333_v17 }
 0x20b   :  { %v2414_v20 = vpop.eup %2413  ;;  %2419 = vtanh.f32 %v1622_v19 }
 0x20c   :  { %1755 = vst [vmem:[%s3250_s3 + $0x1d0] sm:$0xff] %v2414_v20  ;;  %v1337_v21 = vpop.f32.mrb[124].mxu1 }
 0x20d   :  { %v2416_v22 = vpop.eup %2415  ;;  %v1338_v23 = vadd.f32 %v3196_v39, %v1337_v21  ;;  %v1339_v24 = vpop.f32.mrb[125].mxu1 }
 0x20e   :  { %1756 = vst [vmem:[%s3250_s3 + $0x1d8] sm:$0xff] %v2416_v22  ;;  %v1340_v25 = vpop.f32.mrb[126].mxu1 }
 0x20f   :  { %v1627_v27 = vadd.f32 %v1626_v59, %v1338_v23  ;;  %v1341_v28 = vadd.f32 %v3196_v39, %v1340_v25  ;;  %v1342_v29 = vpop.f32.mrb[127].mxu1 }
 0x211   :  { %2421 = vtanh.f32 %v1627_v27  ;;  %v1630_v30 = vadd.f32 %v1629_v62, %v1341_v28 }
 0x213   :  { %v2418_v31 = vpop.eup %2417  ;;  %2423 = vtanh.f32 %v1630_v30 }
 0x214   :  { %1757 = vst [vmem:[%s3250_s3 + $0x1e0] sm:$0xff] %v2418_v31 }
 0x215   :  { %v2420_v32 = vpop.eup %2419 }
 0x216   :  { %1758 = vst [vmem:[%s3250_s3 + $0x1e8] sm:$0xff] %v2420_v32 }
 0x21b   :  { %v2422_v33 = vpop.eup %2421 }
 0x21c   :  { %1759 = vst [vmem:[%s3250_s3 + $0x1f0] sm:$0xff] %v2422_v33 }
 0x21d   :  { %v2424_v34 = vpop.eup %2423 }
 0x21e   :  { %1760 = vst [vmem:[%s3250_s3 + $0x1f8] sm:$0xff] %v2424_v34 }

</bundles_post_ra>
